<compile_context>
chip_gen: v6e
topology: v6e:2x2x1
jax: 0.10.0
libtpu: 0.0.40
codegen_flags: <defaults>
</compile_context>

<pallas_src>
import jax
import jax.numpy as jnp
import numpy as np
from jax.experimental import pallas as pl
from jax.experimental.pallas import tpu as pltpu


def _round_up(n, m):
    return ((n + m - 1) // m) * m


def _cnn_feature_kernel(x_ref, w1_ref, b1_ref, w2_ref, b2_ref, w3_ref, b3_ref,
                        out_ref):
    """One batch-tile of the fused [conv(k=2,pad=1) -> ReLU -> avgpool(4)] x3.

    x_ref  : (L, C8, TB)          bf16, batch on lanes
    wX_ref : (L_s, 2*Cout, Cin)   bf16, taps [k=1 ; k=0] stacked on the M axis,
                                  previous pool's 1/4 folded in
    bX_ref : (1, Cout, 1)         f32
    out_ref: (128, TB)            f32
    """

    def conv_relu_pool(h, w_ref, b_ref):
        # h: (L, Cin, TB) bf16.  One batched MXU matmul per stage (L batch dim):
        #   yf[l] = Wf(2Cout, Cin) @ h[l](Cin, TB)   -> (L, 2Cout, TB) f32
        L = h.shape[0]
        cout = w_ref.shape[1] // 2
        yf = jnp.einsum('loc,lct->lot', w_ref[...], h,
                        preferred_element_type=jnp.float32)
        y1 = yf[:, :cout, :]          # tap k=1 -> uses x[t]
        y0 = yf[:, cout:, :]          # tap k=0 -> uses x[t-1]
        b = b_ref[...]                # (1, Cout, 1)
        # Conv1d(k=2, pad=1): y[t] = y1[t] + y0[t-1], with y0[-1] = 0 (left zero
        # pad); output t == L is never consumed by AvgPool(4) when L % 4 == 0.
        head = jnp.maximum(y1[:1] + b, 0.0)                   # (1,   Cout, TB)
        tail = jnp.maximum(y1[1:] + y0[:L - 1] + b, 0.0)      # (L-1, Cout, TB)
        y = jnp.concatenate([head, tail], axis=0)             # (L,   Cout, TB)
        # AvgPool1d(4): leading-axis regroup + 3 adds (1/4 folded into the next
        # stage's weights; last stage: applied once at the output write).
        y = y.reshape(L // 4, 4, cout, y.shape[-1])
        return y[:, 0] + y[:, 1] + y[:, 2] + y[:, 3]          # (L//4, Cout, TB)

    h = x_ref[...]                                            # (64,  8,  TB) bf16
    h = conv_relu_pool(h, w1_ref, b1_ref)                     # (16, 32,  TB) f32
    h = conv_relu_pool(h.astype(jnp.bfloat16), w2_ref, b2_ref)  # (4, 64,  TB)
    h = conv_relu_pool(h.astype(jnp.bfloat16), w3_ref, b3_ref)  # (1, 128, TB)
    out_ref[...] = 0.25 * h[0]                                # last pool's 1/4


def cnn_model_feature(x_ncl, params, *, block_b=256):
    """x_ncl: (B, C_in, L) float32 (PyTorch Conv1d layout). Returns (B, 128)."""
    (w1, b1), (w2, b2), (w3, b3) = params
    B, C_in, L = x_ncl.shape
    # TODO(synk): this fused path assumes L == 64 so the final pooled length is 1.
    assert L == 64, "kernel assumes L == 64 (final pooled length 1 -> (B, 128))"
    C8 = _round_up(C_in, 8)

    # Batch tile: big enough to amortize per-step pipeline overhead and give dense
    # DMA rows, small enough to keep intermediates ~10-15 MiB (under the 32 MiB
    # scoped-VMEM default, safe vs v7x's 64 MiB physical VMEM).  Multiple of 16,
    # capped so the grid has >= 2 steps whenever B allows (v7x megacore split).
    B16 = _round_up(B, 16)
    TB = max(16, min(_round_up(block_b, 16), B16))
    if B16 >= 32:
        TB = min(TB, max(16, (B16 // 32) * 16))
    B_pad = _round_up(B, TB)

    # XLA prologue: cast to bf16 FIRST (halves pad/transpose traffic), zero-pad
    # channels to a sublane multiple and batch to the tile, then go to the
    # batch-on-lanes layout (L, C8, B_pad).
    x_bf = x_ncl.astype(jnp.bfloat16)
    x_bf = jnp.pad(x_bf, ((0, B_pad - B), (0, C8 - C_in), (0, 0)))
    x_t = jnp.transpose(x_bf, (2, 1, 0))                      # (L, C8, B_pad)

    def fuse_taps(w, b, l_stage, cin_pad, scale):
        # (Cout, Cin, 2) -> Wf = [tap k=1 ; tap k=0] stacked on the output axis,
        # with the previous stage's AvgPool 1/4 folded into the weights (not the
        # bias), broadcast over the stage's time axis for the batched matmul.
        cout, cin, _ = w.shape
        wf = jnp.concatenate([w[:, :, 1], w[:, :, 0]], axis=0) * scale  # (2Cout, Cin)
        wf = jnp.pad(wf, ((0, 0), (0, cin_pad - cin))).astype(jnp.bfloat16)
        wb = jnp.broadcast_to(wf[None], (l_stage, 2 * cout, cin_pad))
        return wb, b.reshape(1, cout, 1).astype(jnp.float32)

    w1f, b1f = fuse_taps(w1, b1, L, C8, 1.0)          # (64, 64, 8),   (1, 32, 1)
    w2f, b2f = fuse_taps(w2, b2, L // 4, 32, 0.25)    # (16, 128, 32), (1, 64, 1)
    w3f, b3f = fuse_taps(w3, b3, L // 16, 64, 0.25)   # (4, 256, 64),  (1, 128, 1)

    def full(a):
        return pl.BlockSpec(a.shape, lambda i, _nd=a.ndim: (0,) * _nd)

    out = pl.pallas_call(
        _cnn_feature_kernel,
        out_shape=jax.ShapeDtypeStruct((128, B_pad), jnp.float32),
        grid=(B_pad // TB,),
        in_specs=[
            pl.BlockSpec((L, C8, TB), lambda i: (0, 0, i)),
            full(w1f), full(b1f),
            full(w2f), full(b2f),
            full(w3f), full(b3f),
        ],
        out_specs=pl.BlockSpec((128, TB), lambda i: (0, i)),
        compiler_params=pltpu.CompilerParams(
            dimension_semantics=("parallel",)),      # megacore batch-tile split
    )(x_t, w1f, b1f, w2f, b2f, w3f, b3f)

    return jnp.transpose(out[:, :B])                 # (B, 128)


# ----------------------- pure-JAX reference (PyTorch semantics) ---------------
def _ref_forward(x, params):
    def conv1d_k2_pad1(h, w, b):
        hp = jnp.pad(h, ((0, 0), (0, 0), (1, 1)))
        out = (jnp.einsum('bci,oc->boi', hp[:, :, :-1], w[:, :, 0]) +
               jnp.einsum('bci,oc->boi', hp[:, :, 1:], w[:, :, 1]) +
               b[None, :, None])
        return out

    def avgpool4(h):
        Lp = (h.shape[2] // 4) * 4
        h = h[:, :, :Lp]
        return h.reshape(h.shape[0], h.shape[1], Lp // 4, 4).mean(-1)

    for (w, b) in params:
        x = avgpool4(jax.nn.relu(conv1d_k2_pad1(x, w, b)))
    return x.reshape(x.shape[0], -1)


if __name__ == "__main__":
    # Small, deterministic setup: input_channels=4, seq length=64, batch=2.
    B, C_in, L = 2, 4, 64
    key = jax.random.PRNGKey(0)
    kx, k1, k2, k3, k4, k5, k6 = jax.random.split(key, 7)

    x = jax.random.normal(kx, (B, C_in, L), dtype=jnp.float32)

    w1 = 0.1 * jax.random.normal(k1, (32, C_in, 2), dtype=jnp.float32)
    b1 = 0.1 * jax.random.normal(k2, (32,), dtype=jnp.float32)
    w2 = 0.1 * jax.random.normal(k3, (64, 32, 2), dtype=jnp.float32)
    b2 = 0.1 * jax.random.normal(k4, (64,), dtype=jnp.float32)
    w3 = 0.1 * jax.random.normal(k5, (128, 64, 2), dtype=jnp.float32)
    b3 = 0.1 * jax.random.normal(k6, (128,), dtype=jnp.float32)

    params = ((w1, b1), (w2, b2), (w3, b3))

    out = jax.jit(cnn_model_feature)(x, params)
    out = jax.block_until_ready(out)

    ref = _ref_forward(x, params)
    # bf16 MXU operands (f32 accumulate) -> compare with bf16-level tolerance.
    np.testing.assert_allclose(np.asarray(out), np.asarray(ref),
                               rtol=2e-2, atol=2e-2)
    assert out.shape == (B, 128)
    print("KERNEL_OK")
</pallas_src>

<mosaic_0001>
module attributes {stable_mosaic.version = 11 : i64} {
  func.func @_cnn_feature_kernel(%arg0: i32, %arg1: memref<64x8x16xbf16, #tpu.memory_space<vmem>>, %arg2: memref<64x64x8xbf16, #tpu.memory_space<vmem>>, %arg3: memref<1x32x1xf32, #tpu.memory_space<vmem>>, %arg4: memref<16x128x32xbf16, #tpu.memory_space<vmem>>, %arg5: memref<1x64x1xf32, #tpu.memory_space<vmem>>, %arg6: memref<4x256x64xbf16, #tpu.memory_space<vmem>>, %arg7: memref<1x128x1xf32, #tpu.memory_space<vmem>>, %arg8: memref<128x16xf32, #tpu.memory_space<vmem>>) attributes {dimension_semantics = [#tpu.dimension_semantics<parallel>], iteration_bounds = array<i64: 1>, scalar_prefetch = 0 : i64, scratch_operands = 0 : i64, tpu.core_type = #tpu.core_type<tc>, window_params = [{transform_indices = @transform_0, window_bounds = array<i64: 64, 8, 16>}, {pipeline_mode = #tpu.pipeline_mode<synchronous>, transform_indices = @transform_1, window_bounds = array<i64: 64, 64, 8>}, {pipeline_mode = #tpu.pipeline_mode<synchronous>, transform_indices = @transform_2, window_bounds = array<i64: 1, 32, 1>}, {pipeline_mode = #tpu.pipeline_mode<synchronous>, transform_indices = @transform_3, window_bounds = array<i64: 16, 128, 32>}, {pipeline_mode = #tpu.pipeline_mode<synchronous>, transform_indices = @transform_4, window_bounds = array<i64: 1, 64, 1>}, {pipeline_mode = #tpu.pipeline_mode<synchronous>, transform_indices = @transform_5, window_bounds = array<i64: 4, 256, 64>}, {pipeline_mode = #tpu.pipeline_mode<synchronous>, transform_indices = @transform_6, window_bounds = array<i64: 1, 128, 1>}, {transform_indices = @transform_7, window_bounds = array<i64: 128, 16>}]} {
    %c0 = arith.constant 0 : index
    %c0_0 = arith.constant 0 : index
    %c0_1 = arith.constant 0 : index
    %0 = vector.load %arg1[%c0, %c0_0, %c0_1] : memref<64x8x16xbf16, #tpu.memory_space<vmem>>, vector<64x8x16xbf16>
    %c0_2 = arith.constant 0 : index
    %c0_3 = arith.constant 0 : index
    %c0_4 = arith.constant 0 : index
    %1 = vector.load %arg2[%c0_2, %c0_3, %c0_4] : memref<64x64x8xbf16, #tpu.memory_space<vmem>>, vector<64x64x8xbf16>
    "tpu.trace_start"() <{level = 10 : i32, message = "loc,lct->lot"}> : () -> ()
    %cst = arith.constant dense<0.000000e+00> : vector<64x64x16xf32>
    %2 = tpu.matmul %1, %0, %cst {dimension_numbers = #tpu.dot_dimension_numbers<[2], [1], [1], [2], [0, 0, 0, 1, 1, 2], [0], [0]>} : vector<64x64x8xbf16>, vector<64x8x16xbf16>, vector<64x64x16xf32> -> vector<64x64x16xf32>
    "tpu.trace_stop"() : () -> ()
    %3 = vector.extract_strided_slice %2 {offsets = [0, 0, 0], sizes = [64, 32, 16], strides = [1, 1, 1]} : vector<64x64x16xf32> to vector<64x32x16xf32>
    %4 = vector.extract_strided_slice %2 {offsets = [0, 32, 0], sizes = [64, 32, 16], strides = [1, 1, 1]} : vector<64x64x16xf32> to vector<64x32x16xf32>
    %c0_5 = arith.constant 0 : index
    %c0_6 = arith.constant 0 : index
    %c0_7 = arith.constant 0 : index
    %5 = vector.load %arg3[%c0_5, %c0_6, %c0_7] : memref<1x32x1xf32, #tpu.memory_space<vmem>>, vector<1x32x1xf32>
    %6 = vector.extract_strided_slice %3 {offsets = [0, 0, 0], sizes = [1, 32, 16], strides = [1, 1, 1]} : vector<64x32x16xf32> to vector<1x32x16xf32>
    %7 = vector.broadcast %5 : vector<1x32x1xf32> to vector<1x32x16xf32>
    %8 = arith.addf %6, %7 : vector<1x32x16xf32>
    %cst_8 = arith.constant 0.000000e+00 : f32
    %9 = vector.broadcast %cst_8 : f32 to vector<1x32x16xf32>
    %10 = arith.maximumf %8, %9 : vector<1x32x16xf32>
    %11 = vector.extract_strided_slice %3 {offsets = [1, 0, 0], sizes = [63, 32, 16], strides = [1, 1, 1]} : vector<64x32x16xf32> to vector<63x32x16xf32>
    %12 = vector.extract_strided_slice %4 {offsets = [0, 0, 0], sizes = [63, 32, 16], strides = [1, 1, 1]} : vector<64x32x16xf32> to vector<63x32x16xf32>
    %13 = arith.addf %11, %12 : vector<63x32x16xf32>
    %14 = vector.broadcast %5 : vector<1x32x1xf32> to vector<63x32x16xf32>
    %15 = arith.addf %13, %14 : vector<63x32x16xf32>
    %cst_9 = arith.constant 0.000000e+00 : f32
    %16 = vector.broadcast %cst_9 : f32 to vector<63x32x16xf32>
    %17 = arith.maximumf %15, %16 : vector<63x32x16xf32>
    %18 = tpu.concatenate %10, %17 in 0 : vector<1x32x16xf32>, vector<63x32x16xf32> -> vector<64x32x16xf32>
    %19 = vector.shape_cast %18 : vector<64x32x16xf32> to vector<16x4x32x16xf32>
    %20 = vector.extract_strided_slice %19 {offsets = [0, 0, 0, 0], sizes = [16, 1, 32, 16], strides = [1, 1, 1, 1]} : vector<16x4x32x16xf32> to vector<16x1x32x16xf32>
    %21 = vector.shape_cast %20 : vector<16x1x32x16xf32> to vector<16x32x16xf32>
    %22 = vector.extract_strided_slice %19 {offsets = [0, 1, 0, 0], sizes = [16, 1, 32, 16], strides = [1, 1, 1, 1]} : vector<16x4x32x16xf32> to vector<16x1x32x16xf32>
    %23 = vector.shape_cast %22 : vector<16x1x32x16xf32> to vector<16x32x16xf32>
    %24 = arith.addf %21, %23 : vector<16x32x16xf32>
    %25 = vector.extract_strided_slice %19 {offsets = [0, 2, 0, 0], sizes = [16, 1, 32, 16], strides = [1, 1, 1, 1]} : vector<16x4x32x16xf32> to vector<16x1x32x16xf32>
    %26 = vector.shape_cast %25 : vector<16x1x32x16xf32> to vector<16x32x16xf32>
    %27 = arith.addf %24, %26 : vector<16x32x16xf32>
    %28 = vector.extract_strided_slice %19 {offsets = [0, 3, 0, 0], sizes = [16, 1, 32, 16], strides = [1, 1, 1, 1]} : vector<16x4x32x16xf32> to vector<16x1x32x16xf32>
    %29 = vector.shape_cast %28 : vector<16x1x32x16xf32> to vector<16x32x16xf32>
    %30 = arith.addf %27, %29 : vector<16x32x16xf32>
    %31 = arith.truncf %30 : vector<16x32x16xf32> to vector<16x32x16xbf16>
    %c0_10 = arith.constant 0 : index
    %c0_11 = arith.constant 0 : index
    %c0_12 = arith.constant 0 : index
    %32 = vector.load %arg4[%c0_10, %c0_11, %c0_12] : memref<16x128x32xbf16, #tpu.memory_space<vmem>>, vector<16x128x32xbf16>
    "tpu.trace_start"() <{level = 10 : i32, message = "loc,lct->lot"}> : () -> ()
    %cst_13 = arith.constant dense<0.000000e+00> : vector<16x128x16xf32>
    %33 = tpu.matmul %32, %31, %cst_13 {dimension_numbers = #tpu.dot_dimension_numbers<[2], [1], [1], [2], [0, 0, 0, 1, 1, 2], [0], [0]>} : vector<16x128x32xbf16>, vector<16x32x16xbf16>, vector<16x128x16xf32> -> vector<16x128x16xf32>
    "tpu.trace_stop"() : () -> ()
    %34 = vector.extract_strided_slice %33 {offsets = [0, 0, 0], sizes = [16, 64, 16], strides = [1, 1, 1]} : vector<16x128x16xf32> to vector<16x64x16xf32>
    %35 = vector.extract_strided_slice %33 {offsets = [0, 64, 0], sizes = [16, 64, 16], strides = [1, 1, 1]} : vector<16x128x16xf32> to vector<16x64x16xf32>
    %c0_14 = arith.constant 0 : index
    %c0_15 = arith.constant 0 : index
    %c0_16 = arith.constant 0 : index
    %36 = vector.load %arg5[%c0_14, %c0_15, %c0_16] : memref<1x64x1xf32, #tpu.memory_space<vmem>>, vector<1x64x1xf32>
    %37 = vector.extract_strided_slice %34 {offsets = [0, 0, 0], sizes = [1, 64, 16], strides = [1, 1, 1]} : vector<16x64x16xf32> to vector<1x64x16xf32>
    %38 = vector.broadcast %36 : vector<1x64x1xf32> to vector<1x64x16xf32>
    %39 = arith.addf %37, %38 : vector<1x64x16xf32>
    %cst_17 = arith.constant 0.000000e+00 : f32
    %40 = vector.broadcast %cst_17 : f32 to vector<1x64x16xf32>
    %41 = arith.maximumf %39, %40 : vector<1x64x16xf32>
    %42 = vector.extract_strided_slice %34 {offsets = [1, 0, 0], sizes = [15, 64, 16], strides = [1, 1, 1]} : vector<16x64x16xf32> to vector<15x64x16xf32>
    %43 = vector.extract_strided_slice %35 {offsets = [0, 0, 0], sizes = [15, 64, 16], strides = [1, 1, 1]} : vector<16x64x16xf32> to vector<15x64x16xf32>
    %44 = arith.addf %42, %43 : vector<15x64x16xf32>
    %45 = vector.broadcast %36 : vector<1x64x1xf32> to vector<15x64x16xf32>
    %46 = arith.addf %44, %45 : vector<15x64x16xf32>
    %cst_18 = arith.constant 0.000000e+00 : f32
    %47 = vector.broadcast %cst_18 : f32 to vector<15x64x16xf32>
    %48 = arith.maximumf %46, %47 : vector<15x64x16xf32>
    %49 = tpu.concatenate %41, %48 in 0 : vector<1x64x16xf32>, vector<15x64x16xf32> -> vector<16x64x16xf32>
    %50 = vector.shape_cast %49 : vector<16x64x16xf32> to vector<4x4x64x16xf32>
    %51 = vector.extract_strided_slice %50 {offsets = [0, 0, 0, 0], sizes = [4, 1, 64, 16], strides = [1, 1, 1, 1]} : vector<4x4x64x16xf32> to vector<4x1x64x16xf32>
    %52 = vector.shape_cast %51 : vector<4x1x64x16xf32> to vector<4x64x16xf32>
    %53 = vector.extract_strided_slice %50 {offsets = [0, 1, 0, 0], sizes = [4, 1, 64, 16], strides = [1, 1, 1, 1]} : vector<4x4x64x16xf32> to vector<4x1x64x16xf32>
    %54 = vector.shape_cast %53 : vector<4x1x64x16xf32> to vector<4x64x16xf32>
    %55 = arith.addf %52, %54 : vector<4x64x16xf32>
    %56 = vector.extract_strided_slice %50 {offsets = [0, 2, 0, 0], sizes = [4, 1, 64, 16], strides = [1, 1, 1, 1]} : vector<4x4x64x16xf32> to vector<4x1x64x16xf32>
    %57 = vector.shape_cast %56 : vector<4x1x64x16xf32> to vector<4x64x16xf32>
    %58 = arith.addf %55, %57 : vector<4x64x16xf32>
    %59 = vector.extract_strided_slice %50 {offsets = [0, 3, 0, 0], sizes = [4, 1, 64, 16], strides = [1, 1, 1, 1]} : vector<4x4x64x16xf32> to vector<4x1x64x16xf32>
    %60 = vector.shape_cast %59 : vector<4x1x64x16xf32> to vector<4x64x16xf32>
    %61 = arith.addf %58, %60 : vector<4x64x16xf32>
    %62 = arith.truncf %61 : vector<4x64x16xf32> to vector<4x64x16xbf16>
    %c0_19 = arith.constant 0 : index
    %c0_20 = arith.constant 0 : index
    %c0_21 = arith.constant 0 : index
    %63 = vector.load %arg6[%c0_19, %c0_20, %c0_21] : memref<4x256x64xbf16, #tpu.memory_space<vmem>>, vector<4x256x64xbf16>
    "tpu.trace_start"() <{level = 10 : i32, message = "loc,lct->lot"}> : () -> ()
    %cst_22 = arith.constant dense<0.000000e+00> : vector<4x256x16xf32>
    %64 = tpu.matmul %63, %62, %cst_22 {dimension_numbers = #tpu.dot_dimension_numbers<[2], [1], [1], [2], [0, 0, 0, 1, 1, 2], [0], [0]>} : vector<4x256x64xbf16>, vector<4x64x16xbf16>, vector<4x256x16xf32> -> vector<4x256x16xf32>
    "tpu.trace_stop"() : () -> ()
    %65 = vector.extract_strided_slice %64 {offsets = [0, 0, 0], sizes = [4, 128, 16], strides = [1, 1, 1]} : vector<4x256x16xf32> to vector<4x128x16xf32>
    %66 = vector.extract_strided_slice %64 {offsets = [0, 128, 0], sizes = [4, 128, 16], strides = [1, 1, 1]} : vector<4x256x16xf32> to vector<4x128x16xf32>
    %c0_23 = arith.constant 0 : index
    %c0_24 = arith.constant 0 : index
    %c0_25 = arith.constant 0 : index
    %67 = vector.load %arg7[%c0_23, %c0_24, %c0_25] : memref<1x128x1xf32, #tpu.memory_space<vmem>>, vector<1x128x1xf32>
    %68 = vector.extract_strided_slice %65 {offsets = [0, 0, 0], sizes = [1, 128, 16], strides = [1, 1, 1]} : vector<4x128x16xf32> to vector<1x128x16xf32>
    %69 = vector.broadcast %67 : vector<1x128x1xf32> to vector<1x128x16xf32>
    %70 = arith.addf %68, %69 : vector<1x128x16xf32>
    %cst_26 = arith.constant 0.000000e+00 : f32
    %71 = vector.broadcast %cst_26 : f32 to vector<1x128x16xf32>
    %72 = arith.maximumf %70, %71 : vector<1x128x16xf32>
    %73 = vector.extract_strided_slice %65 {offsets = [1, 0, 0], sizes = [3, 128, 16], strides = [1, 1, 1]} : vector<4x128x16xf32> to vector<3x128x16xf32>
    %74 = vector.extract_strided_slice %66 {offsets = [0, 0, 0], sizes = [3, 128, 16], strides = [1, 1, 1]} : vector<4x128x16xf32> to vector<3x128x16xf32>
    %75 = arith.addf %73, %74 : vector<3x128x16xf32>
    %76 = vector.broadcast %67 : vector<1x128x1xf32> to vector<3x128x16xf32>
    %77 = arith.addf %75, %76 : vector<3x128x16xf32>
    %cst_27 = arith.constant 0.000000e+00 : f32
    %78 = vector.broadcast %cst_27 : f32 to vector<3x128x16xf32>
    %79 = arith.maximumf %77, %78 : vector<3x128x16xf32>
    %80 = tpu.concatenate %72, %79 in 0 : vector<1x128x16xf32>, vector<3x128x16xf32> -> vector<4x128x16xf32>
    %81 = vector.shape_cast %80 : vector<4x128x16xf32> to vector<1x4x128x16xf32>
    %82 = vector.extract_strided_slice %81 {offsets = [0, 0, 0, 0], sizes = [1, 1, 128, 16], strides = [1, 1, 1, 1]} : vector<1x4x128x16xf32> to vector<1x1x128x16xf32>
    %83 = vector.shape_cast %82 : vector<1x1x128x16xf32> to vector<1x128x16xf32>
    %84 = vector.extract_strided_slice %81 {offsets = [0, 1, 0, 0], sizes = [1, 1, 128, 16], strides = [1, 1, 1, 1]} : vector<1x4x128x16xf32> to vector<1x1x128x16xf32>
    %85 = vector.shape_cast %84 : vector<1x1x128x16xf32> to vector<1x128x16xf32>
    %86 = arith.addf %83, %85 : vector<1x128x16xf32>
    %87 = vector.extract_strided_slice %81 {offsets = [0, 2, 0, 0], sizes = [1, 1, 128, 16], strides = [1, 1, 1, 1]} : vector<1x4x128x16xf32> to vector<1x1x128x16xf32>
    %88 = vector.shape_cast %87 : vector<1x1x128x16xf32> to vector<1x128x16xf32>
    %89 = arith.addf %86, %88 : vector<1x128x16xf32>
    %90 = vector.extract_strided_slice %81 {offsets = [0, 3, 0, 0], sizes = [1, 1, 128, 16], strides = [1, 1, 1, 1]} : vector<1x4x128x16xf32> to vector<1x1x128x16xf32>
    %91 = vector.shape_cast %90 : vector<1x1x128x16xf32> to vector<1x128x16xf32>
    %92 = arith.addf %89, %91 : vector<1x128x16xf32>
    %93 = vector.shape_cast %92 : vector<1x128x16xf32> to vector<128x16xf32>
    %cst_28 = arith.constant 2.500000e-01 : f32
    %94 = vector.broadcast %cst_28 : f32 to vector<128x16xf32>
    %95 = arith.mulf %94, %93 : vector<128x16xf32>
    %c0_29 = arith.constant 0 : index
    %c0_30 = arith.constant 0 : index
    %96 = vector.load %arg8[%c0_29, %c0_30] : memref<128x16xf32, #tpu.memory_space<vmem>>, vector<128x16xf32>
    tpu.vector_store %arg8[%c0_29, %c0_30], %95 {strides = array<i32>} : memref<128x16xf32, #tpu.memory_space<vmem>>, vector<128x16xf32>,
    return
  }
  func.func @transform_0(%arg0: i32) -> (i32, i32, i32) {
    %c0_i32 = arith.constant 0 : i32
    %c0_i32_0 = arith.constant 0 : i32
    %c0_i32_1 = arith.constant 0 : i32
    return %c0_i32, %c0_i32_0, %arg0 : i32, i32, i32
  }
  func.func @transform_1(%arg0: i32) -> (i32, i32, i32) {
    %c0_i32 = arith.constant 0 : i32
    %c0_i32_0 = arith.constant 0 : i32
    %c0_i32_1 = arith.constant 0 : i32
    %c0_i32_2 = arith.constant 0 : i32
    return %c0_i32, %c0_i32_0, %c0_i32_1 : i32, i32, i32
  }
  func.func @transform_2(%arg0: i32) -> (i32, i32, i32) {
    %c0_i32 = arith.constant 0 : i32
    %c0_i32_0 = arith.constant 0 : i32
    %c0_i32_1 = arith.constant 0 : i32
    %c0_i32_2 = arith.constant 0 : i32
    return %c0_i32, %c0_i32_0, %c0_i32_1 : i32, i32, i32
  }
  func.func @transform_3(%arg0: i32) -> (i32, i32, i32) {
    %c0_i32 = arith.constant 0 : i32
    %c0_i32_0 = arith.constant 0 : i32
    %c0_i32_1 = arith.constant 0 : i32
    %c0_i32_2 = arith.constant 0 : i32
    return %c0_i32, %c0_i32_0, %c0_i32_1 : i32, i32, i32
  }
  func.func @transform_4(%arg0: i32) -> (i32, i32, i32) {
    %c0_i32 = arith.constant 0 : i32
    %c0_i32_0 = arith.constant 0 : i32
    %c0_i32_1 = arith.constant 0 : i32
    %c0_i32_2 = arith.constant 0 : i32
    return %c0_i32, %c0_i32_0, %c0_i32_1 : i32, i32, i32
  }
  func.func @transform_5(%arg0: i32) -> (i32, i32, i32) {
    %c0_i32 = arith.constant 0 : i32
    %c0_i32_0 = arith.constant 0 : i32
    %c0_i32_1 = arith.constant 0 : i32
    %c0_i32_2 = arith.constant 0 : i32
    return %c0_i32, %c0_i32_0, %c0_i32_1 : i32, i32, i32
  }
  func.func @transform_6(%arg0: i32) -> (i32, i32, i32) {
    %c0_i32 = arith.constant 0 : i32
    %c0_i32_0 = arith.constant 0 : i32
    %c0_i32_1 = arith.constant 0 : i32
    %c0_i32_2 = arith.constant 0 : i32
    return %c0_i32, %c0_i32_0, %c0_i32_1 : i32, i32, i32
  }
  func.func @transform_7(%arg0: i32) -> (i32, i32) {
    %c0_i32 = arith.constant 0 : i32
    %c0_i32_0 = arith.constant 0 : i32
    return %c0_i32, %arg0 : i32, i32
  }
}

</mosaic_0001>

<bundles_post_ra>
// kernel: cnn_model_feature.1
= control target key start
LH: loop header
LB: loop body
LE: loop exit
PB: predicated region body
PF: predicated region fallthrough
CT: control target
= control target key end

     0   :  { %vm636_vm0 = vcmask 1043456   ;;  %vm623_vm1 = vcmask 64512   ;;  %v16091_v2 = vmov 0   ;;  %vm8309_vm2 = vcmask 261120   ;;  %s20350_s0 = inlined_call_operand.vmem [shape: bf16[64,8,16], index: 0, kind: input, shape index: {}]   ;;  %s20351_s1 = inlined_call_operand.vmem [shape: bf16[64,64,8], index: 1, kind: input, shape index: {}]   ;;  %s20352_s2 = inlined_call_operand.vmem [shape: f32[1,32,1], index: 2, kind: input, shape index: {}]   ;;  %s20353_s4 = inlined_call_operand.vmem [shape: f32[1,64,1], index: 4, kind: input, shape index: {}]   ;;  %s20354_s6 = inlined_call_operand.vmem [shape: f32[1,128,1], index: 6, kind: input, shape index: {}]   ;;  %s20355_s3 = inlined_call_operand.vmem [shape: bf16[16,128,32], index: 3, kind: input, shape index: {}]   ;;  %s20356_s5 = inlined_call_operand.vmem [shape: bf16[4,256,64], index: 5, kind: input, shape index: {}]   ;;  %s20357_s7 = inlined_call_operand.vmem [shape: f32[128,16], index: 7, kind: output, shape index: {}]  }
   0x1   :  { %v27_v0 = vld [vmem:[%s20350_s0] sm:$0xf]  ;;  %v28_v1 = vld [vmem:[%s20350_s0 + $0x4] sm:$0xf]  ;;  %15641 = vset.pattern.permute.xlu0 %v16091_v2  ;;  %15642 = vset.pattern.permute.xlu1 %v16091_v2  ;;  %v15645_v7 = vld [vmem:[%s20351_s1 + $0x8] sm:$0xff]   ;;  %vm11582_vm3 = vcmask 523264  }
   0x2   :  { %15576 = vmatprep.subr.msk.bf16.mxu0 %vm636_vm0, %v27_v0  ;;  %15577 = vmatprep.subr.msk.bf16.mxu1 %vm636_vm0, %v28_v1  ;;  %v638_v3 = vsel %vm636_vm0, %v27_v0, 0  ;;  %v738_v4 = vsel %vm636_vm0, %v28_v1, 0  ;;  %v15643_v5 = vld [vmem:[%s20351_s1] sm:$0xff]   ;;  %v15646_v8 = vld [vmem:[%s20351_s1 + $0x28] sm:$0xff]   ;;  %v15647_v9 = vld [vmem:[%s20351_s1 + $0x10] sm:$0xff]   ;;  %vm12979_vm4 = vcmask 130048  }
   0x3   :  { %v15644_v6 = vld [vmem:[%s20351_s1 + $0x20] sm:$0xff]   ;;  %14457 = vmatpush3.bf16.msra.mxu0 %v638_v3  ;;  %14467 = vmatpush3.bf16.msra.mxu1 %v738_v4  ;;  %v15648_v10 = vld [vmem:[%s20351_s1 + $0x30] sm:$0xff]   ;;  %v15649_v11 = vld [vmem:[%s20351_s1 + $0x18] sm:$0xff]  }
   0x4   :  { %14458 = vmatprep.mubr.msk.bf16.mxu0 %vm623_vm1, %v15643_v5  ;;  %14468 = vmatprep.mubr.msk.bf16.mxu1 %vm623_vm1, %v15644_v6  ;;  %v15650_v12 = vld [vmem:[%s20351_s1 + $0x38] sm:$0xff]   ;;  %v29_v13 = vld [vmem:[%s20350_s0 + $0x8] sm:$0xf]  ;;  %v30_v14 = vld [vmem:[%s20350_s0 + $0xc] sm:$0xf] }
   0x5   :  { %15578 = vmatprep.subr.msk.bf16.mxu0 %vm636_vm0, %v29_v13  ;;  %v838_v15 = vsel %vm636_vm0, %v29_v13, 0  ;;  %v15651_v16 = vld [vmem:[%s20351_s1 + $0x40] sm:$0xff]   ;;  %15579 = vmatprep.subr.msk.bf16.mxu1 %vm636_vm0, %v30_v14  ;;  %v938_v17 = vsel %vm636_vm0, %v30_v14, 0  ;;  %v15653_v19 = vld [vmem:[%s20351_s1 + $0x48] sm:$0xff]   ;;  %v31_v21 = vld [vmem:[%s20350_s0 + $0x10] sm:$0xf] }
   0x6   :  { %14459 = vmatmul.mubr.msk.bf16.vlgmr.msra.gmra.mxu0 %vm623_vm1, %v15645_v7  ;;  %14469 = vmatmul.mubr.msk.bf16.vlgmr.msra.gmra.mxu1 %vm623_vm1, %v15646_v8  ;;  %v15652_v18 = vld [vmem:[%s20351_s1 + $0x60] sm:$0xff]   ;;  %v15654_v20 = vld [vmem:[%s20351_s1 + $0x68] sm:$0xff]   ;;  %v32_v22 = vld [vmem:[%s20350_s0 + $0x14] sm:$0xf]  ;;  %v1038_v25 = vsel %vm636_vm0, %v31_v21, 0 }
   0x7   :  { %14462 = vmatprep.mubr.msk.bf16.mxu0 %vm623_vm1, %v15647_v9  ;;  %14472 = vmatprep.mubr.msk.bf16.mxu1 %vm623_vm1, %v15648_v10  ;;  %v15655_v23 = vld [vmem:[%s20351_s1 + $0x50] sm:$0xff]   ;;  %v1138_v26 = vsel %vm636_vm0, %v32_v22, 0  ;;  %v15657_v27 = vld [vmem:[%s20351_s1 + $0x58] sm:$0xff]   ;;  %v15659_v29 = vld [vmem:[%s20351_s1 + $0x80] sm:$0xff]  }
   0x8   :  { %14477 = vmatpush3.bf16.msra.mxu0 %v838_v15  ;;  %14487 = vmatpush3.bf16.msra.mxu1 %v938_v17  ;;  %v15656_v24 = vld [vmem:[%s20351_s1 + $0x70] sm:$0xff]   ;;  %v15658_v28 = vld [vmem:[%s20351_s1 + $0x78] sm:$0xff]   ;;  %v15660_v32 = vld [vmem:[%s20351_s1 + $0xa0] sm:$0xff]  }
   0x9   :  { %15580 = vmatprep.subr.msk.bf16.mxu0 %vm636_vm0, %v31_v21  ;;  %15581 = vmatprep.subr.msk.bf16.mxu1 %vm636_vm0, %v32_v22  ;;  %v33_v30 = vld [vmem:[%s20350_s0 + $0x18] sm:$0xf]  ;;  %v34_v31 = vld [vmem:[%s20350_s0 + $0x1c] sm:$0xf]  ;;  %v15661_v33 = vld [vmem:[%s20351_s1 + $0x88] sm:$0xff]  }
   0xa   :  { %v15662_v34 = vld [vmem:[%s20351_s1 + $0xa8] sm:$0xff]   ;;  %v15663_v35 = vld [vmem:[%s20351_s1 + $0x90] sm:$0xff]   ;;  %v1238_v37 = vsel %vm636_vm0, %v33_v30, 0  ;;  %v1338_v38 = vsel %vm636_vm0, %v34_v31, 0  ;;  %v35_v39 = vld [vmem:[%s20350_s0 + $0x20] sm:$0xf] }
   0xb   :  { %v15664_v36 = vld [vmem:[%s20351_s1 + $0xb0] sm:$0xff]   ;;  %v36_v40 = vld [vmem:[%s20350_s0 + $0x24] sm:$0xf]  ;;  %v15665_v41 = vld [vmem:[%s20351_s1 + $0x98] sm:$0xff]   ;;  %v1438_v53 = vsel %vm636_vm0, %v35_v39, 0 }
   0xc   :  { %v7003_v42 = vld [vmem:[%s20352_s2 + $0x10] sm:$0xff]  ;;  %v7001_v43 = vld [vmem:[%s20352_s2] sm:$0xff]  ;;  %v15666_v44 = vld [vmem:[%s20351_s1 + $0xb8] sm:$0xff]   ;;  %v1538_v54 = vsel %vm636_vm0, %v36_v40, 0 }
   0xd   :  { %7017 = vperm.xlu0 %15641, %v7003_v42   ;;  %v15667_v45 = vld [vmem:[%s20351_s1 + $0xc0] sm:$0xff]   ;;  %7007 = vperm.xlu1 %15642, %v7001_v43   ;;  %v7004_v47 = vld [vmem:[%s20352_s2 + $0x18] sm:$0xff]  ;;  %v7002_v48 = vld [vmem:[%s20352_s2 + $0x8] sm:$0xff] }
   0xe   :  { %14463 = vmatmul.mubr.msk.bf16.gmra.mxu0 %vm623_vm1, %v15649_v11  ;;  %14473 = vmatmul.mubr.msk.bf16.gmra.mxu1 %vm623_vm1, %v15650_v12  ;;  %v15668_v46 = vld [vmem:[%s20351_s1 + $0xe0] sm:$0xff]   ;;  %v15669_v49 = vld [vmem:[%s20351_s1 + $0xc8] sm:$0xff]   ;;  %v15671_v51 = vld [vmem:[%s20351_s1 + $0xd0] sm:$0xff]  }
   0xf   :  { %14478 = vmatprep.mubr.msk.bf16.mxu0 %vm623_vm1, %v15651_v16  ;;  %14488 = vmatprep.mubr.msk.bf16.mxu1 %vm623_vm1, %v15652_v18  ;;  %v15670_v50 = vld [vmem:[%s20351_s1 + $0xe8] sm:$0xff]   ;;  %v15672_v52 = vld [vmem:[%s20351_s1 + $0xf0] sm:$0xff]   ;;  %v15673_v57 = vld [vmem:[%s20351_s1 + $0xd8] sm:$0xff]  }
  0x10   :  { %v37_v55 = vld [vmem:[%s20350_s0 + $0x28] sm:$0xf]  ;;  %v38_v56 = vld [vmem:[%s20350_s0 + $0x2c] sm:$0xf]  ;;  %v15674_v58 = vld [vmem:[%s20351_s1 + $0xf8] sm:$0xff]  }
  0x11   :  { %7022 = vperm.xlu0 %15641, %v7004_v47   ;;  %7012 = vperm.xlu1 %15642, %v7002_v48   ;;  %v15675_v59 = vld [vmem:[%s20351_s1 + $0x100] sm:$0xff]   ;;  %v15677_v61 = vld [vmem:[%s20351_s1 + $0x108] sm:$0xff]   ;;  %v15679_v63 = vld [vmem:[%s20351_s1 + $0x110] sm:$0xff]   ;;  %v1638_v1 = vsel %vm636_vm0, %v37_v55, 0  ;;  %v1738_v2 = vsel %vm636_vm0, %v38_v56, 0 }
  0x12   :  { %v15676_v60 = vld [vmem:[%s20351_s1 + $0x120] sm:$0xff]   ;;  %v15678_v62 = vld [vmem:[%s20351_s1 + $0x128] sm:$0xff]   ;;  %v15680_v0 = vld [vmem:[%s20351_s1 + $0x130] sm:$0xff]  }
  0x13   :  { %v39_v3 = vld [vmem:[%s20350_s0 + $0x30] sm:$0xf]  ;;  %v40_v4 = vld [vmem:[%s20350_s0 + $0x34] sm:$0xf]  ;;  %v15681_v5 = vld [vmem:[%s20351_s1 + $0x118] sm:$0xff]  }
  0x14   :  { %v15682_v6 = vld [vmem:[%s20351_s1 + $0x138] sm:$0xff]   ;;  %v15683_v7 = vld [vmem:[%s20351_s1 + $0x140] sm:$0xff]   ;;  %v15685_v9 = vld [vmem:[%s20351_s1 + $0x148] sm:$0xff]   ;;  %v1838_v13 = vsel %vm636_vm0, %v39_v3, 0  ;;  %v1938_v14 = vsel %vm636_vm0, %v40_v4, 0 }
  0x15   :  { %v15684_v8 = vld [vmem:[%s20351_s1 + $0x160] sm:$0xff]   ;;  %v15686_v10 = vld [vmem:[%s20351_s1 + $0x168] sm:$0xff]   ;;  %v15687_v11 = vld [vmem:[%s20351_s1 + $0x150] sm:$0xff]  }
  0x16   :  { %14479 = vmatmul.mubr.msk.bf16.vlgmr.msra.gmra.mxu0 %vm623_vm1, %v15653_v19  ;;  %14489 = vmatmul.mubr.msk.bf16.vlgmr.msra.gmra.mxu1 %vm623_vm1, %v15654_v20  ;;  %v15688_v12 = vld [vmem:[%s20351_s1 + $0x170] sm:$0xff]   ;;  %v41_v15 = vld [vmem:[%s20350_s0 + $0x38] sm:$0xf]  ;;  %v42_v16 = vld [vmem:[%s20350_s0 + $0x3c] sm:$0xf] }
  0x17   :  { %14482 = vmatprep.mubr.msk.bf16.mxu0 %vm623_vm1, %v15655_v23  ;;  %14492 = vmatprep.mubr.msk.bf16.mxu1 %vm623_vm1, %v15656_v24  ;;  %v15689_v17 = vld [vmem:[%s20351_s1 + $0x158] sm:$0xff]   ;;  %v15691_v19 = vld [vmem:[%s20351_s1 + $0x180] sm:$0xff]   ;;  %v15693_v21 = vld [vmem:[%s20351_s1 + $0x188] sm:$0xff]  }
  0x18   :  { %14497 = vmatpush3.bf16.msra.mxu0 %v1038_v25  ;;  %14507 = vmatpush3.bf16.msra.mxu1 %v1138_v26  ;;  %v15690_v18 = vld [vmem:[%s20351_s1 + $0x178] sm:$0xff]   ;;  %v15692_v20 = vld [vmem:[%s20351_s1 + $0x1a0] sm:$0xff]   ;;  %v15694_v22 = vld [vmem:[%s20351_s1 + $0x1a8] sm:$0xff]   ;;  %v2038_v25 = vsel %vm636_vm0, %v41_v15, 0  ;;  %v2138_v26 = vsel %vm636_vm0, %v42_v16, 0 }
  0x19   :  { %15582 = vmatprep.subr.msk.bf16.mxu0 %vm636_vm0, %v33_v30  ;;  %15583 = vmatprep.subr.msk.bf16.mxu1 %vm636_vm0, %v34_v31  ;;  %v15695_v23 = vld [vmem:[%s20351_s1 + $0x190] sm:$0xff]   ;;  %v15698_v30 = vld [vmem:[%s20351_s1 + $0x1b8] sm:$0xff]   ;;  %v15699_v31 = vld [vmem:[%s20351_s1 + $0x1c0] sm:$0xff]  }
  0x1a   :  { %v15696_v24 = vld [vmem:[%s20351_s1 + $0x1b0] sm:$0xff]   ;;  %v15706_v42 = vld [vmem:[%s20351_s1 + $0x1f8] sm:$0xff]   ;;  %v15707_v43 = vld [vmem:[%s20351_s1 + $0x200] sm:$0xff]  }
  0x1b   :  { %v15711_v47 = vld [vmem:[%s20351_s1 + $0x210] sm:$0xff]  }
  0x1c   :  { %v15712_v48 = vld [vmem:[%s20351_s1 + $0x230] sm:$0xff]  }
  0x1e   :  { %14483 = vmatmul.mubr.msk.bf16.gmra.mxu0 %vm623_vm1, %v15657_v27  ;;  %14493 = vmatmul.mubr.msk.bf16.gmra.mxu1 %vm623_vm1, %v15658_v28  ;;  %v43_v27 = vld [vmem:[%s20350_s0 + $0x40] sm:$0xf]  ;;  %v44_v28 = vld [vmem:[%s20350_s0 + $0x44] sm:$0xf] }
  0x1f   :  { %14498 = vmatprep.mubr.msk.bf16.mxu0 %vm623_vm1, %v15659_v29  ;;  %14508 = vmatprep.mubr.msk.bf16.mxu1 %vm623_vm1, %v15660_v32  ;;  %v15697_v29 = vld [vmem:[%s20351_s1 + $0x198] sm:$0xff]   ;;  %v15700_v32 = vld [vmem:[%s20351_s1 + $0x1e0] sm:$0xff]  }
  0x26   :  { %14499 = vmatmul.mubr.msk.bf16.vlgmr.msra.gmra.mxu0 %vm623_vm1, %v15661_v33  ;;  %14509 = vmatmul.mubr.msk.bf16.vlgmr.msra.gmra.mxu1 %vm623_vm1, %v15662_v34  ;;  %v15701_v33 = vld [vmem:[%s20351_s1 + $0x1c8] sm:$0xff]  }
  0x27   :  { %14502 = vmatprep.mubr.msk.bf16.mxu0 %vm623_vm1, %v15663_v35  ;;  %14512 = vmatprep.mubr.msk.bf16.mxu1 %vm623_vm1, %v15664_v36  ;;  %v15702_v34 = vld [vmem:[%s20351_s1 + $0x1e8] sm:$0xff]   ;;  %v15703_v35 = vld [vmem:[%s20351_s1 + $0x1d0] sm:$0xff]  }
  0x28   :  { %14517 = vmatpush3.bf16.msra.mxu0 %v1238_v37  ;;  %14527 = vmatpush3.bf16.msra.mxu1 %v1338_v38  ;;  %v15704_v36 = vld [vmem:[%s20351_s1 + $0x1f0] sm:$0xff]   ;;  %v2238_v37 = vsel %vm636_vm0, %v43_v27, 0  ;;  %v2338_v38 = vsel %vm636_vm0, %v44_v28, 0 }
  0x29   :  { %15584 = vmatprep.subr.msk.bf16.mxu0 %vm636_vm0, %v35_v39  ;;  %15585 = vmatprep.subr.msk.bf16.mxu1 %vm636_vm0, %v36_v40  ;;  %v45_v39 = vld [vmem:[%s20350_s0 + $0x48] sm:$0xf]  ;;  %v46_v40 = vld [vmem:[%s20350_s0 + $0x4c] sm:$0xf] }
  0x2e   :  { %14503 = vmatmul.mubr.msk.bf16.gmra.mxu0 %vm623_vm1, %v15665_v41  ;;  %14513 = vmatmul.mubr.msk.bf16.gmra.mxu1 %vm623_vm1, %v15666_v44  ;;  %v15705_v41 = vld [vmem:[%s20351_s1 + $0x1d8] sm:$0xff]   ;;  %v15708_v44 = vld [vmem:[%s20351_s1 + $0x220] sm:$0xff]  }
  0x2f   :  { %14518 = vmatprep.mubr.msk.bf16.mxu0 %vm623_vm1, %v15667_v45  ;;  %14528 = vmatprep.mubr.msk.bf16.mxu1 %vm623_vm1, %v15668_v46  ;;  %v15709_v45 = vld [vmem:[%s20351_s1 + $0x208] sm:$0xff]  }
  0x30   :  { %v15710_v46 = vld [vmem:[%s20351_s1 + $0x228] sm:$0xff]  }
  0x36   :  { %14519 = vmatmul.mubr.msk.bf16.vlgmr.msra.gmra.mxu0 %vm623_vm1, %v15669_v49  ;;  %14529 = vmatmul.mubr.msk.bf16.vlgmr.msra.gmra.mxu1 %vm623_vm1, %v15670_v50  ;;  %v2438_v49 = vsel %vm636_vm0, %v45_v39, 0  ;;  %v2538_v50 = vsel %vm636_vm0, %v46_v40, 0 }
  0x37   :  { %14522 = vmatprep.mubr.msk.bf16.mxu0 %vm623_vm1, %v15671_v51  ;;  %14532 = vmatprep.mubr.msk.bf16.mxu1 %vm623_vm1, %v15672_v52  ;;  %v47_v51 = vld [vmem:[%s20350_s0 + $0x50] sm:$0xf]  ;;  %v48_v52 = vld [vmem:[%s20350_s0 + $0x54] sm:$0xf] }
  0x38   :  { %14537 = vmatpush3.bf16.msra.mxu0 %v1438_v53  ;;  %14547 = vmatpush3.bf16.msra.mxu1 %v1538_v54  ;;  %v15713_v53 = vld [vmem:[%s20351_s1 + $0x218] sm:$0xff]  }
  0x39   :  { %15586 = vmatprep.subr.msk.bf16.mxu0 %vm636_vm0, %v37_v55  ;;  %15587 = vmatprep.subr.msk.bf16.mxu1 %vm636_vm0, %v38_v56  ;;  %v15714_v54 = vld [vmem:[%s20351_s1 + $0x238] sm:$0xff]   ;;  %v15715_v55 = vld [vmem:[%s20351_s1 + $0x240] sm:$0xff]  }
  0x3a   :  { %v15716_v56 = vld [vmem:[%s20351_s1 + $0x260] sm:$0xff]  }
  0x3e   :  { %14523 = vmatmul.mubr.msk.bf16.gmra.mxu0 %vm623_vm1, %v15673_v57  ;;  %14533 = vmatmul.mubr.msk.bf16.gmra.mxu1 %vm623_vm1, %v15674_v58  ;;  %v15717_v57 = vld [vmem:[%s20351_s1 + $0x248] sm:$0xff]  }
  0x3f   :  { %14538 = vmatprep.mubr.msk.bf16.mxu0 %vm623_vm1, %v15675_v59  ;;  %14548 = vmatprep.mubr.msk.bf16.mxu1 %vm623_vm1, %v15676_v60  ;;  %v15718_v58 = vld [vmem:[%s20351_s1 + $0x268] sm:$0xff]   ;;  %v15719_v59 = vld [vmem:[%s20351_s1 + $0x250] sm:$0xff]  }
  0x40   :  { %v15720_v60 = vld [vmem:[%s20351_s1 + $0x270] sm:$0xff]  }
  0x46   :  { %14539 = vmatmul.mubr.msk.bf16.vlgmr.msra.gmra.mxu0 %vm623_vm1, %v15677_v61  ;;  %14549 = vmatmul.mubr.msk.bf16.vlgmr.msra.gmra.mxu1 %vm623_vm1, %v15678_v62  ;;  %v2638_v61 = vsel %vm636_vm0, %v47_v51, 0  ;;  %v2738_v62 = vsel %vm636_vm0, %v48_v52, 0 }
  0x47   :  { %14542 = vmatprep.mubr.msk.bf16.mxu0 %vm623_vm1, %v15679_v63  ;;  %14552 = vmatprep.mubr.msk.bf16.mxu1 %vm623_vm1, %v15680_v0  ;;  %v49_v63 = vld [vmem:[%s20350_s0 + $0x58] sm:$0xf]  ;;  %v50_v0 = vld [vmem:[%s20350_s0 + $0x5c] sm:$0xf] }
  0x48   :  { %14557 = vmatpush3.bf16.msra.mxu0 %v1638_v1  ;;  %14567 = vmatpush3.bf16.msra.mxu1 %v1738_v2  ;;  %v15721_v1 = vld [vmem:[%s20351_s1 + $0x258] sm:$0xff]  }
  0x49   :  { %15588 = vmatprep.subr.msk.bf16.mxu0 %vm636_vm0, %v39_v3  ;;  %15589 = vmatprep.subr.msk.bf16.mxu1 %vm636_vm0, %v40_v4  ;;  %v15722_v2 = vld [vmem:[%s20351_s1 + $0x278] sm:$0xff]   ;;  %v15723_v3 = vld [vmem:[%s20351_s1 + $0x280] sm:$0xff]  }
  0x4a   :  { %v15724_v4 = vld [vmem:[%s20351_s1 + $0x2a0] sm:$0xff]  }
  0x4e   :  { %14543 = vmatmul.mubr.msk.bf16.gmra.mxu0 %vm623_vm1, %v15681_v5  ;;  %14553 = vmatmul.mubr.msk.bf16.gmra.mxu1 %vm623_vm1, %v15682_v6  ;;  %v15725_v5 = vld [vmem:[%s20351_s1 + $0x288] sm:$0xff]  }
  0x4f   :  { %14558 = vmatprep.mubr.msk.bf16.mxu0 %vm623_vm1, %v15683_v7  ;;  %14568 = vmatprep.mubr.msk.bf16.mxu1 %vm623_vm1, %v15684_v8  ;;  %v15726_v6 = vld [vmem:[%s20351_s1 + $0x2a8] sm:$0xff]   ;;  %v15727_v7 = vld [vmem:[%s20351_s1 + $0x290] sm:$0xff]  }
  0x50   :  { %v15728_v8 = vld [vmem:[%s20351_s1 + $0x2b0] sm:$0xff]  }
  0x56   :  { %14559 = vmatmul.mubr.msk.bf16.vlgmr.msra.gmra.mxu0 %vm623_vm1, %v15685_v9  ;;  %14569 = vmatmul.mubr.msk.bf16.vlgmr.msra.gmra.mxu1 %vm623_vm1, %v15686_v10  ;;  %v2838_v9 = vsel %vm636_vm0, %v49_v63, 0  ;;  %v2938_v10 = vsel %vm636_vm0, %v50_v0, 0 }
  0x57   :  { %14562 = vmatprep.mubr.msk.bf16.mxu0 %vm623_vm1, %v15687_v11  ;;  %14572 = vmatprep.mubr.msk.bf16.mxu1 %vm623_vm1, %v15688_v12  ;;  %v51_v11 = vld [vmem:[%s20350_s0 + $0x60] sm:$0xf]  ;;  %v52_v12 = vld [vmem:[%s20350_s0 + $0x64] sm:$0xf] }
  0x58   :  { %14577 = vmatpush3.bf16.msra.mxu0 %v1838_v13  ;;  %14587 = vmatpush3.bf16.msra.mxu1 %v1938_v14  ;;  %v15729_v13 = vld [vmem:[%s20351_s1 + $0x298] sm:$0xff]  }
  0x59   :  { %15590 = vmatprep.subr.msk.bf16.mxu0 %vm636_vm0, %v41_v15  ;;  %15591 = vmatprep.subr.msk.bf16.mxu1 %vm636_vm0, %v42_v16  ;;  %v15730_v14 = vld [vmem:[%s20351_s1 + $0x2b8] sm:$0xff]   ;;  %v15731_v15 = vld [vmem:[%s20351_s1 + $0x2c0] sm:$0xff]  }
  0x5a   :  { %v15732_v16 = vld [vmem:[%s20351_s1 + $0x2e0] sm:$0xff]  }
  0x5e   :  { %14563 = vmatmul.mubr.msk.bf16.gmra.mxu0 %vm623_vm1, %v15689_v17  ;;  %14573 = vmatmul.mubr.msk.bf16.gmra.mxu1 %vm623_vm1, %v15690_v18  ;;  %v15733_v17 = vld [vmem:[%s20351_s1 + $0x2c8] sm:$0xff]  }
  0x5f   :  { %14578 = vmatprep.mubr.msk.bf16.mxu0 %vm623_vm1, %v15691_v19  ;;  %14588 = vmatprep.mubr.msk.bf16.mxu1 %vm623_vm1, %v15692_v20  ;;  %v15734_v18 = vld [vmem:[%s20351_s1 + $0x2e8] sm:$0xff]   ;;  %v15735_v19 = vld [vmem:[%s20351_s1 + $0x2d0] sm:$0xff]  }
  0x60   :  { %v15736_v20 = vld [vmem:[%s20351_s1 + $0x2f0] sm:$0xff]  }
  0x66   :  { %14579 = vmatmul.mubr.msk.bf16.vlgmr.msra.gmra.mxu0 %vm623_vm1, %v15693_v21  ;;  %14589 = vmatmul.mubr.msk.bf16.vlgmr.msra.gmra.mxu1 %vm623_vm1, %v15694_v22  ;;  %v3038_v21 = vsel %vm636_vm0, %v51_v11, 0  ;;  %v3138_v22 = vsel %vm636_vm0, %v52_v12, 0 }
  0x67   :  { %14582 = vmatprep.mubr.msk.bf16.mxu0 %vm623_vm1, %v15695_v23  ;;  %14592 = vmatprep.mubr.msk.bf16.mxu1 %vm623_vm1, %v15696_v24  ;;  %v53_v23 = vld [vmem:[%s20350_s0 + $0x68] sm:$0xf]  ;;  %v54_v24 = vld [vmem:[%s20350_s0 + $0x6c] sm:$0xf] }
  0x68   :  { %14597 = vmatpush3.bf16.msra.mxu0 %v2038_v25  ;;  %14607 = vmatpush3.bf16.msra.mxu1 %v2138_v26  ;;  %v15737_v25 = vld [vmem:[%s20351_s1 + $0x2d8] sm:$0xff]  }
  0x69   :  { %15592 = vmatprep.subr.msk.bf16.mxu0 %vm636_vm0, %v43_v27  ;;  %15593 = vmatprep.subr.msk.bf16.mxu1 %vm636_vm0, %v44_v28  ;;  %v15738_v26 = vld [vmem:[%s20351_s1 + $0x2f8] sm:$0xff]   ;;  %v15739_v27 = vld [vmem:[%s20351_s1 + $0x300] sm:$0xff]  }
  0x6a   :  { %v15740_v28 = vld [vmem:[%s20351_s1 + $0x320] sm:$0xff]  }
  0x6e   :  { %14583 = vmatmul.mubr.msk.bf16.gmra.mxu0 %vm623_vm1, %v15697_v29  ;;  %14593 = vmatmul.mubr.msk.bf16.gmra.mxu1 %vm623_vm1, %v15698_v30  ;;  %v15741_v29 = vld [vmem:[%s20351_s1 + $0x308] sm:$0xff]  }
  0x6f   :  { %14598 = vmatprep.mubr.msk.bf16.mxu0 %vm623_vm1, %v15699_v31  ;;  %14608 = vmatprep.mubr.msk.bf16.mxu1 %vm623_vm1, %v15700_v32  ;;  %v15742_v30 = vld [vmem:[%s20351_s1 + $0x328] sm:$0xff]   ;;  %v15743_v31 = vld [vmem:[%s20351_s1 + $0x310] sm:$0xff]  }
  0x70   :  { %v15744_v32 = vld [vmem:[%s20351_s1 + $0x330] sm:$0xff]  }
  0x76   :  { %14599 = vmatmul.mubr.msk.bf16.vlgmr.msra.gmra.mxu0 %vm623_vm1, %v15701_v33  ;;  %14609 = vmatmul.mubr.msk.bf16.vlgmr.msra.gmra.mxu1 %vm623_vm1, %v15702_v34  ;;  %v3238_v33 = vsel %vm636_vm0, %v53_v23, 0  ;;  %v16690_v34 = vld [vmem:[%s20350_s0 + $0x70] sm:$0xf] }
  0x77   :  { %14602 = vmatprep.mubr.msk.bf16.mxu0 %vm623_vm1, %v15703_v35  ;;  %14612 = vmatprep.mubr.msk.bf16.mxu1 %vm623_vm1, %v15704_v36  ;;  %v16695_v35 = vld [vmem:[%s20350_s0 + $0x74] sm:$0xf] }
  0x78   :  { %14617 = vmatpush3.bf16.msra.mxu0 %v2238_v37  ;;  %14627 = vmatpush3.bf16.msra.mxu1 %v2338_v38  ;;  %v3338_v37 = vsel %vm636_vm0, %v54_v24, 0  ;;  %v10844_v38 = vld [vmem:[%s20353_s4 + $0x30] sm:$0xff] }
  0x79   :  { %15594 = vmatprep.subr.msk.bf16.mxu0 %vm636_vm0, %v45_v39  ;;  %15595 = vmatprep.subr.msk.bf16.mxu1 %vm636_vm0, %v46_v40 }
  0x7a   :  { %10878 = vperm.xlu0 %15641, %v10844_v38   ;;  %v10839_v38 = vld [vmem:[%s20353_s4 + $0x8] sm:$0xff] }
  0x7e   :  { %14603 = vmatmul.mubr.msk.bf16.gmra.mxu0 %vm623_vm1, %v15705_v41  ;;  %14613 = vmatmul.mubr.msk.bf16.gmra.mxu1 %vm623_vm1, %v15706_v42  ;;  %v15745_v42 = vld [vmem:[%s20351_s1 + $0x318] sm:$0xff]  }
  0x7f   :  { %14618 = vmatprep.mubr.msk.bf16.mxu0 %vm623_vm1, %v15707_v43  ;;  %14628 = vmatprep.mubr.msk.bf16.mxu1 %vm623_vm1, %v15708_v44  ;;  %v15746_v44 = vld [vmem:[%s20351_s1 + $0x338] sm:$0xff]  }
  0x86   :  { %14619 = vmatmul.mubr.msk.bf16.vlgmr.msra.gmra.mxu0 %vm623_vm1, %v15709_v45  ;;  %14629 = vmatmul.mubr.msk.bf16.vlgmr.msra.gmra.mxu1 %vm623_vm1, %v15710_v46 }
  0x87   :  { %14622 = vmatprep.mubr.msk.bf16.mxu0 %vm623_vm1, %v15711_v47  ;;  %14632 = vmatprep.mubr.msk.bf16.mxu1 %vm623_vm1, %v15712_v48  ;;  %v15747_v47 = vld [vmem:[%s20351_s1 + $0x340] sm:$0xff]   ;;  %v10845_v48 = vld [vmem:[%s20353_s4 + $0x38] sm:$0xff] }
  0x88   :  { %14637 = vmatpush3.bf16.msra.mxu0 %v2438_v49  ;;  %14647 = vmatpush3.bf16.msra.mxu1 %v2538_v50  ;;  %v16704_v40 = vpop.permute.xlu0 %7017  ;;  %v16710_v43 = vpop.permute.xlu1 %7007  ;;  %v10842_v50 = vld [vmem:[%s20353_s4 + $0x20] sm:$0xff] }
  0x89   :  { %15596 = vmatprep.subr.msk.bf16.mxu0 %vm636_vm0, %v47_v51  ;;  %15597 = vmatprep.subr.msk.bf16.mxu1 %vm636_vm0, %v48_v52  ;;  %v15748_v52 = vld [vmem:[%s20351_s1 + $0x360] sm:$0xff]  }
  0x8a   :  { %10883 = vperm.xlu1 %15642, %v10845_v48   ;;  %10868 = vperm.xlu0 %15641, %v10842_v50   ;;  %v15754_v48 = vld [vmem:[%s20351_s1 + $0x378] sm:$0xff]  }
  0x8e   :  { %14623 = vmatmul.mubr.msk.bf16.gmra.mxu0 %vm623_vm1, %v15713_v53  ;;  %14633 = vmatmul.mubr.msk.bf16.gmra.mxu1 %vm623_vm1, %v15714_v54  ;;  %v16731_v54 = vpop.permute.xlu0 %7022 }
  0x8f   :  { %14638 = vmatprep.mubr.msk.bf16.mxu0 %vm623_vm1, %v15715_v55  ;;  %14648 = vmatprep.mubr.msk.bf16.mxu1 %vm623_vm1, %v15716_v56  ;;  %v10843_v56 = vld [vmem:[%s20353_s4 + $0x28] sm:$0xff] }
  0x90   :  { %10873 = vperm.xlu1 %15642, %v10843_v56   ;;  %v12645_v56 = vld [vmem:[%s20354_s6 + $0x10] sm:$0xff] }
  0x96   :  { %14639 = vmatmul.mubr.msk.bf16.vlgmr.msra.gmra.mxu0 %vm623_vm1, %v15717_v57  ;;  %14649 = vmatmul.mubr.msk.bf16.vlgmr.msra.gmra.mxu1 %vm623_vm1, %v15718_v58  ;;  %v16738_v58 = vpop.permute.xlu1 %7012 }
  0x97   :  { %14642 = vmatprep.mubr.msk.bf16.mxu0 %vm623_vm1, %v15719_v59  ;;  %14652 = vmatprep.mubr.msk.bf16.mxu1 %vm623_vm1, %v15720_v60 }
  0x98   :  { %14657 = vmatpush3.bf16.msra.mxu0 %v2638_v61  ;;  %14667 = vmatpush3.bf16.msra.mxu1 %v2738_v62  ;;  %v10840_v61 = vld [vmem:[%s20353_s4 + $0x10] sm:$0xff] }
  0x99   :  { %15598 = vmatprep.subr.msk.bf16.mxu0 %vm636_vm0, %v49_v63  ;;  %15599 = vmatprep.subr.msk.bf16.mxu1 %vm636_vm0, %v50_v0  ;;  %v15749_v0 = vld [vmem:[%s20351_s1 + $0x348] sm:$0xff]  }
  0x9a   :  { %10858 = vperm.xlu0 %15641, %v10840_v61  }
  0x9e   :  { %14643 = vmatmul.mubr.msk.bf16.gmra.mxu0 %vm623_vm1, %v15721_v1  ;;  %14653 = vmatmul.mubr.msk.bf16.gmra.mxu1 %vm623_vm1, %v15722_v2 }
  0x9f   :  { %14658 = vmatprep.mubr.msk.bf16.mxu0 %vm623_vm1, %v15723_v3  ;;  %14668 = vmatprep.mubr.msk.bf16.mxu1 %vm623_vm1, %v15724_v4 }
  0xa6   :  { %14659 = vmatmul.mubr.msk.bf16.vlgmr.msra.gmra.mxu0 %vm623_vm1, %v15725_v5  ;;  %14669 = vmatmul.mubr.msk.bf16.vlgmr.msra.gmra.mxu1 %vm623_vm1, %v15726_v6 }
  0xa7   :  { %14662 = vmatprep.mubr.msk.bf16.mxu0 %vm623_vm1, %v15727_v7  ;;  %14672 = vmatprep.mubr.msk.bf16.mxu1 %vm623_vm1, %v15728_v8  ;;  %v15750_v7 = vld [vmem:[%s20351_s1 + $0x368] sm:$0xff]   ;;  %v15751_v8 = vld [vmem:[%s20351_s1 + $0x350] sm:$0xff]  }
  0xa8   :  { %14677 = vmatpush3.bf16.msra.mxu0 %v2838_v9  ;;  %14687 = vmatpush3.bf16.msra.mxu1 %v2938_v10  ;;  %v10841_v9 = vld [vmem:[%s20353_s4 + $0x18] sm:$0xff] }
  0xa9   :  { %15600 = vmatprep.subr.msk.bf16.mxu0 %vm636_vm0, %v51_v11  ;;  %15601 = vmatprep.subr.msk.bf16.mxu1 %vm636_vm0, %v52_v12 }
  0xaa   :  { %10863 = vperm.xlu1 %15642, %v10841_v9  }
  0xae   :  { %14663 = vmatmul.mubr.msk.bf16.gmra.mxu0 %vm623_vm1, %v15729_v13  ;;  %14673 = vmatmul.mubr.msk.bf16.gmra.mxu1 %vm623_vm1, %v15730_v14 }
  0xaf   :  { %14678 = vmatprep.mubr.msk.bf16.mxu0 %vm623_vm1, %v15731_v15  ;;  %14688 = vmatprep.mubr.msk.bf16.mxu1 %vm623_vm1, %v15732_v16  ;;  %v15752_v15 = vld [vmem:[%s20351_s1 + $0x370] sm:$0xff]   ;;  %v10838_v16 = vld [vmem:[%s20353_s4] sm:$0xff] }
  0xb0   :  { %10848 = vperm.xlu0 %15641, %v10838_v16   ;;  %10853 = vperm.xlu1 %15642, %v10839_v38  }
  0xb6   :  { %14679 = vmatmul.mubr.msk.bf16.vlgmr.msra.gmra.mxu0 %vm623_vm1, %v15733_v17  ;;  %14689 = vmatmul.mubr.msk.bf16.vlgmr.msra.gmra.mxu1 %vm623_vm1, %v15734_v18 }
  0xb7   :  { %14682 = vmatprep.mubr.msk.bf16.mxu0 %vm623_vm1, %v15735_v19  ;;  %14692 = vmatprep.mubr.msk.bf16.mxu1 %vm623_vm1, %v15736_v20  ;;  %v3438_v19 = vsel %vm636_vm0, %v16690_v34, 0  ;;  %v16774_v20 = vld [vmem:[%s20350_s0 + $0x78] sm:$0xf] }
  0xb8   :  { %14697 = vmatpush3.bf16.msra.mxu0 %v3038_v21  ;;  %14707 = vmatpush3.bf16.msra.mxu1 %v3138_v22 }
  0xb9   :  { %15602 = vmatprep.subr.msk.bf16.mxu0 %vm636_vm0, %v53_v23  ;;  %15603 = vmatprep.subr.msk.bf16.mxu1 %vm636_vm0, %v54_v24 }
  0xbe   :  { %14683 = vmatmul.mubr.msk.bf16.gmra.mxu0 %vm623_vm1, %v15737_v25  ;;  %14693 = vmatmul.mubr.msk.bf16.gmra.mxu1 %vm623_vm1, %v15738_v26  ;;  %v16780_v26 = vld [vmem:[%s20350_s0 + $0x7c] sm:$0xf] }
  0xbf   :  { %14698 = vmatprep.mubr.msk.bf16.mxu0 %vm623_vm1, %v15739_v27  ;;  %14708 = vmatprep.mubr.msk.bf16.mxu1 %vm623_vm1, %v15740_v28 }
  0xc6   :  { %v14460_v36 = vpop.f32.mrf.mxu0  ;;  %14699 = vmatmul.mubr.msk.bf16.vlgmr.msra.gmra.mxu0 %vm623_vm1, %v15741_v29  ;;  %14709 = vmatmul.mubr.msk.bf16.vlgmr.msra.gmra.mxu1 %vm623_vm1, %v15742_v30  ;;  %v14470_v39 = vpop.f32.mrf.mxu1  ;;  %v3538_v30 = vsel %vm636_vm0, %v16695_v35, 0 }
  0xc7   :  { %14702 = vmatprep.mubr.msk.bf16.mxu0 %vm623_vm1, %v15743_v31  ;;  %14712 = vmatprep.mubr.msk.bf16.mxu1 %vm623_vm1, %v15744_v32  ;;  %v7027_v57 = vadd.f32 %v14460_v36, %v16704_v40  ;;  %v12643_v31 = vld [vmem:[%s20354_s6] sm:$0xff] }
  0xc8   :  { %v674_v41 = vpop.f32.mrf.mxu0  ;;  %14717 = vmatpush3.bf16.msra.mxu0 %v3238_v33  ;;  %v774_v45 = vpop.f32.mrf.mxu1  ;;  %14727 = vmatpush3.bf16.msra.mxu1 %v3338_v37 }
  0xc9   :  { %15604 = vmatprep.subr.msk.bf16.mxu0 %vm636_vm0, %v16690_v34  ;;  %15605 = vmatprep.subr.msk.bf16.mxu1 %vm636_vm0, %v16695_v35  ;;  %v7025_v62 = vadd.f32 %v16710_v43, %v674_v41  ;;  %v7031_v10 = vmax.f32 %v7027_v57, 0.0 }
  0xca   :  { %v14461_v46 = vpop.f32.mrf.mxu0  ;;  %v14471_v49 = vpop.f32.mrf.mxu1  ;;  %12661 = vperm.xlu0 %15641, %v12643_v31  }
  0xcb   :  { %v7028_v4 = vadd.f32 %v14461_v46, %v16731_v54  ;;  %v7029_v17 = vmax.f32 %v7025_v62, 0.0 }
  0xcc   :  { %v677_v51 = vpop.f32.mrf.mxu0  ;;  %v777_v53 = vpop.f32.mrf.mxu1 }
  0xcd   :  { %v7026_v5 = vadd.f32 %v16738_v58, %v677_v51  ;;  %v7032_v27 = vmax.f32 %v7028_v4, 0.0 }
  0xce   :  { %v14464_v55 = vpop.f32.mrf.mxu0  ;;  %14703 = vmatmul.mubr.msk.bf16.gmra.mxu0 %vm623_vm1, %v15745_v42  ;;  %14713 = vmatmul.mubr.msk.bf16.gmra.mxu1 %vm623_vm1, %v15746_v44  ;;  %v14474_v60 = vpop.f32.mrf.mxu1 }
  0xcf   :  { %v7035_v59 = vadd.f32 %v14470_v39, %v14464_v55  ;;  %14718 = vmatprep.mubr.msk.bf16.mxu0 %vm623_vm1, %v15747_v47  ;;  %14728 = vmatprep.mubr.msk.bf16.mxu1 %vm623_vm1, %v15748_v52  ;;  %v7030_v28 = vmax.f32 %v7026_v5, 0.0 }
  0xd0   :  { %v690_v63 = vpop.f32.mrf.mxu0  ;;  %v790_v3 = vpop.f32.mrf.mxu1  ;;  %12671 = vperm.xlu0 %15641, %v12645_v56   ;;  %v15763_v56 = vld [vmem:[%s20351_s1 + $0x3c0] sm:$0xff]  }
  0xd1   :  { %v7287_v1 = vadd.f32 %v7035_v59, %v16704_v40  ;;  %v7033_v2 = vadd.f32 %v774_v45, %v690_v63  ;;  %v15753_v45 = vld [vmem:[%s20351_s1 + $0x358] sm:$0xff]   ;;  %v15756_v59 = vld [vmem:[%s20351_s1 + $0x3a0] sm:$0xff]  }
  0xd2   :  { %v14465_v6 = vpop.f32.mrf.mxu0  ;;  %v14475_v14 = vpop.f32.mrf.mxu1 }
  0xd3   :  { %v7539_v11 = vmax.f32 %v7287_v1, 0.0  ;;  %v7285_v12 = vadd.f32 %v7033_v2, %v16710_v43  ;;  %v7036_v13 = vadd.f32 %v14471_v49, %v14465_v6  ;;  %v15755_v49 = vld [vmem:[%s20351_s1 + $0x380] sm:$0xff]   ;;  %v12644_v1 = vld [vmem:[%s20354_s6 + $0x8] sm:$0xff] }
  0xd4   :  { %v693_v18 = vpop.f32.mrf.mxu0  ;;  %v793_v25 = vpop.f32.mrf.mxu1  ;;  %12666 = vperm.xlu1 %15642, %v12644_v1  }
  0xd5   :  { %v7791_v21 = vadd.f32 %v7539_v11, %v7031_v10  ;;  %v7537_v22 = vmax.f32 %v7285_v12, 0.0  ;;  %v7288_v23 = vadd.f32 %v7036_v13, %v16731_v54  ;;  %v7034_v24 = vadd.f32 %v777_v53, %v693_v18  ;;  %v15758_v18 = vld [vmem:[%s20351_s1 + $0x3a8] sm:$0xff]  }
  0xd6   :  { %v14480_v29 = vpop.f32.mrf.mxu0  ;;  %14719 = vmatmul.mubr.msk.bf16.vlgmr.msra.gmra.mxu0 %vm623_vm1, %v15749_v0  ;;  %14729 = vmatmul.mubr.msk.bf16.vlgmr.msra.gmra.mxu1 %vm623_vm1, %v15750_v7  ;;  %v14490_v37 = vpop.f32.mrf.mxu1 }
  0xd7   :  { %v7789_v32 = vadd.f32 %v7537_v22, %v7029_v17  ;;  %v7540_v33 = vmax.f32 %v7288_v23, 0.0  ;;  %v7286_v34 = vadd.f32 %v7034_v24, %v16738_v58  ;;  %v7039_v36 = vadd.f32 %v14480_v29, %v14474_v60  ;;  %14722 = vmatprep.mubr.msk.bf16.mxu0 %vm623_vm1, %v15751_v8  ;;  %14732 = vmatprep.mubr.msk.bf16.mxu1 %vm623_vm1, %v15752_v15  ;;  %v12647_v8 = vld [vmem:[%s20354_s6 + $0x20] sm:$0xff]  ;;  %v12646_v15 = vld [vmem:[%s20354_s6 + $0x18] sm:$0xff]  ;;  %v15757_v17 = vld [vmem:[%s20351_s1 + $0x388] sm:$0xff]  }
  0xd8   :  { %v874_v35 = vpop.f32.mrf.mxu0  ;;  %14737 = vmatpush3.bf16.msra.mxu0 %v3438_v19  ;;  %v974_v46 = vpop.f32.mrf.mxu1  ;;  %14747 = vmatpush3.bf16.msra.mxu1 %v3538_v30  ;;  %v15760_v29 = vld [vmem:[%s20351_s1 + $0x3b0] sm:$0xff]   ;;  %v3638_v30 = vsel %vm636_vm0, %v16774_v20, 0 }
  0xd9   :  { %v7792_v39 = vadd.f32 %v7540_v33, %v7032_v27  ;;  %v7538_v41 = vmax.f32 %v7286_v34, 0.0  ;;  %v7291_v42 = vadd.f32 %v7039_v36, %v16704_v40  ;;  %v7037_v44 = vadd.f32 %v874_v35, %v790_v3  ;;  %15606 = vmatprep.subr.msk.bf16.mxu0 %vm636_vm0, %v16774_v20  ;;  %15607 = vmatprep.subr.msk.bf16.mxu1 %vm636_vm0, %v16780_v26  ;;  %v12649_v27 = vld [vmem:[%s20354_s6 + $0x30] sm:$0xff]  ;;  %v60_v20 = vld [vmem:[%s20350_s0 + $0x84] sm:$0xf] }
  0xda   :  { %v14481_v47 = vpop.f32.mrf.mxu0  ;;  %v14491_v55 = vpop.f32.mrf.mxu1  ;;  %12681 = vperm.xlu0 %15641, %v12647_v8   ;;  %12676 = vperm.xlu1 %15642, %v12646_v15   ;;  %v3738_v35 = vsel %vm636_vm0, %v16780_v26, 0  ;;  %v12651_v26 = vld [vmem:[%s20354_s6 + $0x40] sm:$0xff] }
  0xdb   :  { %v7790_v50 = vadd.f32 %v7538_v41, %v7030_v28  ;;  %v7543_v51 = vmax.f32 %v7291_v42, 0.0  ;;  %v7289_v52 = vadd.f32 %v7037_v44, %v16710_v43  ;;  %v7040_v53 = vadd.f32 %v14481_v47, %v14475_v14 }
  0xdc   :  { %v877_v57 = vpop.f32.mrf.mxu0  ;;  %v977_v0 = vpop.f32.mrf.mxu1 }
  0xdd   :  { %v7855_v60 = vadd.f32 %v7791_v21, %v7543_v51  ;;  %v7541_v61 = vmax.f32 %v7289_v52, 0.0  ;;  %v7292_v62 = vadd.f32 %v7040_v53, %v16731_v54  ;;  %v7038_v63 = vadd.f32 %v877_v57, %v793_v25  ;;  %v15759_v25 = vld [vmem:[%s20351_s1 + $0x390] sm:$0xff]   ;;  %v15761_v51 = vld [vmem:[%s20351_s1 + $0x398] sm:$0xff]  }
  0xde   :  { %v14484_v2 = vpop.f32.mrf.mxu0  ;;  %14723 = vmatmul.mubr.msk.bf16.gmra.mxu0 %vm623_vm1, %v15753_v45  ;;  %14733 = vmatmul.mubr.msk.bf16.gmra.mxu1 %vm623_vm1, %v15754_v48  ;;  %v14494_v7 = vpop.f32.mrf.mxu1 }
  0xdf   :  { %v7853_v3 = vadd.f32 %v7789_v32, %v7541_v61  ;;  %v7544_v4 = vmax.f32 %v7292_v62, 0.0  ;;  %v7290_v5 = vadd.f32 %v7038_v63, %v16738_v58  ;;  %v7043_v6 = vadd.f32 %v14490_v37, %v14484_v2  ;;  %14738 = vmatprep.mubr.msk.bf16.mxu0 %vm623_vm1, %v15755_v49  ;;  %14748 = vmatprep.mubr.msk.bf16.mxu1 %vm623_vm1, %v15756_v59  ;;  %v16854_v37 = vld [vmem:[%s20350_s0 + $0x80] sm:$0xf] }
  0xe0   :  { %v890_v9 = vpop.f32.mrf.mxu0  ;;  %v990_v14 = vpop.f32.mrf.mxu1  ;;  %12691 = vperm.xlu0 %15641, %v12649_v27   ;;  %v15764_v63 = vld [vmem:[%s20351_s1 + $0x3e0] sm:$0xff]  }
  0xe1   :  { %v7856_v10 = vadd.f32 %v7792_v39, %v7544_v4  ;;  %v7542_v11 = vmax.f32 %v7290_v5, 0.0  ;;  %v7295_v12 = vadd.f32 %v7043_v6, %v16704_v40  ;;  %v7041_v13 = vadd.f32 %v974_v46, %v890_v9  ;;  %v12648_v39 = vld [vmem:[%s20354_s6 + $0x28] sm:$0xff] }
  0xe2   :  { %v14485_v16 = vpop.f32.mrf.mxu0  ;;  %v14495_v24 = vpop.f32.mrf.mxu1  ;;  %12686 = vperm.xlu1 %15642, %v12648_v39   ;;  %v12652_v9 = vld [vmem:[%s20354_s6 + $0x48] sm:$0xff] }
  0xe3   :  { %v7854_v19 = vadd.f32 %v7790_v50, %v7542_v11  ;;  %v7547_v21 = vmax.f32 %v7295_v12, 0.0  ;;  %v7293_v22 = vadd.f32 %v7041_v13, %v16710_v43  ;;  %v7044_v23 = vadd.f32 %v14491_v55, %v14485_v16  ;;  %v15762_v55 = vld [vmem:[%s20351_s1 + $0x3b8] sm:$0xff]   ;;  %v12655_v16 = vld [vmem:[%s20354_s6 + $0x60] sm:$0xff] }
  0xe4   :  { %v893_v28 = vpop.f32.mrf.mxu0  ;;  %v993_v36 = vpop.f32.mrf.mxu1  ;;  %12701 = vperm.xlu0 %15641, %v12651_v26  }
  0xe5   :  { %v7919_v31 = vadd.f32 %v7855_v60, %v7547_v21  ;;  %v7545_v32 = vmax.f32 %v7293_v22, 0.0  ;;  %v7296_v33 = vadd.f32 %v7044_v23, %v16731_v54  ;;  %v7042_v34 = vadd.f32 %v977_v0, %v893_v28  ;;  %v12650_v60 = vld [vmem:[%s20354_s6 + $0x38] sm:$0xff]  ;;  %v15766_v21 = vld [vmem:[%s20351_s1 + $0x3e8] sm:$0xff]   ;;  %v15767_v22 = vld [vmem:[%s20351_s1 + $0x3d0] sm:$0xff]  }
  0xe6   :  { %v14500_v38 = vpop.f32.mrf.mxu0  ;;  %14739 = vmatmul.mubr.msk.bf16.vlgmr.msra.gmra.mxu0 %vm623_vm1, %v15757_v17  ;;  %14749 = vmatmul.mubr.msk.bf16.vlgmr.msra.gmra.mxu1 %vm623_vm1, %v15758_v18  ;;  %v14510_v46 = vpop.f32.mrf.mxu1  ;;  %v3838_v23 = vsel %vm636_vm0, %v16854_v37, 0 }
  0xe7   :  { %v7917_v41 = vadd.f32 %v7853_v3, %v7545_v32  ;;  %v7548_v42 = vmax.f32 %v7296_v33, 0.0  ;;  %v7294_v44 = vadd.f32 %v7042_v34, %v16738_v58  ;;  %v7047_v45 = vadd.f32 %v14500_v38, %v14494_v7  ;;  %14742 = vmatprep.mubr.msk.bf16.mxu0 %vm623_vm1, %v15759_v25  ;;  %14752 = vmatprep.mubr.msk.bf16.mxu1 %vm623_vm1, %v15760_v29  ;;  %v12653_v3 = vld [vmem:[%s20354_s6 + $0x50] sm:$0xff]  ;;  %v12654_v32 = vld [vmem:[%s20354_s6 + $0x58] sm:$0xff] }
  0xe8   :  { %v1074_v47 = vpop.f32.mrf.mxu0  ;;  %14757 = vmatpush3.bf16.msra.mxu0 %v3638_v30  ;;  %v1174_v52 = vpop.f32.mrf.mxu1  ;;  %14767 = vmatpush3.bf16.msra.mxu1 %v3738_v35 }
  0xe9   :  { %v7920_v48 = vadd.f32 %v7856_v10, %v7548_v42  ;;  %v7546_v49 = vmax.f32 %v7294_v44, 0.0  ;;  %v7045_v50 = vadd.f32 %v1074_v47, %v990_v14  ;;  %15608 = vmatprep.subr.msk.bf16.mxu0 %vm636_vm0, %v16854_v37  ;;  %15609 = vmatprep.subr.msk.bf16.mxu1 %vm636_vm0, %v60_v20  ;;  %v7299_v6 = vadd.f32 %v7047_v45, %v16704_v40  ;;  %v16934_v37 = vld [vmem:[%s20350_s0 + $0x88] sm:$0xf]  ;;  %v16940_v42 = vld [vmem:[%s20350_s0 + $0x8c] sm:$0xf] }
  0xea   :  { %v14501_v53 = vpop.f32.mrf.mxu0  ;;  %v14511_v59 = vpop.f32.mrf.mxu1  ;;  %12696 = vperm.xlu1 %15642, %v12650_v60   ;;  %12711 = vperm.xlu0 %15641, %v12653_v3   ;;  %v15770_v60 = vld [vmem:[%s20351_s1 + $0x3f8] sm:$0xff]  }
  0xeb   :  { %v7048_v57 = vadd.f32 %v14501_v53, %v14495_v24  ;;  %v16887_v61 = vpack.c.bf16 %v7920_v48, %v7919_v31  ;;  %v7918_v0 = vadd.f32 %v7854_v19, %v7546_v49  ;;  %v7297_v10 = vadd.f32 %v7045_v50, %v16710_v43  ;;  %v15765_v19 = vld [vmem:[%s20351_s1 + $0x3c8] sm:$0xff]   ;;  %v15768_v31 = vld [vmem:[%s20351_s1 + $0x3f0] sm:$0xff]   ;;  %v15769_v53 = vld [vmem:[%s20351_s1 + $0x3d8] sm:$0xff]  }
  0xec   :  { %v1077_v62 = vpop.f32.mrf.mxu0  ;;  %v1177_v2 = vpop.f32.mrf.mxu1  ;;  %v3938_v24 = vsel %vm636_vm0, %v60_v20, 0  ;;  %v7551_v25 = vmax.f32 %v7299_v6, 0.0  ;;  %v15771_v6 = vld [vmem:[%s20351_s1 + $0x400] sm:$0xff]  }
  0xed   :  { %v7046_v1 = vadd.f32 %v1077_v62, %v993_v36  ;;  %v16896_v5 = vpack.c.bf16 %v7918_v0, %v7917_v41  ;;  %v7300_v11 = vadd.f32 %v7048_v57, %v16731_v54  ;;  %v7549_v33 = vmax.f32 %v7297_v10, 0.0 }
  0xee   :  { %v14504_v4 = vpop.f32.mrf.mxu0  ;;  %14743 = vmatmul.mubr.msk.bf16.gmra.mxu0 %vm623_vm1, %v15761_v51  ;;  %14753 = vmatmul.mubr.msk.bf16.gmra.mxu1 %vm623_vm1, %v15762_v55  ;;  %v14514_v8 = vpop.f32.mrf.mxu1  ;;  %v12656_v51 = vld [vmem:[%s20354_s6 + $0x68] sm:$0xff] }
  0xef   :  { %v7051_v7 = vadd.f32 %v14510_v46, %v14504_v4  ;;  %14758 = vmatprep.mubr.msk.bf16.mxu0 %vm623_vm1, %v15763_v56  ;;  %14768 = vmatprep.mubr.msk.bf16.mxu1 %vm623_vm1, %v15764_v63  ;;  %v7298_v17 = vadd.f32 %v7046_v1, %v16738_v58  ;;  %v7552_v34 = vmax.f32 %v7300_v11, 0.0  ;;  %v12657_v46 = vld [vmem:[%s20354_s6 + $0x70] sm:$0xff] }
  0xf0   :  { %v1090_v12 = vpop.f32.mrf.mxu0  ;;  %v1190_v15 = vpop.f32.mrf.mxu1  ;;  %12706 = vperm.xlu1 %15642, %v12652_v9   ;;  %12721 = vperm.xlu0 %15641, %v12655_v16  }
  0xf1   :  { %v7303_v13 = vadd.f32 %v7051_v7, %v16704_v40  ;;  %v7049_v14 = vadd.f32 %v1174_v52, %v1090_v12  ;;  %v7550_v44 = vmax.f32 %v7298_v17, 0.0 }
  0xf2   :  { %v14505_v18 = vpop.f32.mrf.mxu0  ;;  %v14515_v30 = vpop.f32.mrf.mxu1 }
  0xf3   :  { %v7555_v27 = vmax.f32 %v7303_v13, 0.0  ;;  %v7301_v28 = vadd.f32 %v7049_v14, %v16710_v43  ;;  %v7052_v29 = vadd.f32 %v14511_v59, %v14505_v18  ;;  %v12658_v14 = vld [vmem:[%s20354_s6 + $0x78] sm:$0xff] }
  0xf4   :  { %v1093_v36 = vpop.f32.mrf.mxu0  ;;  %v1193_v41 = vpop.f32.mrf.mxu1  ;;  %12716 = vperm.xlu1 %15642, %v12654_v32   ;;  %12731 = vperm.xlu0 %15641, %v12657_v46   ;;  %v15775_v32 = vld [vmem:[%s20351_s1 + $0x410] sm:$0xff]  }
  0xf5   :  { %v7795_v38 = vadd.f32 %v7555_v27, %v7551_v25  ;;  %v7553_v35 = vmax.f32 %v7301_v28, 0.0  ;;  %v7304_v20 = vadd.f32 %v7052_v29, %v16731_v54  ;;  %v7050_v39 = vadd.f32 %v1177_v2, %v1093_v36  ;;  %v15773_v28 = vld [vmem:[%s20351_s1 + $0x408] sm:$0xff]  }
  0xf6   :  { %v14520_v45 = vpop.f32.mrf.mxu0  ;;  %14759 = vmatmul.mubr.msk.bf16.vlgmr.msra.gmra.mxu0 %vm623_vm1, %v15765_v19  ;;  %14769 = vmatmul.mubr.msk.bf16.vlgmr.msra.gmra.mxu1 %vm623_vm1, %v15766_v21  ;;  %v14530_v50 = vpop.f32.mrf.mxu1 }
  0xf7   :  { %v7793_v26 = vadd.f32 %v7553_v35, %v7549_v33  ;;  %v7556_v47 = vmax.f32 %v7304_v20, 0.0  ;;  %v7302_v48 = vadd.f32 %v7050_v39, %v16738_v58  ;;  %v7055_v49 = vadd.f32 %v14520_v45, %v14514_v8  ;;  %14762 = vmatprep.mubr.msk.bf16.mxu0 %vm623_vm1, %v15767_v22  ;;  %14772 = vmatprep.mubr.msk.bf16.mxu1 %vm623_vm1, %v15768_v31  ;;  %v15772_v8 = vld [vmem:[%s20351_s1 + $0x420] sm:$0xff]   ;;  %v15774_v31 = vld [vmem:[%s20351_s1 + $0x428] sm:$0xff]   ;;  %v15776_v20 = vld [vmem:[%s20351_s1 + $0x430] sm:$0xff]  }
  0xf8   :  { %v1274_v52 = vpop.f32.mrf.mxu0  ;;  %14777 = vmatpush3.bf16.msra.mxu0 %v3838_v23  ;;  %v1374_v62 = vpop.f32.mrf.mxu1  ;;  %14787 = vmatpush3.bf16.msra.mxu1 %v3938_v24  ;;  %v63_v45 = vld [vmem:[%s20350_s0 + $0x90] sm:$0xf] }
  0xf9   :  { %v7796_v55 = vadd.f32 %v7556_v47, %v7552_v34  ;;  %v7554_v56 = vmax.f32 %v7302_v48, 0.0  ;;  %v7307_v57 = vadd.f32 %v7055_v49, %v16704_v40  ;;  %v7053_v59 = vadd.f32 %v1274_v52, %v1190_v15  ;;  %15610 = vmatprep.subr.msk.bf16.mxu0 %vm636_vm0, %v16934_v37  ;;  %15611 = vmatprep.subr.msk.bf16.mxu1 %vm636_vm0, %v16940_v42 }
  0xfa   :  { %v14521_v63 = vpop.f32.mrf.mxu0  ;;  %v14531_v4 = vpop.f32.mrf.mxu1  ;;  %12726 = vperm.xlu1 %15642, %v12656_v51  }
  0xfb   :  { %v7794_v0 = vadd.f32 %v7554_v56, %v7550_v44  ;;  %v7559_v1 = vmax.f32 %v7307_v57, 0.0  ;;  %v7305_v2 = vadd.f32 %v7053_v59, %v16710_v43  ;;  %v7056_v3 = vadd.f32 %v14521_v63, %v14515_v30  ;;  %v15777_v57 = vld [vmem:[%s20351_s1 + $0x418] sm:$0xff]  }
  0xfc   :  { %v1277_v7 = vpop.f32.mrf.mxu0  ;;  %v1377_v13 = vpop.f32.mrf.mxu1  ;;  %v4138_v44 = vsel %vm636_vm0, %v16940_v42, 0  ;;  %v15778_v63 = vld [vmem:[%s20351_s1 + $0x438] sm:$0xff]  }
  0xfd   :  { %v7859_v9 = vadd.f32 %v7795_v38, %v7559_v1  ;;  %v7557_v10 = vmax.f32 %v7305_v2, 0.0  ;;  %v7308_v11 = vadd.f32 %v7056_v3, %v16731_v54  ;;  %v7054_v12 = vadd.f32 %v1277_v7, %v1193_v41 }
  0xfe   :  { %v14524_v15 = vpop.f32.mrf.mxu0  ;;  %14763 = vmatmul.mubr.msk.bf16.gmra.mxu0 %vm623_vm1, %v15769_v53  ;;  %14773 = vmatmul.mubr.msk.bf16.gmra.mxu1 %vm623_vm1, %v15770_v60  ;;  %v14534_v21 = vpop.f32.mrf.mxu1  ;;  %v4038_v41 = vsel %vm636_vm0, %v16934_v37, 0 }
  0xff   :  { %v7857_v16 = vadd.f32 %v7793_v26, %v7557_v10  ;;  %v7560_v17 = vmax.f32 %v7308_v11, 0.0  ;;  %v7306_v18 = vadd.f32 %v7054_v12, %v16738_v58  ;;  %v7059_v19 = vadd.f32 %v14530_v50, %v14524_v15  ;;  %14778 = vmatprep.mubr.msk.bf16.mxu0 %vm623_vm1, %v15771_v6  ;;  %14788 = vmatprep.mubr.msk.bf16.mxu1 %vm623_vm1, %v15772_v8  ;;  %v17005_v50 = vld [vmem:[%s20350_s0 + $0x94] sm:$0xf]  ;;  %v15780_v8 = vld [vmem:[%s20351_s1 + $0x460] sm:$0xff]  }
 0x100   :  { %v1290_v22 = vpop.f32.mrf.mxu0  ;;  %12736 = vperm.xlu1 %15642, %v12658_v14   ;;  %v1390_v29 = vpop.f32.mrf.mxu1 }
 0x101   :  { %v7860_v23 = vadd.f32 %v7796_v55, %v7560_v17  ;;  %v7558_v24 = vmax.f32 %v7306_v18, 0.0  ;;  %v7311_v25 = vadd.f32 %v7059_v19, %v16704_v40  ;;  %v7057_v27 = vadd.f32 %v1374_v62, %v1290_v22  ;;  %v15781_v22 = vld [vmem:[%s20351_s1 + $0x448] sm:$0xff]  }
 0x102   :  { %v14525_v30 = vpop.f32.mrf.mxu0  ;;  %v14535_v35 = vpop.f32.mrf.mxu1 }
 0x103   :  { %v7858_v33 = vadd.f32 %v7794_v0, %v7558_v24  ;;  %v7563_v34 = vmax.f32 %v7311_v25, 0.0  ;;  %v7309_v36 = vadd.f32 %v7057_v27, %v16710_v43  ;;  %v7060_v38 = vadd.f32 %v14531_v4, %v14525_v30  ;;  %v15779_v4 = vld [vmem:[%s20351_s1 + $0x440] sm:$0xff]   ;;  %v15782_v25 = vld [vmem:[%s20351_s1 + $0x468] sm:$0xff]   ;;  %v15784_v30 = vld [vmem:[%s20351_s1 + $0x470] sm:$0xff]  }
 0x104   :  { %v1293_v39 = vpop.f32.mrf.mxu0  ;;  %v1393_v49 = vpop.f32.mrf.mxu1 }
 0x105   :  { %v7923_v46 = vadd.f32 %v7859_v9, %v7563_v34  ;;  %v7561_v26 = vmax.f32 %v7309_v36, 0.0  ;;  %v7312_v47 = vadd.f32 %v7060_v38, %v16731_v54  ;;  %v7058_v48 = vadd.f32 %v1377_v13, %v1293_v39 }
 0x106   :  { %v14540_v51 = vpop.f32.mrf.mxu0  ;;  %14779 = vmatmul.mubr.msk.bf16.vlgmr.msra.gmra.mxu0 %vm623_vm1, %v15773_v28  ;;  %14789 = vmatmul.mubr.msk.bf16.vlgmr.msra.gmra.mxu1 %vm623_vm1, %v15774_v31  ;;  %v14550_v55 = vpop.f32.mrf.mxu1  ;;  %v4238_v31 = vsel %vm636_vm0, %v63_v45, 0 }
 0x107   :  { %v7921_v37 = vadd.f32 %v7857_v16, %v7561_v26  ;;  %v7564_v42 = vmax.f32 %v7312_v47, 0.0  ;;  %v7310_v52 = vadd.f32 %v7058_v48, %v16738_v58  ;;  %v7063_v53 = vadd.f32 %v14540_v51, %v14534_v21  ;;  %14782 = vmatprep.mubr.msk.bf16.mxu0 %vm623_vm1, %v15775_v32  ;;  %14792 = vmatprep.mubr.msk.bf16.mxu1 %vm623_vm1, %v15776_v20  ;;  %v17065_v51 = vld [vmem:[%s20350_s0 + $0x9c] sm:$0xf] }
 0x108   :  { %v1474_v56 = vpop.f32.mrf.mxu0  ;;  %14797 = vmatpush3.bf16.msra.mxu0 %v4038_v41  ;;  %v1574_v0 = vpop.f32.mrf.mxu1  ;;  %14807 = vmatpush3.bf16.msra.mxu1 %v4138_v44  ;;  %v4338_v44 = vsel %vm636_vm0, %v17005_v50, 0 }
 0x109   :  { %v7924_v59 = vadd.f32 %v7860_v23, %v7564_v42  ;;  %v7562_v60 = vmax.f32 %v7310_v52, 0.0  ;;  %v7061_v62 = vadd.f32 %v1474_v56, %v1390_v29  ;;  %15612 = vmatprep.subr.msk.bf16.mxu0 %vm636_vm0, %v63_v45  ;;  %15613 = vmatprep.subr.msk.bf16.mxu1 %vm636_vm0, %v17005_v50  ;;  %v7315_v14 = vadd.f32 %v7063_v53, %v16704_v40  ;;  %v15783_v29 = vld [vmem:[%s20351_s1 + $0x450] sm:$0xff]  }
 0x10a   :  { %v14541_v1 = vpop.f32.mrf.mxu0  ;;  %v14551_v3 = vpop.f32.mrf.mxu1 }
 0x10b   :  { %v7064_v2 = vadd.f32 %v14541_v1, %v14535_v35  ;;  %v17024_v6 = vpack.c.bf16 %v7924_v59, %v7923_v46  ;;  %v7922_v9 = vadd.f32 %v7858_v33, %v7562_v60  ;;  %v7313_v17 = vadd.f32 %v7061_v62, %v16710_v43  ;;  %v17059_v46 = vld [vmem:[%s20350_s0 + $0x98] sm:$0xf] }
 0x10c   :  { %v1477_v7 = vpop.f32.mrf.mxu0  ;;  %v1577_v11 = vpop.f32.mrf.mxu1  ;;  %v7567_v32 = vmax.f32 %v7315_v14, 0.0  ;;  %v15785_v1 = vld [vmem:[%s20351_s1 + $0x458] sm:$0xff]  }
 0x10d   :  { %v7062_v10 = vadd.f32 %v1477_v7, %v1393_v49  ;;  %v17030_v13 = vpack.c.bf16 %v7922_v9, %v7921_v37  ;;  %v7316_v18 = vadd.f32 %v7064_v2, %v16731_v54  ;;  %v7565_v35 = vmax.f32 %v7313_v17, 0.0 }
 0x10e   :  { %v14544_v12 = vpop.f32.mrf.mxu0  ;;  %14783 = vmatmul.mubr.msk.bf16.gmra.mxu0 %vm623_vm1, %v15777_v57  ;;  %14793 = vmatmul.mubr.msk.bf16.gmra.mxu1 %vm623_vm1, %v15778_v63  ;;  %v14554_v16 = vpop.f32.mrf.mxu1 }
 0x10f   :  { %v7067_v15 = vadd.f32 %v14550_v55, %v14544_v12  ;;  %14798 = vmatprep.mubr.msk.bf16.mxu0 %vm623_vm1, %v15779_v4  ;;  %v7314_v19 = vadd.f32 %v7062_v10, %v16738_v58  ;;  %14808 = vmatprep.mubr.msk.bf16.mxu1 %vm623_vm1, %v15780_v8  ;;  %v7568_v20 = vmax.f32 %v7316_v18, 0.0  ;;  %v15786_v8 = vld [vmem:[%s20351_s1 + $0x478] sm:$0xff]   ;;  %v15787_v10 = vld [vmem:[%s20351_s1 + $0x480] sm:$0xff]  }
 0x110   :  { %v1490_v21 = vpop.f32.mrf.mxu0  ;;  %v1590_v27 = vpop.f32.mrf.mxu1  ;;  %v15788_v12 = vld [vmem:[%s20351_s1 + $0x4a0] sm:$0xff]  }
 0x111   :  { %v7319_v23 = vadd.f32 %v7067_v15, %v16704_v40  ;;  %v7065_v24 = vadd.f32 %v1574_v0, %v1490_v21  ;;  %v7566_v39 = vmax.f32 %v7314_v19, 0.0 }
 0x112   :  { %v14545_v28 = vpop.f32.mrf.mxu0  ;;  %v14555_v38 = vpop.f32.mrf.mxu1 }
 0x113   :  { %v7571_v33 = vmax.f32 %v7319_v23, 0.0  ;;  %v7317_v34 = vadd.f32 %v7065_v24, %v16710_v43  ;;  %v7068_v36 = vadd.f32 %v14551_v3, %v14545_v28 }
 0x114   :  { %v1493_v41 = vpop.f32.mrf.mxu0  ;;  %v1593_v49 = vpop.f32.mrf.mxu1 }
 0x115   :  { %v7799_v26 = vadd.f32 %v7571_v33, %v7567_v32  ;;  %v7569_v45 = vmax.f32 %v7317_v34, 0.0  ;;  %v7320_v47 = vadd.f32 %v7068_v36, %v16731_v54  ;;  %v7066_v48 = vadd.f32 %v1577_v11, %v1493_v41  ;;  %v15789_v34 = vld [vmem:[%s20351_s1 + $0x488] sm:$0xff]  }
 0x116   :  { %v14560_v37 = vpop.f32.mrf.mxu0  ;;  %14799 = vmatmul.mubr.msk.bf16.vlgmr.msra.gmra.mxu0 %vm623_vm1, %v15781_v22  ;;  %14809 = vmatmul.mubr.msk.bf16.vlgmr.msra.gmra.mxu1 %vm623_vm1, %v15782_v25  ;;  %v14570_v55 = vpop.f32.mrf.mxu1 }
 0x117   :  { %v7797_v50 = vadd.f32 %v7569_v45, %v7565_v35  ;;  %v7572_v42 = vmax.f32 %v7320_v47, 0.0  ;;  %v7318_v52 = vadd.f32 %v7066_v48, %v16738_v58  ;;  %v7071_v53 = vadd.f32 %v14560_v37, %v14554_v16  ;;  %14802 = vmatprep.mubr.msk.bf16.mxu0 %vm623_vm1, %v15783_v29  ;;  %14812 = vmatprep.mubr.msk.bf16.mxu1 %vm623_vm1, %v15784_v30  ;;  %v15792_v45 = vld [vmem:[%s20351_s1 + $0x4b0] sm:$0xff]  }
 0x118   :  { %v1674_v56 = vpop.f32.mrf.mxu0  ;;  %14817 = vmatpush3.bf16.msra.mxu0 %v4238_v31  ;;  %v1774_v63 = vpop.f32.mrf.mxu1  ;;  %14827 = vmatpush3.bf16.msra.mxu1 %v4338_v44  ;;  %v15791_v44 = vld [vmem:[%s20351_s1 + $0x490] sm:$0xff]   ;;  %v4438_v47 = vsel %vm636_vm0, %v17059_v46, 0 }
 0x119   :  { %v7800_v57 = vadd.f32 %v7572_v42, %v7568_v20  ;;  %v7570_v59 = vmax.f32 %v7318_v52, 0.0  ;;  %v7323_v60 = vadd.f32 %v7071_v53, %v16704_v40  ;;  %v7069_v62 = vadd.f32 %v1674_v56, %v1590_v27  ;;  %15614 = vmatprep.subr.msk.bf16.mxu0 %vm636_vm0, %v17059_v46  ;;  %15615 = vmatprep.subr.msk.bf16.mxu1 %vm636_vm0, %v17065_v51 }
 0x11a   :  { %v14561_v0 = vpop.f32.mrf.mxu0  ;;  %v14571_v9 = vpop.f32.mrf.mxu1  ;;  %v4538_v53 = vsel %vm636_vm0, %v17065_v51, 0 }
 0x11b   :  { %v7798_v2 = vadd.f32 %v7570_v59, %v7566_v39  ;;  %v7575_v3 = vmax.f32 %v7323_v60, 0.0  ;;  %v7321_v4 = vadd.f32 %v7069_v62, %v16710_v43  ;;  %v7072_v7 = vadd.f32 %v14561_v0, %v14555_v38  ;;  %v15790_v39 = vld [vmem:[%s20351_s1 + $0x4a8] sm:$0xff]   ;;  %v68_v62 = vld [vmem:[%s20350_s0 + $0xa4] sm:$0xf] }
 0x11c   :  { %v1677_v11 = vpop.f32.mrf.mxu0  ;;  %v1777_v18 = vpop.f32.mrf.mxu1 }
 0x11d   :  { %v7863_v14 = vadd.f32 %v7799_v26, %v7575_v3  ;;  %v7573_v15 = vmax.f32 %v7321_v4, 0.0  ;;  %v7324_v16 = vadd.f32 %v7072_v7, %v16731_v54  ;;  %v7070_v17 = vadd.f32 %v1677_v11, %v1593_v49  ;;  %v15793_v4 = vld [vmem:[%s20351_s1 + $0x498] sm:$0xff]  }
 0x11e   :  { %v14564_v19 = vpop.f32.mrf.mxu0  ;;  %14803 = vmatmul.mubr.msk.bf16.gmra.mxu0 %vm623_vm1, %v15785_v1  ;;  %14813 = vmatmul.mubr.msk.bf16.gmra.mxu1 %vm623_vm1, %v15786_v8  ;;  %v14574_v25 = vpop.f32.mrf.mxu1  ;;  %v15794_v8 = vld [vmem:[%s20351_s1 + $0x4b8] sm:$0xff]  }
 0x11f   :  { %v7861_v21 = vadd.f32 %v7797_v50, %v7573_v15  ;;  %v7576_v22 = vmax.f32 %v7324_v16, 0.0  ;;  %v7322_v23 = vadd.f32 %v7070_v17, %v16738_v58  ;;  %v7075_v24 = vadd.f32 %v14570_v55, %v14564_v19  ;;  %14818 = vmatprep.mubr.msk.bf16.mxu0 %vm623_vm1, %v15787_v10  ;;  %14828 = vmatprep.mubr.msk.bf16.mxu1 %vm623_vm1, %v15788_v12  ;;  %v67_v55 = vld [vmem:[%s20350_s0 + $0xa0] sm:$0xf] }
 0x120   :  { %v1690_v27 = vpop.f32.mrf.mxu0  ;;  %v1790_v32 = vpop.f32.mrf.mxu1  ;;  %v15795_v10 = vld [vmem:[%s20351_s1 + $0x4c0] sm:$0xff]  }
 0x121   :  { %v7864_v28 = vadd.f32 %v7800_v57, %v7576_v22  ;;  %v7574_v29 = vmax.f32 %v7322_v23, 0.0  ;;  %v7327_v30 = vadd.f32 %v7075_v24, %v16704_v40  ;;  %v7073_v31 = vadd.f32 %v1774_v63, %v1690_v27 }
 0x122   :  { %v14565_v33 = vpop.f32.mrf.mxu0  ;;  %v14575_v41 = vpop.f32.mrf.mxu1 }
 0x123   :  { %v7862_v36 = vadd.f32 %v7798_v2, %v7574_v29  ;;  %v7579_v38 = vmax.f32 %v7327_v30, 0.0  ;;  %v7325_v35 = vadd.f32 %v7073_v31, %v16710_v43  ;;  %v7076_v20 = vadd.f32 %v14571_v9, %v14565_v33 }
 0x124   :  { %v1693_v26 = vpop.f32.mrf.mxu0  ;;  %v1793_v42 = vpop.f32.mrf.mxu1 }
 0x125   :  { %v7927_v48 = vadd.f32 %v7863_v14, %v7579_v38  ;;  %v7577_v49 = vmax.f32 %v7325_v35, 0.0  ;;  %v7328_v37 = vadd.f32 %v7076_v20, %v16731_v54  ;;  %v7074_v50 = vadd.f32 %v1777_v18, %v1693_v26  ;;  %v15796_v14 = vld [vmem:[%s20351_s1 + $0x4e0] sm:$0xff]   ;;  %v15798_v35 = vld [vmem:[%s20351_s1 + $0x4e8] sm:$0xff]  }
 0x126   :  { %v14580_v52 = vpop.f32.mrf.mxu0  ;;  %14819 = vmatmul.mubr.msk.bf16.vlgmr.msra.gmra.mxu0 %vm623_vm1, %v15789_v34  ;;  %14829 = vmatmul.mubr.msk.bf16.vlgmr.msra.gmra.mxu1 %vm623_vm1, %v15790_v39  ;;  %v14590_v60 = vpop.f32.mrf.mxu1  ;;  %v15799_v39 = vld [vmem:[%s20351_s1 + $0x4d0] sm:$0xff]  }
 0x127   :  { %v7925_v56 = vadd.f32 %v7861_v21, %v7577_v49  ;;  %v7580_v57 = vmax.f32 %v7328_v37, 0.0  ;;  %v7326_v46 = vadd.f32 %v7074_v50, %v16738_v58  ;;  %v7079_v59 = vadd.f32 %v14580_v52, %v14574_v25  ;;  %14822 = vmatprep.mubr.msk.bf16.mxu0 %vm623_vm1, %v15791_v44  ;;  %14832 = vmatprep.mubr.msk.bf16.mxu1 %vm623_vm1, %v15792_v45  ;;  %v15800_v45 = vld [vmem:[%s20351_s1 + $0x4f0] sm:$0xff]  }
 0x128   :  { %v1874_v63 = vpop.f32.mrf.mxu0  ;;  %14837 = vmatpush3.bf16.msra.mxu0 %v4438_v47  ;;  %v1974_v2 = vpop.f32.mrf.mxu1  ;;  %14847 = vmatpush3.bf16.msra.mxu1 %v4538_v53  ;;  %v4638_v47 = vsel %vm636_vm0, %v67_v55, 0 }
 0x129   :  { %v7928_v51 = vadd.f32 %v7864_v28, %v7580_v57  ;;  %v7578_v0 = vmax.f32 %v7326_v46, 0.0  ;;  %v7077_v1 = vadd.f32 %v1874_v63, %v1790_v32  ;;  %15616 = vmatprep.subr.msk.bf16.mxu0 %vm636_vm0, %v67_v55  ;;  %15617 = vmatprep.subr.msk.bf16.mxu1 %vm636_vm0, %v68_v62  ;;  %v7331_v21 = vadd.f32 %v7079_v59, %v16704_v40  ;;  %v15797_v32 = vld [vmem:[%s20351_s1 + $0x4c8] sm:$0xff]  }
 0x12a   :  { %v14581_v3 = vpop.f32.mrf.mxu0  ;;  %v14591_v9 = vpop.f32.mrf.mxu1  ;;  %v17173_v57 = vld [vmem:[%s20350_s0 + $0xa8] sm:$0xf] }
 0x12b   :  { %v7080_v7 = vadd.f32 %v14581_v3, %v14575_v41  ;;  %v17137_v11 = vpack.c.bf16 %v7928_v51, %v7927_v48  ;;  %v7926_v15 = vadd.f32 %v7862_v36, %v7578_v0  ;;  %v7329_v24 = vadd.f32 %v7077_v1, %v16710_v43  ;;  %v17181_v51 = vld [vmem:[%s20350_s0 + $0xac] sm:$0xf] }
 0x12c   :  { %v1877_v12 = vpop.f32.mrf.mxu0  ;;  %v1977_v17 = vpop.f32.mrf.mxu1  ;;  %v7583_v33 = vmax.f32 %v7331_v21, 0.0 }
 0x12d   :  { %v7078_v16 = vadd.f32 %v1877_v12, %v1793_v42  ;;  %v17143_v19 = vpack.c.bf16 %v7926_v15, %v7925_v56  ;;  %v7332_v30 = vadd.f32 %v7080_v7, %v16731_v54  ;;  %v7581_v41 = vmax.f32 %v7329_v24, 0.0 }
 0x12e   :  { %v14584_v18 = vpop.f32.mrf.mxu0  ;;  %14823 = vmatmul.mubr.msk.bf16.gmra.mxu0 %vm623_vm1, %v15793_v4  ;;  %14833 = vmatmul.mubr.msk.bf16.gmra.mxu1 %vm623_vm1, %v15794_v8  ;;  %v14594_v23 = vpop.f32.mrf.mxu1  ;;  %v4738_v56 = vsel %vm636_vm0, %v68_v62, 0 }
 0x12f   :  { %v7083_v22 = vadd.f32 %v14590_v60, %v14584_v18  ;;  %14838 = vmatprep.mubr.msk.bf16.mxu0 %vm623_vm1, %v15795_v10  ;;  %14848 = vmatprep.mubr.msk.bf16.mxu1 %vm623_vm1, %v15796_v14  ;;  %v7330_v44 = vadd.f32 %v7078_v16, %v16738_v58  ;;  %v7584_v52 = vmax.f32 %v7332_v30, 0.0  ;;  %v15802_v16 = vld [vmem:[%s20351_s1 + $0x4f8] sm:$0xff]   ;;  %v15803_v18 = vld [vmem:[%s20351_s1 + $0x500] sm:$0xff]  }
 0x130   :  { %v1890_v25 = vpop.f32.mrf.mxu0  ;;  %v1990_v29 = vpop.f32.mrf.mxu1 }
 0x131   :  { %v7335_v27 = vadd.f32 %v7083_v22, %v16704_v40  ;;  %v7081_v28 = vadd.f32 %v1974_v2, %v1890_v25  ;;  %v7582_v62 = vmax.f32 %v7330_v44, 0.0  ;;  %v15804_v22 = vld [vmem:[%s20351_s1 + $0x520] sm:$0xff]  }
 0x132   :  { %v14585_v31 = vpop.f32.mrf.mxu0  ;;  %v14595_v20 = vpop.f32.mrf.mxu1 }
 0x133   :  { %v7587_v34 = vmax.f32 %v7335_v27, 0.0  ;;  %v7333_v36 = vadd.f32 %v7081_v28, %v16710_v43  ;;  %v7084_v38 = vadd.f32 %v14591_v9, %v14585_v31  ;;  %v15801_v9 = vld [vmem:[%s20351_s1 + $0x4d8] sm:$0xff]  }
 0x134   :  { %v1893_v26 = vpop.f32.mrf.mxu0  ;;  %v1993_v42 = vpop.f32.mrf.mxu1 }
 0x135   :  { %v7803_v48 = vadd.f32 %v7587_v34, %v7583_v33  ;;  %v7585_v49 = vmax.f32 %v7333_v36, 0.0  ;;  %v7336_v37 = vadd.f32 %v7084_v38, %v16731_v54  ;;  %v7082_v50 = vadd.f32 %v1977_v17, %v1893_v26  ;;  %v15805_v26 = vld [vmem:[%s20351_s1 + $0x508] sm:$0xff]  }
 0x136   :  { %v14600_v53 = vpop.f32.mrf.mxu0  ;;  %14839 = vmatmul.mubr.msk.bf16.vlgmr.msra.gmra.mxu0 %vm623_vm1, %v15797_v32  ;;  %14849 = vmatmul.mubr.msk.bf16.vlgmr.msra.gmra.mxu1 %vm623_vm1, %v15798_v35  ;;  %v14610_v63 = vpop.f32.mrf.mxu1 }
 0x137   :  { %v7801_v46 = vadd.f32 %v7585_v49, %v7581_v41  ;;  %v7588_v59 = vmax.f32 %v7336_v37, 0.0  ;;  %v7334_v55 = vadd.f32 %v7082_v50, %v16738_v58  ;;  %v7087_v60 = vadd.f32 %v14600_v53, %v14594_v23  ;;  %14842 = vmatprep.mubr.msk.bf16.mxu0 %vm623_vm1, %v15799_v39  ;;  %14852 = vmatprep.mubr.msk.bf16.mxu1 %vm623_vm1, %v15800_v45  ;;  %v15806_v37 = vld [vmem:[%s20351_s1 + $0x528] sm:$0xff]   ;;  %v15808_v53 = vld [vmem:[%s20351_s1 + $0x530] sm:$0xff]  }
 0x138   :  { %v2074_v0 = vpop.f32.mrf.mxu0  ;;  %14857 = vmatpush3.bf16.msra.mxu0 %v4638_v47  ;;  %v2174_v7 = vpop.f32.mrf.mxu1  ;;  %14867 = vmatpush3.bf16.msra.mxu1 %v4738_v56  ;;  %v4838_v56 = vsel %vm636_vm0, %v17173_v57, 0 }
 0x139   :  { %v7804_v1 = vadd.f32 %v7588_v59, %v7584_v52  ;;  %v7586_v2 = vmax.f32 %v7334_v55, 0.0  ;;  %v7339_v3 = vadd.f32 %v7087_v60, %v16704_v40  ;;  %v7085_v4 = vadd.f32 %v2074_v0, %v1990_v29  ;;  %15618 = vmatprep.subr.msk.bf16.mxu0 %vm636_vm0, %v17173_v57  ;;  %15619 = vmatprep.subr.msk.bf16.mxu1 %vm636_vm0, %v17181_v51 }
 0x13a   :  { %v14601_v8 = vpop.f32.mrf.mxu0  ;;  %v14611_v17 = vpop.f32.mrf.mxu1  ;;  %v4938_v0 = vsel %vm636_vm0, %v17181_v51, 0 }
 0x13b   :  { %v7802_v10 = vadd.f32 %v7586_v2, %v7582_v62  ;;  %v7591_v12 = vmax.f32 %v7339_v3, 0.0  ;;  %v7337_v14 = vadd.f32 %v7085_v4, %v16710_v43  ;;  %v7088_v15 = vadd.f32 %v14601_v8, %v14595_v20  ;;  %v72_v8 = vld [vmem:[%s20350_s0 + $0xb4] sm:$0xf] }
 0x13c   :  { %v2077_v21 = vpop.f32.mrf.mxu0  ;;  %v2177_v28 = vpop.f32.mrf.mxu1 }
 0x13d   :  { %v7867_v23 = vadd.f32 %v7803_v48, %v7591_v12  ;;  %v7589_v24 = vmax.f32 %v7337_v14, 0.0  ;;  %v7340_v25 = vadd.f32 %v7088_v15, %v16731_v54  ;;  %v7086_v27 = vadd.f32 %v2077_v21, %v1993_v42  ;;  %v15807_v42 = vld [vmem:[%s20351_s1 + $0x510] sm:$0xff]  }
 0x13e   :  { %v14604_v29 = vpop.f32.mrf.mxu0  ;;  %14843 = vmatmul.mubr.msk.bf16.gmra.mxu0 %vm623_vm1, %v15801_v9  ;;  %14853 = vmatmul.mubr.msk.bf16.gmra.mxu1 %vm623_vm1, %v15802_v16  ;;  %v14614_v34 = vpop.f32.mrf.mxu1  ;;  %v15809_v16 = vld [vmem:[%s20351_s1 + $0x518] sm:$0xff]  }
 0x13f   :  { %v7865_v30 = vadd.f32 %v7801_v46, %v7589_v24  ;;  %v7592_v31 = vmax.f32 %v7340_v25, 0.0  ;;  %v7338_v32 = vadd.f32 %v7086_v27, %v16738_v58  ;;  %v7091_v33 = vadd.f32 %v14610_v63, %v14604_v29  ;;  %14858 = vmatprep.mubr.msk.bf16.mxu0 %vm623_vm1, %v15803_v18  ;;  %14868 = vmatprep.mubr.msk.bf16.mxu1 %vm623_vm1, %v15804_v22  ;;  %v15810_v18 = vld [vmem:[%s20351_s1 + $0x538] sm:$0xff]   ;;  %v15811_v22 = vld [vmem:[%s20351_s1 + $0x540] sm:$0xff]  }
 0x140   :  { %v2090_v36 = vpop.f32.mrf.mxu0  ;;  %v2190_v41 = vpop.f32.mrf.mxu1  ;;  %v15812_v25 = vld [vmem:[%s20351_s1 + $0x560] sm:$0xff]  }
 0x141   :  { %v7868_v38 = vadd.f32 %v7804_v1, %v7592_v31  ;;  %v7590_v35 = vmax.f32 %v7338_v32, 0.0  ;;  %v7343_v20 = vadd.f32 %v7091_v33, %v16704_v40  ;;  %v7089_v39 = vadd.f32 %v2174_v7, %v2090_v36  ;;  %v71_v1 = vld [vmem:[%s20350_s0 + $0xb0] sm:$0xf] }
 0x142   :  { %v14605_v44 = vpop.f32.mrf.mxu0  ;;  %v14615_v50 = vpop.f32.mrf.mxu1 }
 0x143   :  { %v7866_v45 = vadd.f32 %v7802_v10, %v7590_v35  ;;  %v7595_v47 = vmax.f32 %v7343_v20, 0.0  ;;  %v7341_v48 = vadd.f32 %v7089_v39, %v16710_v43  ;;  %v7092_v49 = vadd.f32 %v14611_v17, %v14605_v44 }
 0x144   :  { %v2093_v52 = vpop.f32.mrf.mxu0  ;;  %v2193_v63 = vpop.f32.mrf.mxu1 }
 0x145   :  { %v7931_v46 = vadd.f32 %v7867_v23, %v7595_v47  ;;  %v7593_v59 = vmax.f32 %v7341_v48, 0.0  ;;  %v7344_v55 = vadd.f32 %v7092_v49, %v16731_v54  ;;  %v7090_v60 = vadd.f32 %v2177_v28, %v2093_v52 }
 0x146   :  { %v14620_v62 = vpop.f32.mrf.mxu0  ;;  %14859 = vmatmul.mubr.msk.bf16.vlgmr.msra.gmra.mxu0 %vm623_vm1, %v15805_v26  ;;  %14869 = vmatmul.mubr.msk.bf16.vlgmr.msra.gmra.mxu1 %vm623_vm1, %v15806_v37  ;;  %v14630_v7 = vpop.f32.mrf.mxu1  ;;  %v15813_v26 = vld [vmem:[%s20351_s1 + $0x548] sm:$0xff]  }
 0x147   :  { %v7929_v2 = vadd.f32 %v7865_v30, %v7593_v59  ;;  %v7596_v3 = vmax.f32 %v7344_v55, 0.0  ;;  %v7342_v57 = vadd.f32 %v7090_v60, %v16738_v58  ;;  %v7095_v4 = vadd.f32 %v14620_v62, %v14614_v34  ;;  %14862 = vmatprep.mubr.msk.bf16.mxu0 %vm623_vm1, %v15807_v42  ;;  %14872 = vmatprep.mubr.msk.bf16.mxu1 %vm623_vm1, %v15808_v53  ;;  %v15814_v37 = vld [vmem:[%s20351_s1 + $0x568] sm:$0xff]   ;;  %v15815_v42 = vld [vmem:[%s20351_s1 + $0x550] sm:$0xff]  }
 0x148   :  { %v2274_v9 = vpop.f32.mrf.mxu0  ;;  %14877 = vmatpush3.bf16.msra.mxu0 %v4838_v56  ;;  %v2374_v14 = vpop.f32.mrf.mxu1  ;;  %14887 = vmatpush3.bf16.msra.mxu1 %v4938_v0  ;;  %v5038_v59 = vsel %vm636_vm0, %v71_v1, 0 }
 0x149   :  { %v7932_v51 = vadd.f32 %v7868_v38, %v7596_v3  ;;  %v7594_v10 = vmax.f32 %v7342_v57, 0.0  ;;  %v7093_v12 = vadd.f32 %v2274_v9, %v2190_v41  ;;  %15620 = vmatprep.subr.msk.bf16.mxu0 %vm636_vm0, %v71_v1  ;;  %15621 = vmatprep.subr.msk.bf16.mxu1 %vm636_vm0, %v72_v8  ;;  %v7347_v32 = vadd.f32 %v7095_v4, %v16704_v40  ;;  %v17285_v4 = vld [vmem:[%s20350_s0 + $0xb8] sm:$0xf] }
 0x14a   :  { %v14621_v15 = vpop.f32.mrf.mxu0  ;;  %v14631_v21 = vpop.f32.mrf.mxu1  ;;  %v5138_v57 = vsel %vm636_vm0, %v72_v8, 0 }
 0x14b   :  { %v7096_v17 = vadd.f32 %v14621_v15, %v14615_v50  ;;  %v17249_v23 = vpack.c.bf16 %v7932_v51, %v7931_v46  ;;  %v7930_v27 = vadd.f32 %v7866_v45, %v7594_v10  ;;  %v7345_v36 = vadd.f32 %v7093_v12, %v16710_v43  ;;  %v15816_v46 = vld [vmem:[%s20351_s1 + $0x570] sm:$0xff]   ;;  %v17293_v12 = vld [vmem:[%s20350_s0 + $0xbc] sm:$0xf] }
 0x14c   :  { %v2277_v24 = vpop.f32.mrf.mxu0  ;;  %v2377_v29 = vpop.f32.mrf.mxu1  ;;  %v7599_v45 = vmax.f32 %v7347_v32, 0.0 }
 0x14d   :  { %v7094_v28 = vadd.f32 %v2277_v24, %v2193_v63  ;;  %v17255_v31 = vpack.c.bf16 %v7930_v27, %v7929_v2  ;;  %v7348_v41 = vadd.f32 %v7096_v17, %v16731_v54  ;;  %v7597_v52 = vmax.f32 %v7345_v36, 0.0  ;;  %v15817_v24 = vld [vmem:[%s20351_s1 + $0x558] sm:$0xff]   ;;  %v15820_v36 = vld [vmem:[%s20351_s1 + $0x5a0] sm:$0xff]  }
 0x14e   :  { %v14624_v30 = vpop.f32.mrf.mxu0  ;;  %14863 = vmatmul.mubr.msk.bf16.gmra.mxu0 %vm623_vm1, %v15809_v16  ;;  %14873 = vmatmul.mubr.msk.bf16.gmra.mxu1 %vm623_vm1, %v15810_v18  ;;  %v14634_v34 = vpop.f32.mrf.mxu1 }
 0x14f   :  { %v7099_v33 = vadd.f32 %v14630_v7, %v14624_v30  ;;  %14878 = vmatprep.mubr.msk.bf16.mxu0 %vm623_vm1, %v15811_v22  ;;  %14888 = vmatprep.mubr.msk.bf16.mxu1 %vm623_vm1, %v15812_v25  ;;  %v7346_v53 = vadd.f32 %v7094_v28, %v16738_v58  ;;  %v7600_v2 = vmax.f32 %v7348_v41, 0.0  ;;  %v15818_v30 = vld [vmem:[%s20351_s1 + $0x578] sm:$0xff]  }
 0x150   :  { %v2290_v38 = vpop.f32.mrf.mxu0  ;;  %v2390_v39 = vpop.f32.mrf.mxu1 }
 0x151   :  { %v7351_v35 = vadd.f32 %v7099_v33, %v16704_v40  ;;  %v7097_v20 = vadd.f32 %v2374_v14, %v2290_v38  ;;  %v7598_v8 = vmax.f32 %v7346_v53, 0.0  ;;  %v15819_v33 = vld [vmem:[%s20351_s1 + $0x580] sm:$0xff]  }
 0x152   :  { %v14625_v44 = vpop.f32.mrf.mxu0  ;;  %v14635_v50 = vpop.f32.mrf.mxu1 }
 0x153   :  { %v7603_v47 = vmax.f32 %v7351_v35, 0.0  ;;  %v7349_v48 = vadd.f32 %v7097_v20, %v16710_v43  ;;  %v7100_v49 = vadd.f32 %v14631_v21, %v14625_v44 }
 0x154   :  { %v2293_v56 = vpop.f32.mrf.mxu0  ;;  %v2393_v0 = vpop.f32.mrf.mxu1 }
 0x155   :  { %v7807_v55 = vadd.f32 %v7603_v47, %v7599_v45  ;;  %v7601_v60 = vmax.f32 %v7349_v48, 0.0  ;;  %v7352_v63 = vadd.f32 %v7100_v49, %v16731_v54  ;;  %v7098_v62 = vadd.f32 %v2377_v29, %v2293_v56 }
 0x156   :  { %v14640_v3 = vpop.f32.mrf.mxu0  ;;  %14879 = vmatmul.mubr.msk.bf16.vlgmr.msra.gmra.mxu0 %vm623_vm1, %v15813_v26  ;;  %14889 = vmatmul.mubr.msk.bf16.vlgmr.msra.gmra.mxu1 %vm623_vm1, %v15814_v37  ;;  %v14650_v10 = vpop.f32.mrf.mxu1 }
 0x157   :  { %v7805_v7 = vadd.f32 %v7601_v60, %v7597_v52  ;;  %v7604_v9 = vmax.f32 %v7352_v63, 0.0  ;;  %v7350_v1 = vadd.f32 %v7098_v62, %v16738_v58  ;;  %v7103_v51 = vadd.f32 %v14640_v3, %v14634_v34  ;;  %14882 = vmatprep.mubr.msk.bf16.mxu0 %vm623_vm1, %v15815_v42  ;;  %14892 = vmatprep.mubr.msk.bf16.mxu1 %vm623_vm1, %v15816_v46  ;;  %v15823_v3 = vld [vmem:[%s20351_s1 + $0x590] sm:$0xff]  }
 0x158   :  { %v2474_v14 = vpop.f32.mrf.mxu0  ;;  %14897 = vmatpush3.bf16.msra.mxu0 %v5038_v59  ;;  %v2574_v21 = vpop.f32.mrf.mxu1  ;;  %14907 = vmatpush3.bf16.msra.mxu1 %v5138_v57  ;;  %v15821_v59 = vld [vmem:[%s20351_s1 + $0x588] sm:$0xff]  }
 0x159   :  { %v7808_v15 = vadd.f32 %v7604_v9, %v7600_v2  ;;  %v7602_v16 = vmax.f32 %v7350_v1, 0.0  ;;  %v7355_v17 = vadd.f32 %v7103_v51, %v16704_v40  ;;  %v7101_v18 = vadd.f32 %v2474_v14, %v2390_v39  ;;  %15622 = vmatprep.subr.msk.bf16.mxu0 %vm636_vm0, %v17285_v4  ;;  %15623 = vmatprep.subr.msk.bf16.mxu1 %vm636_vm0, %v17293_v12 }
 0x15a   :  { %v14641_v22 = vpop.f32.mrf.mxu0  ;;  %v14651_v32 = vpop.f32.mrf.mxu1  ;;  %v5238_v9 = vsel %vm636_vm0, %v17285_v4, 0 }
 0x15b   :  { %v7806_v25 = vadd.f32 %v7602_v16, %v7598_v8  ;;  %v7607_v27 = vmax.f32 %v7355_v17, 0.0  ;;  %v7353_v28 = vadd.f32 %v7101_v18, %v16710_v43  ;;  %v7104_v29 = vadd.f32 %v14641_v22, %v14635_v50  ;;  %v75_v17 = vld [vmem:[%s20350_s0 + $0xc0] sm:$0xf] }
 0x15c   :  { %v2477_v34 = vpop.f32.mrf.mxu0  ;;  %v2577_v41 = vpop.f32.mrf.mxu1  ;;  %v5338_v16 = vsel %vm636_vm0, %v17293_v12, 0 }
 0x15d   :  { %v7871_v38 = vadd.f32 %v7807_v55, %v7607_v27  ;;  %v7605_v35 = vmax.f32 %v7353_v28, 0.0  ;;  %v7356_v20 = vadd.f32 %v7104_v29, %v16731_v54  ;;  %v7102_v39 = vadd.f32 %v2477_v34, %v2393_v0  ;;  %v15822_v0 = vld [vmem:[%s20351_s1 + $0x5a8] sm:$0xff]  }
 0x15e   :  { %v14644_v44 = vpop.f32.mrf.mxu0  ;;  %14883 = vmatmul.mubr.msk.bf16.gmra.mxu0 %vm623_vm1, %v15817_v24  ;;  %14893 = vmatmul.mubr.msk.bf16.gmra.mxu1 %vm623_vm1, %v15818_v30  ;;  %v14654_v49 = vpop.f32.mrf.mxu1 }
 0x15f   :  { %v7869_v26 = vadd.f32 %v7805_v7, %v7605_v35  ;;  %v7608_v45 = vmax.f32 %v7356_v20, 0.0  ;;  %v7354_v47 = vadd.f32 %v7102_v39, %v16738_v58  ;;  %v7107_v48 = vadd.f32 %v14650_v10, %v14644_v44  ;;  %14898 = vmatprep.mubr.msk.bf16.mxu0 %vm623_vm1, %v15819_v33  ;;  %14908 = vmatprep.mubr.msk.bf16.mxu1 %vm623_vm1, %v15820_v36  ;;  %v15824_v7 = vld [vmem:[%s20351_s1 + $0x5b0] sm:$0xff]   ;;  %v15825_v33 = vld [vmem:[%s20351_s1 + $0x598] sm:$0xff]   ;;  %v15827_v35 = vld [vmem:[%s20351_s1 + $0x5c0] sm:$0xff]  }
 0x160   :  { %v2490_v37 = vpop.f32.mrf.mxu0  ;;  %v2590_v56 = vpop.f32.mrf.mxu1  ;;  %v15826_v36 = vld [vmem:[%s20351_s1 + $0x5b8] sm:$0xff]  }
 0x161   :  { %v7872_v50 = vadd.f32 %v7808_v15, %v7608_v45  ;;  %v7606_v42 = vmax.f32 %v7354_v47, 0.0  ;;  %v7359_v52 = vadd.f32 %v7107_v48, %v16704_v40  ;;  %v7105_v53 = vadd.f32 %v2574_v21, %v2490_v37 }
 0x162   :  { %v14645_v46 = vpop.f32.mrf.mxu0  ;;  %v14655_v2 = vpop.f32.mrf.mxu1 }
 0x163   :  { %v7870_v55 = vadd.f32 %v7806_v25, %v7606_v42  ;;  %v7611_v60 = vmax.f32 %v7359_v52, 0.0  ;;  %v7357_v63 = vadd.f32 %v7105_v53, %v16710_v43  ;;  %v7108_v62 = vadd.f32 %v14651_v32, %v14645_v46  ;;  %v76_v25 = vld [vmem:[%s20350_s0 + $0xc4] sm:$0xf] }
 0x164   :  { %v2493_v57 = vpop.f32.mrf.mxu0  ;;  %v2593_v14 = vpop.f32.mrf.mxu1 }
 0x165   :  { %v7935_v1 = vadd.f32 %v7871_v38, %v7611_v60  ;;  %v7609_v51 = vmax.f32 %v7357_v63, 0.0  ;;  %v7360_v10 = vadd.f32 %v7108_v62, %v16731_v54  ;;  %v7106_v8 = vadd.f32 %v2577_v41, %v2493_v57  ;;  %v15828_v41 = vld [vmem:[%s20351_s1 + $0x5e0] sm:$0xff]   ;;  %v15829_v60 = vld [vmem:[%s20351_s1 + $0x5c8] sm:$0xff]  }
 0x166   :  { %v14660_v15 = vpop.f32.mrf.mxu0  ;;  %14899 = vmatmul.mubr.msk.bf16.vlgmr.msra.gmra.mxu0 %vm623_vm1, %v15821_v59  ;;  %14909 = vmatmul.mubr.msk.bf16.vlgmr.msra.gmra.mxu1 %vm623_vm1, %v15822_v0  ;;  %v14670_v24 = vpop.f32.mrf.mxu1 }
 0x167   :  { %v7933_v18 = vadd.f32 %v7869_v26, %v7609_v51  ;;  %v7612_v21 = vmax.f32 %v7360_v10, 0.0  ;;  %v7358_v4 = vadd.f32 %v7106_v8, %v16738_v58  ;;  %v7111_v22 = vadd.f32 %v14660_v15, %v14654_v49  ;;  %14902 = vmatprep.mubr.msk.bf16.mxu0 %vm623_vm1, %v15823_v3  ;;  %14912 = vmatprep.mubr.msk.bf16.mxu1 %vm623_vm1, %v15824_v7  ;;  %v15830_v3 = vld [vmem:[%s20351_s1 + $0x5e8] sm:$0xff]   ;;  %v15831_v7 = vld [vmem:[%s20351_s1 + $0x5d0] sm:$0xff]  }
 0x168   :  { %v2674_v27 = vpop.f32.mrf.mxu0  ;;  %14917 = vmatpush3.bf16.msra.mxu0 %v5238_v9  ;;  %v2774_v30 = vpop.f32.mrf.mxu1  ;;  %14927 = vmatpush3.bf16.msra.mxu1 %v5338_v16  ;;  %v15832_v10 = vld [vmem:[%s20351_s1 + $0x5f0] sm:$0xff]   ;;  %v5438_v8 = vsel %vm636_vm0, %v75_v17, 0 }
 0x169   :  { %v7936_v12 = vadd.f32 %v7872_v50, %v7612_v21  ;;  %v7610_v28 = vmax.f32 %v7358_v4, 0.0  ;;  %v7109_v29 = vadd.f32 %v2674_v27, %v2590_v56  ;;  %15624 = vmatprep.subr.msk.bf16.mxu0 %vm636_vm0, %v75_v17  ;;  %15625 = vmatprep.subr.msk.bf16.mxu1 %vm636_vm0, %v76_v25  ;;  %v7363_v49 = vadd.f32 %v7111_v22, %v16704_v40  ;;  %v17397_v27 = vld [vmem:[%s20350_s0 + $0xc8] sm:$0xf] }
 0x16a   :  { %v14661_v32 = vpop.f32.mrf.mxu0  ;;  %v14671_v38 = vpop.f32.mrf.mxu1 }
 0x16b   :  { %v7112_v34 = vadd.f32 %v14661_v32, %v14655_v2  ;;  %v17361_v20 = vpack.c.bf16 %v7936_v12, %v7935_v1  ;;  %v7934_v44 = vadd.f32 %v7870_v55, %v7610_v28  ;;  %v7361_v42 = vadd.f32 %v7109_v29, %v16710_v43  ;;  %v78_v32 = vld [vmem:[%s20350_s0 + $0xcc] sm:$0xf] }
 0x16c   :  { %v2677_v39 = vpop.f32.mrf.mxu0  ;;  %v2777_v45 = vpop.f32.mrf.mxu1  ;;  %v7615_v63 = vmax.f32 %v7363_v49, 0.0 }
 0x16d   :  { %v7110_v26 = vadd.f32 %v2677_v39, %v2593_v14  ;;  %v17367_v48 = vpack.c.bf16 %v7934_v44, %v7933_v18  ;;  %v7364_v59 = vadd.f32 %v7112_v34, %v16731_v54  ;;  %v7613_v9 = vmax.f32 %v7361_v42, 0.0  ;;  %v15833_v44 = vld [vmem:[%s20351_s1 + $0x5d8] sm:$0xff]   ;;  %v15835_v42 = vld [vmem:[%s20351_s1 + $0x600] sm:$0xff]  }
 0x16e   :  { %v14664_v47 = vpop.f32.mrf.mxu0  ;;  %14903 = vmatmul.mubr.msk.bf16.gmra.mxu0 %vm623_vm1, %v15825_v33  ;;  %14913 = vmatmul.mubr.msk.bf16.gmra.mxu1 %vm623_vm1, %v15826_v36  ;;  %v14674_v50 = vpop.f32.mrf.mxu1 }
 0x16f   :  { %v7115_v37 = vadd.f32 %v14670_v24, %v14664_v47  ;;  %14918 = vmatprep.mubr.msk.bf16.mxu0 %vm623_vm1, %v15827_v35  ;;  %14928 = vmatprep.mubr.msk.bf16.mxu1 %vm623_vm1, %v15828_v41  ;;  %v7362_v1 = vadd.f32 %v7110_v26, %v16738_v58  ;;  %v7616_v4 = vmax.f32 %v7364_v59, 0.0  ;;  %v5538_v24 = vsel %vm636_vm0, %v76_v25, 0 }
 0x170   :  { %v2690_v52 = vpop.f32.mrf.mxu0  ;;  %v2790_v46 = vpop.f32.mrf.mxu1 }
 0x171   :  { %v7367_v53 = vadd.f32 %v7115_v37, %v16704_v40  ;;  %v7113_v56 = vadd.f32 %v2774_v30, %v2690_v52  ;;  %v7614_v25 = vmax.f32 %v7362_v1, 0.0  ;;  %v15834_v37 = vld [vmem:[%s20351_s1 + $0x5f8] sm:$0xff]  }
 0x172   :  { %v14665_v55 = vpop.f32.mrf.mxu0  ;;  %v14675_v57 = vpop.f32.mrf.mxu1 }
 0x173   :  { %v7619_v62 = vmax.f32 %v7367_v53, 0.0  ;;  %v7365_v0 = vadd.f32 %v7113_v56, %v16710_v43  ;;  %v7116_v2 = vadd.f32 %v14671_v38, %v14665_v55  ;;  %v15836_v53 = vld [vmem:[%s20351_s1 + $0x620] sm:$0xff]  }
 0x174   :  { %v2693_v51 = vpop.f32.mrf.mxu0  ;;  %v2793_v21 = vpop.f32.mrf.mxu1 }
 0x175   :  { %v7811_v14 = vadd.f32 %v7619_v62, %v7615_v63  ;;  %v7617_v15 = vmax.f32 %v7365_v0, 0.0  ;;  %v7368_v16 = vadd.f32 %v7116_v2, %v16731_v54  ;;  %v7114_v18 = vadd.f32 %v2777_v45, %v2693_v51 }
 0x176   :  { %v14680_v22 = vpop.f32.mrf.mxu0  ;;  %14919 = vmatmul.mubr.msk.bf16.vlgmr.msra.gmra.mxu0 %vm623_vm1, %v15829_v60  ;;  %14929 = vmatmul.mubr.msk.bf16.vlgmr.msra.gmra.mxu1 %vm623_vm1, %v15830_v3  ;;  %v14690_v30 = vpop.f32.mrf.mxu1 }
 0x177   :  { %v7809_v12 = vadd.f32 %v7617_v15, %v7613_v9  ;;  %v7620_v28 = vmax.f32 %v7368_v16, 0.0  ;;  %v7366_v17 = vadd.f32 %v7114_v18, %v16738_v58  ;;  %v7119_v29 = vadd.f32 %v14680_v22, %v14674_v50  ;;  %14922 = vmatprep.mubr.msk.bf16.mxu0 %vm623_vm1, %v15831_v7  ;;  %14932 = vmatprep.mubr.msk.bf16.mxu1 %vm623_vm1, %v15832_v10  ;;  %v15837_v15 = vld [vmem:[%s20351_s1 + $0x608] sm:$0xff]  }
 0x178   :  { %v2874_v33 = vpop.f32.mrf.mxu0  ;;  %14937 = vmatpush3.bf16.msra.mxu0 %v5438_v8  ;;  %v2974_v39 = vpop.f32.mrf.mxu1  ;;  %14947 = vmatpush3.bf16.msra.mxu1 %v5538_v24  ;;  %v15838_v22 = vld [vmem:[%s20351_s1 + $0x628] sm:$0xff]  }
 0x179   :  { %v7812_v34 = vadd.f32 %v7620_v28, %v7616_v4  ;;  %v7618_v36 = vmax.f32 %v7366_v17, 0.0  ;;  %v7371_v38 = vadd.f32 %v7119_v29, %v16704_v40  ;;  %v7117_v35 = vadd.f32 %v2874_v33, %v2790_v46  ;;  %15626 = vmatprep.subr.msk.bf16.mxu0 %vm636_vm0, %v17397_v27  ;;  %15627 = vmatprep.subr.msk.bf16.mxu1 %vm636_vm0, %v78_v32  ;;  %v15840_v17 = vld [vmem:[%s20351_s1 + $0x630] sm:$0xff]  }
 0x17a   :  { %v14681_v41 = vpop.f32.mrf.mxu0  ;;  %v14691_v50 = vpop.f32.mrf.mxu1  ;;  %v5638_v29 = vsel %vm636_vm0, %v17397_v27, 0 }
 0x17b   :  { %v7810_v26 = vadd.f32 %v7618_v36, %v7614_v25  ;;  %v7623_v45 = vmax.f32 %v7371_v38, 0.0  ;;  %v7369_v47 = vadd.f32 %v7117_v35, %v16710_v43  ;;  %v7120_v49 = vadd.f32 %v14681_v41, %v14675_v57  ;;  %v79_v25 = vld [vmem:[%s20350_s0 + $0xd0] sm:$0xf]  ;;  %v80_v41 = vld [vmem:[%s20350_s0 + $0xd4] sm:$0xf] }
 0x17c   :  { %v2877_v52 = vpop.f32.mrf.mxu0  ;;  %v2977_v60 = vpop.f32.mrf.mxu1 }
 0x17d   :  { %v7875_v56 = vadd.f32 %v7811_v14, %v7623_v45  ;;  %v7621_v46 = vmax.f32 %v7369_v47, 0.0  ;;  %v7372_v59 = vadd.f32 %v7120_v49, %v16731_v54  ;;  %v7118_v55 = vadd.f32 %v2877_v52, %v2793_v21  ;;  %v15841_v49 = vld [vmem:[%s20351_s1 + $0x618] sm:$0xff]  }
 0x17e   :  { %v14684_v63 = vpop.f32.mrf.mxu0  ;;  %14923 = vmatmul.mubr.msk.bf16.gmra.mxu0 %vm623_vm1, %v15833_v44  ;;  %14933 = vmatmul.mubr.msk.bf16.gmra.mxu1 %vm623_vm1, %v15834_v37  ;;  %v14694_v57 = vpop.f32.mrf.mxu1  ;;  %v15842_v52 = vld [vmem:[%s20351_s1 + $0x638] sm:$0xff]  }
 0x17f   :  { %v7873_v62 = vadd.f32 %v7809_v12, %v7621_v46  ;;  %v7624_v0 = vmax.f32 %v7372_v59, 0.0  ;;  %v7370_v2 = vadd.f32 %v7118_v55, %v16738_v58  ;;  %v7123_v3 = vadd.f32 %v14690_v30, %v14684_v63  ;;  %14938 = vmatprep.mubr.msk.bf16.mxu0 %vm623_vm1, %v15835_v42  ;;  %14948 = vmatprep.mubr.msk.bf16.mxu1 %vm623_vm1, %v15836_v53  ;;  %v15839_v12 = vld [vmem:[%s20351_s1 + $0x610] sm:$0xff]  }
 0x180   :  { %v2890_v7 = vpop.f32.mrf.mxu0  ;;  %v2990_v8 = vpop.f32.mrf.mxu1  ;;  %v5738_v30 = vsel %vm636_vm0, %v78_v32, 0 }
 0x181   :  { %v7876_v9 = vadd.f32 %v7812_v34, %v7624_v0  ;;  %v7622_v1 = vmax.f32 %v7370_v2, 0.0  ;;  %v7375_v51 = vadd.f32 %v7123_v3, %v16704_v40  ;;  %v7121_v10 = vadd.f32 %v2974_v39, %v2890_v7 }
 0x182   :  { %v14685_v14 = vpop.f32.mrf.mxu0  ;;  %v14695_v24 = vpop.f32.mrf.mxu1 }
 0x183   :  { %v7874_v16 = vadd.f32 %v7810_v26, %v7622_v1  ;;  %v7627_v18 = vmax.f32 %v7375_v51, 0.0  ;;  %v7373_v21 = vadd.f32 %v7121_v10, %v16710_v43  ;;  %v7124_v4 = vadd.f32 %v14691_v50, %v14685_v14 }
 0x184   :  { %v2893_v28 = vpop.f32.mrf.mxu0  ;;  %v2993_v35 = vpop.f32.mrf.mxu1 }
 0x185   :  { %v7939_v33 = vadd.f32 %v7875_v56, %v7627_v18  ;;  %v7625_v34 = vmax.f32 %v7373_v21, 0.0  ;;  %v7376_v36 = vadd.f32 %v7124_v4, %v16731_v54  ;;  %v7122_v38 = vadd.f32 %v2977_v60, %v2893_v28  ;;  %v15843_v56 = vld [vmem:[%s20351_s1 + $0x640] sm:$0xff]   ;;  %v15846_v4 = vld [vmem:[%s20351_s1 + $0x668] sm:$0xff]  }
 0x186   :  { %v14700_v39 = vpop.f32.mrf.mxu0  ;;  %14939 = vmatmul.mubr.msk.bf16.vlgmr.msra.gmra.mxu0 %vm623_vm1, %v15837_v15  ;;  %14949 = vmatmul.mubr.msk.bf16.vlgmr.msra.gmra.mxu1 %vm623_vm1, %v15838_v22  ;;  %v14710_v45 = vpop.f32.mrf.mxu1  ;;  %v15844_v60 = vld [vmem:[%s20351_s1 + $0x660] sm:$0xff]   ;;  %v15845_v15 = vld [vmem:[%s20351_s1 + $0x648] sm:$0xff]  }
 0x187   :  { %v7937_v27 = vadd.f32 %v7873_v62, %v7625_v34  ;;  %v7628_v44 = vmax.f32 %v7376_v36, 0.0  ;;  %v7374_v32 = vadd.f32 %v7122_v38, %v16738_v58  ;;  %v7127_v26 = vadd.f32 %v14700_v39, %v14694_v57  ;;  %14942 = vmatprep.mubr.msk.bf16.mxu0 %vm623_vm1, %v15839_v12  ;;  %14952 = vmatprep.mubr.msk.bf16.mxu1 %vm623_vm1, %v15840_v17 }
 0x188   :  { %v3074_v47 = vpop.f32.mrf.mxu0  ;;  %14957 = vmatpush3.bf16.msra.mxu0 %v5638_v29  ;;  %v3174_v53 = vpop.f32.mrf.mxu1  ;;  %14967 = vmatpush3.bf16.msra.mxu1 %v5738_v30  ;;  %v5938_v12 = vsel %vm636_vm0, %v80_v41, 0  ;;  %v15848_v30 = vld [vmem:[%s20351_s1 + $0x670] sm:$0xff]  }
 0x189   :  { %v7940_v37 = vadd.f32 %v7876_v9, %v7628_v44  ;;  %v7626_v50 = vmax.f32 %v7374_v32, 0.0  ;;  %v7125_v42 = vadd.f32 %v3074_v47, %v2990_v8  ;;  %15628 = vmatprep.subr.msk.bf16.mxu0 %vm636_vm0, %v79_v25  ;;  %15629 = vmatprep.subr.msk.bf16.mxu1 %vm636_vm0, %v80_v41  ;;  %v7379_v2 = vadd.f32 %v7127_v26, %v16704_v40  ;;  %v81_v26 = vld [vmem:[%s20350_s0 + $0xd8] sm:$0xf] }
 0x18a   :  { %v14701_v46 = vpop.f32.mrf.mxu0  ;;  %v14711_v55 = vpop.f32.mrf.mxu1  ;;  %v5838_v8 = vsel %vm636_vm0, %v79_v25, 0 }
 0x18b   :  { %v7128_v59 = vadd.f32 %v14701_v46, %v14695_v24  ;;  %v17472_v63 = vpack.c.bf16 %v7940_v37, %v7939_v33  ;;  %v7938_v0 = vadd.f32 %v7874_v16, %v7626_v50  ;;  %v7377_v1 = vadd.f32 %v7125_v42, %v16710_v43  ;;  %v15847_v24 = vld [vmem:[%s20351_s1 + $0x650] sm:$0xff]   ;;  %v82_v37 = vld [vmem:[%s20350_s0 + $0xdc] sm:$0xf] }
 0x18c   :  { %v3077_v62 = vpop.f32.mrf.mxu0  ;;  %v3177_v57 = vpop.f32.mrf.mxu1  ;;  %v7631_v16 = vmax.f32 %v7379_v2, 0.0  ;;  %v15850_v2 = vld [vmem:[%s20351_s1 + $0x678] sm:$0xff]  }
 0x18d   :  { %v7126_v3 = vadd.f32 %v3077_v62, %v2993_v35  ;;  %v17476_v9 = vpack.c.bf16 %v7938_v0, %v7937_v27  ;;  %v7380_v28 = vadd.f32 %v7128_v59, %v16731_v54  ;;  %v7629_v25 = vmax.f32 %v7377_v1, 0.0  ;;  %v15849_v59 = vld [vmem:[%s20351_s1 + $0x658] sm:$0xff]  }
 0x18e   :  { %v14704_v7 = vpop.f32.mrf.mxu0  ;;  %14943 = vmatmul.mubr.msk.bf16.gmra.mxu0 %vm623_vm1, %v15841_v49  ;;  %14953 = vmatmul.mubr.msk.bf16.gmra.mxu1 %vm623_vm1, %v15842_v52  ;;  %v14714_v10 = vpop.f32.mrf.mxu1 }
 0x18f   :  { %v7131_v51 = vadd.f32 %v14710_v45, %v14704_v7  ;;  %14958 = vmatprep.mubr.msk.bf16.mxu0 %vm623_vm1, %v15843_v56  ;;  %14968 = vmatprep.mubr.msk.bf16.mxu1 %vm623_vm1, %v15844_v60  ;;  %v7378_v17 = vadd.f32 %v7126_v3, %v16738_v58  ;;  %v7632_v45 = vmax.f32 %v7380_v28, 0.0  ;;  %v6038_v28 = vsel %vm636_vm0, %v81_v26, 0 }
 0x190   :  { %v3090_v14 = vpop.f32.mrf.mxu0  ;;  %v3190_v22 = vpop.f32.mrf.mxu1 }
 0x191   :  { %v7383_v18 = vadd.f32 %v7131_v51, %v16704_v40  ;;  %v7129_v21 = vadd.f32 %v3174_v53, %v3090_v14  ;;  %v7630_v47 = vmax.f32 %v7378_v17, 0.0  ;;  %v6138_v17 = vsel %vm636_vm0, %v82_v37, 0 }
 0x192   :  { %v14705_v29 = vpop.f32.mrf.mxu0  ;;  %v14715_v38 = vpop.f32.mrf.mxu1 }
 0x193   :  { %v7635_v33 = vmax.f32 %v7383_v18, 0.0  ;;  %v7381_v34 = vadd.f32 %v7129_v21, %v16710_v43  ;;  %v7132_v36 = vadd.f32 %v14711_v55, %v14705_v29 }
 0x194   :  { %v3093_v35 = vpop.f32.mrf.mxu0  ;;  %v3193_v32 = vpop.f32.mrf.mxu1 }
 0x195   :  { %v7815_v39 = vadd.f32 %v7635_v33, %v7631_v16  ;;  %v7633_v27 = vmax.f32 %v7381_v34, 0.0  ;;  %v7384_v41 = vadd.f32 %v7132_v36, %v16731_v54  ;;  %v7130_v44 = vadd.f32 %v3177_v57, %v3093_v35  ;;  %v15851_v57 = vld [vmem:[%s20351_s1 + $0x680] sm:$0xff]  }
 0x196   :  { %v14720_v49 = vpop.f32.mrf.mxu0  ;;  %14959 = vmatmul.mubr.msk.bf16.vlgmr.msra.gmra.mxu0 %vm623_vm1, %v15845_v15  ;;  %14969 = vmatmul.mubr.msk.bf16.vlgmr.msra.gmra.mxu1 %vm623_vm1, %v15846_v4  ;;  %v14730_v56 = vpop.f32.mrf.mxu1  ;;  %v15852_v15 = vld [vmem:[%s20351_s1 + $0x6a0] sm:$0xff]  }
 0x197   :  { %v7813_v50 = vadd.f32 %v7633_v27, %v7629_v25  ;;  %v7636_v42 = vmax.f32 %v7384_v41, 0.0  ;;  %v7382_v52 = vadd.f32 %v7130_v44, %v16738_v58  ;;  %v7135_v53 = vadd.f32 %v14720_v49, %v14714_v10  ;;  %14962 = vmatprep.mubr.msk.bf16.mxu0 %vm623_vm1, %v15847_v24  ;;  %14972 = vmatprep.mubr.msk.bf16.mxu1 %vm623_vm1, %v15848_v30  ;;  %v15854_v44 = vld [vmem:[%s20351_s1 + $0x6a8] sm:$0xff]  }
 0x198   :  { %v3274_v46 = vpop.f32.mrf.mxu0  ;;  %14977 = vmatpush3.bf16.msra.mxu0 %v5838_v8  ;;  %v3374_v3 = vpop.f32.mrf.mxu1  ;;  %14987 = vmatpush3.bf16.msra.mxu1 %v5938_v12 }
 0x199   :  { %v7816_v55 = vadd.f32 %v7636_v42, %v7632_v45  ;;  %v7634_v60 = vmax.f32 %v7382_v52, 0.0  ;;  %v7387_v62 = vadd.f32 %v7135_v53, %v16704_v40  ;;  %v7133_v0 = vadd.f32 %v3274_v46, %v3190_v22  ;;  %15630 = vmatprep.subr.msk.bf16.mxu0 %vm636_vm0, %v81_v26  ;;  %15631 = vmatprep.subr.msk.bf16.mxu1 %vm636_vm0, %v82_v37  ;;  %v15855_v26 = vld [vmem:[%s20351_s1 + $0x690] sm:$0xff]  }
 0x19a   :  { %v14721_v7 = vpop.f32.mrf.mxu0  ;;  %v14731_v14 = vpop.f32.mrf.mxu1  ;;  %v15856_v52 = vld [vmem:[%s20351_s1 + $0x6b0] sm:$0xff]  }
 0x19b   :  { %v7814_v1 = vadd.f32 %v7634_v60, %v7630_v47  ;;  %v7639_v51 = vmax.f32 %v7387_v62, 0.0  ;;  %v7385_v10 = vadd.f32 %v7133_v0, %v16710_v43  ;;  %v7136_v8 = vadd.f32 %v14721_v7, %v14715_v38  ;;  %v15853_v38 = vld [vmem:[%s20351_s1 + $0x688] sm:$0xff]   ;;  %v83_v0 = vld [vmem:[%s20350_s0 + $0xe0] sm:$0xf] }
 0x19c   :  { %v3277_v16 = vpop.f32.mrf.mxu0  ;;  %v3377_v24 = vpop.f32.mrf.mxu1 }
 0x19d   :  { %v7879_v18 = vadd.f32 %v7815_v39, %v7639_v51  ;;  %v7637_v21 = vmax.f32 %v7385_v10, 0.0  ;;  %v7388_v4 = vadd.f32 %v7136_v8, %v16731_v54  ;;  %v7134_v22 = vadd.f32 %v3277_v16, %v3193_v32  ;;  %v15857_v8 = vld [vmem:[%s20351_s1 + $0x698] sm:$0xff]  }
 0x19e   :  { %v14724_v12 = vpop.f32.mrf.mxu0  ;;  %14963 = vmatmul.mubr.msk.bf16.gmra.mxu0 %vm623_vm1, %v15849_v59  ;;  %14973 = vmatmul.mubr.msk.bf16.gmra.mxu1 %vm623_vm1, %v15850_v2  ;;  %v14734_v34 = vpop.f32.mrf.mxu1  ;;  %v84_v2 = vld [vmem:[%s20350_s0 + $0xe4] sm:$0xf] }
 0x19f   :  { %v7877_v29 = vadd.f32 %v7813_v50, %v7637_v21  ;;  %v7640_v30 = vmax.f32 %v7388_v4, 0.0  ;;  %v7386_v25 = vadd.f32 %v7134_v22, %v16738_v58  ;;  %v7139_v33 = vadd.f32 %v14730_v56, %v14724_v12  ;;  %14978 = vmatprep.mubr.msk.bf16.mxu0 %vm623_vm1, %v15851_v57  ;;  %14988 = vmatprep.mubr.msk.bf16.mxu1 %vm623_vm1, %v15852_v15  ;;  %v15859_v4 = vld [vmem:[%s20351_s1 + $0x6c0] sm:$0xff]  }
 0x1a0   :  { %v3290_v36 = vpop.f32.mrf.mxu0  ;;  %v3390_v32 = vpop.f32.mrf.mxu1 }
 0x1a1   :  { %v7880_v35 = vadd.f32 %v7816_v55, %v7640_v30  ;;  %v7638_v39 = vmax.f32 %v7386_v25, 0.0  ;;  %v7391_v27 = vadd.f32 %v7139_v33, %v16704_v40  ;;  %v7137_v41 = vadd.f32 %v3374_v3, %v3290_v36 }
 0x1a2   :  { %v14725_v45 = vpop.f32.mrf.mxu0  ;;  %v14735_v42 = vpop.f32.mrf.mxu1 }
 0x1a3   :  { %v7878_v47 = vadd.f32 %v7814_v1, %v7638_v39  ;;  %v7643_v49 = vmax.f32 %v7391_v27, 0.0  ;;  %v7389_v37 = vadd.f32 %v7137_v41, %v16710_v43  ;;  %v7140_v50 = vadd.f32 %v14731_v14, %v14725_v45 }
 0x1a4   :  { %v3293_v53 = vpop.f32.mrf.mxu0  ;;  %v3393_v60 = vpop.f32.mrf.mxu1  ;;  %v6238_v41 = vsel %vm636_vm0, %v83_v0, 0 }
 0x1a5   :  { %v7943_v56 = vadd.f32 %v7879_v18, %v7643_v49  ;;  %v7641_v46 = vmax.f32 %v7389_v37, 0.0  ;;  %v7392_v59 = vadd.f32 %v7140_v50, %v16731_v54  ;;  %v7138_v55 = vadd.f32 %v3377_v24, %v3293_v53  ;;  %v15858_v18 = vld [vmem:[%s20351_s1 + $0x6b8] sm:$0xff]   ;;  %v15862_v49 = vld [vmem:[%s20351_s1 + $0x6e8] sm:$0xff]   ;;  %v15863_v50 = vld [vmem:[%s20351_s1 + $0x6d0] sm:$0xff]  }
 0x1a6   :  { %v14740_v62 = vpop.f32.mrf.mxu0  ;;  %14979 = vmatmul.mubr.msk.bf16.vlgmr.msra.gmra.mxu0 %vm623_vm1, %v15853_v38  ;;  %14989 = vmatmul.mubr.msk.bf16.vlgmr.msra.gmra.mxu1 %vm623_vm1, %v15854_v44  ;;  %v14750_v51 = vpop.f32.mrf.mxu1 }
 0x1a7   :  { %v7941_v3 = vadd.f32 %v7877_v29, %v7641_v46  ;;  %v7644_v57 = vmax.f32 %v7392_v59, 0.0  ;;  %v7390_v7 = vadd.f32 %v7138_v55, %v16738_v58  ;;  %v7143_v1 = vadd.f32 %v14740_v62, %v14734_v34  ;;  %14982 = vmatprep.mubr.msk.bf16.mxu0 %vm623_vm1, %v15855_v26  ;;  %14992 = vmatprep.mubr.msk.bf16.mxu1 %vm623_vm1, %v15856_v52  ;;  %v15864_v46 = vld [vmem:[%s20351_s1 + $0x6f0] sm:$0xff]  }
 0x1a8   :  { %v3474_v10 = vpop.f32.mrf.mxu0  ;;  %14997 = vmatpush3.bf16.msra.mxu0 %v6038_v28  ;;  %v3574_v21 = vpop.f32.mrf.mxu1  ;;  %15007 = vmatpush3.bf16.msra.mxu1 %v6138_v17  ;;  %v15860_v28 = vld [vmem:[%s20351_s1 + $0x6e0] sm:$0xff]  }
 0x1a9   :  { %v7944_v14 = vadd.f32 %v7880_v35, %v7644_v57  ;;  %v7642_v15 = vmax.f32 %v7390_v7, 0.0  ;;  %v7141_v16 = vadd.f32 %v3474_v10, %v3390_v32  ;;  %15632 = vmatprep.subr.msk.bf16.mxu0 %vm636_vm0, %v83_v0  ;;  %15633 = vmatprep.subr.msk.bf16.mxu1 %vm636_vm0, %v84_v2  ;;  %v7395_v17 = vadd.f32 %v7143_v1, %v16704_v40  ;;  %v15861_v32 = vld [vmem:[%s20351_s1 + $0x6c8] sm:$0xff]  }
 0x1aa   :  { %v14741_v22 = vpop.f32.mrf.mxu0  ;;  %v14751_v12 = vpop.f32.mrf.mxu1  ;;  %v85_v10 = vld [vmem:[%s20350_s0 + $0xe8] sm:$0xf] }
 0x1ab   :  { %v7144_v24 = vadd.f32 %v14741_v22, %v14735_v42  ;;  %v17576_v29 = vpack.c.bf16 %v7944_v14, %v7943_v56  ;;  %v7942_v25 = vadd.f32 %v7878_v47, %v7642_v15  ;;  %v7393_v35 = vadd.f32 %v7141_v16, %v16710_v43  ;;  %v86_v16 = vld [vmem:[%s20350_s0 + $0xec] sm:$0xf] }
 0x1ac   :  { %v3477_v30 = vpop.f32.mrf.mxu0  ;;  %v3577_v34 = vpop.f32.mrf.mxu1  ;;  %v7647_v26 = vmax.f32 %v7395_v17, 0.0  ;;  %v6338_v42 = vsel %vm636_vm0, %v84_v2, 0 }
 0x1ad   :  { %v7142_v33 = vadd.f32 %v3477_v30, %v3393_v60  ;;  %v17580_v38 = vpack.c.bf16 %v7942_v25, %v7941_v3  ;;  %v7396_v52 = vadd.f32 %v7144_v24, %v16731_v54  ;;  %v7645_v59 = vmax.f32 %v7393_v35, 0.0  ;;  %v15867_v35 = vld [vmem:[%s20351_s1 + $0x700] sm:$0xff]  }
 0x1ae   :  { %v14744_v36 = vpop.f32.mrf.mxu0  ;;  %14983 = vmatmul.mubr.msk.bf16.gmra.mxu0 %vm623_vm1, %v15857_v8  ;;  %14993 = vmatmul.mubr.msk.bf16.gmra.mxu1 %vm623_vm1, %v15858_v18  ;;  %v14754_v27 = vpop.f32.mrf.mxu1 }
 0x1af   :  { %v7147_v39 = vadd.f32 %v14750_v51, %v14744_v36  ;;  %14998 = vmatprep.mubr.msk.bf16.mxu0 %vm623_vm1, %v15859_v4  ;;  %15008 = vmatprep.mubr.msk.bf16.mxu1 %vm623_vm1, %v15860_v28  ;;  %v7394_v53 = vadd.f32 %v7142_v33, %v16738_v58  ;;  %v7648_v8 = vmax.f32 %v7396_v52, 0.0  ;;  %v15865_v28 = vld [vmem:[%s20351_s1 + $0x6d8] sm:$0xff]  }
 0x1b0   :  { %v3490_v44 = vpop.f32.mrf.mxu0  ;;  %v3590_v37 = vpop.f32.mrf.mxu1 }
 0x1b1   :  { %v7399_v45 = vadd.f32 %v7147_v39, %v16704_v40  ;;  %v7145_v47 = vadd.f32 %v3574_v21, %v3490_v44  ;;  %v7646_v14 = vmax.f32 %v7394_v53, 0.0 }
 0x1b2   :  { %v14745_v56 = vpop.f32.mrf.mxu0  ;;  %v14755_v0 = vpop.f32.mrf.mxu1 }
 0x1b3   :  { %v7651_v55 = vmax.f32 %v7399_v45, 0.0  ;;  %v7397_v60 = vadd.f32 %v7145_v47, %v16710_v43  ;;  %v7148_v62 = vadd.f32 %v14751_v12, %v14745_v56  ;;  %v15868_v45 = vld [vmem:[%s20351_s1 + $0x720] sm:$0xff]   ;;  %v6438_v56 = vsel %vm636_vm0, %v85_v10, 0 }
 0x1b4   :  { %v3493_v3 = vpop.f32.mrf.mxu0  ;;  %v3593_v51 = vpop.f32.mrf.mxu1 }
 0x1b5   :  { %v7819_v57 = vadd.f32 %v7651_v55, %v7647_v26  ;;  %v7649_v7 = vmax.f32 %v7397_v60, 0.0  ;;  %v7400_v2 = vadd.f32 %v7148_v62, %v16731_v54  ;;  %v7146_v1 = vadd.f32 %v3577_v34, %v3493_v3  ;;  %v15866_v34 = vld [vmem:[%s20351_s1 + $0x6f8] sm:$0xff]  }
 0x1b6   :  { %v14760_v15 = vpop.f32.mrf.mxu0  ;;  %14999 = vmatmul.mubr.msk.bf16.vlgmr.msra.gmra.mxu0 %vm623_vm1, %v15861_v32  ;;  %15009 = vmatmul.mubr.msk.bf16.vlgmr.msra.gmra.mxu1 %vm623_vm1, %v15862_v49  ;;  %v14770_v24 = vpop.f32.mrf.mxu1 }
 0x1b7   :  { %v7817_v18 = vadd.f32 %v7649_v7, %v7645_v59  ;;  %v7652_v21 = vmax.f32 %v7400_v2, 0.0  ;;  %v7398_v4 = vadd.f32 %v7146_v1, %v16738_v58  ;;  %v7151_v22 = vadd.f32 %v14760_v15, %v14754_v27  ;;  %15002 = vmatprep.mubr.msk.bf16.mxu0 %vm623_vm1, %v15863_v50  ;;  %15012 = vmatprep.mubr.msk.bf16.mxu1 %vm623_vm1, %v15864_v46 }
 0x1b8   :  { %v3674_v12 = vpop.f32.mrf.mxu0  ;;  %15017 = vmatpush3.bf16.msra.mxu0 %v6238_v41  ;;  %v3774_v36 = vpop.f32.mrf.mxu1  ;;  %15027 = vmatpush3.bf16.msra.mxu1 %v6338_v42  ;;  %v6538_v46 = vsel %vm636_vm0, %v86_v16, 0 }
 0x1b9   :  { %v7820_v30 = vadd.f32 %v7652_v21, %v7648_v8  ;;  %v7650_v25 = vmax.f32 %v7398_v4, 0.0  ;;  %v7403_v17 = vadd.f32 %v7151_v22, %v16704_v40  ;;  %v7149_v33 = vadd.f32 %v3674_v12, %v3590_v37  ;;  %15634 = vmatprep.subr.msk.bf16.mxu0 %vm636_vm0, %v85_v10  ;;  %15635 = vmatprep.subr.msk.bf16.mxu1 %vm636_vm0, %v86_v16  ;;  %v15870_v10 = vld [vmem:[%s20351_s1 + $0x728] sm:$0xff]  }
 0x1ba   :  { %v14761_v39 = vpop.f32.mrf.mxu0  ;;  %v14771_v26 = vpop.f32.mrf.mxu1 }
 0x1bb   :  { %v7818_v27 = vadd.f32 %v7650_v25, %v7646_v14  ;;  %v7655_v41 = vmax.f32 %v7403_v17, 0.0  ;;  %v7401_v44 = vadd.f32 %v7149_v33, %v16710_v43  ;;  %v7152_v32 = vadd.f32 %v14761_v39, %v14755_v0  ;;  %v15871_v14 = vld [vmem:[%s20351_s1 + $0x710] sm:$0xff]  }
 0x1bc   :  { %v3677_v47 = vpop.f32.mrf.mxu0  ;;  %v3777_v52 = vpop.f32.mrf.mxu1 }
 0x1bd   :  { %v7883_v49 = vadd.f32 %v7819_v57, %v7655_v41  ;;  %v7653_v37 = vmax.f32 %v7401_v44, 0.0  ;;  %v7404_v50 = vadd.f32 %v7152_v32, %v16731_v54  ;;  %v7150_v42 = vadd.f32 %v3677_v47, %v3593_v51  ;;  %v15869_v57 = vld [vmem:[%s20351_s1 + $0x708] sm:$0xff]  }
 0x1be   :  { %v14764_v53 = vpop.f32.mrf.mxu0  ;;  %15003 = vmatmul.mubr.msk.bf16.gmra.mxu0 %vm623_vm1, %v15865_v28  ;;  %15013 = vmatmul.mubr.msk.bf16.gmra.mxu1 %vm623_vm1, %v15866_v34  ;;  %v14774_v0 = vpop.f32.mrf.mxu1 }
 0x1bf   :  { %v7881_v59 = vadd.f32 %v7817_v18, %v7653_v37  ;;  %v7656_v55 = vmax.f32 %v7404_v50, 0.0  ;;  %v7402_v60 = vadd.f32 %v7150_v42, %v16738_v58  ;;  %v7155_v62 = vadd.f32 %v14770_v24, %v14764_v53  ;;  %15018 = vmatprep.mubr.msk.bf16.mxu0 %vm623_vm1, %v15867_v35  ;;  %15028 = vmatprep.mubr.msk.bf16.mxu1 %vm623_vm1, %v15868_v45  ;;  %v15872_v24 = vld [vmem:[%s20351_s1 + $0x730] sm:$0xff]   ;;  %v15873_v45 = vld [vmem:[%s20351_s1 + $0x718] sm:$0xff]  }
 0x1c0   :  { %v3690_v3 = vpop.f32.mrf.mxu0  ;;  %v3790_v8 = vpop.f32.mrf.mxu1  ;;  %v88_v35 = vld [vmem:[%s20350_s0 + $0xf4] sm:$0xf]  ;;  %v15874_v50 = vld [vmem:[%s20351_s1 + $0x738] sm:$0xff]  }
 0x1c1   :  { %v7884_v7 = vadd.f32 %v7820_v30, %v7656_v55  ;;  %v7654_v2 = vmax.f32 %v7402_v60, 0.0  ;;  %v7407_v1 = vadd.f32 %v7155_v62, %v16704_v40  ;;  %v7153_v51 = vadd.f32 %v3774_v36, %v3690_v3  ;;  %v87_v36 = vld [vmem:[%s20350_s0 + $0xf0] sm:$0xf]  ;;  %v15876_v55 = vld [vmem:[%s20351_s1 + $0x760] sm:$0xff]  }
 0x1c2   :  { %v14765_v15 = vpop.f32.mrf.mxu0  ;;  %v14775_v22 = vpop.f32.mrf.mxu1 }
 0x1c3   :  { %v7882_v16 = vadd.f32 %v7818_v27, %v7654_v2  ;;  %v7659_v18 = vmax.f32 %v7407_v1, 0.0  ;;  %v7405_v21 = vadd.f32 %v7153_v51, %v16710_v43  ;;  %v7156_v4 = vadd.f32 %v14771_v26, %v14765_v15  ;;  %v15877_v15 = vld [vmem:[%s20351_s1 + $0x748] sm:$0xff]  }
 0x1c4   :  { %v3693_v12 = vpop.f32.mrf.mxu0  ;;  %v3793_v33 = vpop.f32.mrf.mxu1 }
 0x1c5   :  { %v7947_v28 = vadd.f32 %v7883_v49, %v7659_v18  ;;  %v7657_v30 = vmax.f32 %v7405_v21, 0.0  ;;  %v7408_v25 = vadd.f32 %v7156_v4, %v16731_v54  ;;  %v7154_v17 = vadd.f32 %v3777_v52, %v3693_v12  ;;  %v15875_v52 = vld [vmem:[%s20351_s1 + $0x740] sm:$0xff]   ;;  %v15878_v4 = vld [vmem:[%s20351_s1 + $0x768] sm:$0xff]  }
 0x1c6   :  { %v14780_v34 = vpop.f32.mrf.mxu0  ;;  %15019 = vmatmul.mubr.msk.bf16.vlgmr.msra.gmra.mxu0 %vm623_vm1, %v15869_v57  ;;  %15029 = vmatmul.mubr.msk.bf16.vlgmr.msra.gmra.mxu1 %vm623_vm1, %v15870_v10  ;;  %v14790_v32 = vpop.f32.mrf.mxu1  ;;  %v6738_v12 = vsel %vm636_vm0, %v88_v35, 0 }
 0x1c7   :  { %v7945_v39 = vadd.f32 %v7881_v59, %v7657_v30  ;;  %v7660_v27 = vmax.f32 %v7408_v25, 0.0  ;;  %v7406_v41 = vadd.f32 %v7154_v17, %v16738_v58  ;;  %v7159_v44 = vadd.f32 %v14780_v34, %v14774_v0  ;;  %15022 = vmatprep.mubr.msk.bf16.mxu0 %vm623_vm1, %v15871_v14  ;;  %15032 = vmatprep.mubr.msk.bf16.mxu1 %vm623_vm1, %v15872_v24  ;;  %v15879_v24 = vld [vmem:[%s20351_s1 + $0x750] sm:$0xff]  }
 0x1c8   :  { %v3874_v26 = vpop.f32.mrf.mxu0  ;;  %15037 = vmatpush3.bf16.msra.mxu0 %v6438_v56  ;;  %v3974_v42 = vpop.f32.mrf.mxu1  ;;  %15047 = vmatpush3.bf16.msra.mxu1 %v6538_v46  ;;  %v15880_v17 = vld [vmem:[%s20351_s1 + $0x770] sm:$0xff]  }
 0x1c9   :  { %v7948_v47 = vadd.f32 %v7884_v7, %v7660_v27  ;;  %v7658_v49 = vmax.f32 %v7406_v41, 0.0  ;;  %v7157_v37 = vadd.f32 %v3874_v26, %v3790_v8  ;;  %15636 = vmatprep.subr.msk.bf16.mxu0 %vm636_vm0, %v87_v36  ;;  %15637 = vmatprep.subr.msk.bf16.mxu1 %vm636_vm0, %v88_v35  ;;  %v7411_v46 = vadd.f32 %v7159_v44, %v16704_v40 }
 0x1ca   :  { %v14781_v53 = vpop.f32.mrf.mxu0  ;;  %v14791_v56 = vpop.f32.mrf.mxu1  ;;  %v6638_v8 = vsel %vm636_vm0, %v87_v36, 0 }
 0x1cb   :  { %v7160_v59 = vadd.f32 %v14781_v53, %v14775_v22  ;;  %v17680_v60 = vpack.c.bf16 %v7948_v47, %v7947_v28  ;;  %v7946_v0 = vadd.f32 %v7882_v16, %v7658_v49  ;;  %v7409_v1 = vadd.f32 %v7157_v37, %v16710_v43  ;;  %v89_v47 = vld [vmem:[%s20350_s0 + $0xf8] sm:$0xf] }
 0x1cc   :  { %v3877_v62 = vpop.f32.mrf.mxu0  ;;  %v3977_v57 = vpop.f32.mrf.mxu1  ;;  %v7663_v16 = vmax.f32 %v7411_v46, 0.0 }
 0x1cd   :  { %v7158_v3 = vadd.f32 %v3877_v62, %v3793_v33  ;;  %v17684_v2 = vpack.c.bf16 %v7946_v0, %v7945_v39  ;;  %v7412_v28 = vadd.f32 %v7160_v59, %v16731_v54  ;;  %v7661_v33 = vmax.f32 %v7409_v1, 0.0  ;;  %v15881_v0 = vld [vmem:[%s20351_s1 + $0x758] sm:$0xff]  }
 0x1ce   :  { %v14784_v7 = vpop.f32.mrf.mxu0  ;;  %15023 = vmatmul.mubr.msk.bf16.gmra.mxu0 %vm623_vm1, %v15873_v45  ;;  %15033 = vmatmul.mubr.msk.bf16.gmra.mxu1 %vm623_vm1, %v15874_v50  ;;  %v14794_v10 = vpop.f32.mrf.mxu1  ;;  %v15882_v1 = vld [vmem:[%s20351_s1 + $0x778] sm:$0xff]  }
 0x1cf   :  { %v7163_v51 = vadd.f32 %v14790_v32, %v14784_v7  ;;  %15038 = vmatprep.mubr.msk.bf16.mxu0 %vm623_vm1, %v15875_v52  ;;  %15048 = vmatprep.mubr.msk.bf16.mxu1 %vm623_vm1, %v15876_v55  ;;  %v7410_v30 = vadd.f32 %v7158_v3, %v16738_v58  ;;  %v7664_v49 = vmax.f32 %v7412_v28, 0.0 }
 0x1d0   :  { %v3890_v14 = vpop.f32.mrf.mxu0  ;;  %v3990_v22 = vpop.f32.mrf.mxu1 }
 0x1d1   :  { %v7415_v18 = vadd.f32 %v7163_v51, %v16704_v40  ;;  %v7161_v21 = vadd.f32 %v3974_v42, %v3890_v14  ;;  %v7662_v37 = vmax.f32 %v7410_v30, 0.0  ;;  %v90_v42 = vld [vmem:[%s20350_s0 + $0xfc] sm:$0xf] }
 0x1d2   :  { %v14785_v25 = vpop.f32.mrf.mxu0  ;;  %v14795_v27 = vpop.f32.mrf.mxu1 }
 0x1d3   :  { %v7667_v34 = vmax.f32 %v7415_v18, 0.0  ;;  %v7413_v36 = vadd.f32 %v7161_v21, %v16710_v43  ;;  %v7164_v39 = vadd.f32 %v14791_v56, %v14785_v25 }
 0x1d4   :  { %v3893_v41 = vpop.f32.mrf.mxu0  ;;  %v3993_v45 = vpop.f32.mrf.mxu1 }
 0x1d5   :  { %v7823_v44 = vadd.f32 %v7667_v34, %v7663_v16  ;;  %v7665_v32 = vmax.f32 %v7413_v36, 0.0  ;;  %v7416_v35 = vadd.f32 %v7164_v39, %v16731_v54  ;;  %v7162_v26 = vadd.f32 %v3977_v57, %v3893_v41 }
 0x1d6   :  { %v14800_v50 = vpop.f32.mrf.mxu0  ;;  %15039 = vmatmul.mubr.msk.bf16.vlgmr.msra.gmra.mxu0 %vm623_vm1, %v15877_v15  ;;  %15049 = vmatmul.mubr.msk.bf16.vlgmr.msra.gmra.mxu1 %vm623_vm1, %v15878_v4  ;;  %v14810_v55 = vpop.f32.mrf.mxu1  ;;  %v15884_v4 = vld [vmem:[%s20351_s1 + $0x7a0] sm:$0xff]   ;;  %v6938_v34 = vsel %vm636_vm0, %v90_v42, 0 }
 0x1d7   :  { %v7821_v52 = vadd.f32 %v7665_v32, %v7661_v33  ;;  %v7668_v53 = vmax.f32 %v7416_v35, 0.0  ;;  %v7414_v59 = vadd.f32 %v7162_v26, %v16738_v58  ;;  %v7167_v56 = vadd.f32 %v14800_v50, %v14794_v10  ;;  %15042 = vmatprep.mubr.msk.bf16.mxu0 %vm623_vm1, %v15879_v24  ;;  %15052 = vmatprep.mubr.msk.bf16.mxu1 %vm623_vm1, %v15880_v17  ;;  %v15883_v10 = vld [vmem:[%s20351_s1 + $0x780] sm:$0xff]  }
 0x1d8   :  { %v4074_v62 = vpop.f32.mrf.mxu0  ;;  %15057 = vmatpush3.bf16.msra.mxu0 %v6638_v8  ;;  %v4174_v51 = vpop.f32.mrf.mxu1  ;;  %15067 = vmatpush3.bf16.msra.mxu1 %v6738_v12  ;;  %v6838_v33 = vsel %vm636_vm0, %v89_v47, 0 }
 0x1d9   :  { %v7824_v46 = vadd.f32 %v7668_v53, %v7664_v49  ;;  %v7666_v3 = vmax.f32 %v7414_v59, 0.0  ;;  %v7419_v57 = vadd.f32 %v7167_v56, %v16704_v40  ;;  %v7165_v7 = vadd.f32 %v4074_v62, %v3990_v22  ;;  %15638 = vmatprep.subr.msk.bf16.mxu0 %vm636_vm0, %v89_v47  ;;  %15639 = vmatprep.subr.msk.bf16.mxu1 %vm636_vm0, %v90_v42  ;;  %v15885_v49 = vld [vmem:[%s20351_s1 + $0x788] sm:$0xff]  }
 0x1da   :  { %v14801_v14 = vpop.f32.mrf.mxu0  ;;  %v14811_v21 = vpop.f32.mrf.mxu1  ;;  %v15886_v56 = vld [vmem:[%s20351_s1 + $0x7a8] sm:$0xff]  }
 0x1db   :  { %v7822_v8 = vadd.f32 %v7666_v3, %v7662_v37  ;;  %v7671_v15 = vmax.f32 %v7419_v57, 0.0  ;;  %v7417_v16 = vadd.f32 %v7165_v7, %v16710_v43  ;;  %v7168_v18 = vadd.f32 %v14801_v14, %v14795_v27 }
 0x1dc   :  { %v4077_v22 = vpop.f32.mrf.mxu0  ;;  %v4177_v25 = vpop.f32.mrf.mxu1 }
 0x1dd   :  { %v7887_v24 = vadd.f32 %v7823_v44, %v7671_v15  ;;  %v7669_v12 = vmax.f32 %v7417_v16, 0.0  ;;  %v7420_v28 = vadd.f32 %v7168_v18, %v16731_v54  ;;  %v7166_v30 = vadd.f32 %v4077_v22, %v3993_v45 }
 0x1de   :  { %v14804_v17 = vpop.f32.mrf.mxu0  ;;  %15043 = vmatmul.mubr.msk.bf16.gmra.mxu0 %vm623_vm1, %v15881_v0  ;;  %15053 = vmatmul.mubr.msk.bf16.gmra.mxu1 %vm623_vm1, %v15882_v1  ;;  %v14814_v44 = vpop.f32.mrf.mxu1  ;;  %v15887_v1 = vld [vmem:[%s20351_s1 + $0x790] sm:$0xff]  }
 0x1df   :  { %v7885_v36 = vadd.f32 %v7821_v52, %v7669_v12  ;;  %v7672_v39 = vmax.f32 %v7420_v28, 0.0  ;;  %v7418_v27 = vadd.f32 %v7166_v30, %v16738_v58  ;;  %v7171_v41 = vadd.f32 %v14810_v55, %v14804_v17  ;;  %15058 = vmatprep.mubr.msk.bf16.mxu0 %vm623_vm1, %v15883_v10  ;;  %15068 = vmatprep.mubr.msk.bf16.mxu1 %vm623_vm1, %v15884_v4  ;;  %v15888_v10 = vld [vmem:[%s20351_s1 + $0x7b0] sm:$0xff]   ;;  %v15889_v4 = vld [vmem:[%s20351_s1 + $0x798] sm:$0xff]  }
 0x1e0   :  { %v4090_v32 = vpop.f32.mrf.mxu0  ;;  %v4190_v37 = vpop.f32.mrf.mxu1  ;;  %v15890_v28 = vld [vmem:[%s20351_s1 + $0x7b8] sm:$0xff]  }
 0x1e1   :  { %v7888_v35 = vadd.f32 %v7824_v46, %v7672_v39  ;;  %v7670_v26 = vmax.f32 %v7418_v27, 0.0  ;;  %v7423_v45 = vadd.f32 %v7171_v41, %v16704_v40  ;;  %v7169_v47 = vadd.f32 %v4174_v51, %v4090_v32 }
 0x1e2   :  { %v14805_v50 = vpop.f32.mrf.mxu0  ;;  %v14815_v55 = vpop.f32.mrf.mxu1 }
 0x1e3   :  { %v7886_v42 = vadd.f32 %v7822_v8, %v7670_v26  ;;  %v7675_v52 = vmax.f32 %v7423_v45, 0.0  ;;  %v7421_v53 = vadd.f32 %v7169_v47, %v16710_v43  ;;  %v7172_v59 = vadd.f32 %v14811_v21, %v14805_v50 }
 0x1e4   :  { %v4093_v62 = vpop.f32.mrf.mxu0  ;;  %v4193_v7 = vpop.f32.mrf.mxu1 }
 0x1e5   :  { %v7951_v0 = vadd.f32 %v7887_v24, %v7675_v52  ;;  %v7673_v46 = vmax.f32 %v7421_v53, 0.0  ;;  %v7424_v3 = vadd.f32 %v7172_v59, %v16731_v54  ;;  %v7170_v57 = vadd.f32 %v4177_v25, %v4093_v62  ;;  %v15891_v25 = vld [vmem:[%s20351_s1 + $0x7c0] sm:$0xff]  }
 0x1e6   :  { %v14820_v51 = vpop.f32.mrf.mxu0  ;;  %15059 = vmatmul.mubr.msk.bf16.vlgmr.msra.gmra.mxu0 %vm623_vm1, %v15885_v49  ;;  %15069 = vmatmul.mubr.msk.bf16.vlgmr.msra.gmra.mxu1 %vm623_vm1, %v15886_v56  ;;  %v14830_v18 = vpop.f32.mrf.mxu1  ;;  %v15894_v56 = vld [vmem:[%s20351_s1 + $0x7e8] sm:$0xff]  }
 0x1e7   :  { %v7949_v14 = vadd.f32 %v7885_v36, %v7673_v46  ;;  %v7676_v8 = vmax.f32 %v7424_v3, 0.0  ;;  %v7422_v15 = vadd.f32 %v7170_v57, %v16738_v58  ;;  %v7175_v16 = vadd.f32 %v14820_v51, %v14814_v44  ;;  %15077 = vmatpush3.bf16.msra.mxu0 %v6838_v33  ;;  %15087 = vmatpush3.bf16.msra.mxu1 %v6938_v34  ;;  %v15892_v36 = vld [vmem:[%s20351_s1 + $0x7e0] sm:$0xff]  }
 0x1e8   :  { %15096 = vmatprep.subr.bf16.mxu0 %v16887_v61  ;;  %v4274_v21 = vpop.f32.mrf.mxu0  ;;  %15116 = vmatprep.subr.bf16.mxu1 %v17024_v6  ;;  %v4374_v30 = vpop.f32.mrf.mxu1 }
 0x1e9   :  { %v7952_v22 = vadd.f32 %v7888_v35, %v7676_v8  ;;  %v7674_v24 = vmax.f32 %v7422_v15, 0.0  ;;  %v7173_v12 = vadd.f32 %v4274_v21, %v4190_v37  ;;  %15062 = vmatprep.mubr.msk.bf16.mxu0 %vm623_vm1, %v15887_v1  ;;  %15072 = vmatprep.mubr.msk.bf16.mxu1 %vm623_vm1, %v15888_v10  ;;  %v7427_v44 = vadd.f32 %v7175_v16, %v16704_v40  ;;  %v15895_v21 = vld [vmem:[%s20351_s1 + $0x7d0] sm:$0xff]  }
 0x1ea   :  { %v14821_v17 = vpop.f32.mrf.mxu0  ;;  %v14831_v34 = vpop.f32.mrf.mxu1 }
 0x1eb   :  { %v7176_v33 = vadd.f32 %v14821_v17, %v14815_v55  ;;  %v17778_v39 = vpack.c.bf16 %v7952_v22, %v7951_v0  ;;  %v7950_v41 = vadd.f32 %v7886_v42, %v7674_v24  ;;  %v7425_v47 = vadd.f32 %v7173_v12, %v16710_v43  ;;  %v15893_v42 = vld [vmem:[%s20351_s1 + $0x7c8] sm:$0xff]   ;;  %v15896_v12 = vld [vmem:[%s20351_s1 + $0x7f0] sm:$0xff]  }
 0x1ec   :  { %v4277_v27 = vpop.f32.mrf.mxu0  ;;  %v4377_v35 = vpop.f32.mrf.mxu1  ;;  %v7679_v52 = vmax.f32 %v7427_v44, 0.0 }
 0x1ed   :  { %v7174_v32 = vadd.f32 %v4277_v27, %v4193_v7  ;;  %v17782_v45 = vpack.c.bf16 %v7950_v41, %v7949_v14  ;;  %v7428_v62 = vadd.f32 %v7176_v33, %v16731_v54  ;;  %v7677_v3 = vmax.f32 %v7425_v47, 0.0 }
 0x1ee   :  { %v14824_v26 = vpop.f32.mrf.mxu0  ;;  %15063 = vmatmul.mubr.msk.bf16.gmra.mxu0 %vm623_vm1, %v15889_v4  ;;  %15073 = vmatmul.mubr.msk.bf16.gmra.mxu1 %vm623_vm1, %v15890_v28  ;;  %v14834_v37 = vpop.f32.mrf.mxu1 }
 0x1ef   :  { %v7179_v49 = vadd.f32 %v14830_v18, %v14824_v26  ;;  %15078 = vmatprep.mubr.msk.bf16.mxu0 %vm623_vm1, %v15891_v25  ;;  %15088 = vmatprep.mubr.msk.bf16.mxu1 %vm623_vm1, %v15892_v36  ;;  %v7426_v0 = vadd.f32 %v7174_v32, %v16738_v58  ;;  %v7680_v4 = vmax.f32 %v7428_v62, 0.0  ;;  %v15897_v36 = vld [vmem:[%s20351_s1 + $0x7d8] sm:$0xff]  }
 0x1f0   :  { %v4290_v50 = vpop.f32.mrf.mxu0  ;;  %v4390_v55 = vpop.f32.mrf.mxu1 }
 0x1f1   :  { %v7431_v53 = vadd.f32 %v7179_v49, %v16704_v40  ;;  %v7177_v59 = vadd.f32 %v4374_v30, %v4290_v50  ;;  %v7678_v22 = vmax.f32 %v7426_v0, 0.0 }
 0x1f2   :  { %v14825_v46 = vpop.f32.mrf.mxu0  ;;  %v14835_v51 = vpop.f32.mrf.mxu1 }
 0x1f3   :  { %v7683_v57 = vmax.f32 %v7431_v53, 0.0  ;;  %v7429_v7 = vadd.f32 %v7177_v59, %v16710_v43  ;;  %v7180_v1 = vadd.f32 %v14831_v34, %v14825_v46 }
 0x1f4   :  { %v4293_v10 = vpop.f32.mrf.mxu0  ;;  %v4393_v18 = vpop.f32.mrf.mxu1 }
 0x1f5   :  { %v7827_v14 = vadd.f32 %v7683_v57, %v7679_v52  ;;  %v7681_v8 = vmax.f32 %v7429_v7, 0.0  ;;  %v7432_v15 = vadd.f32 %v7180_v1, %v16731_v54  ;;  %v7178_v16 = vadd.f32 %v4377_v35, %v4293_v10  ;;  %v15899_v35 = vld [vmem:[%s20355_s3] sm:$0xff]  }
 0x1f6   :  { %v14840_v24 = vpop.f32.mrf.mxu0  ;;  %15079 = vmatmul.mubr.msk.bf16.vlgmr.msra.gmra.mxu0 %vm623_vm1, %v15893_v42  ;;  %15089 = vmatmul.mubr.msk.bf16.vlgmr.msra.gmra.mxu1 %vm623_vm1, %v15894_v56  ;;  %v14850_v33 = vpop.f32.mrf.mxu1  ;;  %v15900_v52 = vld [vmem:[%s20355_s3 + $0x40] sm:$0xff]  }
 0x1f7   :  { %v7825_v28 = vadd.f32 %v7681_v8, %v7677_v3  ;;  %v7684_v30 = vmax.f32 %v7432_v15, 0.0  ;;  %v7430_v25 = vadd.f32 %v7178_v16, %v16738_v58  ;;  %v7183_v17 = vadd.f32 %v14840_v24, %v14834_v37  ;;  %15097 = vmatpush3.bf16.msra.mxu0 %v16887_v61  ;;  %15117 = vmatpush3.bf16.msra.mxu1 %v17024_v6  ;;  %v15898_v61 = vld [vmem:[%s20351_s1 + $0x7f8] sm:$0xff]  }
 0x1f8   :  { %15098 = vmatprep.subr.bf16.mxu0 %v16896_v5  ;;  %v4474_v34 = vpop.f32.mrf.mxu0  ;;  %15118 = vmatprep.subr.bf16.mxu1 %v17030_v13  ;;  %v4574_v6 = vpop.f32.mrf.mxu1 }
 0x1f9   :  { %v7828_v27 = vadd.f32 %v7684_v30, %v7680_v4  ;;  %v7682_v41 = vmax.f32 %v7430_v25, 0.0  ;;  %v7435_v44 = vadd.f32 %v7183_v17, %v16704_v40  ;;  %v7181_v32 = vadd.f32 %v4474_v34, %v4390_v55  ;;  %15082 = vmatprep.mubr.msk.bf16.mxu0 %vm623_vm1, %v15895_v21  ;;  %15092 = vmatprep.mubr.msk.bf16.mxu1 %vm623_vm1, %v15896_v12  ;;  %v15902_v12 = vld [vmem:[%s20355_s3 + $0x48] sm:$0xff]  }
 0x1fa   :  { %v14841_v26 = vpop.f32.mrf.mxu0  ;;  %v14851_v42 = vpop.f32.mrf.mxu1 }
 0x1fb   :  { %v7826_v47 = vadd.f32 %v7682_v41, %v7678_v22  ;;  %v7687_v49 = vmax.f32 %v7435_v44, 0.0  ;;  %v7433_v37 = vadd.f32 %v7181_v32, %v16710_v43  ;;  %v7184_v50 = vadd.f32 %v14841_v26, %v14835_v51  ;;  %15099 = vmatpush3.bf16.msra.mxu0 %v16896_v5  ;;  %15119 = vmatpush3.bf16.msra.mxu1 %v17030_v13  ;;  %v15904_v44 = vld [vmem:[%s20355_s3 + $0x50] sm:$0xff]  }
 0x1fc   :  { %15136 = vmatprep.subr.bf16.mxu0 %v17137_v11  ;;  %v4477_v53 = vpop.f32.mrf.mxu0  ;;  %15156 = vmatprep.subr.bf16.mxu1 %v17249_v23  ;;  %v4577_v0 = vpop.f32.mrf.mxu1 }
 0x1fd   :  { %v7891_v59 = vadd.f32 %v7827_v14, %v7687_v49  ;;  %v7685_v56 = vmax.f32 %v7433_v37, 0.0  ;;  %v7436_v55 = vadd.f32 %v7184_v50, %v16731_v54  ;;  %v7182_v62 = vadd.f32 %v4477_v53, %v4393_v18  ;;  %v15901_v18 = vld [vmem:[%s20355_s3 + $0x8] sm:$0xff]  }
 0x1fe   :  { %v14844_v46 = vpop.f32.mrf.mxu0  ;;  %15083 = vmatmul.mubr.msk.bf16.gmra.mxu0 %vm623_vm1, %v15897_v36  ;;  %15093 = vmatmul.mubr.msk.bf16.gmra.mxu1 %vm623_vm1, %v15898_v61  ;;  %v14854_v13 = vpop.f32.mrf.mxu1 }
 0x1ff   :  { %v7889_v5 = vadd.f32 %v7825_v28, %v7685_v56  ;;  %v7688_v3 = vmax.f32 %v7436_v55, 0.0  ;;  %v7434_v57 = vadd.f32 %v7182_v62, %v16738_v58  ;;  %v7187_v7 = vadd.f32 %v14850_v33, %v14844_v46  ;;  %15100 = vmatprep.mubr.msk.bf16.mxu0 %vm8309_vm2, %v15899_v35  ;;  %15120 = vmatprep.mubr.msk.bf16.mxu1 %vm8309_vm2, %v15900_v52  ;;  %v15907_v56 = vld [vmem:[%s20355_s3 + $0x20] sm:$0xff]  }
 0x200   :  { %v4490_v1 = vpop.f32.mrf.mxu0  ;;  %v4590_v15 = vpop.f32.mrf.mxu1 }
 0x201   :  { %v7892_v51 = vadd.f32 %v7828_v27, %v7688_v3  ;;  %v7686_v10 = vmax.f32 %v7434_v57, 0.0  ;;  %v7439_v14 = vadd.f32 %v7187_v7, %v16704_v40  ;;  %v7185_v8 = vadd.f32 %v4574_v6, %v4490_v1  ;;  %v15903_v27 = vld [vmem:[%s20355_s3 + $0x10] sm:$0xff]  }
 0x202   :  { %v14845_v16 = vpop.f32.mrf.mxu0  ;;  %v14855_v28 = vpop.f32.mrf.mxu1 }
 0x203   :  { %v7890_v21 = vadd.f32 %v7826_v47, %v7686_v10  ;;  %v7691_v4 = vmax.f32 %v7439_v14, 0.0  ;;  %v7437_v22 = vadd.f32 %v7185_v8, %v16710_v43  ;;  %v7188_v24 = vadd.f32 %v14851_v42, %v14845_v16 }
 0x204   :  { %v4493_v30 = vpop.f32.mrf.mxu0  ;;  %v4593_v36 = vpop.f32.mrf.mxu1 }
 0x205   :  { %v7955_v25 = vadd.f32 %v7891_v59, %v7691_v4  ;;  %v7689_v17 = vmax.f32 %v7437_v22, 0.0  ;;  %v7440_v33 = vadd.f32 %v7188_v24, %v16731_v54  ;;  %v7186_v34 = vadd.f32 %v4577_v0, %v4493_v30  ;;  %v15911_v30 = vld [vmem:[%s20355_s3 + $0x30] sm:$0xff]  }
 0x206   :  { %v14860_v41 = vpop.f32.mrf.mxu0  ;;  %15101 = vmatmul.mubr.msk.bf16.vlgmr.msra.gmra.mxu0 %vm8309_vm2, %v15901_v18  ;;  %15121 = vmatmul.mubr.msk.bf16.vlgmr.msra.gmra.mxu1 %vm8309_vm2, %v15902_v12  ;;  %v14870_v26 = vpop.f32.mrf.mxu1  ;;  %v15909_v18 = vld [vmem:[%s20355_s3 + $0x28] sm:$0xff]  }
 0x207   :  { %v7953_v32 = vadd.f32 %v7889_v5, %v7689_v17  ;;  %v7692_v61 = vmax.f32 %v7440_v33, 0.0  ;;  %v7438_v6 = vadd.f32 %v7186_v34, %v16738_v58  ;;  %v7191_v35 = vadd.f32 %v14860_v41, %v14854_v13  ;;  %15137 = vmatpush3.bf16.msra.mxu0 %v17137_v11  ;;  %15157 = vmatpush3.bf16.msra.mxu1 %v17249_v23  ;;  %v15905_v11 = vld [vmem:[%s20355_s3 + $0x18] sm:$0xff]   ;;  %v15910_v12 = vld [vmem:[%s20355_s3 + $0x68] sm:$0xff]   ;;  %v15912_v34 = vld [vmem:[%s20355_s3 + $0x70] sm:$0xff]  }
 0x208   :  { %15138 = vmatprep.subr.bf16.mxu0 %v17143_v19  ;;  %v4674_v47 = vpop.f32.mrf.mxu0  ;;  %15158 = vmatprep.subr.bf16.mxu1 %v17255_v31  ;;  %v4774_v42 = vpop.f32.mrf.mxu1  ;;  %v15906_v23 = vld [vmem:[%s20355_s3 + $0x58] sm:$0xff]  }
 0x209   :  { %v7956_v49 = vadd.f32 %v7892_v51, %v7692_v61  ;;  %v7690_v37 = vmax.f32 %v7438_v6, 0.0  ;;  %v7189_v50 = vadd.f32 %v4674_v47, %v4590_v15  ;;  %15104 = vmatprep.mubr.msk.bf16.mxu0 %vm8309_vm2, %v15903_v27  ;;  %15124 = vmatprep.mubr.msk.bf16.mxu1 %vm8309_vm2, %v15904_v44  ;;  %v7443_v7 = vadd.f32 %v7191_v35, %v16704_v40 }
 0x20a   :  { %v14861_v52 = vpop.f32.mrf.mxu0  ;;  %v14871_v59 = vpop.f32.mrf.mxu1 }
 0x20b   :  { %v7192_v53 = vadd.f32 %v14861_v52, %v14855_v28  ;;  %15139 = vmatpush3.bf16.msra.mxu0 %v17143_v19  ;;  %v17872_v55 = vpack.c.bf16 %v7956_v49, %v7955_v25  ;;  %15159 = vmatpush3.bf16.msra.mxu1 %v17255_v31  ;;  %v15908_v19 = vld [vmem:[%s20355_s3 + $0x60] sm:$0xff]   ;;  %v7954_v0 = vadd.f32 %v7890_v21, %v7690_v37  ;;  %v7695_v21 = vmax.f32 %v7443_v7, 0.0 }
 0x20c   :  { %15176 = vmatprep.subr.bf16.mxu0 %v17361_v20  ;;  %v4677_v62 = vpop.f32.mrf.mxu0  ;;  %15196 = vmatprep.subr.bf16.mxu1 %v17472_v63  ;;  %v4777_v5 = vpop.f32.mrf.mxu1  ;;  %v7441_v1 = vadd.f32 %v7189_v50, %v16710_v43 }
 0x20d   :  { %v7190_v46 = vadd.f32 %v4677_v62, %v4593_v36  ;;  %v17881_v57 = vpack.c.bf16 %v7954_v0, %v7953_v32  ;;  %v7444_v15 = vadd.f32 %v7192_v53, %v16731_v54  ;;  %v15913_v62 = vld [vmem:[%s20355_s3 + $0x38] sm:$0xff]  }
 0x20e   :  { %v14864_v3 = vpop.f32.mrf.mxu0  ;;  %15105 = vmatmul.mubr.msk.bf16.gmra.mxu0 %vm8309_vm2, %v15905_v11  ;;  %15125 = vmatmul.mubr.msk.bf16.gmra.mxu1 %vm8309_vm2, %v15906_v23  ;;  %v14874_v13 = vpop.f32.mrf.mxu1  ;;  %v7693_v25 = vmax.f32 %v7441_v1, 0.0  ;;  %v15916_v1 = vld [vmem:[%s20355_s3 + $0xc0] sm:$0xff]  }
 0x20f   :  { %v7195_v31 = vadd.f32 %v14870_v26, %v14864_v3  ;;  %15108 = vmatprep.mubr.msk.bf16.mxu0 %vm8309_vm2, %v15907_v56  ;;  %15128 = vmatprep.mubr.msk.bf16.mxu1 %vm8309_vm2, %v15908_v19  ;;  %v7442_v17 = vadd.f32 %v7190_v46, %v16738_v58  ;;  %v7696_v61 = vmax.f32 %v7444_v15, 0.0  ;;  %v15914_v3 = vld [vmem:[%s20355_s3 + $0x78] sm:$0xff]  }
 0x210   :  { %v4690_v51 = vpop.f32.mrf.mxu0  ;;  %v4790_v8 = vpop.f32.mrf.mxu1 }
 0x211   :  { %v7447_v10 = vadd.f32 %v7195_v31, %v16704_v40  ;;  %v7193_v14 = vadd.f32 %v4774_v42, %v4690_v51  ;;  %v7694_v50 = vmax.f32 %v7442_v17, 0.0  ;;  %v15915_v31 = vld [vmem:[%s20355_s3 + $0x80] sm:$0xff]  }
 0x212   :  { %v14865_v16 = vpop.f32.mrf.mxu0  ;;  %v14875_v28 = vpop.f32.mrf.mxu1 }
 0x213   :  { %v7699_v4 = vmax.f32 %v7447_v10, 0.0  ;;  %v7445_v22 = vadd.f32 %v7193_v14, %v16710_v43  ;;  %v7196_v24 = vadd.f32 %v14871_v59, %v14865_v16 }
 0x214   :  { %v4693_v33 = vpop.f32.mrf.mxu0  ;;  %v4793_v32 = vpop.f32.mrf.mxu1 }
 0x215   :  { %v7831_v36 = vadd.f32 %v7699_v4, %v7695_v21  ;;  %v7697_v27 = vmax.f32 %v7445_v22, 0.0  ;;  %v7448_v41 = vadd.f32 %v7196_v24, %v16731_v54  ;;  %v7194_v44 = vadd.f32 %v4777_v5, %v4693_v33 }
 0x216   :  { %v14880_v6 = vpop.f32.mrf.mxu0  ;;  %15109 = vmatmul.mubr.msk.bf16.gmra.mxu0 %vm8309_vm2, %v15909_v18  ;;  %15129 = vmatmul.mubr.msk.bf16.gmra.mxu1 %vm8309_vm2, %v15910_v12  ;;  %v14890_v37 = vpop.f32.mrf.mxu1 }
 0x217   :  { %v7829_v35 = vadd.f32 %v7697_v27, %v7693_v25  ;;  %v7700_v26 = vmax.f32 %v7448_v41, 0.0  ;;  %v7446_v47 = vadd.f32 %v7194_v44, %v16738_v58  ;;  %v7199_v49 = vadd.f32 %v14880_v6, %v14874_v13  ;;  %15112 = vmatprep.mubr.msk.bf16.mxu0 %vm8309_vm2, %v15911_v30  ;;  %15132 = vmatprep.mubr.msk.bf16.mxu1 %vm8309_vm2, %v15912_v34 }
 0x218   :  { %v4874_v42 = vpop.f32.mrf.mxu0  ;;  %v4974_v59 = vpop.f32.mrf.mxu1 }
 0x219   :  { %v7832_v52 = vadd.f32 %v7700_v26, %v7696_v61  ;;  %v7698_v11 = vmax.f32 %v7446_v47, 0.0  ;;  %v7451_v53 = vadd.f32 %v7199_v49, %v16704_v40  ;;  %v7197_v23 = vadd.f32 %v4874_v42, %v4790_v8  ;;  %v15918_v61 = vld [vmem:[%s20355_s3 + $0xc8] sm:$0xff]   ;;  %v15919_v42 = vld [vmem:[%s20355_s3 + $0x90] sm:$0xff]  }
 0x21a   :  { %v14881_v56 = vpop.f32.mrf.mxu0  ;;  %v14891_v7 = vpop.f32.mrf.mxu1 }
 0x21b   :  { %v7830_v19 = vadd.f32 %v7698_v11, %v7694_v50  ;;  %v7703_v0 = vmax.f32 %v7451_v53, 0.0  ;;  %v7449_v46 = vadd.f32 %v7197_v23, %v16710_v43  ;;  %v7200_v5 = vadd.f32 %v14881_v56, %v14875_v28  ;;  %v15920_v11 = vld [vmem:[%s20355_s3 + $0xd0] sm:$0xff]  }
 0x21c   :  { %v4877_v13 = vpop.f32.mrf.mxu0  ;;  %v4977_v15 = vpop.f32.mrf.mxu1 }
 0x21d   :  { %v7895_v51 = vadd.f32 %v7831_v36, %v7703_v0  ;;  %v7701_v10 = vmax.f32 %v7449_v46, 0.0  ;;  %v7452_v14 = vadd.f32 %v7200_v5, %v16731_v54  ;;  %v7198_v8 = vadd.f32 %v4877_v13, %v4793_v32  ;;  %v15917_v36 = vld [vmem:[%s20355_s3 + $0x88] sm:$0xff]  }
 0x21e   :  { %v14884_v16 = vpop.f32.mrf.mxu0  ;;  %15113 = vmatmul.mubr.msk.bf16.gmra.mxu0 %vm8309_vm2, %v15913_v62  ;;  %15133 = vmatmul.mubr.msk.bf16.gmra.mxu1 %vm8309_vm2, %v15914_v3  ;;  %v17929_v24 = vpop.f32.mrf.mxu1 }
 0x21f   :  { %v7893_v18 = vadd.f32 %v7829_v35, %v7701_v10  ;;  %v7704_v21 = vmax.f32 %v7452_v14, 0.0  ;;  %v7450_v4 = vadd.f32 %v7198_v8, %v16738_v58  ;;  %v7203_v22 = vadd.f32 %v14890_v37, %v14884_v16  ;;  %15140 = vmatprep.mubr.msk.bf16.mxu0 %vm8309_vm2, %v15915_v31  ;;  %15160 = vmatprep.mubr.msk.bf16.mxu1 %vm8309_vm2, %v15916_v1  ;;  %v15923_v31 = vld [vmem:[%s20355_s3 + $0xa0] sm:$0xff]  }
 0x220   :  { %v4890_v12 = vpop.f32.mrf.mxu0  ;;  %v4990_v33 = vpop.f32.mrf.mxu1 }
 0x221   :  { %v7896_v28 = vadd.f32 %v7832_v52, %v7704_v21  ;;  %v7702_v30 = vmax.f32 %v7450_v4, 0.0  ;;  %v7455_v25 = vadd.f32 %v7203_v22, %v16704_v40  ;;  %v7201_v17 = vadd.f32 %v4974_v59, %v4890_v12  ;;  %v15925_v12 = vld [vmem:[%s20355_s3 + $0xa8] sm:$0xff]  }
 0x222   :  { %v14885_v34 = vpop.f32.mrf.mxu0  ;;  %v17940_v6 = vpop.f32.mrf.mxu1 }
 0x223   :  { %v7894_v27 = vadd.f32 %v7830_v19, %v7702_v30  ;;  %v7707_v41 = vmax.f32 %v7455_v25, 0.0  ;;  %v7453_v44 = vadd.f32 %v7201_v17, %v16710_v43  ;;  %v7204_v32 = vadd.f32 %v14891_v7, %v14885_v34  ;;  %v15926_v30 = vld [vmem:[%s20355_s3 + $0xe8] sm:$0xff]   ;;  %v15927_v17 = vld [vmem:[%s20355_s3 + $0xb0] sm:$0xff]  }
 0x224   :  { %v4893_v35 = vpop.f32.mrf.mxu0  ;;  %v4993_v50 = vpop.f32.mrf.mxu1  ;;  %v15928_v34 = vld [vmem:[%s20355_s3 + $0xf0] sm:$0xff]  }
 0x225   :  { %v7959_v26 = vadd.f32 %v7895_v51, %v7707_v41  ;;  %v7705_v47 = vmax.f32 %v7453_v44, 0.0  ;;  %v7456_v49 = vadd.f32 %v7204_v32, %v16731_v54  ;;  %v7202_v37 = vadd.f32 %v4977_v15, %v4893_v35 }
 0x226   :  { %v17946_v52 = vpop.f32.mrf.mxu0  ;;  %15141 = vmatmul.mubr.msk.bf16.vlgmr.msra.gmra.mxu0 %vm8309_vm2, %v15917_v36  ;;  %15161 = vmatmul.mubr.msk.bf16.vlgmr.msra.gmra.mxu1 %vm8309_vm2, %v15918_v61  ;;  %v17955_v56 = vpop.f32.mrf.mxu1 }
 0x227   :  { %v7957_v53 = vadd.f32 %v7893_v18, %v7705_v47  ;;  %v7708_v23 = vmax.f32 %v7456_v49, 0.0  ;;  %v7454_v59 = vadd.f32 %v7202_v37, %v16738_v58  ;;  %15177 = vmatpush3.bf16.msra.mxu0 %v17361_v20  ;;  %15197 = vmatpush3.bf16.msra.mxu1 %v17472_v63  ;;  %v15921_v20 = vld [vmem:[%s20355_s3 + $0x98] sm:$0xff]  }
 0x228   :  { %15178 = vmatprep.subr.bf16.mxu0 %v17367_v48  ;;  %v5074_v62 = vpop.f32.mrf.mxu0  ;;  %15198 = vmatprep.subr.bf16.mxu1 %v17476_v9  ;;  %v5174_v5 = vpop.f32.mrf.mxu1  ;;  %v15922_v63 = vld [vmem:[%s20355_s3 + $0xd8] sm:$0xff]  }
 0x229   :  { %v7960_v19 = vadd.f32 %v7896_v28, %v7708_v23  ;;  %v7706_v0 = vmax.f32 %v7454_v59, 0.0  ;;  %v7205_v46 = vadd.f32 %v5074_v62, %v4990_v33  ;;  %15144 = vmatprep.mubr.msk.bf16.mxu0 %vm8309_vm2, %v15919_v42  ;;  %15164 = vmatprep.mubr.msk.bf16.mxu1 %vm8309_vm2, %v15920_v11  ;;  %v15929_v23 = vld [vmem:[%s20355_s3 + $0xb8] sm:$0xff]  }
 0x22a   :  { %v17961_v3 = vpop.f32.mrf.mxu0  ;;  %v17971_v7 = vpop.f32.mrf.mxu1 }
 0x22b   :  { %15179 = vmatpush3.bf16.msra.mxu0 %v17367_v48  ;;  %v17976_v13 = vpack.c.bf16 %v7960_v19, %v7959_v26  ;;  %15199 = vmatpush3.bf16.msra.mxu1 %v17476_v9  ;;  %v15924_v48 = vld [vmem:[%s20355_s3 + $0xe0] sm:$0xff]   ;;  %v7958_v51 = vadd.f32 %v7894_v27, %v7706_v0  ;;  %v7457_v18 = vadd.f32 %v7205_v46, %v16710_v43  ;;  %v15930_v19 = vld [vmem:[%s20355_s3 + $0xf8] sm:$0xff]  }
 0x22c   :  { %15216 = vmatprep.subr.bf16.mxu0 %v17576_v29  ;;  %v5077_v1 = vpop.f32.mrf.mxu0  ;;  %15236 = vmatprep.subr.bf16.mxu1 %v17680_v60  ;;  %v5177_v14 = vpop.f32.mrf.mxu1  ;;  %v15931_v46 = vld [vmem:[%s20355_s3 + $0x100] sm:$0xff]  }
 0x22d   :  { %v7206_v10 = vadd.f32 %v5077_v1, %v4993_v50  ;;  %v17987_v15 = vpack.c.bf16 %v7958_v51, %v7957_v53  ;;  %v7709_v36 = vmax.f32 %v7457_v18, 0.0 }
 0x22e   :  { %v17984_v8 = vpop.f32.mrf.mxu0  ;;  %15145 = vmatmul.mubr.msk.bf16.gmra.mxu0 %vm8309_vm2, %v15921_v20  ;;  %15165 = vmatmul.mubr.msk.bf16.gmra.mxu1 %vm8309_vm2, %v15922_v63  ;;  %v17991_v9 = vpop.f32.mrf.mxu1  ;;  %v15932_v20 = vld [vmem:[%s20355_s3 + $0x140] sm:$0xff]  }
 0x22f   :  { %15148 = vmatprep.mubr.msk.bf16.mxu0 %vm8309_vm2, %v15923_v31  ;;  %15168 = vmatprep.mubr.msk.bf16.mxu1 %vm8309_vm2, %v15924_v48  ;;  %v7458_v27 = vadd.f32 %v7206_v10, %v16738_v58 }
 0x230   :  { %v5090_v16 = vpop.f32.mrf.mxu0  ;;  %v5190_v4 = vpop.f32.mrf.mxu1 }
 0x231   :  { %v7209_v21 = vadd.f32 %v5174_v5, %v5090_v16  ;;  %v7710_v37 = vmax.f32 %v7458_v27, 0.0 }
 0x232   :  { %v17995_v22 = vpop.f32.mrf.mxu0  ;;  %v18004_v25 = vpop.f32.mrf.mxu1 }
 0x233   :  { %v7461_v28 = vadd.f32 %v7209_v21, %v16710_v43 }
 0x234   :  { %v5093_v33 = vpop.f32.mrf.mxu0  ;;  %v5193_v32 = vpop.f32.mrf.mxu1 }
 0x235   :  { %v7713_v41 = vmax.f32 %v7461_v28, 0.0  ;;  %v7210_v44 = vadd.f32 %v5177_v14, %v5093_v33  ;;  %v15933_v28 = vld [vmem:[%s20355_s3 + $0x108] sm:$0xff]  }
 0x236   :  { %v18013_v61 = vpop.f32.mrf.mxu0  ;;  %15149 = vmatmul.mubr.msk.bf16.gmra.mxu0 %vm8309_vm2, %v15925_v12  ;;  %15169 = vmatmul.mubr.msk.bf16.gmra.mxu1 %vm8309_vm2, %v15926_v30  ;;  %v18019_v47 = vpop.f32.mrf.mxu1  ;;  %v15934_v33 = vld [vmem:[%s20355_s3 + $0x148] sm:$0xff]  }
 0x237   :  { %v7833_v35 = vadd.f32 %v7713_v41, %v7709_v36  ;;  %v7462_v26 = vadd.f32 %v7210_v44, %v16738_v58  ;;  %15152 = vmatprep.mubr.msk.bf16.mxu0 %vm8309_vm2, %v15927_v17  ;;  %15172 = vmatprep.mubr.msk.bf16.mxu1 %vm8309_vm2, %v15928_v34 }
 0x238   :  { %v5274_v49 = vpop.f32.mrf.mxu0  ;;  %v5374_v11 = vpop.f32.mrf.mxu1 }
 0x239   :  { %v7714_v50 = vmax.f32 %v7462_v26, 0.0  ;;  %v7213_v42 = vadd.f32 %v5274_v49, %v5190_v4  ;;  %v15936_v26 = vld [vmem:[%s20355_s3 + $0x150] sm:$0xff]  }
 0x23a   :  { %v18022_v53 = vpop.f32.mrf.mxu0  ;;  %v18031_v0 = vpop.f32.mrf.mxu1 }
 0x23b   :  { %v7834_v59 = vadd.f32 %v7714_v50, %v7710_v37  ;;  %v7465_v62 = vadd.f32 %v7213_v42, %v16710_v43 }
 0x23c   :  { %v5277_v5 = vpop.f32.mrf.mxu0  ;;  %v5377_v1 = vpop.f32.mrf.mxu1 }
 0x23d   :  { %v7717_v63 = vmax.f32 %v7465_v62, 0.0  ;;  %v7214_v31 = vadd.f32 %v5277_v5, %v5193_v32  ;;  %v15935_v32 = vld [vmem:[%s20355_s3 + $0x110] sm:$0xff]  }
 0x23e   :  { %v18039_v48 = vpop.f32.mrf.mxu0  ;;  %15153 = vmatmul.mubr.msk.bf16.gmra.mxu0 %vm8309_vm2, %v15929_v23  ;;  %15173 = vmatmul.mubr.msk.bf16.gmra.mxu1 %vm8309_vm2, %v15930_v19  ;;  %v18045_v14 = vpop.f32.mrf.mxu1 }
 0x23f   :  { %v7897_v51 = vadd.f32 %v7833_v35, %v7717_v63  ;;  %v7466_v10 = vadd.f32 %v7214_v31, %v16738_v58  ;;  %15180 = vmatprep.mubr.msk.bf16.mxu0 %vm8309_vm2, %v15931_v46  ;;  %15200 = vmatprep.mubr.msk.bf16.mxu1 %vm8309_vm2, %v15932_v20  ;;  %v15939_v46 = vld [vmem:[%s20355_s3 + $0x120] sm:$0xff]  }
 0x240   :  { %v5290_v16 = vpop.f32.mrf.mxu0  ;;  %v5390_v4 = vpop.f32.mrf.mxu1  ;;  %v15940_v20 = vld [vmem:[%s20355_s3 + $0x160] sm:$0xff]  }
 0x241   :  { %v7718_v18 = vmax.f32 %v7466_v10, 0.0  ;;  %v7217_v21 = vadd.f32 %v5374_v11, %v5290_v16 }
 0x242   :  { %v18048_v12 = vpop.f32.mrf.mxu0  ;;  %v18057_v34 = vpop.f32.mrf.mxu1 }
 0x243   :  { %v7898_v30 = vadd.f32 %v7834_v59, %v7718_v18  ;;  %v7469_v17 = vadd.f32 %v7217_v21, %v16710_v43 }
 0x244   :  { %v5293_v36 = vpop.f32.mrf.mxu0  ;;  %v5393_v44 = vpop.f32.mrf.mxu1 }
 0x245   :  { %v7721_v27 = vmax.f32 %v7469_v17, 0.0  ;;  %v7218_v41 = vadd.f32 %v5377_v1, %v5293_v36  ;;  %v15942_v17 = vld [vmem:[%s20355_s3 + $0x168] sm:$0xff]   ;;  %v15943_v36 = vld [vmem:[%s20355_s3 + $0x130] sm:$0xff]  }
 0x246   :  { %v18062_v35 = vpop.f32.mrf.mxu0  ;;  %15181 = vmatmul.mubr.msk.bf16.vlgmr.msra.gmra.mxu0 %vm8309_vm2, %v15933_v28  ;;  %15201 = vmatmul.mubr.msk.bf16.vlgmr.msra.gmra.mxu1 %vm8309_vm2, %v15934_v33  ;;  %v18071_v50 = vpop.f32.mrf.mxu1  ;;  %v15941_v28 = vld [vmem:[%s20355_s3 + $0x128] sm:$0xff]  }
 0x247   :  { %v7961_v49 = vadd.f32 %v7897_v51, %v7721_v27  ;;  %v7470_v37 = vadd.f32 %v7218_v41, %v16738_v58  ;;  %15217 = vmatpush3.bf16.msra.mxu0 %v17576_v29  ;;  %15237 = vmatpush3.bf16.msra.mxu1 %v17680_v60  ;;  %v15937_v29 = vld [vmem:[%s20355_s3 + $0x118] sm:$0xff]   ;;  %v15944_v41 = vld [vmem:[%s20355_s3 + $0x170] sm:$0xff]  }
 0x248   :  { %15218 = vmatprep.subr.bf16.mxu0 %v17580_v38  ;;  %v5474_v42 = vpop.f32.mrf.mxu0  ;;  %15238 = vmatprep.subr.bf16.mxu1 %v17684_v2  ;;  %v5574_v59 = vpop.f32.mrf.mxu1  ;;  %v15938_v60 = vld [vmem:[%s20355_s3 + $0x158] sm:$0xff]  }
 0x249   :  { %v7722_v11 = vmax.f32 %v7470_v37, 0.0  ;;  %v7221_v23 = vadd.f32 %v5474_v42, %v5390_v4  ;;  %15184 = vmatprep.mubr.msk.bf16.mxu0 %vm8309_vm2, %v15935_v32  ;;  %15204 = vmatprep.mubr.msk.bf16.mxu1 %vm8309_vm2, %v15936_v26 }
 0x24a   :  { %v18077_v62 = vpop.f32.mrf.mxu0  ;;  %v18087_v19 = vpop.f32.mrf.mxu1 }
 0x24b   :  { %15219 = vmatpush3.bf16.msra.mxu0 %v17580_v38  ;;  %15239 = vmatpush3.bf16.msra.mxu1 %v17684_v2  ;;  %v7962_v38 = vadd.f32 %v7898_v30, %v7722_v11  ;;  %v7473_v16 = vadd.f32 %v7221_v23, %v16710_v43  ;;  %v7212_v11 = vadd.f32 %v17971_v7, %v17995_v22 }
 0x24c   :  { %15256 = vmatprep.subr.bf16.mxu0 %v17778_v39  ;;  %v5477_v5 = vpop.f32.mrf.mxu0  ;;  %15276 = vmatprep.subr.bf16.mxu1 %v17872_v55  ;;  %v5577_v31 = vpop.f32.mrf.mxu1  ;;  %v7216_v7 = vadd.f32 %v18022_v53, %v18004_v25 }
 0x24d   :  { %v7222_v63 = vadd.f32 %v5477_v5, %v5393_v44  ;;  %v18101_v51 = vpack.c.bf16 %v7962_v38, %v7961_v49  ;;  %v7725_v44 = vmax.f32 %v7473_v16, 0.0 }
 0x24e   :  { %v18098_v1 = vpop.f32.mrf.mxu0  ;;  %15185 = vmatmul.mubr.msk.bf16.gmra.mxu0 %vm8309_vm2, %v15937_v29  ;;  %15205 = vmatmul.mubr.msk.bf16.gmra.mxu1 %vm8309_vm2, %v15938_v60  ;;  %v18105_v2 = vpop.f32.mrf.mxu1  ;;  %v7208_v60 = vadd.f32 %v17961_v3, %v17940_v6  ;;  %v7464_v3 = vadd.f32 %v7212_v11, %v16731_v54 }
 0x24f   :  { %15188 = vmatprep.mubr.msk.bf16.mxu0 %vm8309_vm2, %v15939_v46  ;;  %15208 = vmatprep.mubr.msk.bf16.mxu1 %vm8309_vm2, %v15940_v20  ;;  %v7474_v32 = vadd.f32 %v7222_v63, %v16738_v58  ;;  %v7211_v46 = vadd.f32 %v17955_v56, %v17984_v8  ;;  %v15945_v56 = vld [vmem:[%s20355_s3 + $0x138] sm:$0xff]   ;;  %v7220_v8 = vadd.f32 %v18031_v0, %v18048_v12  ;;  %v15948_v0 = vld [vmem:[%s20355_s3 + $0x1c0] sm:$0xff]  }
 0x250   :  { %v5490_v10 = vpop.f32.mrf.mxu0  ;;  %v5590_v21 = vpop.f32.mrf.mxu1  ;;  %v7468_v12 = vadd.f32 %v7216_v7, %v16731_v54 }
 0x251   :  { %v7225_v18 = vadd.f32 %v5574_v59, %v5490_v10  ;;  %v7726_v22 = vmax.f32 %v7474_v32, 0.0  ;;  %v7215_v10 = vadd.f32 %v18013_v61, %v17991_v9  ;;  %v15947_v9 = vld [vmem:[%s20355_s3 + $0x180] sm:$0xff]   ;;  %v7460_v61 = vadd.f32 %v7208_v60, %v16731_v54 }
 0x252   :  { %v18109_v4 = vpop.f32.mrf.mxu0  ;;  %v18118_v33 = vpop.f32.mrf.mxu1  ;;  %v7463_v16 = vadd.f32 %v7211_v46, %v16704_v40  ;;  %v7472_v32 = vadd.f32 %v7220_v8, %v16731_v54  ;;  %v15950_v8 = vld [vmem:[%s20355_s3 + $0x1c8] sm:$0xff]  }
 0x253   :  { %v7477_v30 = vadd.f32 %v7225_v18, %v16710_v43 }
 0x254   :  { %v5493_v27 = vpop.f32.mrf.mxu0  ;;  %v5593_v37 = vpop.f32.mrf.mxu1 }
 0x255   :  { %v7729_v26 = vmax.f32 %v7477_v30, 0.0  ;;  %v7226_v49 = vadd.f32 %v5577_v31, %v5493_v27  ;;  %v7207_v31 = vadd.f32 %v17946_v52, %v17929_v24  ;;  %v15946_v24 = vld [vmem:[%s20355_s3 + $0x178] sm:$0xff]   ;;  %v7467_v27 = vadd.f32 %v7215_v10, %v16704_v40 }
 0x256   :  { %v18127_v42 = vpop.f32.mrf.mxu0  ;;  %15189 = vmatmul.mubr.msk.bf16.gmra.mxu0 %vm8309_vm2, %v15941_v28  ;;  %15209 = vmatmul.mubr.msk.bf16.gmra.mxu1 %vm8309_vm2, %v15942_v17  ;;  %v18135_v29 = vpop.f32.mrf.mxu1  ;;  %v7724_v10 = vmax.f32 %v7472_v32, 0.0 }
 0x257   :  { %v7837_v23 = vadd.f32 %v7729_v26, %v7725_v44  ;;  %v7478_v59 = vadd.f32 %v7226_v49, %v16738_v58  ;;  %15192 = vmatprep.mubr.msk.bf16.mxu0 %vm8309_vm2, %v15943_v36  ;;  %15212 = vmatprep.mubr.msk.bf16.mxu1 %vm8309_vm2, %v15944_v41  ;;  %v7459_v36 = vadd.f32 %v7207_v31, %v16704_v40  ;;  %v7716_v44 = vmax.f32 %v7464_v3, 0.0 }
 0x258   :  { %v5674_v5 = vpop.f32.mrf.mxu0  ;;  %v5774_v63 = vpop.f32.mrf.mxu1 }
 0x259   :  { %v7730_v20 = vmax.f32 %v7478_v59, 0.0  ;;  %v7229_v38 = vadd.f32 %v5674_v5, %v5590_v21  ;;  %v7219_v21 = vadd.f32 %v18019_v47, %v18039_v48  ;;  %v7712_v48 = vmax.f32 %v7460_v61, 0.0 }
 0x25a   :  { %v18148_v6 = vpop.f32.mrf.mxu0  ;;  %v18160_v52 = vpop.f32.mrf.mxu1  ;;  %v7720_v59 = vmax.f32 %v7468_v12, 0.0 }
 0x25b   :  { %v7838_v25 = vadd.f32 %v7730_v20, %v7726_v22  ;;  %v7481_v53 = vadd.f32 %v7229_v38, %v16710_v43  ;;  %v7471_v60 = vadd.f32 %v7219_v21, %v16704_v40  ;;  %v7719_v22 = vmax.f32 %v7467_v27, 0.0  ;;  %v15949_v38 = vld [vmem:[%s20355_s3 + $0x188] sm:$0xff]  }
 0x25c   :  { %v5677_v18 = vpop.f32.mrf.mxu0  ;;  %v5777_v17 = vpop.f32.mrf.mxu1  ;;  %v7836_v31 = vadd.f32 %v7716_v44, %v7712_v48 }
 0x25d   :  { %v7733_v28 = vmax.f32 %v7481_v53, 0.0  ;;  %v7230_v30 = vadd.f32 %v5677_v18, %v5593_v37  ;;  %v7715_v37 = vmax.f32 %v7463_v16, 0.0  ;;  %v7723_v61 = vmax.f32 %v7471_v60, 0.0 }
 0x25e   :  { %v18175_v41 = vpop.f32.mrf.mxu0  ;;  %15193 = vmatmul.mubr.msk.bf16.gmra.mxu0 %vm8309_vm2, %v15945_v56  ;;  %15213 = vmatmul.mubr.msk.bf16.gmra.mxu1 %vm8309_vm2, %v15946_v24  ;;  %v18182_v47 = vpop.f32.mrf.mxu1 }
 0x25f   :  { %v7901_v26 = vadd.f32 %v7837_v23, %v7733_v28  ;;  %v7482_v49 = vadd.f32 %v7230_v30, %v16738_v58  ;;  %15220 = vmatprep.mubr.msk.bf16.mxu0 %vm8309_vm2, %v15947_v9  ;;  %15240 = vmatprep.mubr.msk.bf16.mxu1 %vm8309_vm2, %v15948_v0  ;;  %v7711_v23 = vmax.f32 %v7459_v36, 0.0  ;;  %v7900_v9 = vadd.f32 %v7836_v31, %v7720_v59  ;;  %v15952_v28 = vld [vmem:[%s20355_s3 + $0x1d0] sm:$0xff]   ;;  %v15955_v59 = vld [vmem:[%s20355_s3 + $0x1a0] sm:$0xff]  }
 0x260   :  { %v5690_v11 = vpop.f32.mrf.mxu0  ;;  %v18186_v7 = vpop.f32.mrf.mxu1 }
 0x261   :  { %v7734_v46 = vmax.f32 %v7482_v49, 0.0  ;;  %v7233_v5 = vadd.f32 %v5774_v63, %v5690_v11  ;;  %v7835_v53 = vadd.f32 %v7715_v37, %v7711_v23  ;;  %v7964_v30 = vadd.f32 %v7900_v9, %v7724_v10  ;;  %v15954_v37 = vld [vmem:[%s20355_s3 + $0x1d8] sm:$0xff]   ;;  %v15960_v9 = vld [vmem:[%s20355_s3 + $0x1f0] sm:$0xff]  }
 0x262   :  { %v18188_v20 = vpop.f32.mrf.mxu0  ;;  %v18197_v63 = vpop.f32.mrf.mxu1 }
 0x263   :  { %v7902_v56 = vadd.f32 %v7838_v25, %v7734_v46  ;;  %v7485_v3 = vadd.f32 %v7233_v5, %v16710_v43  ;;  %v15951_v25 = vld [vmem:[%s20355_s3 + $0x190] sm:$0xff]   ;;  %v7899_v12 = vadd.f32 %v7835_v53, %v7719_v22 }
 0x264   :  { %v5693_v24 = vpop.f32.mrf.mxu0  ;;  %v18199_v0 = vpop.f32.mrf.mxu1  ;;  %v15959_v53 = vld [vmem:[%s20355_s3 + $0x1b0] sm:$0xff]  }
 0x265   :  { %v7737_v16 = vmax.f32 %v7485_v3, 0.0  ;;  %v7234_v18 = vadd.f32 %v5777_v17, %v5693_v24  ;;  %v7963_v32 = vadd.f32 %v7899_v12, %v7723_v61  ;;  %v15958_v3 = vld [vmem:[%s20355_s3 + $0x1e8] sm:$0xff]   ;;  %v7228_v61 = vadd.f32 %v18087_v19, %v18109_v4 }
 0x266   :  { %v18204_v21 = vpop.f32.mrf.mxu0  ;;  %15221 = vmatmul.mubr.msk.bf16.vlgmr.msra.gmra.mxu0 %vm8309_vm2, %v15949_v38  ;;  %15241 = vmatmul.mubr.msk.bf16.vlgmr.msra.gmra.mxu1 %vm8309_vm2, %v15950_v8  ;;  %v14990_v17 = vpop.f32.mrf.mxu1  ;;  %v7224_v12 = vadd.f32 %v18077_v62, %v18057_v34  ;;  %v7223_v4 = vadd.f32 %v18062_v35, %v18045_v14  ;;  %v7231_v34 = vadd.f32 %v18127_v42, %v18105_v2  ;;  %v15961_v14 = vld [vmem:[%s20355_s3 + $0x1b8] sm:$0xff]   ;;  %v15963_v42 = vld [vmem:[%s20355_s3 + $0x200] sm:$0xff]  }
 0x267   :  { %v7965_v36 = vadd.f32 %v7901_v26, %v7737_v16  ;;  %v7486_v27 = vadd.f32 %v7234_v18, %v16738_v58  ;;  %15257 = vmatpush3.bf16.msra.mxu0 %v17778_v39  ;;  %15277 = vmatpush3.bf16.msra.mxu1 %v17872_v55  ;;  %v15953_v39 = vld [vmem:[%s20355_s3 + $0x198] sm:$0xff]   ;;  %v18226_v55 = vpack.c.bf16 %v7964_v30, %v7963_v32 }
 0x268   :  { %15258 = vmatprep.subr.bf16.mxu0 %v17782_v45  ;;  %v18215_v44 = vpop.f32.mrf.mxu0  ;;  %15278 = vmatprep.subr.bf16.mxu1 %v17881_v57  ;;  %v18219_v26 = vpop.f32.mrf.mxu1  ;;  %v7232_v30 = vadd.f32 %v18148_v6, %v18118_v33  ;;  %v7239_v62 = vadd.f32 %v18204_v21, %v18182_v47 }
 0x269   :  { %v7738_v49 = vmax.f32 %v7486_v27, 0.0  ;;  %15224 = vmatprep.mubr.msk.bf16.mxu0 %vm8309_vm2, %v15951_v25  ;;  %15244 = vmatprep.mubr.msk.bf16.mxu1 %vm8309_vm2, %v15952_v28  ;;  %v7227_v28 = vadd.f32 %v18071_v50, %v18098_v1  ;;  %v7236_v50 = vadd.f32 %v18160_v52, %v18188_v20  ;;  %v7476_v52 = vadd.f32 %v7224_v12, %v16731_v54 }
 0x26a   :  { %v14981_v48 = vpop.f32.mrf.mxu0  ;;  %v14991_v11 = vpop.f32.mrf.mxu1  ;;  %v7484_v20 = vadd.f32 %v7232_v30, %v16731_v54 }
 0x26b   :  { %15259 = vmatpush3.bf16.msra.mxu0 %v17782_v45  ;;  %15279 = vmatpush3.bf16.msra.mxu1 %v17881_v57  ;;  %v15956_v45 = vld [vmem:[%s20355_s3 + $0x1e0] sm:$0xff]   ;;  %v7966_v46 = vadd.f32 %v7902_v56, %v7738_v49  ;;  %v15957_v56 = vld [vmem:[%s20355_s3 + $0x1a8] sm:$0xff]   ;;  %v7240_v1 = vadd.f32 %v14981_v48, %v18197_v63  ;;  %v7479_v47 = vadd.f32 %v7227_v28, %v16704_v40 }
 0x26c   :  { %15296 = vmatprep.subr.bf16.mxu0 %v17976_v13  ;;  %v18236_v60 = vpop.f32.mrf.mxu0  ;;  %15316 = vmatprep.subr.bf16.mxu1 %v18226_v55  ;;  %v18242_v5 = vpop.f32.mrf.mxu1  ;;  %v7235_v63 = vadd.f32 %v18135_v29, %v18175_v41  ;;  %v15964_v48 = vld [vmem:[%s20355_s3 + $0x240] sm:$0xff]   ;;  %v7491_v29 = vadd.f32 %v7239_v62, %v16704_v40 }
 0x26d   :  { %v18245_v22 = vpack.c.bf16 %v7966_v46, %v7965_v36  ;;  %v7480_v36 = vadd.f32 %v7228_v61, %v16731_v54  ;;  %v7483_v46 = vadd.f32 %v7231_v34, %v16704_v40  ;;  %v7492_v41 = vadd.f32 %v7240_v1, %v16731_v54  ;;  %v15965_v1 = vld [vmem:[%s20355_s3 + $0x208] sm:$0xff]  }
 0x26e   :  { %v14984_v23 = vpop.f32.mrf.mxu0  ;;  %15225 = vmatmul.mubr.msk.bf16.gmra.mxu0 %vm8309_vm2, %v15953_v39  ;;  %15245 = vmatmul.mubr.msk.bf16.gmra.mxu1 %vm8309_vm2, %v15954_v37  ;;  %v14994_v57 = vpop.f32.mrf.mxu1  ;;  %v7475_v39 = vadd.f32 %v7223_v4, %v16704_v40  ;;  %v7736_v61 = vmax.f32 %v7484_v20, 0.0 }
 0x26f   :  { %15228 = vmatprep.mubr.msk.bf16.mxu0 %vm8309_vm2, %v15955_v59  ;;  %15248 = vmatprep.mubr.msk.bf16.mxu1 %vm8309_vm2, %v15956_v45  ;;  %v7243_v27 = vadd.f32 %v14990_v17, %v14984_v23  ;;  %v15962_v17 = vld [vmem:[%s20355_s3 + $0x1f8] sm:$0xff]   ;;  %v7732_v37 = vmax.f32 %v7480_v36, 0.0  ;;  %v7488_v23 = vadd.f32 %v7236_v50, %v16731_v54  ;;  %v7743_v50 = vmax.f32 %v7491_v29, 0.0 }
 0x270   :  { %v18249_v38 = vpop.f32.mrf.mxu0  ;;  %v18252_v31 = vpop.f32.mrf.mxu1  ;;  %v7727_v28 = vmax.f32 %v7475_v39, 0.0 }
 0x271   :  { %v7740_v34 = vmax.f32 %v7488_v23, 0.0 }
 0x272   :  { %v14985_v10 = vpop.f32.mrf.mxu0  ;;  %v14995_v8 = vpop.f32.mrf.mxu1 }
 0x273   :  { %v7244_v32 = vadd.f32 %v14991_v11, %v14985_v10  ;;  %v7495_v11 = vadd.f32 %v7243_v27, %v16704_v40 }
 0x274   :  { %v18263_v24 = vpop.f32.mrf.mxu0  ;;  %v18270_v16 = vpop.f32.mrf.mxu1 }
 0x275   :  { %v7496_v59 = vadd.f32 %v7244_v32, %v16731_v54  ;;  %v7747_v30 = vmax.f32 %v7495_v11, 0.0  ;;  %v7735_v32 = vmax.f32 %v7483_v46, 0.0 }
 0x276   :  { %v15000_v18 = vpop.f32.mrf.mxu0  ;;  %15229 = vmatmul.mubr.msk.bf16.gmra.mxu0 %vm8309_vm2, %v15957_v56  ;;  %15249 = vmatmul.mubr.msk.bf16.gmra.mxu1 %vm8309_vm2, %v15958_v3  ;;  %v15010_v25 = vpop.f32.mrf.mxu1 }
 0x277   :  { %15232 = vmatprep.mubr.msk.bf16.mxu0 %vm8309_vm2, %v15959_v53  ;;  %15252 = vmatprep.mubr.msk.bf16.mxu1 %vm8309_vm2, %v15960_v9  ;;  %v7247_v35 = vadd.f32 %v15000_v18, %v14994_v57  ;;  %v7728_v53 = vmax.f32 %v7476_v52, 0.0  ;;  %v7731_v9 = vmax.f32 %v7479_v47, 0.0  ;;  %v7487_v18 = vadd.f32 %v7235_v63, %v16704_v40 }
 0x278   :  { %v18281_v19 = vpop.f32.mrf.mxu0  ;;  %v18287_v49 = vpop.f32.mrf.mxu1  ;;  %v7748_v4 = vmax.f32 %v7496_v59, 0.0 }
 0x279   :  { %v7499_v10 = vadd.f32 %v7247_v35, %v16704_v40  ;;  %v7840_v27 = vadd.f32 %v7732_v37, %v7728_v53  ;;  %v7839_v52 = vadd.f32 %v7731_v9, %v7727_v28  ;;  %v7739_v20 = vmax.f32 %v7487_v18, 0.0 }
 0x27a   :  { %v15001_v33 = vpop.f32.mrf.mxu0  ;;  %v15011_v2 = vpop.f32.mrf.mxu1 }
 0x27b   :  { %v7248_v6 = vadd.f32 %v15001_v33, %v14995_v8  ;;  %v7744_v33 = vmax.f32 %v7492_v41, 0.0  ;;  %v7904_v47 = vadd.f32 %v7840_v27, %v7736_v61  ;;  %v7903_v46 = vadd.f32 %v7839_v52, %v7735_v32  ;;  %v15968_v41 = vld [vmem:[%s20355_s3 + $0x250] sm:$0xff]   ;;  %v15971_v32 = vld [vmem:[%s20355_s3 + $0x220] sm:$0xff]  }
 0x27c   :  { %v18310_v21 = vpop.f32.mrf.mxu0  ;;  %v18318_v45 = vpop.f32.mrf.mxu1  ;;  %v7238_v52 = vadd.f32 %v18236_v60, %v18199_v0  ;;  %v15976_v0 = vld [vmem:[%s20355_s3 + $0x270] sm:$0xff]   ;;  %v7245_v60 = vadd.f32 %v18281_v19, %v18252_v31 }
 0x27d   :  { %v7500_v56 = vadd.f32 %v7248_v6, %v16731_v54  ;;  %v7844_v39 = vadd.f32 %v7748_v4, %v7744_v33  ;;  %v7968_v23 = vadd.f32 %v7904_v47, %v7740_v34  ;;  %v7967_v53 = vadd.f32 %v7903_v46, %v7739_v20  ;;  %v15974_v47 = vld [vmem:[%s20355_s3 + $0x268] sm:$0xff]  }
 0x27e   :  { %v15004_v57 = vpop.f32.mrf.mxu0  ;;  %15233 = vmatmul.mubr.msk.bf16.gmra.mxu0 %vm8309_vm2, %v15961_v14  ;;  %15253 = vmatmul.mubr.msk.bf16.gmra.mxu1 %vm8309_vm2, %v15962_v17  ;;  %v18329_v8 = vpop.f32.mrf.mxu1  ;;  %v7751_v14 = vmax.f32 %v7499_v10, 0.0  ;;  %v15966_v17 = vld [vmem:[%s20355_s3 + $0x248] sm:$0xff]  }
 0x27f   :  { %v7251_v3 = vadd.f32 %v15010_v25, %v15004_v57  ;;  %15260 = vmatprep.mubr.msk.bf16.mxu0 %vm8309_vm2, %v15963_v42  ;;  %15280 = vmatprep.mubr.msk.bf16.mxu1 %vm8309_vm2, %v15964_v48  ;;  %v7752_v35 = vmax.f32 %v7500_v56, 0.0  ;;  %v7843_v48 = vadd.f32 %v7747_v30, %v7743_v50  ;;  %v18370_v4 = vpack.c.bf16 %v7968_v23, %v7967_v53 }
 0x280   :  { %v18332_v12 = vpop.f32.mrf.mxu0  ;;  %v18336_v36 = vpop.f32.mrf.mxu1 }
 0x281   :  { %v7503_v25 = vadd.f32 %v7251_v3, %v16704_v40  ;;  %v7907_v57 = vadd.f32 %v7843_v48, %v7751_v14  ;;  %v7908_v10 = vadd.f32 %v7844_v39, %v7752_v35  ;;  %v7237_v14 = vadd.f32 %v18215_v44, %v18186_v7  ;;  %v15975_v7 = vld [vmem:[%s20355_s3 + $0x230] sm:$0xff]  }
 0x282   :  { %v15005_v62 = vpop.f32.mrf.mxu0  ;;  %v18344_v42 = vpop.f32.mrf.mxu1  ;;  %v7242_v35 = vadd.f32 %v18242_v5, %v18263_v24  ;;  %v7241_v44 = vadd.f32 %v18219_v26, %v18249_v38  ;;  %v7246_v5 = vadd.f32 %v18310_v21, %v18270_v16  ;;  %v7249_v48 = vadd.f32 %v18287_v49, %v18332_v12 }
 0x283   :  { %v7252_v6 = vadd.f32 %v15011_v2, %v15005_v62  ;;  %v7755_v37 = vmax.f32 %v7503_v25, 0.0  ;;  %v15967_v2 = vld [vmem:[%s20355_s3 + $0x210] sm:$0xff]   ;;  %v15970_v25 = vld [vmem:[%s20355_s3 + $0x258] sm:$0xff]  }
 0x284   :  { %v18346_v63 = vpop.f32.mrf.mxu0  ;;  %v18349_v59 = vpop.f32.mrf.mxu1  ;;  %v7494_v26 = vadd.f32 %v7242_v35, %v16738_v58  ;;  %v7493_v49 = vadd.f32 %v7241_v44, %v16710_v43  ;;  %v7498_v12 = vadd.f32 %v7246_v5, %v16738_v58 }
 0x285   :  { %v7504_v11 = vadd.f32 %v7252_v6, %v16731_v54  ;;  %v7971_v61 = vadd.f32 %v7907_v57, %v7755_v37  ;;  %v7489_v37 = vadd.f32 %v7237_v14, %v16710_v43  ;;  %v7250_v38 = vadd.f32 %v18318_v45, %v18346_v63 }
 0x286   :  { %v15020_v29 = vpop.f32.mrf.mxu0  ;;  %15261 = vmatmul.mubr.msk.bf16.vlgmr.msra.gmra.mxu0 %vm8309_vm2, %v15965_v1  ;;  %15281 = vmatmul.mubr.msk.bf16.vlgmr.msra.gmra.mxu1 %vm8309_vm2, %v15966_v17  ;;  %v18360_v3 = vpop.f32.mrf.mxu1  ;;  %v15973_v17 = vld [vmem:[%s20355_s3 + $0x228] sm:$0xff]   ;;  %v7497_v45 = vadd.f32 %v7245_v60, %v16710_v43 }
 0x287   :  { %v7756_v56 = vmax.f32 %v7504_v11, 0.0  ;;  %15297 = vmatpush3.bf16.msra.mxu0 %v17976_v13  ;;  %15317 = vmatpush3.bf16.msra.mxu1 %v18226_v55  ;;  %v15969_v13 = vld [vmem:[%s20355_s3 + $0x218] sm:$0xff]   ;;  %v7255_v16 = vadd.f32 %v15020_v29, %v18329_v8  ;;  %v7490_v11 = vadd.f32 %v7238_v52, %v16738_v58  ;;  %v7501_v8 = vadd.f32 %v7249_v48, %v16710_v43 }
 0x288   :  { %15298 = vmatprep.subr.bf16.mxu0 %v17987_v15  ;;  %v18364_v9 = vpop.f32.mrf.mxu0  ;;  %15318 = vmatprep.subr.bf16.mxu1 %v18101_v51  ;;  %v18368_v28 = vpop.f32.mrf.mxu1  ;;  %v7741_v23 = vmax.f32 %v7489_v37, 0.0  ;;  %v7746_v29 = vmax.f32 %v7494_v26, 0.0  ;;  %v7749_v14 = vmax.f32 %v7497_v45, 0.0 }
 0x289   :  { %v7972_v18 = vadd.f32 %v7908_v10, %v7756_v56  ;;  %15264 = vmatprep.mubr.msk.bf16.mxu0 %vm8309_vm2, %v15967_v2  ;;  %15284 = vmatprep.mubr.msk.bf16.mxu1 %vm8309_vm2, %v15968_v41  ;;  %v7502_v41 = vadd.f32 %v7250_v38, %v16738_v58  ;;  %v7507_v57 = vadd.f32 %v7255_v16, %v16704_v40  ;;  %v15977_v56 = vld [vmem:[%s20355_s3 + $0x238] sm:$0xff]   ;;  %v7742_v53 = vmax.f32 %v7490_v11, 0.0  ;;  %v15981_v16 = vld [vmem:[%s20355_s3 + $0x288] sm:$0xff]  }
 0x28a   :  { %v15021_v30 = vpop.f32.mrf.mxu0  ;;  %v15031_v27 = vpop.f32.mrf.mxu1 }
 0x28b   :  { %15299 = vmatpush3.bf16.msra.mxu0 %v17987_v15  ;;  %v18377_v55 = vpack.c.bf16 %v7972_v18, %v7971_v61  ;;  %15319 = vmatpush3.bf16.msra.mxu1 %v18101_v51  ;;  %v15972_v15 = vld [vmem:[%s20355_s3 + $0x260] sm:$0xff]   ;;  %v7256_v31 = vadd.f32 %v15021_v30, %v18344_v42  ;;  %v7842_v52 = vadd.f32 %v7746_v29, %v7742_v53  ;;  %v15983_v53 = vld [vmem:[%s20355_s3 + $0x290] sm:$0xff]  }
 0x28c   :  { %15336 = vmatprep.subr.bf16.mxu0 %v18370_v4  ;;  %v18387_v34 = vpop.f32.mrf.mxu0  ;;  %v18393_v50 = vpop.f32.mrf.mxu1 }
 0x28d   :  { %15356 = vmatprep.subr.bf16.mxu1 %v18377_v55  ;;  %v7508_v61 = vadd.f32 %v7256_v31, %v16731_v54 }
 0x28e   :  { %v15024_v62 = vpop.f32.mrf.mxu0  ;;  %15265 = vmatmul.mubr.msk.bf16.gmra.mxu0 %vm8309_vm2, %v15969_v13  ;;  %15285 = vmatmul.mubr.msk.bf16.gmra.mxu1 %vm8309_vm2, %v15970_v25  ;;  %v15034_v51 = vpop.f32.mrf.mxu1  ;;  %v15979_v25 = vld [vmem:[%s20355_s3 + $0x280] sm:$0xff]  }
 0x28f   :  { %15268 = vmatprep.mubr.msk.bf16.mxu0 %vm8309_vm2, %v15971_v32  ;;  %15288 = vmatprep.mubr.msk.bf16.mxu1 %vm8309_vm2, %v15972_v15  ;;  %v7259_v63 = vadd.f32 %v18360_v3, %v15024_v62  ;;  %v15978_v3 = vld [vmem:[%s20355_s3 + $0x278] sm:$0xff]   ;;  %v7745_v32 = vmax.f32 %v7493_v49, 0.0  ;;  %v7750_v15 = vmax.f32 %v7498_v12, 0.0  ;;  %v7760_v44 = vmax.f32 %v7508_v61, 0.0 }
 0x290   :  { %v18398_v1 = vpop.f32.mrf.mxu0  ;;  %v18401_v33 = vpop.f32.mrf.mxu1 }
 0x291   :  { %v7511_v35 = vadd.f32 %v7259_v63, %v16704_v40  ;;  %v7841_v37 = vadd.f32 %v7745_v32, %v7741_v23  ;;  %v7906_v26 = vadd.f32 %v7842_v52, %v7750_v15 }
 0x292   :  { %v15025_v6 = vpop.f32.mrf.mxu0  ;;  %v15035_v20 = vpop.f32.mrf.mxu1 }
 0x293   :  { %v7260_v42 = vadd.f32 %v15031_v27, %v15025_v6  ;;  %v15980_v27 = vld [vmem:[%s20355_s3 + $0x2c0] sm:$0xff]   ;;  %v7905_v12 = vadd.f32 %v7841_v37, %v7749_v14 }
 0x294   :  { %v18422_v24 = vpop.f32.mrf.mxu0  ;;  %v18431_v39 = vpop.f32.mrf.mxu1 }
 0x295   :  { %v7512_v6 = vadd.f32 %v7260_v42, %v16731_v54 }
 0x296   :  { %v15040_v21 = vpop.f32.mrf.mxu0  ;;  %15269 = vmatmul.mubr.msk.bf16.gmra.mxu0 %vm8309_vm2, %v15973_v17  ;;  %15289 = vmatmul.mubr.msk.bf16.gmra.mxu1 %vm8309_vm2, %v15974_v47  ;;  %v15050_v19 = vpop.f32.mrf.mxu1  ;;  %v7754_v47 = vmax.f32 %v7502_v41, 0.0 }
 0x297   :  { %15272 = vmatprep.mubr.msk.bf16.mxu0 %vm8309_vm2, %v15975_v7  ;;  %15292 = vmatprep.mubr.msk.bf16.mxu1 %vm8309_vm2, %v15976_v0  ;;  %v7263_v18 = vadd.f32 %v15040_v21, %v15034_v51  ;;  %v7753_v51 = vmax.f32 %v7501_v8, 0.0  ;;  %v7763_v21 = vmax.f32 %v7511_v35, 0.0  ;;  %v7764_v11 = vmax.f32 %v7512_v6, 0.0 }
 0x298   :  { %v18445_v2 = vpop.f32.mrf.mxu0  ;;  %v18451_v46 = vpop.f32.mrf.mxu1  ;;  %v7970_v8 = vadd.f32 %v7906_v26, %v7754_v47  ;;  %v7258_v35 = vadd.f32 %v18393_v50, %v18422_v24 }
 0x299   :  { %v7515_v5 = vadd.f32 %v7263_v18, %v16704_v40  ;;  %v7969_v41 = vadd.f32 %v7905_v12, %v7753_v51  ;;  %v7848_v18 = vadd.f32 %v7764_v11, %v7760_v44 }
 0x29a   :  { %v15041_v10 = vpop.f32.mrf.mxu0  ;;  %v15051_v13 = vpop.f32.mrf.mxu1 }
 0x29b   :  { %v7264_v30 = vadd.f32 %v15041_v10, %v15035_v20  ;;  %v7759_v20 = vmax.f32 %v7507_v57, 0.0  ;;  %v7767_v63 = vmax.f32 %v7515_v5, 0.0  ;;  %v7253_v57 = vadd.f32 %v18364_v9, %v18336_v36 }
 0x29c   :  { %v18468_v62 = vpop.f32.mrf.mxu0  ;;  %v18472_v17 = vpop.f32.mrf.mxu1  ;;  %v7254_v10 = vadd.f32 %v18387_v34, %v18349_v59  ;;  %v8007_v59 = vpack.c.bf16 %v7970_v8, %v7969_v41  ;;  %v7257_v9 = vadd.f32 %v18368_v28, %v18398_v1  ;;  %v15984_v1 = vld [vmem:[%s20355_s3 + $0x298] sm:$0xff]   ;;  %v15992_v41 = vld [vmem:[%s20355_s3 + $0x2e8] sm:$0xff]  }
 0x29d   :  { %v7516_v0 = vadd.f32 %v7264_v30, %v16731_v54  ;;  %v7847_v61 = vadd.f32 %v7763_v21, %v7759_v20  ;;  %v18510_v14 = vadd.f32 %v7253_v57, %v16710_v43  ;;  %v7262_v20 = vadd.f32 %v18468_v62, %v18431_v39  ;;  %v15990_v39 = vld [vmem:[%s20355_s3 + $0x2e0] sm:$0xff]  }
 0x29e   :  { %v15044_v7 = vpop.f32.mrf.mxu0  ;;  %15273 = vmatmul.mubr.msk.bf16.gmra.mxu0 %vm8309_vm2, %v15977_v56  ;;  %15293 = vmatmul.mubr.msk.bf16.gmra.mxu1 %vm8309_vm2, %v15978_v3  ;;  %v18479_v48 = vpop.f32.mrf.mxu1  ;;  %v18513_v51 = vadd.f32 %v7254_v10, %v16738_v58  ;;  %v18530_v24 = vadd.f32 %v7257_v9, %v16710_v43  ;;  %v18548_v62 = vadd.f32 %v7258_v35, %v16738_v58 }
 0x29f   :  { %v7267_v60 = vadd.f32 %v15050_v19, %v15044_v7  ;;  %15300 = vmatprep.mubr.msk.bf16.mxu0 %vm8309_vm2, %v15979_v25  ;;  %15320 = vmatprep.mubr.msk.bf16.mxu1 %vm8309_vm2, %v15980_v27  ;;  %v15982_v19 = vld [vmem:[%s20355_s3 + $0x2c8] sm:$0xff]   ;;  %v7768_v42 = vmax.f32 %v7516_v0, 0.0  ;;  %v7911_v34 = vadd.f32 %v7847_v61, %v7767_v63  ;;  %v15988_v7 = vld [vmem:[%s20355_s3 + $0x2d8] sm:$0xff]   ;;  %v7757_v44 = vmax.f32 %v18510_v14, 0.0  ;;  %v15997_v14 = vld [vmem:[%s20355_s3 + $0x310] sm:$0xff]  }
 0x2a0   :  { %v6490_v38 = vpop.f32.mrf.mxu0  ;;  %v18489_v49 = vpop.f32.mrf.mxu1 }
 0x2a1   :  { %v7519_v31 = vadd.f32 %v7267_v60, %v16704_v40  ;;  %v7912_v27 = vadd.f32 %v7848_v18, %v7768_v42  ;;  %v7265_v5 = vadd.f32 %v18451_v46, %v6490_v38  ;;  %v7761_v38 = vmax.f32 %v18530_v24, 0.0 }
 0x2a2   :  { %v15045_v45 = vpop.f32.mrf.mxu0  ;;  %v15055_v29 = vpop.f32.mrf.mxu1 }
 0x2a3   :  { %v7268_v23 = vadd.f32 %v15051_v13, %v15045_v45  ;;  %v7771_v30 = vmax.f32 %v7519_v31, 0.0  ;;  %v15986_v13 = vld [vmem:[%s20355_s3 + $0x2d0] sm:$0xff]   ;;  %v15987_v45 = vld [vmem:[%s20355_s3 + $0x2a8] sm:$0xff]  }
 0x2a4   :  { %v6493_v56 = vpop.f32.mrf.mxu0  ;;  %v18499_v25 = vpop.f32.mrf.mxu1 }
 0x2a5   :  { %v7520_v3 = vadd.f32 %v7268_v23, %v16731_v54  ;;  %v7975_v6 = vadd.f32 %v7911_v34, %v7771_v30  ;;  %v7266_v0 = vadd.f32 %v18472_v17, %v6493_v56  ;;  %v15993_v30 = vld [vmem:[%s20355_s3 + $0x2f0] sm:$0xff]  }
 0x2a6   :  { %v15060_v36 = vpop.f32.mrf.mxu0  ;;  %15301 = vmatmul.mubr.msk.bf16.vlgmr.msra.gmra.mxu0 %vm8309_vm2, %v15981_v16  ;;  %15321 = vmatmul.mubr.msk.bf16.vlgmr.msra.gmra.mxu1 %vm8309_vm2, %v15982_v19  ;;  %v15070_v15 = vpop.f32.mrf.mxu1  ;;  %v18558_v16 = vadd.f32 %v7262_v20, %v16738_v58 }
 0x2a7   :  { %v7772_v32 = vmax.f32 %v7520_v3, 0.0  ;;  %15337 = vmatpush3.bf16.msra.mxu0 %v18370_v4  ;;  %15357 = vmatpush3.bf16.msra.mxu1 %v18377_v55  ;;  %v7261_v4 = vadd.f32 %v18445_v2, %v18401_v33  ;;  %v15985_v55 = vld [vmem:[%s20355_s3 + $0x2a0] sm:$0xff]   ;;  %v7271_v26 = vadd.f32 %v15060_v36, %v18479_v48  ;;  %v18564_v48 = vadd.f32 %v7265_v5, %v16710_v43  ;;  %v15995_v5 = vld [vmem:[%s20355_s3 + $0x2f8] sm:$0xff]  }
 0x2a8   :  { %15338 = vmatprep.subr.bf16.mxu0 %v18245_v22  ;;  %v6674_v28 = vpop.f32.mrf.mxu0  ;;  %15358 = vmatprep.subr.bf16.mxu1 %v8007_v59  ;;  %v6774_v47 = vpop.f32.mrf.mxu1  ;;  %v18567_v19 = vadd.f32 %v7266_v0, %v16738_v58  ;;  %v7766_v10 = vmax.f32 %v18558_v16, 0.0 }
 0x2a9   :  { %v7976_v52 = vadd.f32 %v7912_v27, %v7772_v32  ;;  %15304 = vmatprep.mubr.msk.bf16.mxu0 %vm8309_vm2, %v15983_v53  ;;  %15324 = vmatprep.mubr.msk.bf16.mxu1 %vm8309_vm2, %v15986_v13  ;;  %v18551_v37 = vadd.f32 %v7261_v4, %v16710_v43  ;;  %v7269_v21 = vadd.f32 %v6674_v28, %v18489_v49  ;;  %v7762_v49 = vmax.f32 %v18548_v62, 0.0 }
 0x2aa   :  { %v15061_v50 = vpop.f32.mrf.mxu0  ;;  %v15071_v2 = vpop.f32.mrf.mxu1  ;;  %v18576_v63 = vadd.f32 %v7271_v26, %v16704_v40  ;;  %v7769_v3 = vmax.f32 %v18564_v48, 0.0 }
 0x2ab   :  { %15339 = vmatpush3.bf16.msra.mxu0 %v18245_v22  ;;  %v18535_v33 = vpack.c.bf16 %v7976_v52, %v7975_v6  ;;  %15359 = vmatpush3.bf16.msra.mxu1 %v8007_v59  ;;  %v7758_v22 = vmax.f32 %v18513_v51, 0.0  ;;  %v7272_v11 = vadd.f32 %v15061_v50, %v15055_v29  ;;  %v7765_v8 = vmax.f32 %v18551_v37, 0.0  ;;  %v15989_v29 = vld [vmem:[%s20355_s3 + $0x2b0] sm:$0xff]   ;;  %v15991_v52 = vld [vmem:[%s20355_s3 + $0x2b8] sm:$0xff]  }
 0x2ac   :  { %v6677_v60 = vpop.f32.mrf.mxu0  ;;  %v6777_v46 = vpop.f32.mrf.mxu1  ;;  %v18587_v56 = vadd.f32 %v7269_v21, %v16710_v43  ;;  %v7775_v36 = vmax.f32 %v18576_v63, 0.0  ;;  %v7845_v51 = vadd.f32 %v7761_v38, %v7757_v44 }
 0x2ad   :  { %15376 = vmatprep.subr.bf16.mxu0 %v18535_v33  ;;  %v7270_v42 = vadd.f32 %v6677_v60, %v18499_v25  ;;  %v18590_v53 = vadd.f32 %v7272_v11, %v16731_v54  ;;  %v7770_v25 = vmax.f32 %v18567_v19, 0.0 }
 0x2ae   :  { %v15064_v17 = vpop.f32.mrf.mxu0  ;;  %15305 = vmatmul.mubr.msk.bf16.gmra.mxu0 %vm8309_vm2, %v15984_v1  ;;  %v15074_v31 = vpop.f32.mrf.mxu1  ;;  %15325 = vmatmul.mubr.msk.bf16.gmra.mxu1 %vm8309_vm2, %v15988_v7  ;;  %v15994_v7 = vld [vmem:[%s20355_s3 + $0x300] sm:$0xff]   ;;  %v7909_v24 = vadd.f32 %v7845_v51, %v7765_v8 }
 0x2af   :  { %15308 = vmatprep.mubr.msk.bf16.mxu0 %vm8309_vm2, %v15985_v55  ;;  %15328 = vmatprep.mubr.msk.bf16.mxu1 %vm8309_vm2, %v15990_v39  ;;  %v7275_v61 = vadd.f32 %v15070_v15, %v15064_v17  ;;  %v18599_v59 = vadd.f32 %v7270_v42, %v16738_v58  ;;  %v7773_v15 = vmax.f32 %v18587_v56, 0.0  ;;  %v7776_v35 = vmax.f32 %v18590_v53, 0.0  ;;  %v15998_v17 = vld [vmem:[%s20355_s3 + $0x340] sm:$0xff]  }
 0x2b0   :  { %v6690_v12 = vpop.f32.mrf.mxu0  ;;  %v6790_v23 = vpop.f32.mrf.mxu1  ;;  %v7973_v37 = vadd.f32 %v7909_v24, %v7769_v3 }
 0x2b1   :  { %v7273_v9 = vadd.f32 %v6774_v47, %v6690_v12  ;;  %v7527_v28 = vadd.f32 %v7275_v61, %v16704_v40  ;;  %v7774_v47 = vmax.f32 %v18599_v59, 0.0  ;;  %v15996_v61 = vld [vmem:[%s20355_s3 + $0x308] sm:$0xff]  }
 0x2b2   :  { %v15065_v57 = vpop.f32.mrf.mxu0  ;;  %v15075_v18 = vpop.f32.mrf.mxu1 }
 0x2b3   :  { %v7276_v34 = vadd.f32 %v15071_v2, %v15065_v57  ;;  %v7525_v55 = vadd.f32 %v7273_v9, %v16710_v43  ;;  %v7779_v60 = vmax.f32 %v7527_v28, 0.0 }
 0x2b4   :  { %v6693_v13 = vpop.f32.mrf.mxu0  ;;  %v6793_v27 = vpop.f32.mrf.mxu1 }
 0x2b5   :  { %v7274_v1 = vadd.f32 %v6777_v46, %v6693_v13  ;;  %v7528_v50 = vadd.f32 %v7276_v34, %v16731_v54  ;;  %v7777_v21 = vmax.f32 %v7525_v55, 0.0  ;;  %v7851_v8 = vadd.f32 %v7779_v60, %v7775_v36 }
 0x2b6   :  { %v15080_v32 = vpop.f32.mrf.mxu0  ;;  %15309 = vmatmul.mubr.msk.bf16.gmra.mxu0 %vm8309_vm2, %v15987_v45  ;;  %v15090_v4 = vpop.f32.mrf.mxu1  ;;  %15329 = vmatmul.mubr.msk.bf16.gmra.mxu1 %vm8309_vm2, %v15992_v41  ;;  %v7846_v45 = vadd.f32 %v7762_v49, %v7758_v22 }
 0x2b7   :  { %15312 = vmatprep.mubr.msk.bf16.mxu0 %vm8309_vm2, %v15989_v29  ;;  %15332 = vmatprep.mubr.msk.bf16.mxu1 %vm8309_vm2, %v15993_v30  ;;  %v7279_v20 = vadd.f32 %v15080_v32, %v15074_v31  ;;  %v7526_v39 = vadd.f32 %v7274_v1, %v16738_v58  ;;  %v7780_v11 = vmax.f32 %v7528_v50, 0.0  ;;  %v16003_v1 = vld [vmem:[%s20355_s3 + $0x350] sm:$0xff]  }
 0x2b8   :  { %v6874_v6 = vpop.f32.mrf.mxu0  ;;  %v6974_v2 = vpop.f32.mrf.mxu1  ;;  %v7910_v22 = vadd.f32 %v7846_v45, %v7766_v10  ;;  %v16000_v10 = vld [vmem:[%s20355_s3 + $0x348] sm:$0xff]   ;;  %v16007_v45 = vld [vmem:[%s20355_s3 + $0x360] sm:$0xff]  }
 0x2b9   :  { %v7277_v62 = vadd.f32 %v6874_v6, %v6790_v23  ;;  %v7531_v31 = vadd.f32 %v7279_v20, %v16704_v40  ;;  %v7778_v23 = vmax.f32 %v7526_v39, 0.0  ;;  %v7849_v20 = vadd.f32 %v7777_v21, %v7773_v15  ;;  %v16001_v21 = vld [vmem:[%s20355_s3 + $0x320] sm:$0xff]  }
 0x2ba   :  { %v15081_v0 = vpop.f32.mrf.mxu0  ;;  %v15091_v46 = vpop.f32.mrf.mxu1  ;;  %v7974_v38 = vadd.f32 %v7910_v22, %v7770_v25  ;;  %v7852_v25 = vadd.f32 %v7780_v11, %v7776_v35  ;;  %v16005_v22 = vld [vmem:[%s20355_s3 + $0x330] sm:$0xff]  }
 0x2bb   :  { %v7280_v26 = vadd.f32 %v15081_v0, %v15075_v18  ;;  %v7529_v29 = vadd.f32 %v7277_v62, %v16710_v43  ;;  %v7783_v18 = vmax.f32 %v7531_v31, 0.0  ;;  %v16004_v31 = vld [vmem:[%s20355_s3 + $0x358] sm:$0xff]  }
 0x2bc   :  { %v6877_v16 = vpop.f32.mrf.mxu0  ;;  %v6977_v12 = vpop.f32.mrf.mxu1  ;;  %v8009_v48 = vpack.c.bf16 %v7974_v38, %v7973_v37 }
 0x2bd   :  { %v7278_v19 = vadd.f32 %v6877_v16, %v6793_v27  ;;  %v7532_v41 = vadd.f32 %v7280_v26, %v16731_v54  ;;  %v7781_v34 = vmax.f32 %v7529_v29, 0.0 }
 0x2be   :  { %v15084_v42 = vpop.f32.mrf.mxu0  ;;  %15313 = vmatmul.mubr.msk.bf16.gmra.mxu0 %vm8309_vm2, %v15991_v52  ;;  %15333 = vmatmul.mubr.msk.bf16.gmra.mxu1 %vm8309_vm2, %v15995_v5  ;;  %v15094_v53 = vpop.f32.mrf.mxu1 }
 0x2bf   :  { %v7283_v57 = vadd.f32 %v15090_v4, %v15084_v42  ;;  %15340 = vmatprep.mubr.msk.bf16.mxu0 %vm8309_vm2, %v15994_v7  ;;  %15360 = vmatprep.mubr.msk.bf16.mxu1 %vm8309_vm2, %v15998_v17  ;;  %v7530_v30 = vadd.f32 %v7278_v19, %v16738_v58  ;;  %v7784_v27 = vmax.f32 %v7532_v41, 0.0  ;;  %v7915_v7 = vadd.f32 %v7851_v8, %v7783_v18  ;;  %v16002_v53 = vld [vmem:[%s20355_s3 + $0x328] sm:$0xff]   ;;  %v18760_v8 = vpop.permute.xlu1 %10883 }
 0x2c0   :  { %v6890_v49 = vpop.f32.mrf.mxu0  ;;  %v6990_v9 = vpop.f32.mrf.mxu1  ;;  %v7913_v56 = vadd.f32 %v7849_v20, %v7781_v34  ;;  %v16016_v20 = vld [vmem:[%s20355_s3 + $0x3c8] sm:$0xff]  }
 0x2c1   :  { %v7535_v13 = vadd.f32 %v7283_v57, %v16704_v40  ;;  %v7281_v59 = vadd.f32 %v6974_v2, %v6890_v49  ;;  %v7782_v6 = vmax.f32 %v7530_v30, 0.0  ;;  %v7850_v2 = vadd.f32 %v7778_v23, %v7774_v47  ;;  %v16011_v30 = vld [vmem:[%s20355_s3 + $0x370] sm:$0xff]  }
 0x2c2   :  { %v15085_v44 = vpop.f32.mrf.mxu0  ;;  %v15095_v28 = vpop.f32.mrf.mxu1  ;;  %v7916_v63 = vadd.f32 %v7852_v25, %v7784_v27  ;;  %v16012_v27 = vld [vmem:[%s20355_s3 + $0x378] sm:$0xff]  }
 0x2c3   :  { %v7533_v32 = vadd.f32 %v7281_v59, %v16710_v43  ;;  %v7284_v40 = vadd.f32 %v15091_v46, %v15085_v44  ;;  %v7787_v52 = vmax.f32 %v7535_v13, 0.0  ;;  %v7914_v47 = vadd.f32 %v7850_v2, %v7782_v6  ;;  %v16006_v44 = vld [vmem:[%s20355_s3 + $0x338] sm:$0xff]   ;;  %v16010_v6 = vld [vmem:[%s20355_s3 + $0x388] sm:$0xff]  }
 0x2c4   :  { %v6893_v4 = vpop.f32.mrf.mxu0  ;;  %v6992_v43 = vpop.f32.mrf.mxu1 }
 0x2c5   :  { %v7536_v55 = vadd.f32 %v7284_v40, %v16731_v54  ;;  %v7282_v50 = vadd.f32 %v6977_v12, %v6893_v4  ;;  %v7785_v3 = vmax.f32 %v7533_v32, 0.0  ;;  %v7979_v0 = vadd.f32 %v7915_v7, %v7787_v52  ;;  %v16015_v40 = vld [vmem:[%s20355_s3 + $0x3c0] sm:$0xff]   ;;  %v18768_v52 = vpop.permute.xlu0 %10878  ;;  %v16019_v7 = vld [vmem:[%s20355_s3 + $0x3d0] sm:$0xff]  }
 0x2c6   :  { %v18661_v5 = vpop.f32.mrf.mxu0  ;;  %15341 = vmatmul.mubr.msk.bf16.vlgmr.msra.gmra.mxu0 %vm8309_vm2, %v15996_v61  ;;  %v18667_v54 = vpop.f32.mrf.mxu1  ;;  %15361 = vmatmul.mubr.msk.bf16.vlgmr.msra.gmra.mxu1 %vm8309_vm2, %v16000_v10  ;;  %v16008_v61 = vld [vmem:[%s20355_s3 + $0x368] sm:$0xff]   ;;  %v16009_v10 = vld [vmem:[%s20355_s3 + $0x380] sm:$0xff]  }
 0x2c7   :  { %v7788_v36 = vmax.f32 %v7536_v55, 0.0  ;;  %v7534_v35 = vadd.f32 %v7282_v50, %v16738_v58  ;;  %15377 = vmatpush3.bf16.msra.mxu0 %v18535_v33  ;;  %15344 = vmatprep.mubr.msk.bf16.mxu0 %vm8309_vm2, %v15997_v14  ;;  %v15999_v58 = vld [vmem:[%s20355_s3 + $0x318] sm:$0xff]   ;;  %v7977_v26 = vadd.f32 %v7913_v56, %v7785_v3  ;;  %v16013_v50 = vld [vmem:[%s20355_s3 + $0x390] sm:$0xff]  }
 0x2c8   :  { %15378 = vmatprep.subr.bf16.mxu0 %v8009_v48  ;;  %v18669_v15 = vpop.f32.mrf.mxu0  ;;  %v18675_v62 = vpop.f32.mrf.mxu1  ;;  %15364 = vmatprep.mubr.msk.bf16.mxu1 %vm8309_vm2, %v16003_v1 }
 0x2c9   :  { %v7980_v60 = vadd.f32 %v7916_v63, %v7788_v36  ;;  %v7786_v39 = vmax.f32 %v7534_v35, 0.0  ;;  %v18788_v63 = vpop.permute.xlu1 %10873  ;;  %v18796_v35 = vpop.permute.xlu0 %10868 }
 0x2ca   :  { %v18678_v33 = vpop.f32.mrf.mxu0  ;;  %v18680_v16 = vpop.f32.mrf.mxu1 }
 0x2cb   :  { %15379 = vmatpush3.bf16.msra.mxu0 %v8009_v48  ;;  %v8012_v46 = vpack.c.bf16 %v7980_v60, %v7979_v0  ;;  %v7978_v17 = vadd.f32 %v7914_v47, %v7786_v39  ;;  %v16014_v0 = vld [vmem:[%s20355_s3 + $0x398] sm:$0xff]   ;;  %v16017_v39 = vld [vmem:[%s20355_s3 + $0x3a0] sm:$0xff]  }
 0x2cc   :  { %v18685_v11 = vpop.f32.mrf.mxu0  ;;  %v18690_v12 = vpop.f32.mrf.mxu1 }
 0x2cd   :  { %15396 = vmatprep.subr.bf16.mxu1 %v8012_v46  ;;  %v8011_v19 = vpack.c.bf16 %v7978_v17, %v7977_v26  ;;  %v16020_v26 = vld [vmem:[%s20355_s3 + $0x3d8] sm:$0xff]  }
 0x2ce   :  { %v18695_v42 = vpop.f32.mrf.mxu0  ;;  %15345 = vmatmul.mubr.msk.bf16.gmra.mxu0 %vm8309_vm2, %v15999_v58  ;;  %15397 = vmatpush3.bf16.msra.mxu1 %v8012_v46  ;;  %v18699_v23 = vpop.f32.mrf.mxu1 }
 0x2cf   :  { %15398 = vmatprep.subr.bf16.mxu1 %v8011_v19  ;;  %15348 = vmatprep.mubr.msk.bf16.mxu0 %vm8309_vm2, %v16001_v21  ;;  %v18816_v46 = vpop.permute.xlu1 %10863  ;;  %v16031_v21 = vld [vmem:[%s20355_s3 + $0x3e0] sm:$0xff]  }
 0x2d0   :  { %v18701_v29 = vpop.f32.mrf.mxu0  ;;  %15365 = vmatmul.mubr.msk.bf16.gmra.mxu1 %vm8309_vm2, %v16004_v31  ;;  %v18704_v41 = vpop.f32.mrf.mxu1 }
 0x2d1   :  { %15368 = vmatprep.mubr.msk.bf16.mxu1 %vm8309_vm2, %v16007_v45 }
 0x2d2   :  { %v18707_v57 = vpop.f32.mrf.mxu0  ;;  %15399 = vmatpush3.bf16.msra.mxu1 %v8011_v19  ;;  %v18712_v51 = vpop.f32.mrf.mxu1 }
 0x2d3   :  { %v18824_v19 = vpop.permute.xlu0 %10858 }
 0x2d4   :  { %v18717_v49 = vpop.f32.mrf.mxu0  ;;  %v18722_v18 = vpop.f32.mrf.mxu1 }
 0x2d6   :  { %v15110_v13 = vpop.f32.mrf.mxu0  ;;  %15349 = vmatmul.mubr.msk.bf16.gmra.mxu0 %vm8309_vm2, %v16002_v53  ;;  %v18729_v59 = vpop.f32.mrf.mxu1 }
 0x2d7   :  { %15352 = vmatprep.mubr.msk.bf16.mxu0 %vm8309_vm2, %v16005_v22  ;;  %v10904_v22 = vadd.f32 %v18667_v54, %v15110_v13  ;;  %v10889_v54 = vadd.f32 %v18678_v33, %v18816_v46  ;;  %v16032_v33 = vld [vmem:[%s20355_s3 + $0x3e8] sm:$0xff]  }
 0x2d8   :  { %v18731_v9 = vpop.f32.mrf.mxu0  ;;  %15369 = vmatmul.mubr.msk.bf16.gmra.mxu1 %vm8309_vm2, %v16008_v61  ;;  %v18734_v14 = vpop.f32.mrf.mxu1 }
 0x2d9   :  { %15372 = vmatprep.mubr.msk.bf16.mxu1 %vm8309_vm2, %v16011_v30 }
 0x2da   :  { %v15111_v24 = vpop.f32.mrf.mxu0  ;;  %v18740_v38 = vpop.f32.mrf.mxu1 }
 0x2db   :  { %v10905_v61 = vadd.f32 %v18680_v16, %v15111_v24  ;;  %v16021_v24 = vld [vmem:[%s20355_s3 + $0x3b0] sm:$0xff]  }
 0x2dc   :  { %v18745_v34 = vpop.f32.mrf.mxu0  ;;  %v18750_v32 = vpop.f32.mrf.mxu1 }
 0x2de   :  { %v15114_v28 = vpop.f32.mrf.mxu0  ;;  %15353 = vmatmul.mubr.msk.bf16.gmra.mxu0 %vm8309_vm2, %v16006_v44  ;;  %v18757_v1 = vpop.f32.mrf.mxu1  ;;  %v18839_v44 = vadd.f32 %v18661_v5, %v18824_v19 }
 0x2df   :  { %15380 = vmatprep.mubr.msk.bf16.mxu0 %vm8309_vm2, %v16009_v10  ;;  %v10908_v16 = vadd.f32 %v18699_v23, %v15114_v28  ;;  %v18863_v23 = vpop.permute.xlu0 %10848  ;;  %v11024_v28 = vadd.f32 %v10904_v22, %v18824_v19 }
 0x2e0   :  { %v8416_v37 = vpop.f32.mrf.mxu0  ;;  %15373 = vmatmul.mubr.msk.bf16.gmra.mxu1 %vm8309_vm2, %v16012_v27  ;;  %v18762_v25 = vpop.f32.mrf.mxu1  ;;  %v16018_v27 = vld [vmem:[%s20355_s3 + $0x3a8] sm:$0xff]  }
 0x2e1   :  { %15400 = vmatprep.mubr.msk.bf16.mxu1 %vm8309_vm2, %v16015_v40  ;;  %v18844_v40 = vpop.permute.xlu1 %10853 }
 0x2e2   :  { %v15115_v4 = vpop.f32.mrf.mxu0  ;;  %v18770_v55 = vpop.f32.mrf.mxu1  ;;  %v18856_v5 = vadd.f32 %v18844_v40, %v18685_v11 }
 0x2e4   :  { %v18775_v43 = vpop.f32.mrf.mxu0  ;;  %v18780_v2 = vpop.f32.mrf.mxu1 }
 0x2e6   :  { %v18785_v48 = vpop.f32.mrf.mxu0  ;;  %15381 = vmatmul.mubr.msk.bf16.vlgmr.msra.gmra.mxu0 %vm8309_vm2, %v16010_v6  ;;  %v18791_v3 = vpop.f32.mrf.mxu1  ;;  %v10906_v6 = vadd.f32 %v18704_v41, %v8416_v37  ;;  %v16033_v41 = vld [vmem:[%s20355_s3 + $0x3f0] sm:$0xff]   ;;  %v18877_v37 = vadd.f32 %v18863_v23, %v18669_v15  ;;  %v10907_v15 = vadd.f32 %v18722_v18, %v18775_v43  ;;  %v10902_v18 = vadd.f32 %v18675_v62, %v18731_v9 }
 0x2e7   :  { %15384 = vmatprep.mubr.msk.bf16.mxu0 %vm8309_vm2, %v16013_v50  ;;  %v10909_v50 = vadd.f32 %v18712_v51, %v15115_v4  ;;  %v10896_v51 = vmax.f32 %v18839_v44, 0.0  ;;  %v10892_v4 = vadd.f32 %v18695_v42, %v18768_v52 }
 0x2e8   :  { %v18793_v36 = vpop.f32.mrf.mxu0  ;;  %15401 = vmatmul.mubr.msk.bf16.vlgmr.msra.gmra.mxu1 %vm8309_vm2, %v16016_v20  ;;  %v18798_v56 = vpop.f32.mrf.mxu1 }
 0x2e9   :  { %15404 = vmatprep.mubr.msk.bf16.mxu1 %vm8309_vm2, %v16019_v7  ;;  %v11025_v7 = vadd.f32 %v10905_v61, %v18816_v46  ;;  %v11026_v61 = vadd.f32 %v10906_v6, %v18796_v35  ;;  %v11029_v44 = vadd.f32 %v10909_v50, %v18760_v8 }
 0x2ea   :  { %v18801_v47 = vpop.f32.mrf.mxu0  ;;  %v18806_v60 = vpop.f32.mrf.mxu1 }
 0x2eb   :  { %v11145_v43 = vmax.f32 %v11025_v7, 0.0  ;;  %v10912_v7 = vadd.f32 %v18785_v48, %v18729_v59  ;;  %v18934_v59 = vadd.f32 %v10902_v18, %v18863_v23 }
 0x2ec   :  { %v18811_v58 = vpop.f32.mrf.mxu0  ;;  %v18818_v17 = vpop.f32.mrf.mxu1 }
 0x2ed   :  { %v18951_v18 = vadd.f32 %v10912_v7, %v18824_v19 }
 0x2ee   :  { %v15146_v31 = vpop.f32.mrf.mxu0  ;;  %15385 = vmatmul.mubr.msk.bf16.gmra.mxu0 %vm8309_vm2, %v16014_v0  ;;  %v18827_v45 = vpop.f32.mrf.mxu1  ;;  %v10903_v0 = vadd.f32 %v18690_v12, %v18745_v34  ;;  %v10897_v34 = vmax.f32 %v10889_v54, 0.0 }
 0x2ef   :  { %15388 = vmatprep.mubr.msk.bf16.mxu0 %vm8309_vm2, %v16017_v39  ;;  %v10890_v39 = vadd.f32 %v18796_v35, %v18701_v29  ;;  %v18897_v29 = vadd.f32 %v18788_v63, %v18717_v49  ;;  %v10900_v49 = vmax.f32 %v10892_v4, 0.0  ;;  %v10916_v6 = vadd.f32 %v15146_v31, %v18757_v1  ;;  %v16023_v1 = vld [vmem:[%s20356_s5] sm:$0xff]  }
 0x2f0   :  { %v18829_v53 = vpop.f32.mrf.mxu0  ;;  %15405 = vmatmul.mubr.msk.bf16.gmra.mxu1 %vm8309_vm2, %v16020_v26  ;;  %v18834_v30 = vpop.f32.mrf.mxu1  ;;  %v10893_v26 = vadd.f32 %v18707_v57, %v18760_v8  ;;  %v18907_v54 = vadd.f32 %v10903_v0, %v18844_v40  ;;  %v11146_v31 = vmax.f32 %v11026_v61, 0.0  ;;  %v18936_v48 = vadd.f32 %v11145_v43, %v10897_v34 }
 0x2f1   :  { %15408 = vmatprep.mubr.msk.bf16.mxu1 %vm8309_vm2, %v16031_v21  ;;  %v11028_v21 = vadd.f32 %v10908_v16, %v18768_v52 }
 0x2f2   :  { %v15147_v10 = vpop.f32.mrf.mxu0  ;;  %v18849_v13 = vpop.f32.mrf.mxu1  ;;  %v10901_v62 = vmax.f32 %v10893_v26, 0.0 }
 0x2f3   :  { %v10917_v50 = vadd.f32 %v15147_v10, %v18770_v55  ;;  %v11148_v9 = vmax.f32 %v11028_v21, 0.0  ;;  %v10899_v55 = vmax.f32 %v18897_v29, 0.0  ;;  %v11149_v10 = vmax.f32 %v11029_v44, 0.0 }
 0x2f4   :  { %v8709_v20 = vpop.f32.mrf.mxu0  ;;  %v18869_v11 = vpop.f32.mrf.mxu1  ;;  %v10914_v29 = vadd.f32 %v18829_v53, %v18762_v25 }
 0x2f5   :  { %v10915_v61 = vadd.f32 %v8709_v20, %v18780_v2  ;;  %v11268_v34 = vadd.f32 %v11148_v9, %v10900_v49  ;;  %v11269_v25 = vadd.f32 %v11149_v10, %v10901_v62  ;;  %v10910_v49 = vadd.f32 %v18793_v36, %v18734_v14 }
 0x2f6   :  { %v18883_v12 = vpop.f32.mrf.mxu0  ;;  %15389 = vmatmul.mubr.msk.bf16.gmra.mxu0 %vm8309_vm2, %v16018_v27  ;;  %v18892_v22 = vpop.f32.mrf.mxu1  ;;  %v11144_v27 = vmax.f32 %v11024_v28, 0.0  ;;  %v11027_v28 = vadd.f32 %v10907_v15, %v18788_v63  ;;  %v11152_v14 = vmax.f32 %v18951_v18, 0.0 }
 0x2f7   :  { %15392 = vmatprep.mubr.msk.bf16.mxu0 %vm8309_vm2, %v16021_v24  ;;  %v10898_v24 = vmax.f32 %v10890_v39, 0.0  ;;  %v16034_v39 = vld [vmem:[%s20355_s3 + $0x3f8] sm:$0xff]   ;;  %v11035_v62 = vadd.f32 %v10915_v61, %v18788_v63 }
 0x2f8   :  { %v18901_v57 = vpop.f32.mrf.mxu0  ;;  %15409 = vmatmul.mubr.msk.bf16.gmra.mxu1 %vm8309_vm2, %v16032_v33  ;;  %v18909_v16 = vpop.f32.mrf.mxu1  ;;  %v16022_v33 = vld [vmem:[%s20355_s3 + $0x3b8] sm:$0xff]   ;;  %v18931_v26 = vadd.f32 %v11144_v27, %v10896_v51  ;;  %v11037_v51 = vadd.f32 %v10917_v50, %v18760_v8  ;;  %v11147_v27 = vmax.f32 %v11027_v28, 0.0  ;;  %v10911_v50 = vadd.f32 %v18811_v58, %v18750_v32 }
 0x2f9   :  { %15412 = vmatprep.mubr.msk.bf16.mxu1 %vm8309_vm2, %v16033_v41  ;;  %v10913_v41 = vadd.f32 %v18801_v47, %v18740_v38  ;;  %v16036_v38 = vld [vmem:[%s20356_s5 + $0x80] sm:$0xff]   ;;  %v11036_v47 = vadd.f32 %v10916_v6, %v18768_v52  ;;  %v11266_v6 = vadd.f32 %v11146_v31, %v10898_v24  ;;  %v10920_v32 = vadd.f32 %v18791_v3, %v18883_v12 }
 0x2fa   :  { %v15151_v42 = vpop.f32.mrf.mxu0  ;;  %v18920_v0 = vpop.f32.mrf.mxu1  ;;  %v11267_v7 = vadd.f32 %v11147_v27, %v10899_v55 }
 0x2fb   :  { %v11033_v53 = vadd.f32 %v10913_v41, %v18816_v46  ;;  %v10921_v2 = vadd.f32 %v18806_v60, %v15151_v42  ;;  %v11156_v24 = vmax.f32 %v11036_v47, 0.0  ;;  %v11034_v60 = vadd.f32 %v10914_v29, %v18796_v35 }
 0x2fc   :  { %v8725_v4 = vpop.f32.mrf.mxu0  ;;  %v18939_v15 = vpop.f32.mrf.mxu1  ;;  %v11157_v42 = vmax.f32 %v11037_v51, 0.0  ;;  %v11155_v51 = vmax.f32 %v11035_v62, 0.0 }
 0x2fd   :  { %v10919_v31 = vadd.f32 %v18818_v17, %v8725_v4  ;;  %v11154_v12 = vmax.f32 %v11034_v60, 0.0  ;;  %v11040_v17 = vadd.f32 %v10920_v32, %v18824_v19  ;;  %v10918_v4 = vadd.f32 %v18798_v56, %v18901_v57 }
 0x2fe   :  { %v15154_v44 = vpop.f32.mrf.mxu0  ;;  %15393 = vmatmul.mubr.msk.bf16.gmra.mxu0 %vm8309_vm2, %v16022_v33  ;;  %v18954_v21 = vpop.f32.mrf.mxu1  ;;  %v11301_v29 = vadd.f32 %v11269_v25, %v11157_v42  ;;  %v11142_v56 = vmax.f32 %v18934_v59, 0.0  ;;  %v11299_v60 = vadd.f32 %v11267_v7, %v11155_v51  ;;  %v11296_v7 = vadd.f32 %v18931_v26, %v11152_v14 }
 0x2ff   :  { %v10924_v43 = vadd.f32 %v18827_v45, %v15154_v44  ;;  %15424 = vmatprep.mubr.msk.bf16.mxu0 %vm11582_vm3, %v16023_v1  ;;  %v11041_v1 = vadd.f32 %v10921_v2, %v18816_v46  ;;  %v11160_v62 = vmax.f32 %v11040_v17, 0.0 }
 0x300   :  { %v8738_v20 = vpop.f32.mrf.mxu0  ;;  %15413 = vmatmul.mubr.msk.bf16.gmra.mxu1 %vm8309_vm2, %v16034_v39  ;;  %v18966_v9 = vpop.f32.mrf.mxu1  ;;  %v11031_v39 = vadd.f32 %v10911_v50, %v18844_v40 }
 0x301   :  { %v11044_v45 = vadd.f32 %v10924_v43, %v18768_v52  ;;  %v10922_v33 = vadd.f32 %v18834_v30, %v8738_v20  ;;  %15464 = vmatprep.mubr.msk.bf16.mxu1 %vm11582_vm3, %v16036_v38  ;;  %v11153_v30 = vmax.f32 %v11033_v53, 0.0  ;;  %v11161_v43 = vmax.f32 %v11041_v1, 0.0 }
 0x302   :  { %v15155_v28 = vpop.f32.mrf.mxu0  ;;  %v18975_v58 = vpop.f32.mrf.mxu1  ;;  %v11151_v42 = vmax.f32 %v11031_v39, 0.0  ;;  %v20362_v1 = vmax.f32 %v18856_v5, 0.0 }
 0x303   :  { %v10925_v36 = vadd.f32 %v18849_v13, %v15155_v28  ;;  %v11042_v10 = vadd.f32 %v10922_v33, %v18796_v35  ;;  %v11164_v55 = vmax.f32 %v11044_v45, 0.0  ;;  %v11300_v13 = vadd.f32 %v11268_v34, %v11156_v24 }
 0x304   :  { %v8741_v41 = vpop.f32.mrf.mxu0  ;;  %v18983_v3 = vpop.f32.mrf.mxu1  ;;  %v11039_v34 = vadd.f32 %v10919_v31, %v18844_v40  ;;  %v11297_v57 = vadd.f32 %v18936_v48, %v11153_v30  ;;  %v11298_v24 = vadd.f32 %v11266_v6, %v11154_v12  ;;  %v11038_v28 = vadd.f32 %v10918_v4, %v18863_v23 }
 0x305   :  { %v11045_v38 = vadd.f32 %v10925_v36, %v18760_v8  ;;  %v10923_v47 = vadd.f32 %v18869_v11, %v8741_v41  ;;  %v11030_v11 = vadd.f32 %v10910_v49, %v18863_v23  ;;  %v11162_v53 = vmax.f32 %v11042_v10, 0.0 }
 0x306   :  { %v18985_v61 = vpop.f32.mrf.mxu0  ;;  %v18991_v18 = vpop.f32.mrf.mxu1  ;;  %v11332_v2 = vadd.f32 %v11300_v13, %v11164_v55  ;;  %v20363_v31 = vmax.f32 %v18907_v54, 0.0  ;;  %v11329_v41 = vadd.f32 %v11297_v57, %v11161_v43  ;;  %v11159_v39 = vmax.f32 %v11039_v34, 0.0  ;;  %v16025_v57 = vld [vmem:[%s20356_s5 + $0x10] sm:$0xff]  }
 0x307   :  { %v11165_v44 = vmax.f32 %v11045_v38, 0.0  ;;  %v11043_v27 = vadd.f32 %v10923_v47, %v18788_v63  ;;  %v11330_v10 = vadd.f32 %v11298_v24, %v11162_v53  ;;  %v11150_v30 = vmax.f32 %v11030_v11, 0.0 }
 0x308   :  { %v9012_v25 = vpop.f32.mrf.mxu0  ;;  %v18998_v33 = vpop.f32.mrf.mxu1  ;;  %v11263_v59 = vadd.f32 %v20363_v31, %v20362_v1  ;;  %v11328_v54 = vadd.f32 %v11296_v7, %v11160_v62  ;;  %v11158_v13 = vmax.f32 %v11038_v28, 0.0 }
 0x309   :  { %v11333_v20 = vadd.f32 %v11301_v29, %v11165_v44  ;;  %v11163_v50 = vmax.f32 %v11043_v27, 0.0  ;;  %v18996_v45 = vadd.f32 %v9012_v25, %v18909_v16  ;;  %v10894_v16 = vmax.f32 %v18877_v37, 0.0 }
 0x30a   :  { %v19002_v49 = vpop.f32.mrf.mxu0  ;;  %v19005_v36 = vpop.f32.mrf.mxu1  ;;  %v11295_v47 = vadd.f32 %v11263_v59, %v11151_v42  ;;  %v11359_v26 = vpack.c.bf16 %v11329_v41, %v11328_v54  ;;  %v16027_v59 = vld [vmem:[%s20356_s5 + $0x20] sm:$0xff]   ;;  %v16029_v54 = vld [vmem:[%s20356_s5 + $0x30] sm:$0xff]  }
 0x30b   :  { %v11361_v32 = vpack.c.bf16 %v11333_v20, %v11332_v2  ;;  %v11331_v6 = vadd.f32 %v11299_v60, %v11163_v50  ;;  %v11262_v5 = vadd.f32 %v11142_v56, %v10894_v16  ;;  %v16024_v20 = vld [vmem:[%s20356_s5 + $0x8] sm:$0xff]   ;;  %v16026_v16 = vld [vmem:[%s20356_s5 + $0x18] sm:$0xff]  }
 0x30c   :  { %v19012_v48 = vpop.f32.mrf.mxu0  ;;  %v19015_v55 = vpop.f32.mrf.mxu1  ;;  %v11327_v14 = vadd.f32 %v11295_v47, %v11159_v39 }
 0x30d   :  { %15416 = vmatprep.subr.bf16.mxu0 %v11361_v32  ;;  %v11360_v37 = vpack.c.bf16 %v11331_v6, %v11330_v10  ;;  %v11294_v51 = vadd.f32 %v11262_v5, %v11150_v30 }
 0x30e   :  { %v19017_v38 = vpop.f32.mrf.mxu0  ;;  %15417 = vmatpush3.bf16.msra.mxu0 %v11361_v32  ;;  %v19019_v12 = vpop.f32.mrf.mxu1 }
 0x30f   :  { %15418 = vmatprep.subr.bf16.mxu0 %v11360_v37  ;;  %v11326_v44 = vadd.f32 %v11294_v51, %v11158_v13  ;;  %v10928_v51 = vadd.f32 %v18985_v61, %v18892_v22 }
 0x310   :  { %v9028_v29 = vpop.f32.mrf.mxu0  ;;  %v19021_v17 = vpop.f32.mrf.mxu1 }
 0x311   :  { %v11358_v43 = vpack.c.bf16 %v11327_v14, %v11326_v44  ;;  %v10929_v14 = vadd.f32 %v19002_v49, %v18920_v0  ;;  %v11048_v22 = vadd.f32 %v10928_v51, %v18824_v19  ;;  %v10930_v61 = vadd.f32 %v9028_v29, %v18966_v9 }
 0x312   :  { %v15187_v4 = vpop.f32.mrf.mxu0  ;;  %15419 = vmatpush3.bf16.msra.mxu0 %v11360_v37  ;;  %v19023_v27 = vpop.f32.mrf.mxu1  ;;  %v16028_v37 = vld [vmem:[%s20356_s5 + $0x28] sm:$0xff]  }
 0x313   :  { %15420 = vmatprep.subr.bf16.mxu0 %v11359_v26  ;;  %v19095_v0 = vadd.f32 %v10929_v14, %v18816_v46  ;;  %v10933_v49 = vadd.f32 %v15187_v4, %v18975_v58  ;;  %v11168_v51 = vmax.f32 %v11048_v22, 0.0 }
 0x314   :  { %v9031_v11 = vpop.f32.mrf.mxu0  ;;  %v19025_v34 = vpop.f32.mrf.mxu1 }
 0x315   :  { %v10931_v9 = vadd.f32 %v9031_v11, %v18983_v3  ;;  %v19121_v3 = vadd.f32 %v10930_v61, %v18796_v35 }
 0x316   :  { %v15190_v53 = vpop.f32.mrf.mxu0  ;;  %15421 = vmatpush3.bf16.msra.mxu0 %v11359_v26  ;;  %v15210_v25 = vpop.f32.mrf.mxu1 }
 0x317   :  { %15422 = vmatprep.subr.bf16.mxu0 %v11358_v43 }
 0x318   :  { %v19027_v2 = vpop.f32.mrf.mxu0  ;;  %v19032_v50 = vpop.f32.mrf.mxu1 }
 0x31a   :  { %v15191_v56 = vpop.f32.mrf.mxu0  ;;  %15423 = vmatpush3.bf16.msra.mxu0 %v11358_v43  ;;  %v15211_v24 = vpop.f32.mrf.mxu1 }
 0x31c   :  { %v19037_v60 = vpop.f32.mrf.mxu0  ;;  %v19040_v42 = vpop.f32.mrf.mxu1 }
 0x31d   :  { %15425 = vmatmul.mubr.msk.bf16.vlgmr.msra.gmra.mxu0 %vm11582_vm3, %v16024_v20  ;;  %v10932_v20 = vadd.f32 %v19017_v38, %v18954_v21  ;;  %v16030_v21 = vld [vmem:[%s20356_s5 + $0x38] sm:$0xff]   ;;  %v10927_v38 = vadd.f32 %v19012_v48, %v18939_v15  ;;  %v19118_v15 = vadd.f32 %v18996_v45, %v18863_v23 }
 0x31e   :  { %v15194_v62 = vpop.f32.mrf.mxu0  ;;  %15428 = vmatprep.mubr.msk.bf16.mxu0 %vm11582_vm3, %v16025_v57  ;;  %v19043_v28 = vpop.f32.mrf.mxu1  ;;  %v10936_v57 = vadd.f32 %v18991_v18, %v15190_v53 }
 0x31f   :  { %v19111_v58 = vadd.f32 %v10932_v20, %v18768_v52  ;;  %v10940_v48 = vadd.f32 %v19019_v12, %v15194_v62  ;;  %v19134_v45 = vadd.f32 %v10927_v38, %v18844_v40  ;;  %v19137_v20 = vadd.f32 %v10931_v9, %v18788_v63 }
 0x320   :  { %v9060_v32 = vpop.f32.mrf.mxu0  ;;  %v19048_v1 = vpop.f32.mrf.mxu1  ;;  %v10934_v12 = vadd.f32 %v18998_v33, %v19027_v2 }
 0x321   :  { %v11060_v33 = vadd.f32 %v10940_v48, %v18768_v52 }
 0x322   :  { %v19050_v31 = vpop.f32.mrf.mxu0  ;;  %v19055_v10 = vpop.f32.mrf.mxu1 }
 0x323   :  { %v10941_v2 = vadd.f32 %v19023_v27, %v19050_v31 }
 0x324   :  { %v19057_v6 = vpop.f32.mrf.mxu0  ;;  %v19060_v7 = vpop.f32.mrf.mxu1 }
 0x325   :  { %15429 = vmatmul.mubr.msk.bf16.gmra.mxu0 %vm11582_vm3, %v16026_v16 }
 0x326   :  { %v15222_v30 = vpop.f32.mrf.mxu0  ;;  %15432 = vmatprep.mubr.msk.bf16.mxu0 %vm11582_vm3, %v16027_v59  ;;  %v15242_v41 = vpop.f32.mrf.mxu1 }
 0x327   :  { %v10944_v29 = vadd.f32 %v15222_v30, %v15210_v25  ;;  %v11169_v25 = vmax.f32 %v19095_v0, 0.0  ;;  %v19126_v30 = vadd.f32 %v10933_v49, %v18760_v8  ;;  %v11170_v49 = vmax.f32 %v19121_v3, 0.0 }
 0x328   :  { %v19063_v39 = vpop.f32.mrf.mxu0  ;;  %v19068_v5 = vpop.f32.mrf.mxu1 }
 0x329   :  { %v11064_v62 = vadd.f32 %v10944_v29, %v18824_v19 }
 0x32a   :  { %v15223_v47 = vpop.f32.mrf.mxu0  ;;  %v19073_v13 = vpop.f32.mrf.mxu1 }
 0x32b   :  { %v10945_v4 = vadd.f32 %v15223_v47, %v15211_v24  ;;  %v10938_v47 = vadd.f32 %v19021_v17, %v9060_v32  ;;  %v11172_v17 = vmax.f32 %v19111_v58, 0.0  ;;  %v19165_v58 = vadd.f32 %v10934_v12, %v18863_v23 }
 0x32c   :  { %v19077_v26 = vpop.f32.mrf.mxu0  ;;  %v19082_v44 = vpop.f32.mrf.mxu1  ;;  %v11184_v27 = vmax.f32 %v11064_v62, 0.0  ;;  %v11180_v12 = vmax.f32 %v11060_v33, 0.0  ;;  %v11061_v62 = vadd.f32 %v10941_v2, %v18760_v8 }
 0x32d   :  { %15433 = vmatmul.mubr.msk.bf16.gmra.mxu0 %vm11582_vm3, %v16028_v37  ;;  %v10937_v37 = vadd.f32 %v19005_v36, %v15191_v56  ;;  %v11056_v36 = vadd.f32 %v10936_v57, %v18824_v19  ;;  %v11065_v22 = vadd.f32 %v10945_v4, %v18816_v46  ;;  %v11058_v29 = vadd.f32 %v10938_v47, %v18796_v35  ;;  %v16039_v4 = vld [vmem:[%s20356_s5 + $0x50] sm:$0xff]  }
 0x32e   :  { %v15226_v43 = vpop.f32.mrf.mxu0  ;;  %15436 = vmatprep.mubr.msk.bf16.mxu0 %vm11582_vm3, %v16029_v54  ;;  %v19088_v16 = vpop.f32.mrf.mxu1  ;;  %v16035_v54 = vld [vmem:[%s20356_s5 + $0x40] sm:$0xff]  }
 0x32f   :  { %v11057_v24 = vadd.f32 %v10937_v37, %v18816_v46  ;;  %v11176_v32 = vmax.f32 %v11056_v36, 0.0  ;;  %v10935_v37 = vadd.f32 %v19015_v55, %v19037_v60  ;;  %v16037_v55 = vld [vmem:[%s20356_s5 + $0x48] sm:$0xff]   ;;  %v10948_v31 = vadd.f32 %v15226_v43, %v19043_v28 }
 0x330   :  { %v19092_v59 = vpop.f32.mrf.mxu0  ;;  %v19102_v18 = vpop.f32.mrf.mxu1  ;;  %v11185_v48 = vmax.f32 %v11065_v22, 0.0  ;;  %v10939_v28 = vadd.f32 %v19025_v34, %v19057_v6  ;;  %v11178_v38 = vmax.f32 %v11058_v29, 0.0 }
 0x331   :  { %v11177_v9 = vmax.f32 %v11057_v24, 0.0  ;;  %v11272_v3 = vadd.f32 %v11176_v32, %v11168_v51  ;;  %v10946_v22 = vadd.f32 %v19092_v59, %v19048_v1 }
 0x332   :  { %v15227_v53 = vpop.f32.mrf.mxu0  ;;  %v19114_v56 = vpop.f32.mrf.mxu1 }
 0x333   :  { %v10949_v24 = vadd.f32 %v15227_v53, %v19055_v10  ;;  %v11273_v60 = vadd.f32 %v11177_v9, %v11169_v25  ;;  %v11068_v53 = vadd.f32 %v10948_v31, %v18768_v52 }
 0x334   :  { %v9353_v11 = vpop.f32.mrf.mxu0  ;;  %v19131_v14 = vpop.f32.mrf.mxu1 }
 0x335   :  { %15437 = vmatmul.mubr.msk.bf16.gmra.mxu0 %vm11582_vm3, %v16030_v21  ;;  %v11305_v34 = vadd.f32 %v11273_v60, %v11185_v48  ;;  %v11069_v6 = vadd.f32 %v10949_v24, %v18760_v8  ;;  %v16043_v24 = vld [vmem:[%s20356_s5 + $0x60] sm:$0xff]  }
 0x336   :  { %v15230_v57 = vpop.f32.mrf.mxu0  ;;  %15440 = vmatprep.mubr.msk.bf16.mxu0 %vm11582_vm3, %v16035_v54  ;;  %v19145_v0 = vpop.f32.mrf.mxu1 }
 0x337   :  { %v10952_v61 = vadd.f32 %v15242_v41, %v15230_v57 }
 0x338   :  { %v19153_v21 = vpop.f32.mrf.mxu0  ;;  %v19158_v54 = vpop.f32.mrf.mxu1 }
 0x339   :  { %v11072_v41 = vadd.f32 %v10952_v61, %v18824_v19  ;;  %v19176_v61 = vadd.f32 %v10935_v37, %v18844_v40  ;;  %v10947_v37 = vadd.f32 %v9353_v11, %v19060_v7 }
 0x33a   :  { %v15231_v36 = vpop.f32.mrf.mxu0  ;;  %v19173_v57 = vpop.f32.mrf.mxu1 }
 0x33b   :  { %v10953_v47 = vadd.f32 %v19073_v13, %v15231_v36  ;;  %v11192_v51 = vmax.f32 %v11072_v41, 0.0  ;;  %v11304_v13 = vadd.f32 %v11272_v3, %v11184_v27  ;;  %v11175_v29 = vmax.f32 %v19176_v61, 0.0 }
 0x33c   :  { %v9369_v43 = vpop.f32.mrf.mxu0  ;;  %v19182_v10 = vpop.f32.mrf.mxu1  ;;  %v11276_v41 = vadd.f32 %v11180_v12, %v11172_v17  ;;  %v11059_v27 = vadd.f32 %v10939_v28, %v18788_v63  ;;  %v10943_v36 = vadd.f32 %v19077_v26, %v19040_v42  ;;  %v11188_v17 = vmax.f32 %v11068_v53, 0.0 }
 0x33d   :  { %v11073_v32 = vadd.f32 %v10953_v47, %v18816_v46  ;;  %15441 = vmatmul.mubr.msk.bf16.gmra.mxu0 %vm11582_vm3, %v16037_v55  ;;  %v11181_v55 = vmax.f32 %v11061_v62, 0.0  ;;  %v11336_v59 = vadd.f32 %v11304_v13, %v11192_v51  ;;  %v11067_v3 = vadd.f32 %v10947_v37, %v18788_v63 }
 0x33e   :  { %v15234_v33 = vpop.f32.mrf.mxu0  ;;  %15444 = vmatprep.mubr.msk.bf16.mxu0 %vm11582_vm3, %v16039_v4  ;;  %v19192_v9 = vpop.f32.mrf.mxu1  ;;  %v11066_v4 = vadd.f32 %v10946_v22, %v18796_v35  ;;  %v11189_v47 = vmax.f32 %v11069_v6, 0.0  ;;  %v11179_v51 = vmax.f32 %v11059_v27, 0.0  ;;  %v10942_v42 = vadd.f32 %v19063_v39, %v19032_v50 }
 0x33f   :  { %v11193_v25 = vmax.f32 %v11073_v32, 0.0  ;;  %v10956_v2 = vadd.f32 %v19088_v16, %v15234_v33  ;;  %v16041_v16 = vld [vmem:[%s20356_s5 + $0x58] sm:$0xff]   ;;  %v10951_v26 = vadd.f32 %v19082_v44, %v9369_v43  ;;  %v20364_v53 = vmax.f32 %v19126_v30, 0.0 }
 0x340   :  { %v9382_v1 = vpop.f32.mrf.mxu0  ;;  %v19198_v31 = vpop.f32.mrf.mxu1  ;;  %v11063_v33 = vadd.f32 %v10943_v36, %v18844_v40  ;;  %v11308_v50 = vadd.f32 %v11276_v41, %v11188_v17  ;;  %v11186_v39 = vmax.f32 %v11066_v4, 0.0  ;;  %v11187_v44 = vmax.f32 %v11067_v3, 0.0  ;;  %v16047_v3 = vld [vmem:[%s20356_s5 + $0x70] sm:$0xff]  }
 0x341   :  { %v11337_v7 = vadd.f32 %v11305_v34, %v11193_v25  ;;  %v11076_v11 = vadd.f32 %v10956_v2, %v18768_v52  ;;  %v10954_v60 = vadd.f32 %v19102_v18, %v9382_v1  ;;  %v11274_v18 = vadd.f32 %v11178_v38, %v11170_v49 }
 0x342   :  { %v15235_v48 = vpop.f32.mrf.mxu0  ;;  %v19211_v62 = vpop.f32.mrf.mxu1  ;;  %v11277_v22 = vadd.f32 %v11181_v55, %v20364_v53  ;;  %v10950_v34 = vadd.f32 %v19068_v5, %v19153_v21  ;;  %v20365_v2 = vmax.f32 %v19137_v20, 0.0  ;;  %v11062_v41 = vadd.f32 %v10942_v42, %v18863_v23  ;;  %v16045_v21 = vld [vmem:[%s20356_s5 + $0x68] sm:$0xff]  }
 0x343   :  { %v10957_v12 = vadd.f32 %v19114_v56, %v15235_v48  ;;  %v19213_v28 = vpack.c.bf16 %v11337_v7, %v11336_v59  ;;  %v11074_v32 = vadd.f32 %v10954_v60, %v18796_v35  ;;  %v11196_v49 = vmax.f32 %v11076_v11, 0.0 }
 0x344   :  { %v9385_v13 = vpop.f32.mrf.mxu0  ;;  %v19223_v37 = vpop.f32.mrf.mxu1  ;;  %v11309_v30 = vadd.f32 %v11277_v22, %v11189_v47  ;;  %v11275_v55 = vadd.f32 %v11179_v51, %v20365_v2  ;;  %v11071_v27 = vadd.f32 %v10951_v26, %v18844_v40  ;;  %v11167_v20 = vmax.f32 %v19134_v45, 0.0 }
 0x345   :  { %v11077_v38 = vadd.f32 %v10957_v12, %v18760_v8  ;;  %v10955_v56 = vadd.f32 %v19131_v14, %v9385_v13  ;;  %15445 = vmatmul.mubr.msk.bf16.gmra.mxu0 %vm11582_vm3, %v16041_v16  ;;  %v11194_v1 = vmax.f32 %v11074_v32, 0.0  ;;  %v11340_v7 = vadd.f32 %v11308_v50, %v11196_v49 }
 0x346   :  { %v19227_v43 = vpop.f32.mrf.mxu0  ;;  %15448 = vmatprep.mubr.msk.bf16.mxu0 %vm11582_vm3, %v16043_v24  ;;  %v19233_v25 = vpop.f32.mrf.mxu1  ;;  %v11306_v36 = vadd.f32 %v11274_v18, %v11186_v39  ;;  %v11307_v17 = vadd.f32 %v11275_v55, %v11187_v44  ;;  %v11174_v48 = vmax.f32 %v19165_v58, 0.0  ;;  %v11070_v24 = vadd.f32 %v10950_v34, %v18863_v23  ;;  %v16049_v39 = vld [vmem:[%s20356_s5 + $0x78] sm:$0xff]  }
 0x347   :  { %v11197_v6 = vmax.f32 %v11077_v38, 0.0  ;;  %v11075_v14 = vadd.f32 %v10955_v56, %v18788_v63  ;;  %v11166_v18 = vmax.f32 %v19118_v15, 0.0  ;;  %v11271_v26 = vadd.f32 %v11175_v29, %v11167_v20 }
 0x348   :  { %v9656_v59 = vpop.f32.mrf.mxu0  ;;  %v19242_v5 = vpop.f32.mrf.mxu1  ;;  %v11338_v51 = vadd.f32 %v11306_v36, %v11194_v1  ;;  %v11182_v32 = vmax.f32 %v11062_v41, 0.0  ;;  %v11191_v13 = vmax.f32 %v11071_v27, 0.0  ;;  %v11190_v56 = vmax.f32 %v11070_v24, 0.0 }
 0x349   :  { %v11341_v11 = vadd.f32 %v11309_v30, %v11197_v6  ;;  %v11195_v60 = vmax.f32 %v11075_v14, 0.0  ;;  %v19240_v16 = vadd.f32 %v9656_v59, %v19158_v54  ;;  %v11183_v54 = vmax.f32 %v11063_v33, 0.0  ;;  %v16052_v30 = vld [vmem:[%s20356_s5 + $0x100] sm:$0xff]   ;;  %v16038_v59 = vld [vmem:[%s20356_s5 + $0x88] sm:$0xff]  }
 0x34a   :  { %v19248_v4 = vpop.f32.mrf.mxu0  ;;  %v19255_v12 = vpop.f32.mrf.mxu1  ;;  %v11270_v49 = vadd.f32 %v11174_v48, %v11166_v18  ;;  %v16042_v48 = vld [vmem:[%s20356_s5 + $0x98] sm:$0xff]  }
 0x34b   :  { %v11365_v47 = vpack.c.bf16 %v11341_v11, %v11340_v7  ;;  %v11339_v45 = vadd.f32 %v11307_v17, %v11195_v60  ;;  %v11303_v38 = vadd.f32 %v11271_v26, %v11183_v54  ;;  %v16040_v60 = vld [vmem:[%s20356_s5 + $0x90] sm:$0xff]  }
 0x34c   :  { %v19257_v42 = vpop.f32.mrf.mxu0  ;;  %v19262_v53 = vpop.f32.mrf.mxu1  ;;  %v11302_v29 = vadd.f32 %v11270_v49, %v11182_v32 }
 0x34d   :  { %15456 = vmatprep.subr.bf16.mxu1 %v11365_v47  ;;  %15449 = vmatmul.mubr.msk.bf16.gmra.mxu0 %vm11582_vm3, %v16045_v21  ;;  %v11364_v22 = vpack.c.bf16 %v11339_v45, %v11338_v51  ;;  %v11335_v33 = vadd.f32 %v11303_v38, %v11191_v13 }
 0x34e   :  { %v19265_v58 = vpop.f32.mrf.mxu0  ;;  %15457 = vmatpush3.bf16.msra.mxu1 %v11365_v47  ;;  %15452 = vmatprep.mubr.msk.bf16.mxu0 %vm11582_vm3, %v16047_v3  ;;  %v19268_v15 = vpop.f32.mrf.mxu1  ;;  %v11334_v34 = vadd.f32 %v11302_v29, %v11190_v56  ;;  %v16044_v47 = vld [vmem:[%s20356_s5 + $0xa0] sm:$0xff]   ;;  %v16048_v56 = vld [vmem:[%s20356_s5 + $0xb0] sm:$0xff]  }
 0x34f   :  { %15458 = vmatprep.subr.bf16.mxu1 %v11364_v22 }
 0x350   :  { %v9672_v61 = vpop.f32.mrf.mxu0  ;;  %v19270_v50 = vpop.f32.mrf.mxu1  ;;  %v11362_v2 = vpack.c.bf16 %v11335_v33, %v11334_v34  ;;  %v10961_v34 = vadd.f32 %v19248_v4, %v19173_v57 }
 0x352   :  { %v15267_v44 = vpop.f32.mrf.mxu0  ;;  %15459 = vmatpush3.bf16.msra.mxu1 %v11364_v22  ;;  %v19279_v6 = vpop.f32.mrf.mxu1  ;;  %v16046_v22 = vld [vmem:[%s20356_s5 + $0xa8] sm:$0xff]  }
 0x353   :  { %15460 = vmatprep.subr.bf16.mxu1 %v19213_v28 }
 0x354   :  { %v9675_v14 = vpop.f32.mrf.mxu0  ;;  %v19281_v55 = vpop.f32.mrf.mxu1 }
 0x355   :  { %15453 = vmatmul.mubr.msk.bf16.gmra.mxu0 %vm11582_vm3, %v16049_v39  ;;  %v10960_v39 = vadd.f32 %v19227_v43, %v19145_v0  ;;  %v10962_v0 = vadd.f32 %v9672_v61, %v19198_v31  ;;  %v10965_v43 = vadd.f32 %v15267_v44, %v19211_v62  ;;  %v10963_v57 = vadd.f32 %v9675_v14, %v19223_v37  ;;  %v16051_v31 = vld [vmem:[%s20356_s5 + $0xc0] sm:$0xff]  }
 0x356   :  { %v15270_v41 = vpop.f32.mrf.mxu0  ;;  %15461 = vmatpush3.bf16.msra.mxu1 %v19213_v28  ;;  %15504 = vmatprep.mubr.msk.bf16.mxu0 %vm11582_vm3, %v16052_v30  ;;  %v15290_v27 = vpop.f32.mrf.mxu1  ;;  %v10959_v62 = vadd.f32 %v19257_v42, %v19182_v10 }
 0x357   :  { %15462 = vmatprep.subr.bf16.mxu1 %v11362_v2  ;;  %v19374_v44 = vadd.f32 %v10962_v0, %v18796_v35  ;;  %v19377_v14 = vadd.f32 %v10965_v43, %v18760_v8 }
 0x358   :  { %v19286_v1 = vpop.f32.mrf.mxu0  ;;  %v19291_v7 = vpop.f32.mrf.mxu1 }
 0x359   :  { %v10966_v10 = vadd.f32 %v19242_v5, %v19286_v1  ;;  %v19396_v5 = vadd.f32 %v10959_v62, %v18844_v40 }
 0x35a   :  { %v15271_v11 = vpop.f32.mrf.mxu0  ;;  %15463 = vmatpush3.bf16.msra.mxu1 %v11362_v2  ;;  %v15291_v21 = vpop.f32.mrf.mxu1 }
 0x35b   :  { %v10969_v4 = vadd.f32 %v19255_v12, %v15271_v11 }
 0x35c   :  { %v19296_v28 = vpop.f32.mrf.mxu0  ;;  %v19299_v20 = vpop.f32.mrf.mxu1 }
 0x35d   :  { %15465 = vmatmul.mubr.msk.bf16.vlgmr.msra.gmra.mxu1 %vm11582_vm3, %v16038_v59  ;;  %v10968_v59 = vadd.f32 %v19233_v25, %v15270_v41  ;;  %v16050_v25 = vld [vmem:[%s20356_s5 + $0xb8] sm:$0xff]   ;;  %v11089_v42 = vadd.f32 %v10969_v4, %v18816_v46  ;;  %v19409_v4 = vadd.f32 %v10966_v10, %v18863_v23 }
 0x35e   :  { %v15274_v36 = vpop.f32.mrf.mxu0  ;;  %15468 = vmatprep.mubr.msk.bf16.mxu1 %vm11582_vm3, %v16040_v60  ;;  %v19302_v17 = vpop.f32.mrf.mxu1 }
 0x35f   :  { %v11088_v37 = vadd.f32 %v10968_v59, %v18824_v19 }
 0x360   :  { %v9704_v3 = vpop.f32.mrf.mxu0  ;;  %v19307_v54 = vpop.f32.mrf.mxu1 }
 0x361   :  { %v11208_v1 = vmax.f32 %v11088_v37, 0.0 }
 0x362   :  { %v19309_v24 = vpop.f32.mrf.mxu0  ;;  %v19314_v51 = vpop.f32.mrf.mxu1 }
 0x364   :  { %v19316_v45 = vpop.f32.mrf.mxu0  ;;  %v19319_v18 = vpop.f32.mrf.mxu1 }
 0x365   :  { %15469 = vmatmul.mubr.msk.bf16.gmra.mxu1 %vm11582_vm3, %v16042_v48  ;;  %v10964_v48 = vadd.f32 %v19265_v58, %v19192_v9 }
 0x366   :  { %v15302_v26 = vpop.f32.mrf.mxu0  ;;  %15472 = vmatprep.mubr.msk.bf16.mxu1 %vm11582_vm3, %v16044_v47  ;;  %v15322_v32 = vpop.f32.mrf.mxu1 }
 0x367   :  { %v19371_v61 = vadd.f32 %v10964_v48, %v18768_v52  ;;  %v10976_v11 = vadd.f32 %v15302_v26, %v15290_v27  ;;  %v10972_v27 = vadd.f32 %v19268_v15, %v15274_v36  ;;  %v10970_v26 = vadd.f32 %v19270_v50, %v9704_v3 }
 0x368   :  { %v19322_v13 = vpop.f32.mrf.mxu0  ;;  %v19327_v49 = vpop.f32.mrf.mxu1  ;;  %v11205_v15 = vmax.f32 %v19377_v14, 0.0 }
 0x369   :  { %20366 = vst [vmem:[#allocation2_spill] sm:$0xff] %v19327_v49  ;;  %v19380_v49 = vadd.f32 %v10963_v57, %v18788_v63  ;;  %v11202_v57 = vmax.f32 %v19374_v44, 0.0  ;;  %v11096_v50 = vadd.f32 %v10976_v11, %v18824_v19  ;;  %v11092_v62 = vadd.f32 %v10972_v27, %v18768_v52 }
 0x36a   :  { %v15303_v38 = vpop.f32.mrf.mxu0  ;;  %v19332_v29 = vpop.f32.mrf.mxu1  ;;  %v11090_v37 = vadd.f32 %v10970_v26, %v18796_v35  ;;  %v10967_v27 = vadd.f32 %v19262_v53, %v19296_v28 }
 0x36b   :  { %v10977_v58 = vadd.f32 %v15303_v38, %v15291_v21  ;;  %v19390_v38 = vadd.f32 %v19240_v16, %v18863_v23  ;;  %v11204_v16 = vmax.f32 %v19371_v61, 0.0  ;;  %v11216_v26 = vmax.f32 %v11096_v50, 0.0 }
 0x36c   :  { %v19334_v33 = vpop.f32.mrf.mxu0  ;;  %v19339_v30 = vpop.f32.mrf.mxu1  ;;  %v11210_v53 = vmax.f32 %v11090_v37, 0.0 }
 0x36d   :  { %15473 = vmatmul.mubr.msk.bf16.gmra.mxu1 %vm11582_vm3, %v16046_v22  ;;  %v11080_v22 = vadd.f32 %v10960_v39, %v18824_v19  ;;  %v11097_v0 = vadd.f32 %v10977_v58, %v18816_v46  ;;  %v10971_v58 = vadd.f32 %v19281_v55, %v19316_v45 }
 0x36e   :  { %v19343_v2 = vpop.f32.mrf.mxu0  ;;  %15476 = vmatprep.mubr.msk.bf16.mxu1 %vm11582_vm3, %v16048_v56  ;;  %v19347_v60 = vpop.f32.mrf.mxu1  ;;  %v11081_v56 = vadd.f32 %v10961_v34, %v18816_v46 }
 0x36f   :  { %v11200_v34 = vmax.f32 %v11080_v22, 0.0  ;;  %v11217_v11 = vmax.f32 %v11097_v0, 0.0  ;;  %v10980_v55 = vadd.f32 %v19343_v2, %v19302_v17  ;;  %v11091_v28 = vadd.f32 %v10971_v58, %v18788_v63 }
 0x370   :  { %v9994_v47 = vpop.f32.mrf.mxu0  ;;  %v19359_v41 = vpop.f32.mrf.mxu1  ;;  %v11201_v59 = vmax.f32 %v11081_v56, 0.0 }
 0x371   :  { %v10978_v45 = vadd.f32 %v9994_v47, %v19307_v54 }
 0x372   :  { %v15307_v9 = vpop.f32.mrf.mxu0  ;;  %v19368_v12 = vpop.f32.mrf.mxu1 }
 0x373   :  { %v10981_v10 = vadd.f32 %v15307_v9, %v19314_v51  ;;  %v11212_v9 = vmax.f32 %v11092_v62, 0.0 }
 0x374   :  { %v9997_v39 = vpop.f32.mrf.mxu0  ;;  %v19386_v21 = vpop.f32.mrf.mxu1 }
 0x375   :  { %15477 = vmatmul.mubr.msk.bf16.gmra.mxu1 %vm11582_vm3, %v16050_v25  ;;  %v11209_v25 = vmax.f32 %v11089_v42, 0.0  ;;  %v11101_v2 = vadd.f32 %v10981_v10, %v18760_v8 }
 0x376   :  { %v15310_v48 = vpop.f32.mrf.mxu0  ;;  %15480 = vmatprep.mubr.msk.bf16.mxu1 %vm11582_vm3, %v16051_v31  ;;  %v19399_v22 = vpop.f32.mrf.mxu1  ;;  %v16053_v31 = vld [vmem:[%s20356_s5 + $0xc8] sm:$0xff]  }
 0x377   :  { %v10984_v43 = vadd.f32 %v15322_v32, %v15310_v48  ;;  %v10973_v32 = vadd.f32 %v19279_v6, %v19309_v24  ;;  %v16055_v6 = vld [vmem:[%s20356_s5 + $0xd0] sm:$0xff]   ;;  %v11280_v24 = vadd.f32 %v11208_v1, %v11200_v34  ;;  %v11281_v3 = vadd.f32 %v11209_v25, %v11201_v59 }
 0x378   :  { %v19405_v36 = vpop.f32.mrf.mxu0  ;;  %v19413_v56 = vpop.f32.mrf.mxu1  ;;  %v10979_v1 = vadd.f32 %v9997_v39, %v19319_v18  ;;  %v19448_v59 = vadd.f32 %v10967_v27, %v18844_v40  ;;  %v11100_v25 = vadd.f32 %v10980_v55, %v18768_v52  ;;  %v11282_v27 = vadd.f32 %v11210_v53, %v11202_v57 }
 0x379   :  { %v11104_v61 = vadd.f32 %v10984_v43, %v18824_v19  ;;  %v11093_v34 = vadd.f32 %v10973_v32, %v18760_v8  ;;  %v11313_v54 = vadd.f32 %v11281_v3, %v11217_v11  ;;  %v11312_v50 = vadd.f32 %v11280_v24, %v11216_v26 }
 0x37a   :  { %v15311_v44 = vpop.f32.mrf.mxu0  ;;  %v19428_v48 = vpop.f32.mrf.mxu1  ;;  %v11098_v32 = vadd.f32 %v10978_v45, %v18796_v35  ;;  %v11099_v37 = vadd.f32 %v10979_v1, %v18788_v63  ;;  %v11221_v26 = vmax.f32 %v11101_v2, 0.0 }
 0x37b   :  { %v10985_v42 = vadd.f32 %v19332_v29, %v15311_v44  ;;  %v11224_v0 = vmax.f32 %v11104_v61, 0.0  ;;  %v11213_v62 = vmax.f32 %v11093_v34, 0.0  ;;  %v11284_v44 = vadd.f32 %v11212_v9, %v11204_v16 }
 0x37c   :  { %v10013_v43 = vpop.f32.mrf.mxu0  ;;  %v19438_v29 = vpop.f32.mrf.mxu1  ;;  %v10975_v16 = vadd.f32 %v19334_v33, %v19299_v20  ;;  %v11220_v34 = vmax.f32 %v11100_v25, 0.0  ;;  %v11218_v1 = vmax.f32 %v11098_v32, 0.0  ;;  %v10974_v33 = vadd.f32 %v19322_v13, %v19291_v7  ;;  %v20368_v32 = vld [vmem:[#allocation2_spill] sm:$0xff] }
 0x37d   :  { %v11105_v51 = vadd.f32 %v10985_v42, %v18816_v46  ;;  %15481 = vmatmul.mubr.msk.bf16.gmra.mxu1 %vm11582_vm3, %v16053_v31  ;;  %v11344_v24 = vadd.f32 %v11312_v50, %v11224_v0  ;;  %v16059_v42 = vld [vmem:[%s20356_s5 + $0xe0] sm:$0xff]   ;;  %v11219_v0 = vmax.f32 %v11099_v37, 0.0 }
 0x37e   :  { %v15314_v17 = vpop.f32.mrf.mxu0  ;;  %15484 = vmatprep.mubr.msk.bf16.mxu1 %vm11582_vm3, %v16055_v6  ;;  %v19445_v39 = vpop.f32.mrf.mxu1  ;;  %v11211_v6 = vmax.f32 %v11091_v28, 0.0  ;;  %v11285_v28 = vadd.f32 %v11213_v62, %v11205_v15  ;;  %v11095_v50 = vadd.f32 %v10975_v16, %v18844_v40  ;;  %v11316_v25 = vadd.f32 %v11284_v44, %v11220_v34 }
 0x37f   :  { %v11225_v47 = vmax.f32 %v11105_v51, 0.0  ;;  %v10988_v18 = vadd.f32 %v19347_v60, %v15314_v17  ;;  %v16057_v60 = vld [vmem:[%s20356_s5 + $0xd8] sm:$0xff]  }
 0x380   :  { %v10026_v31 = vpop.f32.mrf.mxu0  ;;  %v19454_v61 = vpop.f32.mrf.mxu1  ;;  %v11317_v15 = vadd.f32 %v11285_v28, %v11221_v26 }
 0x381   :  { %v11345_v3 = vadd.f32 %v11313_v54, %v11225_v47  ;;  %v10986_v58 = vadd.f32 %v19359_v41, %v10026_v31  ;;  %v11108_v11 = vadd.f32 %v10988_v18, %v18768_v52  ;;  %v10983_v54 = vadd.f32 %v19339_v30, %v10013_v43 }
 0x382   :  { %v15315_v10 = vpop.f32.mrf.mxu0  ;;  %v19465_v45 = vpop.f32.mrf.mxu1  ;;  %v10982_v31 = vadd.f32 %v20368_v32, %v19405_v36 }
 0x383   :  { %v11106_v41 = vadd.f32 %v10986_v58, %v18796_v35  ;;  %v10989_v55 = vadd.f32 %v19368_v12, %v15315_v10  ;;  %v19469_v9 = vpack.c.bf16 %v11345_v3, %v11344_v24  ;;  %v20367_v12 = vmax.f32 %v19380_v49, 0.0  ;;  %v16061_v3 = vld [vmem:[%s20356_s5 + $0xe8] sm:$0xff]  }
 0x384   :  { %v10029_v51 = vpop.f32.mrf.mxu0  ;;  %v19475_v17 = vpop.f32.mrf.mxu1  ;;  %v11228_v2 = vmax.f32 %v11108_v11, 0.0  ;;  %v11314_v49 = vadd.f32 %v11282_v27, %v11218_v1  ;;  %v11207_v58 = vmax.f32 %v19448_v59, 0.0  ;;  %v11103_v44 = vadd.f32 %v10983_v54, %v18844_v40 }
 0x385   :  { %v11109_v57 = vadd.f32 %v10989_v55, %v18760_v8  ;;  %v10987_v53 = vadd.f32 %v19386_v21, %v10029_v51  ;;  %15485 = vmatmul.mubr.msk.bf16.gmra.mxu1 %vm11582_vm3, %v16057_v60  ;;  %v11283_v20 = vadd.f32 %v11211_v6, %v20367_v12  ;;  %v11226_v47 = vmax.f32 %v11106_v41, 0.0 }
 0x386   :  { %v19483_v14 = vpop.f32.mrf.mxu0  ;;  %15488 = vmatprep.mubr.msk.bf16.mxu1 %vm11582_vm3, %v16059_v42  ;;  %v19490_v13 = vpop.f32.mrf.mxu1  ;;  %v11094_v60 = vadd.f32 %v10974_v33, %v18863_v23  ;;  %v11348_v36 = vadd.f32 %v11316_v25, %v11228_v2  ;;  %v11199_v11 = vmax.f32 %v19396_v5, 0.0  ;;  %v11206_v27 = vmax.f32 %v19409_v4, 0.0 }
 0x387   :  { %v11229_v21 = vmax.f32 %v11109_v57, 0.0  ;;  %v11107_v18 = vadd.f32 %v10987_v53, %v18788_v63  ;;  %v11315_v30 = vadd.f32 %v11283_v20, %v11219_v0  ;;  %v11346_v10 = vadd.f32 %v11314_v49, %v11226_v47 }
 0x388   :  { %v10300_v7 = vpop.f32.mrf.mxu0  ;;  %v19503_v24 = vpop.f32.mrf.mxu1  ;;  %v11215_v59 = vmax.f32 %v11095_v50, 0.0  ;;  %v11102_v26 = vadd.f32 %v10982_v31, %v18863_v23  ;;  %v11198_v1 = vmax.f32 %v19390_v38, 0.0  ;;  %v11279_v51 = vadd.f32 %v11207_v58, %v11199_v11  ;;  %v16065_v38 = vld [vmem:[%s20356_s5 + $0xf8] sm:$0xff]   ;;  %v16056_v58 = vld [vmem:[%s20356_s5 + $0x110] sm:$0xff]  }
 0x389   :  { %v11349_v43 = vadd.f32 %v11317_v15, %v11229_v21  ;;  %v11227_v62 = vmax.f32 %v11107_v18, 0.0  ;;  %v19493_v37 = vadd.f32 %v10300_v7, %v19413_v56  ;;  %v16063_v56 = vld [vmem:[%s20356_s5 + $0xf0] sm:$0xff]   ;;  %v11214_v28 = vmax.f32 %v11094_v60, 0.0  ;;  %v16068_v21 = vld [vmem:[%s20356_s5 + $0x180] sm:$0xff]  }
 0x38a   :  { %v19501_v6 = vpop.f32.mrf.mxu0  ;;  %v19513_v16 = vpop.f32.mrf.mxu1  ;;  %v11223_v5 = vmax.f32 %v11103_v44, 0.0  ;;  %v11278_v57 = vadd.f32 %v11206_v27, %v11198_v1  ;;  %v11311_v53 = vadd.f32 %v11279_v51, %v11215_v59  ;;  %v11222_v12 = vmax.f32 %v11102_v26, 0.0  ;;  %v16060_v59 = vld [vmem:[%s20356_s5 + $0x120] sm:$0xff]  }
 0x38b   :  { %v11347_v42 = vadd.f32 %v11315_v30, %v11227_v62  ;;  %v11369_v55 = vpack.c.bf16 %v11349_v43, %v11348_v36  ;;  %v16054_v62 = vld [vmem:[%s20356_s5 + $0x108] sm:$0xff]   ;;  %v10992_v51 = vadd.f32 %v19483_v14, %v19399_v22 }
 0x38c   :  { %v19511_v41 = vpop.f32.mrf.mxu0  ;;  %v19519_v4 = vpop.f32.mrf.mxu1  ;;  %v11310_v54 = vadd.f32 %v11278_v57, %v11214_v28  ;;  %v11343_v2 = vadd.f32 %v11311_v53, %v11223_v5  ;;  %v10993_v57 = vadd.f32 %v19501_v6, %v19428_v48  ;;  %v19598_v48 = vadd.f32 %v19493_v37, %v18863_v23 }
 0x38d   :  { %v11368_v34 = vpack.c.bf16 %v11347_v42, %v11346_v10  ;;  %15489 = vmatmul.mubr.msk.bf16.gmra.mxu1 %vm11582_vm3, %v16061_v3  ;;  %15496 = vmatprep.subr.bf16.mxu0 %v11369_v55  ;;  %v16058_v42 = vld [vmem:[%s20356_s5 + $0x118] sm:$0xff]   ;;  %v10991_v22 = vadd.f32 %v19511_v41, %v19438_v29 }
 0x38e   :  { %v19517_v0 = vpop.f32.mrf.mxu0  ;;  %15492 = vmatprep.mubr.msk.bf16.mxu1 %vm11582_vm3, %v16063_v56  ;;  %15497 = vmatpush3.bf16.msra.mxu0 %v11369_v55  ;;  %v11342_v18 = vadd.f32 %v11310_v54, %v11222_v12  ;;  %v16062_v12 = vld [vmem:[%s20356_s5 + $0x128] sm:$0xff]   ;;  %v19588_v54 = vadd.f32 %v10992_v51, %v18824_v19  ;;  %v11113_v37 = vadd.f32 %v10993_v57, %v18816_v46 }
 0x38f   :  { %15498 = vmatprep.subr.bf16.mxu0 %v11368_v34  ;;  %v10996_v29 = vadd.f32 %v19517_v0, %v19445_v39  ;;  %v11111_v39 = vadd.f32 %v10991_v22, %v18844_v40 }
 0x390   :  { %v19522_v20 = vpop.f32.mrf.mxu0  ;;  %v19524_v33 = vpop.f32.mrf.mxu1  ;;  %v11366_v32 = vpack.c.bf16 %v11343_v2, %v11342_v18  ;;  %v16064_v2 = vld [vmem:[%s20356_s5 + $0x130] sm:$0xff]  }
 0x391   :  { %v11231_v22 = vmax.f32 %v11111_v39, 0.0 }
 0x392   :  { %v15347_v15 = vpop.f32.mrf.mxu0  ;;  %v19529_v47 = vpop.f32.mrf.mxu1  ;;  %15499 = vmatpush3.bf16.msra.mxu0 %v11368_v34 }
 0x393   :  { %15500 = vmatprep.subr.bf16.mxu0 %v19469_v9 }
 0x394   :  { %v10319_v50 = vpop.f32.mrf.mxu0  ;;  %v19535_v25 = vpop.f32.mrf.mxu1 }
 0x395   :  { %15493 = vmatmul.mubr.msk.bf16.gmra.mxu1 %vm11582_vm3, %v16065_v38 }
 0x396   :  { %v15350_v49 = vpop.f32.mrf.mxu0  ;;  %v19538_v31 = vpop.f32.mrf.mxu1  ;;  %15544 = vmatprep.mubr.msk.bf16.mxu1 %vm11582_vm3, %v16068_v21  ;;  %15501 = vmatpush3.bf16.msra.mxu0 %v19469_v9 }
 0x397   :  { %15502 = vmatprep.subr.bf16.mxu0 %v11366_v32  ;;  %v11000_v14 = vadd.f32 %v19490_v13, %v15350_v49  ;;  %v10994_v13 = vadd.f32 %v19522_v20, %v19454_v61  ;;  %v10997_v49 = vadd.f32 %v15347_v15, %v19465_v45  ;;  %v11230_v61 = vmax.f32 %v19598_v48, 0.0 }
 0x398   :  { %v10332_v7 = vpop.f32.mrf.mxu0  ;;  %v19542_v30 = vpop.f32.mrf.mxu1 }
 0x399   :  { %v10998_v6 = vadd.f32 %v19503_v24, %v10332_v7  ;;  %v10995_v24 = vadd.f32 %v10319_v50, %v19475_v17  ;;  %v11232_v7 = vmax.f32 %v19588_v54, 0.0  ;;  %v11120_v0 = vadd.f32 %v11000_v14, %v18824_v19 }
 0x39a   :  { %v15351_v43 = vpop.f32.mrf.mxu0  ;;  %v19547_v3 = vpop.f32.mrf.mxu1  ;;  %15503 = vmatpush3.bf16.msra.mxu0 %v11366_v32  ;;  %v11116_v50 = vadd.f32 %v10996_v29, %v18768_v52 }
 0x39b   :  { %v11001_v21 = vadd.f32 %v19513_v16, %v15351_v43  ;;  %v11118_v20 = vadd.f32 %v10998_v6, %v18863_v23  ;;  %v19630_v43 = vadd.f32 %v10994_v13, %v18796_v35  ;;  %v11240_v14 = vmax.f32 %v11120_v0, 0.0 }
 0x39c   :  { %v10335_v60 = vpop.f32.mrf.mxu0  ;;  %v15371_v44 = vpop.f32.mrf.mxu1  ;;  %v11236_v29 = vmax.f32 %v11116_v50, 0.0 }
 0x39d   :  { %15505 = vmatmul.mubr.msk.bf16.vlgmr.msra.gmra.mxu0 %vm11582_vm3, %v16054_v62  ;;  %v10999_v18 = vadd.f32 %v19519_v4, %v10335_v60  ;;  %v11121_v45 = vadd.f32 %v11001_v21, %v18816_v46  ;;  %v11238_v48 = vmax.f32 %v11118_v20, 0.0  ;;  %v11234_v13 = vmax.f32 %v19630_v43, 0.0 }
 0x39e   :  { %v15354_v9 = vpop.f32.mrf.mxu0  ;;  %v19553_v36 = vpop.f32.mrf.mxu1  ;;  %15508 = vmatprep.mubr.msk.bf16.mxu0 %vm11582_vm3, %v16056_v58 }
 0x39f   :  { %v11004_v41 = vadd.f32 %v19524_v33, %v15354_v9  ;;  %v11119_v17 = vadd.f32 %v10999_v18, %v18844_v40  ;;  %v11233_v9 = vmax.f32 %v11113_v37, 0.0  ;;  %v11241_v6 = vmax.f32 %v11121_v45, 0.0 }
 0x3a0   :  { %v10348_v56 = vpop.f32.mrf.mxu0  ;;  %v19556_v11 = vpop.f32.mrf.mxu1  ;;  %v11286_v20 = vadd.f32 %v11238_v48, %v11230_v61 }
 0x3a1   :  { %v11124_v58 = vadd.f32 %v11004_v41, %v18768_v52 }
 0x3a2   :  { %v15355_v10 = vpop.f32.mrf.mxu0  ;;  %v19561_v27 = vpop.f32.mrf.mxu1 }
 0x3a3   :  { %v11244_v41 = vmax.f32 %v11124_v58, 0.0 }
 0x3a4   :  { %v19566_v26 = vpop.f32.mrf.mxu0  ;;  %v19568_v55 = vpop.f32.mrf.mxu1 }
 0x3a5   :  { %15509 = vmatmul.mubr.msk.bf16.gmra.mxu0 %vm11582_vm3, %v16058_v42  ;;  %v19635_v42 = vadd.f32 %v10997_v49, %v18760_v8  ;;  %v11288_v49 = vadd.f32 %v11240_v14, %v11232_v7  ;;  %v19672_v58 = vadd.f32 %v11244_v41, %v11236_v29  ;;  %v11003_v7 = vadd.f32 %v19538_v31, %v19566_v26 }
 0x3a6   :  { %v15382_v34 = vpop.f32.mrf.mxu0  ;;  %v19571_v1 = vpop.f32.mrf.mxu1  ;;  %15512 = vmatprep.mubr.msk.bf16.mxu0 %vm11582_vm3, %v16060_v59  ;;  %v19638_v59 = vadd.f32 %v10995_v24, %v18788_v63 }
 0x3a7   :  { %v11008_v60 = vadd.f32 %v15382_v34, %v19542_v30  ;;  %v11005_v30 = vadd.f32 %v19535_v25, %v15355_v10  ;;  %v16067_v34 = vld [vmem:[%s20356_s5 + $0x140] sm:$0xff]   ;;  %v11237_v25 = vmax.f32 %v19635_v42, 0.0 }
 0x3a8   :  { %v19576_v28 = vpop.f32.mrf.mxu0  ;;  %v19578_v5 = vpop.f32.mrf.mxu1 }
 0x3a9   :  { %v11006_v10 = vadd.f32 %v19576_v28, %v19547_v3  ;;  %v19667_v39 = vadd.f32 %v11005_v30, %v18760_v8  ;;  %v11289_v3 = vadd.f32 %v11241_v6, %v11233_v9 }
 0x3aa   :  { %v15383_v53 = vpop.f32.mrf.mxu0  ;;  %v19585_v38 = vpop.f32.mrf.mxu1 }
 0x3ab   :  { %v11009_v51 = vadd.f32 %v15383_v53, %v15371_v44  ;;  %v11239_v44 = vmax.f32 %v11119_v17, 0.0  ;;  %v11245_v31 = vmax.f32 %v19667_v39, 0.0 }
 0x3ac   :  { %v10625_v32 = vpop.f32.mrf.mxu0  ;;  %v19603_v62 = vpop.f32.mrf.mxu1 }
 0x3ad   :  { %15513 = vmatmul.mubr.msk.bf16.gmra.mxu0 %vm11582_vm3, %v16062_v12  ;;  %v16066_v12 = vld [vmem:[%s20356_s5 + $0x138] sm:$0xff]   ;;  %v11007_v53 = vadd.f32 %v10625_v32, %v19553_v36  ;;  %v11129_v37 = vadd.f32 %v11009_v51, %v18816_v46  ;;  %v11287_v28 = vadd.f32 %v11239_v44, %v11231_v22  ;;  %v16069_v22 = vld [vmem:[%s20356_s5 + $0x148] sm:$0xff]  }
 0x3ae   :  { %v15386_v16 = vpop.f32.mrf.mxu0  ;;  %v19614_v4 = vpop.f32.mrf.mxu1  ;;  %15516 = vmatprep.mubr.msk.bf16.mxu0 %vm11582_vm3, %v16064_v2  ;;  %v11002_v2 = vadd.f32 %v19529_v47, %v10348_v56  ;;  %v11128_v47 = vadd.f32 %v11008_v60, %v18824_v19  ;;  %v11235_v56 = vmax.f32 %v19638_v59, 0.0  ;;  %v16077_v59 = vld [vmem:[%s20356_s5 + $0x168] sm:$0xff]  }
 0x3af   :  { %v11127_v45 = vadd.f32 %v11007_v53, %v18844_v40  ;;  %v11012_v14 = vadd.f32 %v15386_v16, %v19556_v11  ;;  %v16071_v11 = vld [vmem:[%s20356_s5 + $0x150] sm:$0xff]   ;;  %v11123_v53 = vadd.f32 %v11003_v7, %v18788_v63 }
 0x3b0   :  { %v19624_v33 = vpop.f32.mrf.mxu0  ;;  %v19626_v15 = vpop.f32.mrf.mxu1  ;;  %v19664_v24 = vadd.f32 %v11002_v2, %v18796_v35  ;;  %v11248_v60 = vmax.f32 %v11128_v47, 0.0 }
 0x3b1   :  { %v11247_v16 = vmax.f32 %v11127_v45, 0.0  ;;  %v11132_v47 = vadd.f32 %v11012_v14, %v18768_v52 }
 0x3b2   :  { %v15387_v57 = vpop.f32.mrf.mxu0  ;;  %v19643_v54 = vpop.f32.mrf.mxu1  ;;  %v11242_v30 = vmax.f32 %v19664_v24, 0.0  ;;  %v11320_v29 = vadd.f32 %v11288_v49, %v11248_v60 }
 0x3b3   :  { %v11013_v26 = vadd.f32 %v15387_v57, %v19568_v55  ;;  %v11252_v7 = vmax.f32 %v11132_v47, 0.0 }
 0x3b4   :  { %v10641_v21 = vpop.f32.mrf.mxu0  ;;  %v19651_v18 = vpop.f32.mrf.mxu1 }
 0x3b5   :  { %15517 = vmatmul.mubr.msk.bf16.gmra.mxu0 %vm11582_vm3, %v16066_v12  ;;  %v11126_v12 = vadd.f32 %v11006_v10, %v18863_v23  ;;  %v11324_v42 = vadd.f32 %v19672_v58, %v11252_v7 }
 0x3b6   :  { %v15390_v36 = vpop.f32.mrf.mxu0  ;;  %v19661_v32 = vpop.f32.mrf.mxu1  ;;  %15520 = vmatprep.mubr.msk.bf16.mxu0 %vm11582_vm3, %v16067_v34  ;;  %v11011_v34 = vadd.f32 %v10641_v21, %v19571_v1 }
 0x3b7   :  { %v11016_v0 = vadd.f32 %v19578_v5, %v15390_v36  ;;  %v11249_v5 = vmax.f32 %v11129_v37, 0.0  ;;  %v11246_v57 = vmax.f32 %v11126_v12, 0.0 }
 0x3b8   :  { %v10654_v17 = vpop.f32.mrf.mxu0  ;;  %v15410_v50 = vpop.f32.mrf.mxu1  ;;  %v11131_v36 = vadd.f32 %v11011_v34, %v18788_v63 }
 0x3b9   :  { %v11014_v51 = vadd.f32 %v19585_v38, %v10654_v17  ;;  %v11136_v61 = vadd.f32 %v11016_v0, %v18824_v19  ;;  %v11010_v19 = vadd.f32 %v19624_v33, %v19561_v27  ;;  %v11321_v41 = vadd.f32 %v11289_v3, %v11249_v5 }
 0x3ba   :  { %v15391_v9 = vpop.f32.mrf.mxu0  ;;  %v10815_v2 = vpop.f32.mrf.mxu1  ;;  %v11243_v50 = vmax.f32 %v11123_v53, 0.0 }
 0x3bb   :  { %v11017_v38 = vadd.f32 %v19603_v62, %v15391_v9  ;;  %v11134_v48 = vadd.f32 %v11014_v51, %v18863_v23  ;;  %v11256_v10 = vmax.f32 %v11136_v61, 0.0  ;;  %v11133_v23 = vadd.f32 %v11013_v26, %v18760_v8 }
 0x3bc   :  { %v10657_v6 = vpop.f32.mrf.mxu0  ;;  %v15411_v44 = vpop.f32.mrf.mxu1 }
 0x3bd   :  { %v11137_v55 = vadd.f32 %v11017_v38, %v18816_v46  ;;  %v11015_v62 = vadd.f32 %v19614_v4, %v10657_v6  ;;  %15521 = vmatmul.mubr.msk.bf16.gmra.mxu0 %vm11582_vm3, %v16069_v22  ;;  %v11319_v46 = vadd.f32 %v11287_v28, %v11247_v16  ;;  %v11130_v4 = vadd.f32 %v11010_v19, %v18796_v35  ;;  %v16073_v28 = vld [vmem:[%s20356_s5 + $0x158] sm:$0xff]  }
 0x3be   :  { %v15394_v37 = vpop.f32.mrf.mxu0  ;;  %v10817_v27 = vpop.f32.mrf.mxu1  ;;  %15524 = vmatprep.mubr.msk.bf16.mxu0 %vm11582_vm3, %v16071_v11  ;;  %v11254_v49 = vmax.f32 %v11134_v48, 0.0  ;;  %v11253_v12 = vmax.f32 %v11133_v23, 0.0  ;;  %v11251_v38 = vmax.f32 %v11131_v36, 0.0  ;;  %v11291_v19 = vadd.f32 %v11243_v50, %v11235_v56 }
 0x3bf   :  { %v11257_v1 = vmax.f32 %v11137_v55, 0.0  ;;  %v11135_v33 = vadd.f32 %v11015_v62, %v18844_v40  ;;  %v11020_v21 = vadd.f32 %v19626_v15, %v15394_v37  ;;  %v11318_v40 = vadd.f32 %v11286_v20, %v11246_v57  ;;  %v16081_v55 = vld [vmem:[%s20356_s5 + $0x178] sm:$0xff]   ;;  %v16070_v62 = vld [vmem:[%s20356_s5 + $0x188] sm:$0xff]   ;;  %v16072_v57 = vld [vmem:[%s20356_s5 + $0x190] sm:$0xff]  }
 0x3c0   :  { %v10670_v24 = vpop.f32.mrf.mxu0  ;;  %v15414_v39 = vpop.f32.mrf.mxu1  ;;  %v11352_v15 = vadd.f32 %v11320_v29, %v11256_v10  ;;  %v11250_v20 = vmax.f32 %v11130_v4, 0.0  ;;  %v16079_v29 = vld [vmem:[%s20356_s5 + $0x170] sm:$0xff]   ;;  %v16076_v10 = vld [vmem:[%s20356_s5 + $0x1a0] sm:$0xff]   ;;  %v16078_v27 = vld [vmem:[%s20356_s5 + $0x1a8] sm:$0xff]  }
 0x3c1   :  { %v11353_v0 = vadd.f32 %v11321_v41, %v11257_v1  ;;  %v11255_v3 = vmax.f32 %v11135_v33, 0.0  ;;  %v11140_v45 = vadd.f32 %v11020_v21, %v18768_v52  ;;  %v11018_v17 = vadd.f32 %v19643_v54, %v10670_v24  ;;  %v16075_v52 = vld [vmem:[%s20356_s5 + $0x160] sm:$0xff]   ;;  %v16074_v41 = vld [vmem:[%s20356_s5 + $0x198] sm:$0xff]   ;;  %v16080_v1 = vld [vmem:[%s20356_s5 + $0x1b0] sm:$0xff]  }
 0x3c2   :  { %v15395_v60 = vpop.f32.mrf.mxu0  ;;  %v10827_v51 = vpop.f32.mrf.mxu1  ;;  %v11293_v54 = vadd.f32 %v11245_v31, %v11237_v25  ;;  %v11350_v9 = vadd.f32 %v11318_v40, %v11254_v49  ;;  %v16082_v21 = vld [vmem:[%s20356_s5 + $0x1b8] sm:$0xff]   ;;  %v16083_v4 = vld [vmem:[%s20356_s5 + $0x1c0] sm:$0xff]   ;;  %v16084_v49 = vld [vmem:[%s20356_s5 + $0x1c8] sm:$0xff]  }
 0x3c3   :  { %v11351_v5 = vadd.f32 %v11319_v46, %v11255_v3  ;;  %v11138_v14 = vadd.f32 %v11018_v17, %v18796_v35  ;;  %v11021_v61 = vadd.f32 %v19651_v18, %v15395_v60  ;;  %v11371_v2 = vpack.c.bf16 %v11353_v0, %v11352_v15  ;;  %v16085_v39 = vld [vmem:[%s20356_s5 + $0x1d0] sm:$0xff]   ;;  %v16086_v3 = vld [vmem:[%s20356_s5 + $0x1d8] sm:$0xff]   ;;  %v16087_v17 = vld [vmem:[%s20356_s5 + $0x1e0] sm:$0xff]  }
 0x3c4   :  { %v10673_v22 = vpop.f32.mrf.mxu0  ;;  %v15415_v26 = vpop.f32.mrf.mxu1  ;;  %v11260_v11 = vmax.f32 %v11140_v45, 0.0  ;;  %v11290_v18 = vadd.f32 %v11242_v30, %v11234_v13  ;;  %v11325_v34 = vadd.f32 %v11293_v54, %v11253_v12  ;;  %v16088_v40 = vld [vmem:[%s20356_s5 + $0x1e8] sm:$0xff]   ;;  %v16089_v15 = vld [vmem:[%s20356_s5 + $0x1f0] sm:$0xff]  }
 0x3c5   :  { %v11141_v16 = vadd.f32 %v11021_v61, %v18760_v8  ;;  %v11019_v35 = vadd.f32 %v19661_v32, %v10673_v22  ;;  %v11370_v25 = vpack.c.bf16 %v11351_v5, %v11350_v9  ;;  %15525 = vmatmul.mubr.msk.bf16.gmra.mxu0 %vm11582_vm3, %v16073_v28  ;;  %v11258_v48 = vmax.f32 %v11138_v14, 0.0  ;;  %v16090_v28 = vld [vmem:[%s20356_s5 + $0x1f8] sm:$0xff]  }
 0x3c6   :  { %v10829_v31 = vpop.f32.mrf.mxu1  ;;  %15528 = vmatprep.mubr.msk.bf16.mxu0 %vm11582_vm3, %v16075_v52  ;;  %v11322_v8 = vadd.f32 %v11290_v18, %v11250_v20  ;;  %v11323_v32 = vadd.f32 %v11291_v19, %v11251_v38  ;;  %v11356_v43 = vadd.f32 %v11324_v42, %v11260_v11 }
 0x3c7   :  { %v11261_v6 = vmax.f32 %v11141_v16, 0.0  ;;  %v11139_v44 = vadd.f32 %v11019_v35, %v18788_v63 }
 0x3c8   :  { %v11354_v56 = vadd.f32 %v11322_v8, %v11258_v48 }
 0x3c9   :  { %v11357_v13 = vadd.f32 %v11325_v34, %v11261_v6  ;;  %v11259_v30 = vmax.f32 %v11139_v44, 0.0 }
 0x3cb   :  { %v11355_v58 = vadd.f32 %v11323_v32, %v11259_v30  ;;  %v11373_v53 = vpack.c.bf16 %v11357_v13, %v11356_v43 }
 0x3cd   :  { %15536 = vmatprep.subr.bf16.mxu1 %v11373_v53  ;;  %v11372_v63 = vpack.c.bf16 %v11355_v58, %v11354_v56  ;;  %15529 = vmatmul.mubr.msk.bf16.gmra.mxu0 %vm11582_vm3, %v16077_v59 }
 0x3ce   :  { %15537 = vmatpush3.bf16.msra.mxu1 %v11373_v53  ;;  %15532 = vmatprep.mubr.msk.bf16.mxu0 %vm11582_vm3, %v16079_v29 }
 0x3cf   :  { %15538 = vmatprep.subr.bf16.mxu1 %v11372_v63 }
 0x3d2   :  { %15539 = vmatpush3.bf16.msra.mxu1 %v11372_v63 }
 0x3d3   :  { %15540 = vmatprep.subr.bf16.mxu1 %v11371_v2 }
 0x3d5   :  { %15533 = vmatmul.mubr.msk.bf16.gmra.mxu0 %vm11582_vm3, %v16081_v55 }
 0x3d6   :  { %15541 = vmatpush3.bf16.msra.mxu1 %v11371_v2 }
 0x3d7   :  { %15542 = vmatprep.subr.bf16.mxu1 %v11370_v25 }
 0x3da   :  { %15543 = vmatpush3.bf16.msra.mxu1 %v11370_v25 }
 0x3dd   :  { %15545 = vmatmul.mubr.msk.bf16.vlgmr.msra.gmra.mxu1 %vm11582_vm3, %v16070_v62  ;;  %v19750_v47 = vpop.f32.mrf.mxu0  ;;  %v19897_v62 = vpop.permute.xlu0 %12661 }
 0x3de   :  { %15548 = vmatprep.mubr.msk.bf16.mxu1 %vm11582_vm3, %v16072_v57 }
 0x3df   :  { %v19756_v37 = vpop.f32.mrf.mxu0 }
 0x3e1   :  { %v19762_v23 = vpop.f32.mrf.mxu0 }
 0x3e3   :  { %v19768_v33 = vpop.f32.mrf.mxu0 }
 0x3e5   :  { %15549 = vmatmul.mubr.msk.bf16.gmra.mxu1 %vm11582_vm3, %v16074_v41  ;;  %v19774_v46 = vpop.f32.mrf.mxu0 }
 0x3e6   :  { %15552 = vmatprep.mubr.msk.bf16.mxu1 %vm11582_vm3, %v16076_v10  ;;  %v19903_v10 = vpop.permute.xlu1 %12666 }
 0x3e7   :  { %v19780_v36 = vpop.f32.mrf.mxu0 }
 0x3e9   :  { %v19786_v24 = vpop.f32.mrf.mxu0 }
 0x3eb   :  { %v19792_v0 = vpop.f32.mrf.mxu0 }
 0x3ed   :  { %15553 = vmatmul.mubr.msk.bf16.gmra.mxu1 %vm11582_vm3, %v16078_v27  ;;  %v19798_v45 = vpop.f32.mrf.mxu0 }
 0x3ee   :  { %15556 = vmatprep.mubr.msk.bf16.mxu1 %vm11582_vm3, %v16080_v1 }
 0x3ef   :  { %v19804_v50 = vpop.f32.mrf.mxu0 }
 0x3f1   :  { %v19810_v7 = vpop.f32.mrf.mxu0 }
 0x3f3   :  { %v19816_v60 = vpop.f32.mrf.mxu0 }
 0x3f5   :  { %15557 = vmatmul.mubr.msk.bf16.gmra.mxu1 %vm11582_vm3, %v16082_v21  ;;  %v19822_v51 = vpop.f32.mrf.mxu0 }
 0x3f6   :  { %15560 = vmatprep.mubr.msk.bf16.mxu1 %vm11582_vm3, %v16083_v4  ;;  %v19911_v4 = vpop.permute.xlu0 %12671 }
 0x3f7   :  { %v19825_v12 = vpop.f32.mrf.mxu0 }
 0x3f9   :  { %v19827_v5 = vpop.f32.mrf.mxu0 }
 0x3fb   :  { %v19829_v14 = vpop.f32.mrf.mxu0 }
 0x3fd   :  { %15561 = vmatmul.mubr.msk.bf16.gmra.mxu1 %vm11582_vm3, %v16084_v49  ;;  %v19831_v61 = vpop.f32.mrf.mxu0 }
 0x3fe   :  { %15564 = vmatprep.mubr.msk.bf16.mxu1 %vm11582_vm3, %v16085_v39  ;;  %v19915_v39 = vpop.permute.xlu1 %12676 }
 0x3ff   :  { %v19835_v54 = vpop.f32.mrf.mxu0 }
 0x401   :  { %v19839_v9 = vpop.f32.mrf.mxu0 }
 0x403   :  { %v19843_v2 = vpop.f32.mrf.mxu0 }
 0x405   :  { %15565 = vmatmul.mubr.msk.bf16.gmra.mxu1 %vm11582_vm3, %v16086_v3  ;;  %v19847_v38 = vpop.f32.mrf.mxu0 }
 0x406   :  { %15568 = vmatprep.mubr.msk.bf16.mxu1 %vm11582_vm3, %v16087_v17 }
 0x407   :  { %v19851_v16 = vpop.f32.mrf.mxu0 }
 0x409   :  { %v19855_v18 = vpop.f32.mrf.mxu0 }
 0x40b   :  { %v19859_v42 = vpop.f32.mrf.mxu0 }
 0x40d   :  { %15569 = vmatmul.mubr.msk.bf16.gmra.mxu1 %vm11582_vm3, %v16088_v40  ;;  %v19863_v31 = vpop.f32.mrf.mxu0 }
 0x40e   :  { %15572 = vmatprep.mubr.msk.bf16.mxu1 %vm11582_vm3, %v16089_v15  ;;  %v19923_v15 = vpop.permute.xlu0 %12681 }
 0x40f   :  { %v19867_v48 = vpop.f32.mrf.mxu0 }
 0x411   :  { %v19871_v44 = vpop.f32.mrf.mxu0 }
 0x413   :  { %v19875_v32 = vpop.f32.mrf.mxu0 }
 0x415   :  { %15573 = vmatmul.mubr.msk.bf16.gmra.mxu1 %vm11582_vm3, %v16090_v28  ;;  %v19879_v13 = vpop.f32.mrf.mxu0 }
 0x417   :  { %v19883_v59 = vpop.f32.mrf.mxu0 }
 0x418   :  { %20369 = vst [vmem:[#allocation2_spill] sm:$0xff] %v19883_v59 }
 0x419   :  { %v19887_v58 = vpop.f32.mrf.mxu0 }
 0x41a   :  { %20371 = vst [vmem:[#allocation4_spill] sm:$0xff] %v19887_v58 }
 0x41b   :  { %v19891_v29 = vpop.f32.mrf.mxu0 }
 0x41c   :  { %20373 = vst [vmem:[#allocation6_spill] sm:$0xff] %v19891_v29  ;;  %v19929_v29 = vpop.permute.xlu1 %12686 }
 0x41d   :  { %v19833_v52 = vpop.f32.mrf.mxu1 }
 0x41f   :  { %v19837_v20 = vpop.f32.mrf.mxu1 }
 0x421   :  { %v19841_v22 = vpop.f32.mrf.mxu1 }
 0x423   :  { %v19845_v26 = vpop.f32.mrf.mxu1 }
 0x425   :  { %v19849_v11 = vpop.f32.mrf.mxu1 }
 0x427   :  { %v19853_v35 = vpop.f32.mrf.mxu1 }
 0x429   :  { %v19857_v19 = vpop.f32.mrf.mxu1 }
 0x42b   :  { %v19861_v25 = vpop.f32.mrf.mxu1 }
 0x42d   :  { %v19865_v34 = vpop.f32.mrf.mxu1 }
 0x42f   :  { %v19869_v6 = vpop.f32.mrf.mxu1 }
 0x431   :  { %v19873_v8 = vpop.f32.mrf.mxu1 }
 0x433   :  { %v19877_v43 = vpop.f32.mrf.mxu1 }
 0x435   :  { %v19881_v30 = vpop.f32.mrf.mxu1 }
 0x437   :  { %v19885_v56 = vpop.f32.mrf.mxu1 }
 0x438   :  { %20370 = vst [vmem:[#allocation3_spill] sm:$0xff] %v19885_v56 }
 0x439   :  { %v19889_v53 = vpop.f32.mrf.mxu1 }
 0x43a   :  { %20372 = vst [vmem:[#allocation5_spill] sm:$0xff] %v19889_v53 }
 0x43b   :  { %v19893_v63 = vpop.f32.mrf.mxu1 }
 0x43c   :  { %20374 = vst [vmem:[#allocation7_spill] sm:$0xff] %v19893_v63 }
 0x43d   :  { %v19899_v57 = vpop.f32.mrf.mxu1 }
 0x43e   :  { %20376 = vst [vmem:[#allocation9_spill] sm:$0xff] %v19899_v57 }
 0x43f   :  { %v19907_v1 = vpop.f32.mrf.mxu1 }
 0x440   :  { %20379 = vst [vmem:[#allocation12_spill] sm:$0xff] %v19907_v1 }
 0x441   :  { %v19917_v3 = vpop.f32.mrf.mxu1 }
 0x442   :  { %20382 = vst [vmem:[#allocation15_spill] sm:$0xff] %v19917_v3 }
 0x443   :  { %v19925_v28 = vpop.f32.mrf.mxu1 }
 0x444   :  { %20385 = vst [vmem:[#allocation18_spill] sm:$0xff] %v19925_v28 }
 0x445   :  { %v19933_v58 = vpop.f32.mrf.mxu1 }
 0x446   :  { %20388 = vst [vmem:[#allocation21_spill] sm:$0xff] %v19933_v58 }
 0x45d   :  { %v19895_v55 = vpop.f32.mrf.mxu0 }
 0x45e   :  { %20375 = vst [vmem:[#allocation8_spill] sm:$0xff] %v19895_v55 }
 0x45f   :  { %v19901_v41 = vpop.f32.mrf.mxu0 }
 0x460   :  { %20377 = vst [vmem:[#allocation10_spill] sm:$0xff] %v19901_v41 }
 0x461   :  { %v19905_v27 = vpop.f32.mrf.mxu0 }
 0x462   :  { %20378 = vst [vmem:[#allocation11_spill] sm:$0xff] %v19905_v27 }
 0x463   :  { %v19909_v21 = vpop.f32.mrf.mxu0 }
 0x464   :  { %20380 = vst [vmem:[#allocation13_spill] sm:$0xff] %v19909_v21  ;;  %v19937_v21 = vpop.permute.xlu0 %12691 }
 0x465   :  { %v19913_v49 = vpop.f32.mrf.mxu0 }
 0x466   :  { %20381 = vst [vmem:[#allocation14_spill] sm:$0xff] %v19913_v49 }
 0x467   :  { %v19919_v17 = vpop.f32.mrf.mxu0 }
 0x468   :  { %20383 = vst [vmem:[#allocation16_spill] sm:$0xff] %v19919_v17  ;;  %v19941_v17 = vpop.permute.xlu1 %12696 }
 0x469   :  { %v19921_v40 = vpop.f32.mrf.mxu0 }
 0x46a   :  { %20384 = vst [vmem:[#allocation17_spill] sm:$0xff] %v19921_v40  ;;  %v19943_v40 = vpop.f32.mrf.mxu1 }
 0x46b   :  { %v19927_v63 = vpop.f32.mrf.mxu0  ;;  %20391 = vst [vmem:[#allocation24_spill] sm:$0xff] %v19943_v40 }
 0x46c   :  { %20386 = vst [vmem:[#allocation19_spill] sm:$0xff] %v19927_v63  ;;  %v19949_v63 = vpop.permute.xlu0 %12701  ;;  %v19951_v41 = vpop.f32.mrf.mxu1 }
 0x46d   :  { %v19931_v53 = vpop.f32.mrf.mxu0  ;;  %20394 = vst [vmem:[#allocation27_spill] sm:$0xff] %v19951_v41  ;;  %v19955_v58 = vpop.permute.xlu1 %12706 }
 0x46e   :  { %20387 = vst [vmem:[#allocation20_spill] sm:$0xff] %v19931_v53  ;;  %v19959_v1 = vpop.f32.mrf.mxu1 }
 0x46f   :  { %v19935_v49 = vpop.f32.mrf.mxu0  ;;  %20397 = vst [vmem:[#allocation30_spill] sm:$0xff] %v19959_v1 }
 0x470   :  { %20389 = vst [vmem:[#allocation22_spill] sm:$0xff] %v19935_v49  ;;  %v19963_v55 = vpop.permute.xlu0 %12711 }
 0x471   :  { %v19939_v27 = vpop.f32.mrf.mxu0 }
 0x472   :  { %20390 = vst [vmem:[#allocation23_spill] sm:$0xff] %v19939_v27 }
 0x473   :  { %v19945_v3 = vpop.f32.mrf.mxu0 }
 0x474   :  { %20392 = vst [vmem:[#allocation25_spill] sm:$0xff] %v19945_v3  ;;  %v19967_v3 = vpop.permute.xlu1 %12716  ;;  %v19977_v41 = vpop.permute.xlu0 %12721 }
 0x475   :  { %v19947_v28 = vpop.f32.mrf.mxu0  ;;  %20402 = vst [vmem:[#allocation35_spill] sm:$0xff] %v19977_v41  ;;  %v20032_v56 = vadd.f32 %v19810_v7, %v19967_v3 }
 0x476   :  { %20393 = vst [vmem:[#allocation26_spill] sm:$0xff] %v19947_v28  ;;  %v19969_v28 = vpop.f32.mrf.mxu1 }
 0x477   :  { %v19953_v53 = vpop.f32.mrf.mxu0  ;;  %20400 = vst [vmem:[#allocation33_spill] sm:$0xff] %v19969_v28  ;;  %v19991_v28 = vadd.f32 %v19903_v10, %v19768_v33  ;;  %v20012_v33 = vadd.f32 %v19929_v29, %v19792_v0  ;;  %v20028_v0 = vadd.f32 %v19949_v63, %v19804_v50 }
 0x478   :  { %20395 = vst [vmem:[#allocation28_spill] sm:$0xff] %v19953_v53  ;;  %v19975_v53 = vadd.f32 %v19750_v47, %v19911_v4  ;;  %v19987_v1 = vpop.f32.mrf.mxu1  ;;  %v19995_v47 = vadd.f32 %v19774_v46, %v19937_v21  ;;  %v20034_v46 = vpop.permute.xlu0 %12731 }
 0x479   :  { %v19957_v49 = vpop.f32.mrf.mxu0  ;;  %20403 = vst [vmem:[#allocation36_spill] sm:$0xff] %v19987_v1  ;;  %v20008_v1 = vadd.f32 %v19786_v24, %v19941_v17  ;;  %v12756_v24 = vmax.f32 %v19991_v28, 0.0  ;;  %v12772_v28 = vadd.f32 %v19845_v26, %v19843_v2  ;;  %v12777_v2 = vadd.f32 %v19849_v11, %v19847_v38 }
 0x47a   :  { %20396 = vst [vmem:[#allocation29_spill] sm:$0xff] %v19957_v49  ;;  %v19981_v49 = vadd.f32 %v19897_v62, %v19756_v37  ;;  %v20001_v37 = vadd.f32 %v19923_v15, %v19780_v36  ;;  %v20018_v36 = vadd.f32 %v19798_v45, %v19963_v55  ;;  %v20053_v45 = vadd.f32 %v19822_v51, %v20034_v46 }
 0x47b   :  { %v19961_v27 = vpop.f32.mrf.mxu0  ;;  %v12820_v50 = vadd.f32 %v12772_v28, %v19903_v10  ;;  %v12778_v38 = vadd.f32 %v19857_v19, %v19855_v18  ;;  %v12781_v18 = vadd.f32 %v19865_v34, %v19863_v31 }
 0x47c   :  { %20398 = vst [vmem:[#allocation31_spill] sm:$0xff] %v19961_v27  ;;  %v19985_v27 = vadd.f32 %v19762_v23, %v19915_v39  ;;  %v12757_v23 = vmax.f32 %v19975_v53, 0.0  ;;  %v20022_v53 = vpop.f32.mrf.mxu1 }
 0x47d   :  { %v19965_v40 = vpop.f32.mrf.mxu0  ;;  %20405 = vst [vmem:[#allocation38_spill] sm:$0xff] %v20022_v53  ;;  %v20049_v53 = vadd.f32 %v19955_v58, %v19816_v60 }
 0x47e   :  { %20399 = vst [vmem:[#allocation32_spill] sm:$0xff] %v19965_v40  ;;  %v20065_v26 = vpop.f32.mrf.mxu1 }
 0x47f   :  { %v19971_v57 = vpop.f32.mrf.mxu0 }
 0x480   :  { %20401 = vst [vmem:[#allocation34_spill] sm:$0xff] %v19971_v57  ;;  %v19997_v57 = vpop.permute.xlu1 %12726  ;;  %v20094_v19 = vpop.f32.mrf.mxu1 }
 0x481   :  { %v20003_v40 = vpop.f32.mrf.mxu0 }
 0x482   :  { %20404 = vst [vmem:[#allocation37_spill] sm:$0xff] %v20003_v40  ;;  %v12773_v40 = vadd.f32 %v19833_v52, %v19831_v61  ;;  %v12771_v61 = vadd.f32 %v19837_v20, %v19835_v54  ;;  %v12774_v52 = vadd.f32 %v19841_v22, %v19839_v9  ;;  %v20060_v9 = vadd.f32 %v19977_v41, %v19825_v12 }
 0x483   :  { %v20043_v59 = vpop.f32.mrf.mxu0  ;;  %v12775_v20 = vadd.f32 %v19853_v35, %v19851_v16  ;;  %v12776_v16 = vadd.f32 %v19861_v25, %v19859_v42  ;;  %v12782_v42 = vadd.f32 %v19873_v8, %v19871_v44  ;;  %v12829_v44 = vadd.f32 %v12781_v18, %v19963_v55  ;;  %v20408_v8 = vld [vmem:[#allocation2_spill] sm:$0xff] }
 0x484   :  { %v20055_v54 = vpop.permute.xlu1 %12736  ;;  %v12821_v22 = vadd.f32 %v12773_v40, %v19911_v4  ;;  %v12819_v12 = vadd.f32 %v12771_v61, %v19897_v62  ;;  %v12822_v40 = vadd.f32 %v12774_v52, %v19915_v39  ;;  %v12825_v52 = vadd.f32 %v12777_v2, %v19937_v21 }
 0x485   :  { %v20071_v7 = vadd.f32 %v19827_v5, %v20055_v54  ;;  %v20080_v11 = vpop.f32.mrf.mxu0  ;;  %v20086_v5 = vadd.f32 %v19997_v57, %v19829_v14  ;;  %v12823_v60 = vadd.f32 %v12775_v20, %v19923_v15  ;;  %v12779_v14 = vadd.f32 %v19869_v6, %v19867_v48 }
 0x486   :  { %v12869_v61 = vmax.f32 %v12821_v22, 0.0  ;;  %v12867_v25 = vmax.f32 %v12819_v12, 0.0  ;;  %v12870_v35 = vmax.f32 %v12822_v40, 0.0  ;;  %v12868_v22 = vmax.f32 %v12820_v50, 0.0  ;;  %v20409_v50 = vld [vmem:[#allocation3_spill] sm:$0xff]  ;;  %v20114_v40 = vpop.f32.mrf.mxu1 }
 0x487   :  { %20406 = vst [vmem:[#allocation39_spill] sm:$0xff] %v20071_v7  ;;  %20407 = vst [vmem:[#allocation40_spill] sm:$0xff] %v20086_v5  ;;  %v12826_v2 = vadd.f32 %v12778_v38, %v19941_v17  ;;  %v20103_v51 = vpop.f32.mrf.mxu0  ;;  %v12824_v34 = vadd.f32 %v12776_v16, %v19929_v29  ;;  %v12780_v20 = vadd.f32 %v19877_v43, %v19875_v32  ;;  %v12873_v28 = vmax.f32 %v12825_v52, 0.0  ;;  %v20410_v5 = vld [vmem:[#allocation9_spill] sm:$0xff]  ;;  %v20411_v7 = vld [vmem:[#allocation8_spill] sm:$0xff] }
 0x488   :  { %v12785_v48 = vadd.f32 %v19881_v30, %v19879_v13  ;;  %v12917_v6 = vadd.f32 %v12869_v61, %v12757_v23  ;;  %v12783_v12 = vadd.f32 %v20409_v50, %v20408_v8  ;;  %v12871_v38 = vmax.f32 %v12823_v60, 0.0  ;;  %v20414_v8 = vld [vmem:[#allocation12_spill] sm:$0xff]  ;;  %v20415_v50 = vld [vmem:[#allocation10_spill] sm:$0xff] }
 0x489   :  { %v12827_v31 = vadd.f32 %v12779_v14, %v19949_v63  ;;  %v12830_v16 = vadd.f32 %v12782_v42, %v19967_v3  ;;  %v12789_v32 = vadd.f32 %v20411_v7, %v20410_v5  ;;  %v20412_v43 = vmax.f32 %v19981_v49, 0.0  ;;  %v20128_v18 = vpop.f32.mrf.mxu0 }
 0x48a   :  { %v20413_v30 = vmax.f32 %v19985_v27, 0.0  ;;  %v20126_v61 = vadd.f32 %v12868_v22, %v12756_v24  ;;  %v12874_v52 = vmax.f32 %v12826_v2, 0.0  ;;  %v12872_v60 = vmax.f32 %v12824_v34, 0.0  ;;  %v20417_v24 = vld [vmem:[#allocation15_spill] sm:$0xff]  ;;  %v20141_v2 = vpop.f32.mrf.mxu1 }
 0x48b   :  { %v12915_v13 = vadd.f32 %v12867_v25, %v20412_v43  ;;  %v12828_v14 = vadd.f32 %v12780_v20, %v19955_v58  ;;  %v12833_v42 = vadd.f32 %v12785_v48, %v20034_v46  ;;  %v12787_v7 = vadd.f32 %v20415_v50, %v20414_v8  ;;  %v20418_v25 = vld [vmem:[#allocation11_spill] sm:$0xff]  ;;  %20419 = vst [vmem:[#allocation2_spill] sm:$0xff] %v20141_v2  ;;  %v20423_v8 = vld [vmem:[#allocation13_spill] sm:$0xff]  ;;  %v20427_v2 = vld [vmem:[#allocation16_spill] sm:$0xff] }
 0x48c   :  { %v20124_v23 = vadd.f32 %v12870_v35, %v20413_v30  ;;  %v20416_v49 = vmax.f32 %v19995_v47, 0.0  ;;  %v12877_v27 = vmax.f32 %v12829_v44, 0.0  ;;  %v12831_v35 = vadd.f32 %v12783_v12, %v19977_v41  ;;  %v20422_v44 = vld [vmem:[#allocation18_spill] sm:$0xff]  ;;  %v20424_v50 = vld [vmem:[#allocation21_spill] sm:$0xff] }
 0x48d   :  { %v12790_v22 = vadd.f32 %v20418_v25, %v20417_v24  ;;  %v20420_v34 = vmax.f32 %v20001_v37, 0.0  ;;  %v12875_v48 = vmax.f32 %v12827_v31, 0.0  ;;  %v12878_v43 = vmax.f32 %v12830_v16, 0.0  ;;  %v20426_v25 = vld [vmem:[#allocation24_spill] sm:$0xff]  ;;  %v20158_v37 = vpop.f32.mrf.mxu0 }
 0x48e   :  { %v20136_v5 = vadd.f32 %v12873_v28, %v20416_v49  ;;  %v12837_v30 = vadd.f32 %v12789_v32, %v19911_v4  ;;  %v20421_v47 = vmax.f32 %v20008_v1, 0.0  ;;  %v12788_v12 = vadd.f32 %v20423_v8, %v20422_v44  ;;  %v20425_v49 = vld [vmem:[#allocation14_spill] sm:$0xff]  ;;  %v20430_v44 = vld [vmem:[#allocation4_spill] sm:$0xff]  ;;  %v20431_v8 = vld [vmem:[#allocation5_spill] sm:$0xff] }
 0x48f   :  { %v20145_v20 = vadd.f32 %v12871_v38, %v20420_v34  ;;  %v12793_v24 = vadd.f32 %v20425_v49, %v20424_v50  ;;  %v12791_v41 = vadd.f32 %v20427_v2, %v20426_v25  ;;  %v20428_v31 = vmax.f32 %v20012_v33, 0.0  ;;  %v20172_v49 = vpop.f32.mrf.mxu1 }
 0x490   :  { %v20150_v28 = vadd.f32 %v12874_v52, %v20421_v47  ;;  %v12876_v16 = vmax.f32 %v12828_v14, 0.0  ;;  %v12881_v32 = vmax.f32 %v12833_v42, 0.0  ;;  %v12835_v1 = vadd.f32 %v12787_v7, %v19897_v62  ;;  %v20435_v7 = vld [vmem:[#allocation6_spill] sm:$0xff] }
 0x491   :  { %v20162_v38 = vadd.f32 %v12872_v60, %v20428_v31  ;;  %v20429_v52 = vmax.f32 %v20018_v36, 0.0  ;;  %v12879_v47 = vmax.f32 %v12831_v35, 0.0  ;;  %v12786_v50 = vadd.f32 %v20431_v8, %v20430_v44  ;;  %v20436_v36 = vld [vmem:[#allocation7_spill] sm:$0xff]  ;;  %v20438_v44 = vld [vmem:[#allocation17_spill] sm:$0xff] }
 0x492   :  { %v12838_v2 = vadd.f32 %v12790_v22, %v19915_v39  ;;  %v20432_v33 = vmax.f32 %v20028_v0, 0.0  ;;  %v20433_v14 = vmax.f32 %v20032_v56, 0.0  ;;  %v12885_v25 = vmax.f32 %v12837_v30, 0.0 }
 0x493   :  { %v20167_v34 = vadd.f32 %v12877_v27, %v20429_v52  ;;  %v12784_v27 = vadd.f32 %v20436_v36, %v20435_v7  ;;  %v12836_v35 = vadd.f32 %v12788_v12, %v19903_v10  ;;  %v12841_v31 = vadd.f32 %v12793_v24, %v19937_v21  ;;  %v20437_v52 = vld [vmem:[#allocation27_spill] sm:$0xff] }
 0x494   :  { %v20176_v60 = vadd.f32 %v12875_v48, %v20432_v33  ;;  %v20180_v42 = vadd.f32 %v12878_v43, %v20433_v14  ;;  %v12839_v22 = vadd.f32 %v12791_v41, %v19923_v15  ;;  %v12794_v8 = vadd.f32 %v20438_v44, %v20437_v52  ;;  %v20189_v48 = vpop.f32.mrf.mxu0  ;;  %v20442_v14 = vld [vmem:[#allocation32_spill] sm:$0xff]  ;;  %v20445_v44 = vld [vmem:[#allocation30_spill] sm:$0xff] }
 0x495   :  { %v20439_v56 = vmax.f32 %v20049_v53, 0.0  ;;  %v20440_v33 = vmax.f32 %v20053_v45, 0.0  ;;  %v12883_v12 = vmax.f32 %v12835_v1, 0.0  ;;  %v20443_v41 = vmax.f32 %v20060_v9, 0.0  ;;  %v20447_v1 = vld [vmem:[#allocation34_spill] sm:$0xff] }
 0x496   :  { %20434 = vst [vmem:[#allocation3_spill] sm:$0xff] %v20180_v42  ;;  %v20205_v36 = vadd.f32 %v12786_v50, %v20055_v54  ;;  %v12886_v52 = vmax.f32 %v12838_v2, 0.0  ;;  %v20446_v42 = vld [vmem:[#allocation19_spill] sm:$0xff]  ;;  %v12933_v45 = vadd.f32 %v12917_v6, %v12885_v25  ;;  %v12889_v9 = vmax.f32 %v12841_v31, 0.0  ;;  %v20449_v25 = vld [vmem:[#allocation33_spill] sm:$0xff]  ;;  %v20451_v31 = vld [vmem:[#allocation36_spill] sm:$0xff] }
 0x497   :  { %v20193_v43 = vadd.f32 %v12876_v16, %v20439_v56  ;;  %v20197_v30 = vadd.f32 %v12881_v32, %v20440_v33  ;;  %v20202_v7 = vadd.f32 %v12879_v47, %v20443_v41  ;;  %v12792_v53 = vadd.f32 %v20446_v42, %v20445_v44  ;;  %v20215_v41 = vpop.f32.mrf.mxu0  ;;  %v20448_v44 = vld [vmem:[#allocation37_spill] sm:$0xff] }
 0x498   :  { %v20210_v56 = vadd.f32 %v12784_v27, %v19997_v57  ;;  %v12884_v33 = vmax.f32 %v12836_v35, 0.0  ;;  %v12887_v47 = vmax.f32 %v12839_v22, 0.0  ;;  %v12931_v2 = vadd.f32 %v12915_v13, %v12883_v12  ;;  %v20452_v22 = vld [vmem:[#allocation22_spill] sm:$0xff] }
 0x499   :  { %20441 = vst [vmem:[#allocation9_spill] sm:$0xff] %v20197_v30  ;;  %20444 = vst [vmem:[#allocation8_spill] sm:$0xff] %v20202_v7  ;;  %v12934_v6 = vadd.f32 %v20124_v23, %v12886_v52 }
 0x49a   :  { %v12935_v23 = vadd.f32 %v20145_v20, %v12887_v47  ;;  %v20453_v47 = vld [vmem:[#allocation38_spill] sm:$0xff] }
 0x49d   :  { %v15546_v0 = vpop.f32.mrf.mxu1 }
 0x49e   :  { %v12805_v24 = vadd.f32 %v15546_v0, %v20442_v14  ;;  %v12842_v14 = vadd.f32 %v12794_v8, %v19941_v17 }
 0x49f   :  { %v12532_v16 = vpop.f32.mrf.mxu1 }
 0x4a0   :  { %v12853_v32 = vadd.f32 %v12805_v24, %v19911_v4  ;;  %v12803_v0 = vadd.f32 %v12532_v16, %v20447_v1  ;;  %v12840_v4 = vadd.f32 %v12792_v53, %v19929_v29  ;;  %v20450_v24 = vld [vmem:[#allocation20_spill] sm:$0xff]  ;;  %v12795_v16 = vadd.f32 %v20452_v22, %v20451_v31 }
 0x4a1   :  { %v15547_v50 = vpop.f32.mrf.mxu1  ;;  %v12797_v35 = vadd.f32 %v20450_v24, %v20449_v25  ;;  %v12890_v52 = vmax.f32 %v12842_v14, 0.0  ;;  %v20454_v14 = vld [vmem:[#allocation23_spill] sm:$0xff] }
 0x4a2   :  { %v12901_v7 = vmax.f32 %v12853_v32, 0.0  ;;  %v12851_v42 = vadd.f32 %v12803_v0, %v19897_v62  ;;  %v12806_v27 = vadd.f32 %v15547_v50, %v20448_v44  ;;  %v12932_v62 = vadd.f32 %v20126_v61, %v12884_v33  ;;  %v20230_v0 = vpop.f32.mrf.mxu0 }
 0x4a3   :  { %v12535_v8 = vpop.f32.mrf.mxu1  ;;  %v12937_v32 = vadd.f32 %v20136_v5, %v12889_v9 }
 0x4a4   :  { %v12949_v1 = vadd.f32 %v12933_v45, %v12901_v7  ;;  %v12899_v30 = vmax.f32 %v12851_v42, 0.0  ;;  %v12854_v13 = vadd.f32 %v12806_v27, %v19915_v39  ;;  %v12804_v12 = vadd.f32 %v12535_v8, %v20043_v59  ;;  %v20455_v42 = vld [vmem:[#allocation25_spill] sm:$0xff]  ;;  %v12342_v24 = vpop.f32.mrf.mxu0 }
 0x4a5   :  { %v15550_v53 = vpop.f32.mrf.mxu1  ;;  %v12888_v45 = vmax.f32 %v12840_v4, 0.0  ;;  %v12845_v39 = vadd.f32 %v12797_v35, %v19963_v55  ;;  %v12843_v59 = vadd.f32 %v12795_v16, %v19949_v63  ;;  %v12796_v27 = vadd.f32 %v20455_v42, %v20065_v26  ;;  %v20460_v42 = vld [vmem:[#allocation29_spill] sm:$0xff] }
 0x4a6   :  { %v12965_v50 = vmul.f32 0.25, %v12949_v1  ;;  %v12947_v44 = vadd.f32 %v12931_v2, %v12899_v30  ;;  %v12902_v25 = vmax.f32 %v12854_v13, 0.0  ;;  %v12852_v7 = vadd.f32 %v12804_v12, %v19903_v10 }
 0x4a7   :  { %v12809_v61 = vadd.f32 %v15550_v53, %v20080_v11  ;;  %v12548_v33 = vpop.f32.mrf.mxu1  ;;  %v12938_v10 = vadd.f32 %v20150_v28, %v12890_v52  ;;  %v12798_v2 = vadd.f32 %v20454_v14, %v20453_v47  ;;  %v12936_v31 = vadd.f32 %v20162_v38, %v12888_v45  ;;  %v20456_v38 = vld [vmem:[#allocation26_spill] sm:$0xff]  ;;  %v20458_v47 = vld [vmem:[#allocation35_spill] sm:$0xff] }
 0x4a8   :  { %12982 = vst.msk [vmem:[%s20357_s7 + $0x10] sm:$0xff] %vm12979_vm4, %v12965_v50  ;;  %v12963_v5 = vmul.f32 0.25, %v12947_v44  ;;  %v12950_v20 = vadd.f32 %v12934_v6, %v12902_v25  ;;  %v12900_v9 = vmax.f32 %v12852_v7, 0.0  ;;  %v12807_v30 = vadd.f32 %v12548_v33, %v20103_v51  ;;  %v15534_v50 = vpop.f32.mrf.mxu0 }
 0x4a9   :  { %v12857_v11 = vadd.f32 %v12809_v61, %v19937_v21  ;;  %v15551_v4 = vpop.f32.mrf.mxu1  ;;  %v12893_v22 = vmax.f32 %v12845_v39, 0.0  ;;  %v12891_v16 = vmax.f32 %v12843_v59, 0.0 }
 0x4aa   :  { %12980 = vst.msk [vmem:[%s20357_s7] sm:$0xff] %vm12979_vm4, %v12963_v5  ;;  %v12966_v6 = vmul.f32 0.25, %v12950_v20  ;;  %v12948_v35 = vadd.f32 %v12932_v62, %v12900_v9  ;;  %v12855_v51 = vadd.f32 %v12807_v30, %v19923_v15  ;;  %v12810_v28 = vadd.f32 %v15551_v4, %v20128_v18 }
 0x4ab   :  { %v12905_v26 = vmax.f32 %v12857_v11, 0.0  ;;  %v12551_v8 = vpop.f32.mrf.mxu1  ;;  %v12846_v15 = vadd.f32 %v12798_v2, %v19967_v3  ;;  %v12844_v18 = vadd.f32 %v12796_v27, %v19955_v58  ;;  %v12801_v62 = vadd.f32 %v20456_v38, %v20094_v19  ;;  %v20457_v19 = vld [vmem:[#allocation28_spill] sm:$0xff]  ;;  %v20459_v2 = vld [vmem:[#allocation2_spill] sm:$0xff]  ;;  %v20461_v11 = vld [vmem:[#allocation31_spill] sm:$0xff] }
 0x4ac   :  { %12983 = vst.msk [vmem:[%s20357_s7 + $0x18] sm:$0xff] %vm12979_vm4, %v12966_v6  ;;  %v12964_v21 = vmul.f32 0.25, %v12948_v35  ;;  %v12903_v1 = vmax.f32 %v12855_v51, 0.0  ;;  %v12858_v13 = vadd.f32 %v12810_v28, %v19941_v17  ;;  %v12808_v12 = vadd.f32 %v12551_v8, %v20158_v37 }
 0x4ad   :  { %v12953_v52 = vadd.f32 %v12937_v32, %v12905_v26  ;;  %v15554_v53 = vpop.f32.mrf.mxu1  ;;  %v12941_v7 = vadd.f32 %v20167_v34, %v12893_v22  ;;  %v12939_v45 = vadd.f32 %v20176_v60, %v12891_v16  ;;  %v12799_v32 = vadd.f32 %v20457_v19, %v20114_v40  ;;  %v12355_v40 = vpop.f32.mrf.mxu0 }
 0x4ae   :  { %12981 = vst.msk [vmem:[%s20357_s7 + $0x8] sm:$0xff] %vm12979_vm4, %v12964_v21  ;;  %v12951_v44 = vadd.f32 %v12935_v23, %v12903_v1  ;;  %v12906_v25 = vmax.f32 %v12858_v13, 0.0  ;;  %v12856_v17 = vadd.f32 %v12808_v12, %v19929_v29  ;;  %v12813_v37 = vadd.f32 %v15554_v53, %v20189_v48 }
 0x4af   :  { %v12969_v39 = vmul.f32 0.25, %v12953_v52  ;;  %v12564_v59 = vpop.f32.mrf.mxu1  ;;  %v12894_v23 = vmax.f32 %v12846_v15, 0.0  ;;  %v12892_v9 = vmax.f32 %v12844_v18, 0.0  ;;  %v12849_v29 = vadd.f32 %v12801_v62, %v20034_v46  ;;  %v15535_v21 = vpop.f32.mrf.mxu0 }
 0x4b0   :  { %v12967_v61 = vmul.f32 0.25, %v12951_v44  ;;  %v12954_v33 = vadd.f32 %v12938_v10, %v12906_v25  ;;  %v12904_v5 = vmax.f32 %v12856_v17, 0.0  ;;  %v12861_v20 = vadd.f32 %v12813_v37, %v19963_v55  ;;  %v20463_v44 = vld [vmem:[#allocation9_spill] sm:$0xff] }
 0x4b1   :  { %12986 = vst.msk [vmem:[%s20357_s7 + $0x30] sm:$0xff] %vm12979_vm4, %v12969_v39  ;;  %v12811_v34 = vadd.f32 %v12564_v59, %v20215_v41  ;;  %v15555_v60 = vpop.f32.mrf.mxu1  ;;  %v12847_v14 = vadd.f32 %v12799_v32, %v20458_v47  ;;  %v12802_v27 = vadd.f32 %v20460_v42, %v20459_v2  ;;  %v12800_v41 = vadd.f32 %v20461_v11, %v20172_v49  ;;  %v20464_v59 = vld [vmem:[#allocation8_spill] sm:$0xff] }
 0x4b2   :  { %12984 = vst.msk [vmem:[%s20357_s7 + $0x20] sm:$0xff] %vm12979_vm4, %v12967_v61  ;;  %v12970_v48 = vmul.f32 0.25, %v12954_v33  ;;  %v12952_v55 = vadd.f32 %v12936_v31, %v12904_v5  ;;  %v12909_v30 = vmax.f32 %v12861_v20, 0.0  ;;  %v12814_v10 = vadd.f32 %v15555_v60, %v20230_v0  ;;  %v20462_v31 = vld [vmem:[#allocation3_spill] sm:$0xff] }
 0x4b3   :  { %v12859_v4 = vadd.f32 %v12811_v34, %v19949_v63  ;;  %v12567_v6 = vpop.f32.mrf.mxu1  ;;  %v12942_v22 = vadd.f32 %v20462_v31, %v12894_v23  ;;  %v12940_v16 = vadd.f32 %v20193_v43, %v12892_v9  ;;  %v12897_v26 = vmax.f32 %v12849_v29, 0.0  ;;  %v20465_v29 = vld [vmem:[#allocation39_spill] sm:$0xff] }
 0x4b4   :  { %12987 = vst.msk [vmem:[%s20357_s7 + $0x38] sm:$0xff] %vm12979_vm4, %v12970_v48  ;;  %v12968_v35 = vmul.f32 0.25, %v12952_v55  ;;  %v12957_v51 = vadd.f32 %v12941_v7, %v12909_v30  ;;  %v12862_v0 = vadd.f32 %v12814_v10, %v19967_v3  ;;  %v12812_v28 = vadd.f32 %v12567_v6, %v12342_v24  ;;  %v12358_v7 = vpop.f32.mrf.mxu0  ;;  %v20467_v55 = vld [vmem:[#allocation40_spill] sm:$0xff] }
 0x4b5   :  { %v12907_v8 = vmax.f32 %v12859_v4, 0.0  ;;  %v15558_v49 = vpop.f32.mrf.mxu1  ;;  %v12895_v3 = vmax.f32 %v12847_v14, 0.0  ;;  %v12850_v24 = vadd.f32 %v12802_v27, %v20055_v54  ;;  %v12848_v15 = vadd.f32 %v12800_v41, %v19997_v57 }
 0x4b6   :  { %12985 = vst.msk [vmem:[%s20357_s7 + $0x28] sm:$0xff] %vm12979_vm4, %v12968_v35  ;;  %v12973_v63 = vmul.f32 0.25, %v12957_v51  ;;  %v12910_v1 = vmax.f32 %v12862_v0, 0.0  ;;  %v12860_v13 = vadd.f32 %v12812_v28, %v19955_v58  ;;  %v12817_v12 = vadd.f32 %v15558_v49, %v15534_v50 }
 0x4b7   :  { %v12955_v43 = vadd.f32 %v12939_v45, %v12907_v8  ;;  %v12580_v18 = vpop.f32.mrf.mxu1  ;;  %v12882_v58 = vmax.f32 %v20205_v36, 0.0  ;;  %v12880_v50 = vmax.f32 %v20210_v56, 0.0  ;;  %v12945_v25 = vadd.f32 %v20463_v44, %v12897_v26 }
 0x4b8   :  { %12990 = vst.msk [vmem:[%s20357_s7 + $0x50] sm:$0xff] %vm12979_vm4, %v12973_v63  ;;  %v12958_v38 = vadd.f32 %v12942_v22, %v12910_v1  ;;  %v12908_v62 = vmax.f32 %v12860_v13, 0.0  ;;  %v12865_v52 = vadd.f32 %v12817_v12, %v20034_v46  ;;  %v12815_v53 = vadd.f32 %v12580_v18, %v12355_v40 }
 0x4b9   :  { %v12971_v17 = vmul.f32 0.25, %v12955_v43  ;;  %v15559_v37 = vpop.f32.mrf.mxu1  ;;  %v12943_v61 = vadd.f32 %v20464_v59, %v12895_v3  ;;  %v12898_v33 = vmax.f32 %v12850_v24, 0.0  ;;  %v12896_v5 = vmax.f32 %v12848_v15, 0.0 }
 0x4ba   :  { %v12974_v45 = vmul.f32 0.25, %v12958_v38  ;;  %v12956_v19 = vadd.f32 %v12940_v16, %v12908_v62  ;;  %v12913_v32 = vmax.f32 %v12865_v52, 0.0  ;;  %v12863_v39 = vadd.f32 %v12815_v53, %v20458_v47 }
 0x4bb   :  { %12988 = vst.msk [vmem:[%s20357_s7 + $0x40] sm:$0xff] %vm12979_vm4, %v12971_v17  ;;  %v12818_v46 = vadd.f32 %v15559_v37, %v15535_v21  ;;  %v12583_v36 = vpop.f32.mrf.mxu1  ;;  %v20466_v34 = vmax.f32 %v20465_v29, 0.0  ;;  %v20468_v30 = vmax.f32 %v20467_v55, 0.0 }
 0x4bc   :  { %12991 = vst.msk [vmem:[%s20357_s7 + $0x58] sm:$0xff] %vm12979_vm4, %v12974_v45  ;;  %v12972_v56 = vmul.f32 0.25, %v12956_v19  ;;  %v12961_v20 = vadd.f32 %v12945_v25, %v12913_v32  ;;  %v12911_v23 = vmax.f32 %v12863_v39, 0.0  ;;  %v12816_v9 = vadd.f32 %v12583_v36, %v12358_v7 }
 0x4bd   :  { %v12930_v60 = vadd.f32 %v12882_v58, %v20466_v34  ;;  %v12866_v40 = vadd.f32 %v12818_v46, %v20055_v54  ;;  %v15562_v48 = vpop.f32.mrf.mxu1  ;;  %v12928_v10 = vadd.f32 %v12880_v50, %v20468_v30 }
 0x4be   :  { %12989 = vst.msk [vmem:[%s20357_s7 + $0x48] sm:$0xff] %vm12979_vm4, %v12972_v56  ;;  %v12977_v47 = vmul.f32 0.25, %v12961_v20  ;;  %v12959_v14 = vadd.f32 %v12943_v61, %v12911_v23  ;;  %v12864_v2 = vadd.f32 %v12816_v9, %v19997_v57 }
 0x4bf   :  { %v12946_v42 = vadd.f32 %v12930_v60, %v12898_v33  ;;  %v12914_v27 = vmax.f32 %v12866_v40, 0.0  ;;  %v12596_v11 = vpop.f32.mrf.mxu1  ;;  %v12944_v41 = vadd.f32 %v12928_v10, %v12896_v5 }
 0x4c0   :  { %12994 = vst.msk [vmem:[%s20357_s7 + $0x70] sm:$0xff] %vm12979_vm4, %v12977_v47  ;;  %v12975_v54 = vmul.f32 0.25, %v12959_v14  ;;  %v12912_v4 = vmax.f32 %v12864_v2, 0.0 }
 0x4c1   :  { %v12962_v6 = vadd.f32 %v12946_v42, %v12914_v27  ;;  %v15563_v35 = vpop.f32.mrf.mxu1 }
 0x4c2   :  { %12992 = vst.msk [vmem:[%s20357_s7 + $0x60] sm:$0xff] %vm12979_vm4, %v12975_v54  ;;  %v12960_v51 = vadd.f32 %v12944_v41, %v12912_v4 }
 0x4c3   :  { %v12978_v57 = vmul.f32 0.25, %v12962_v6  ;;  %v12598_v0 = vpop.f32.mrf.mxu1 }
 0x4c4   :  { %v12976_v28 = vmul.f32 0.25, %v12960_v51 }
 0x4c5   :  { %12995 = vst.msk [vmem:[%s20357_s7 + $0x78] sm:$0xff] %vm12979_vm4, %v12978_v57  ;;  %v15566_v31 = vpop.f32.mrf.mxu1 }
 0x4c6   :  { %12993 = vst.msk [vmem:[%s20357_s7 + $0x68] sm:$0xff] %vm12979_vm4, %v12976_v28 }
 0x4c7   :  { %v12608_v22 = vpop.f32.mrf.mxu1 }
 0x4c9   :  { %v15567_v16 = vpop.f32.mrf.mxu1 }
 0x4cb   :  { %v12610_v26 = vpop.f32.mrf.mxu1 }
 0x4cd   :  { %v15570_v8 = vpop.f32.mrf.mxu1 }
 0x4cf   :  { %v12620_v49 = vpop.f32.mrf.mxu1 }
 0x4d1   :  { %v15571_v21 = vpop.f32.mrf.mxu1 }
 0x4d3   :  { %v12622_v63 = vpop.f32.mrf.mxu1 }
 0x4d5   :  { %v15574_v1 = vpop.f32.mrf.mxu1 }
 0x4d7   :  { %v12632_v13 = vpop.f32.mrf.mxu1 }
 0x4d9   :  { %v15575_v12 = vpop.f32.mrf.mxu1 }
 0x4db   :  { %v12634_v3 = vpop.f32.mrf.mxu1 }

</bundles_post_ra>
